<compile_context>
chip_gen: v6e
topology: v6e:2x2x1
jax: 0.10.0
libtpu: 0.0.40
codegen_flags: <defaults>
</compile_context>

<pallas_src>
import jax
import jax.numpy as jnp
from jax.experimental import pallas as pl
from jax.experimental.pallas import tpu as pltpu


def _round_up(n, m):
    return ((n + m - 1) // m) * m


def _gelu_tanh(x):
    # TODO(synk): PyTorch nn.GELU() defaults to the exact erf form; the tanh
    # approximation (max abs deviation ~3e-3) is used for a guaranteed TPU
    # (EUP tanh) lowering.
    c = 0.7978845608028654  # sqrt(2/pi)
    return 0.5 * x * (1.0 + jnp.tanh(c * (x + 0.044715 * x * x * x)))


def _mlp_kernel(x_ref, w1_ref, b1_ref, w2_ref, b2_ref, o_ref):
    # fc1 on the MXU: (tm, D) @ (D, F) -> (tm, F), f32 accumulation.
    x = x_ref[...].astype(jnp.bfloat16)          # cast fused in-kernel (VPU)
    h = jnp.dot(x, w1_ref[...], preferred_element_type=jnp.float32)
    h = _gelu_tanh(h + b1_ref[...])
    # dropout = identity (eval).  fc2: (tm, F) @ (F, D) -> (tm, D).
    y = jnp.dot(h.astype(jnp.bfloat16), w2_ref[...],
                preferred_element_type=jnp.float32)
    o_ref[...] = (y + b2_ref[...]).astype(o_ref.dtype)


def prepare_mlp_params(w1, b1, w2, b2, *, compute_dtype=jnp.bfloat16):
    """One-time weight preparation (transpose + cast) -- keep OUT of the hot path.

    PyTorch nn.Linear layout: w1 (3072, 768), b1 (3072,), w2 (768, 3072), b2 (768,).
    """
    F, D = w1.shape
    assert w2.shape == (D, F) and b1.shape == (F,) and b2.shape == (D,)
    return dict(
        w1=jnp.asarray(w1).T.astype(compute_dtype),          # (D, F) bf16
        b1=jnp.asarray(b1).reshape(1, F).astype(jnp.float32),
        w2=jnp.asarray(w2).T.astype(compute_dtype),          # (F, D) bf16
        b2=jnp.asarray(b2).reshape(1, D).astype(jnp.float32),
    )


def mlp_block(x, params, *, tm_max=256, out_dtype=None):
    """Fused MLP block: fc2(gelu(fc1(x))).  Dropout = identity (inference).

    x: (..., 768) float32 or bfloat16; params from prepare_mlp_params().
    """
    orig_shape = x.shape
    D = orig_shape[-1]
    w1, b1, w2, b2 = params["w1"], params["b1"], params["w2"], params["b2"]
    F = w1.shape[1]
    assert w1.shape == (D, F) and w2.shape == (F, D)
    assert b1.shape == (1, F) and b2.shape == (1, D)

    x2 = x.reshape(-1, D)
    M = x2.shape[0]
    out_dtype = x.dtype if out_dtype is None else out_dtype

    # Row tile: multiple of 8 (sublane).  Ragged last tile is handled by the
    # grid (pl.cdiv) -- no full-array pad copy.  Rows are independent through
    # both matmuls, so garbage OOB rows never contaminate valid output rows.
    tm = min(tm_max, _round_up(M, 8))
    grid = (pl.cdiv(M, tm),)

    # Constant-index blocks (weights/biases): single-buffered -> no wasted VMEM.
    resident = dict(pipeline_mode=pl.Buffered(1))

    out = pl.pallas_call(
        _mlp_kernel,
        out_shape=jax.ShapeDtypeStruct((M, D), out_dtype),
        grid_spec=pltpu.PrefetchScalarGridSpec(
            num_scalar_prefetch=0,
            grid=grid,
            in_specs=[
                pl.BlockSpec((tm, D), lambda i: (i, 0)),              # x row tile
                pl.BlockSpec((D, F), lambda i: (0, 0), **resident),   # W1 resident
                pl.BlockSpec((1, F), lambda i: (0, 0), **resident),   # b1 resident
                pl.BlockSpec((F, D), lambda i: (0, 0), **resident),   # W2 resident
                pl.BlockSpec((1, D), lambda i: (0, 0), **resident),   # b2 resident
            ],
            out_specs=pl.BlockSpec((tm, D), lambda i: (i, 0)),
        ),
        compiler_params=pltpu.CompilerParams(
            # M axis is embarrassingly parallel -> megacore sharding on 2-TC chips.
            dimension_semantics=("parallel",),
            # ~21 MiB live at tm=256; raise limit explicitly (v5e default is 16 MiB,
            # 40 MiB still leaves headroom inside v7x's 64 MiB physical VMEM).
            vmem_limit_bytes=40 * 1024 * 1024),
    )(x2, w1, b1, w2, b2)

    return out.reshape(orig_shape[:-1] + (D,))


if __name__ == "__main__":
    # Small shapes consistent with the module: batch=2, seq=8; hidden sizes are
    # fixed by the module (768 -> 3072 -> 768).
    B, S, D, F = 2, 8, 768, 3072

    key = jax.random.PRNGKey(0)
    kx, kw1, kb1, kw2, kb2 = jax.random.split(key, 5)

    x = jax.random.normal(kx, (B, S, D), dtype=jnp.float32)
    w1 = jax.random.normal(kw1, (F, D), dtype=jnp.float32) * 0.02   # PyTorch layout
    b1 = jax.random.normal(kb1, (F,), dtype=jnp.float32) * 0.02
    w2 = jax.random.normal(kw2, (D, F), dtype=jnp.float32) * 0.02
    b2 = jax.random.normal(kb2, (D,), dtype=jnp.float32) * 0.02

    params = prepare_mlp_params(w1, b1, w2, b2)   # one-time transpose/cast
    out = mlp_block(x, params)
    out = jax.block_until_ready(out)

    # Reference mirroring the kernel's dtype pipeline (bf16 MXU operands,
    # f32 accumulation, tanh-GELU, dropout identity in eval mode).
    hp = jax.lax.Precision.HIGHEST
    xb = x.astype(jnp.bfloat16).astype(jnp.float32).reshape(-1, D)
    w1b = w1.astype(jnp.bfloat16).astype(jnp.float32)
    w2b = w2.astype(jnp.bfloat16).astype(jnp.float32)
    h = jnp.dot(xb, w1b.T, precision=hp) + b1
    h = _gelu_tanh(h)
    hb = h.astype(jnp.bfloat16).astype(jnp.float32)
    ref = (jnp.dot(hb, w2b.T, precision=hp) + b2).reshape(B, S, D)

    assert out.shape == (B, S, D), out.shape
    max_err = float(jnp.max(jnp.abs(out - ref)))
    assert jnp.allclose(out, ref, atol=1e-2, rtol=1e-2), max_err
    print("KERNEL_OK")
</pallas_src>

<mosaic_0001>
module attributes {stable_mosaic.version = 11 : i64} {
  func.func @_mlp_kernel(%arg0: i32, %arg1: memref<16x768xf32, #tpu.memory_space<vmem>>, %arg2: memref<768x3072xbf16, #tpu.memory_space<vmem>>, %arg3: memref<1x3072xf32, #tpu.memory_space<vmem>>, %arg4: memref<3072x768xbf16, #tpu.memory_space<vmem>>, %arg5: memref<1x768xf32, #tpu.memory_space<vmem>>, %arg6: memref<16x768xf32, #tpu.memory_space<vmem>>) attributes {dimension_semantics = [#tpu.dimension_semantics<parallel>], iteration_bounds = array<i64: 1>, scalar_prefetch = 0 : i64, scratch_operands = 0 : i64, tpu.core_type = #tpu.core_type<tc>, window_params = [{transform_indices = @transform_0, window_bounds = array<i64: 16, 768>}, {pipeline_mode = #tpu.pipeline_mode<synchronous>, transform_indices = @transform_1, window_bounds = array<i64: 768, 3072>}, {pipeline_mode = #tpu.pipeline_mode<synchronous>, transform_indices = @transform_2, window_bounds = array<i64: 1, 3072>}, {pipeline_mode = #tpu.pipeline_mode<synchronous>, transform_indices = @transform_3, window_bounds = array<i64: 3072, 768>}, {pipeline_mode = #tpu.pipeline_mode<synchronous>, transform_indices = @transform_4, window_bounds = array<i64: 1, 768>}, {transform_indices = @transform_5, window_bounds = array<i64: 16, 768>}]} {
    %c0 = arith.constant 0 : index
    %c0_0 = arith.constant 0 : index
    %0 = vector.load %arg1[%c0, %c0_0] : memref<16x768xf32, #tpu.memory_space<vmem>>, vector<16x768xf32>
    %1 = arith.truncf %0 : vector<16x768xf32> to vector<16x768xbf16>
    %c0_1 = arith.constant 0 : index
    %c0_2 = arith.constant 0 : index
    %2 = vector.load %arg2[%c0_1, %c0_2] : memref<768x3072xbf16, #tpu.memory_space<vmem>>, vector<768x3072xbf16>
    %cst = arith.constant dense<0.000000e+00> : vector<16x3072xf32>
    %3 = tpu.matmul %1, %2, %cst {dimension_numbers = #tpu.dot_dimension_numbers<[1], [0], [0], [1], [0, 0, 1, 1], [], []>} : vector<16x768xbf16>, vector<768x3072xbf16>, vector<16x3072xf32> -> vector<16x3072xf32>
    %c0_3 = arith.constant 0 : index
    %c0_4 = arith.constant 0 : index
    %4 = vector.load %arg3[%c0_3, %c0_4] : memref<1x3072xf32, #tpu.memory_space<vmem>>, vector<1x3072xf32>
    %5 = vector.broadcast %4 : vector<1x3072xf32> to vector<16x3072xf32>
    %6 = arith.addf %3, %5 : vector<16x3072xf32>
    %cst_5 = arith.constant 5.000000e-01 : f32
    %7 = vector.broadcast %cst_5 : f32 to vector<16x3072xf32>
    %8 = arith.mulf %7, %6 : vector<16x3072xf32>
    %cst_6 = arith.constant 4.471500e-02 : f32
    %9 = vector.broadcast %cst_6 : f32 to vector<16x3072xf32>
    %10 = arith.mulf %9, %6 : vector<16x3072xf32>
    %11 = arith.mulf %10, %6 : vector<16x3072xf32>
    %12 = arith.mulf %11, %6 : vector<16x3072xf32>
    %13 = arith.addf %6, %12 : vector<16x3072xf32>
    %cst_7 = arith.constant 0.797884583 : f32
    %14 = vector.broadcast %cst_7 : f32 to vector<16x3072xf32>
    %15 = arith.mulf %14, %13 : vector<16x3072xf32>
    %16 = math.tanh %15 : vector<16x3072xf32>
    %cst_8 = arith.constant 1.000000e+00 : f32
    %17 = vector.broadcast %cst_8 : f32 to vector<16x3072xf32>
    %18 = arith.addf %17, %16 : vector<16x3072xf32>
    %19 = arith.mulf %8, %18 : vector<16x3072xf32>
    %20 = arith.truncf %19 : vector<16x3072xf32> to vector<16x3072xbf16>
    %c0_9 = arith.constant 0 : index
    %c0_10 = arith.constant 0 : index
    %21 = vector.load %arg4[%c0_9, %c0_10] : memref<3072x768xbf16, #tpu.memory_space<vmem>>, vector<3072x768xbf16>
    %cst_11 = arith.constant dense<0.000000e+00> : vector<16x768xf32>
    %22 = tpu.matmul %20, %21, %cst_11 {dimension_numbers = #tpu.dot_dimension_numbers<[1], [0], [0], [1], [0, 0, 1, 1], [], []>} : vector<16x3072xbf16>, vector<3072x768xbf16>, vector<16x768xf32> -> vector<16x768xf32>
    %c0_12 = arith.constant 0 : index
    %c0_13 = arith.constant 0 : index
    %23 = vector.load %arg5[%c0_12, %c0_13] : memref<1x768xf32, #tpu.memory_space<vmem>>, vector<1x768xf32>
    %24 = vector.broadcast %23 : vector<1x768xf32> to vector<16x768xf32>
    %25 = arith.addf %22, %24 : vector<16x768xf32>
    %c0_14 = arith.constant 0 : index
    %c0_15 = arith.constant 0 : index
    %26 = vector.load %arg6[%c0_14, %c0_15] : memref<16x768xf32, #tpu.memory_space<vmem>>, vector<16x768xf32>
    tpu.vector_store %arg6[%c0_14, %c0_15], %25 {strides = array<i32>} : memref<16x768xf32, #tpu.memory_space<vmem>>, vector<16x768xf32>,
    return
  }
  func.func @transform_0(%arg0: i32) -> (i32, i32) {
    %c0_i32 = arith.constant 0 : i32
    %c0_i32_0 = arith.constant 0 : i32
    return %arg0, %c0_i32 : i32, i32
  }
  func.func @transform_1(%arg0: i32) -> (i32, i32) {
    %c0_i32 = arith.constant 0 : i32
    %c0_i32_0 = arith.constant 0 : i32
    %c0_i32_1 = arith.constant 0 : i32
    return %c0_i32, %c0_i32_0 : i32, i32
  }
  func.func @transform_2(%arg0: i32) -> (i32, i32) {
    %c0_i32 = arith.constant 0 : i32
    %c0_i32_0 = arith.constant 0 : i32
    %c0_i32_1 = arith.constant 0 : i32
    return %c0_i32, %c0_i32_0 : i32, i32
  }
  func.func @transform_3(%arg0: i32) -> (i32, i32) {
    %c0_i32 = arith.constant 0 : i32
    %c0_i32_0 = arith.constant 0 : i32
    %c0_i32_1 = arith.constant 0 : i32
    return %c0_i32, %c0_i32_0 : i32, i32
  }
  func.func @transform_4(%arg0: i32) -> (i32, i32) {
    %c0_i32 = arith.constant 0 : i32
    %c0_i32_0 = arith.constant 0 : i32
    %c0_i32_1 = arith.constant 0 : i32
    return %c0_i32, %c0_i32_0 : i32, i32
  }
  func.func @transform_5(%arg0: i32) -> (i32, i32) {
    %c0_i32 = arith.constant 0 : i32
    %c0_i32_0 = arith.constant 0 : i32
    return %arg0, %c0_i32 : i32, i32
  }
}

</mosaic_0001>

<bundles_post_ra>
// kernel: tpu_custom_call.1
= control target key start
LH: loop header
LB: loop body
LE: loop exit
PB: predicated region body
PF: predicated region fallthrough
CT: control target
= control target key end

     0   :  { %10 = vsyncpa [#allocation3], 0  ;;  %s23049_s0 = inlined_call_operand.hbm [shape: f32[16,768], index: 0, kind: input, shape index: {}]   ;;  %s23050_s1 = inlined_call_operand.hbm [shape: bf16[768,3072], index: 1, kind: input, shape index: {}]   ;;  %s23051_s2 = inlined_call_operand.hbm [shape: f32[1,3072], index: 2, kind: input, shape index: {}]   ;;  %s23052_s3 = inlined_call_operand.hbm [shape: bf16[3072,768], index: 3, kind: input, shape index: {}]   ;;  %s23053_s4 = inlined_call_operand.hbm [shape: f32[1,768], index: 4, kind: input, shape index: {}]   ;;  %s23054_s5 = inlined_call_operand.hbm [shape: f32[16,768], index: 5, kind: output, shape index: {}]  }
   0x1   :  { %11 = vsyncpa [#allocation6], 0 }
   0x2   :  { %12 = vsyncpa [#allocation9], 0 }
   0x3   :  { %13 = vsyncpa [#allocation4], 0  ;;  %s21945_s18 = smov [#allocation5]  }
   0x4   :  { %s31_s19 = sshll.u32 %s21945_s18, 4  ;;  %s32_s19 = int_to_ptr.vmem [resolvable:$true] %s31_s19 }
   0x5   :  { %s21825_s20 = scalar_lea.vmem %s32_s19, 147456  ;;  %p21830_p1 = scmp.lt.s32.totalorder %s32_s19, %s32_s19 }
   0x6   :  { %p21826_p0 = scmp.ne.s32.totalorder %s32_s19, %s21825_s20  ;;  %p21831_p2 = scmp.lt.s32.totalorder %s21825_s20, %s21825_s20 }
   0x8   :  { %p21832_p3 = por %p21831_p2, %p21830_p1 }
   0xa   :  { %p21833_p4 = pnand %p21832_p3, %p21826_p0 }
   0xc   :  { %21836 = shalt.err (!%p21833_p4)
}
   0xd   :  { %s21946_s21 = smov 1536   ;;  %s21947_s22 = smov 96  }
   0xe   :  { %37 = dma.hbm_to_vmem [thread:$0]  %s23050_s1, 147456, %s32_s19, [#allocation6], %s21946_s21, %s21946_s21, %s21947_s22  }
   0xf   :  { %s21948_s25 = smov [#allocation8]  }
  0x10   :  { %s53_s26 = sshll.u32 %s21948_s25, 4  ;;  %s54_s26 = int_to_ptr.vmem [resolvable:$true] %s53_s26 }
  0x11   :  { %s21845_s27 = scalar_lea.vmem %s54_s26, 147456  ;;  %p21850_p6 = scmp.lt.s32.totalorder %s54_s26, %s54_s26 }
  0x12   :  { %p21846_p5 = scmp.ne.s32.totalorder %s54_s26, %s21845_s27  ;;  %p21851_p7 = scmp.lt.s32.totalorder %s21845_s27, %s21845_s27 }
  0x14   :  { %p21852_p8 = por %p21851_p7, %p21850_p6 }
  0x16   :  { %p21853_p9 = pnand %p21852_p8, %p21846_p5 }
  0x18   :  { %21856 = shalt.err (!%p21853_p9)
}
  0x19   :  { %s21949_s28 = smov 384   ;;  %s21950_s29 = smov 24  }
  0x1a   :  { %59 = dma.hbm_to_vmem [thread:$0]  %s23052_s3, 147456, %s54_s26, [#allocation9], %s21949_s28, %s21949_s28, %s21950_s29  }
  0x1b   :  { %s21951_s7 = smov [#allocation2]  }
  0x1c   :  { %s19_s8 = sshll.u32 %s21951_s7, 4  ;;  %s20_s8 = int_to_ptr.vmem [resolvable:$true] %s19_s8 }
  0x1d   :  { %s21865_s1 = scalar_lea.vmem %s20_s8, 1536  ;;  %p21870_p11 = scmp.lt.s32.totalorder %s20_s8, %s20_s8 }
  0x1e   :  { %p21866_p10 = scmp.ne.s32.totalorder %s20_s8, %s21865_s1  ;;  %p21871_p12 = scmp.lt.s32.totalorder %s21865_s1, %s21865_s1 }
  0x20   :  { %p21872_p13 = por %p21871_p12, %p21870_p11 }
  0x22   :  { %p21873_p0 = pnand %p21872_p13, %p21866_p10 }
  0x24   :  { %21876 = shalt.err (!%p21873_p0)
}
  0x25   :  { %s21952_s9 = smov 768   ;;  %s21953_s10 = smov 48  }
  0x26   :  { %25 = dma.hbm_to_vmem [thread:$0]  %s23049_s0, 1536, %s20_s8, [#allocation3], %s21952_s9, %s21952_s9, %s21953_s10  }
  0x27   :  { %s21954_s3 = smov [#allocation7]   ;;  %s21955_s14 = smov [#allocation10]  }
  0x28   :  { %s44_s13 = sshll.u32 %s21954_s3, 4  ;;  %s66_s15 = sshll.u32 %s21955_s14, 4  ;;  %s45_s13 = int_to_ptr.vmem [resolvable:$true] %s44_s13  ;;  %s67_s15 = int_to_ptr.vmem [resolvable:$true] %s66_s15 }
  0x29   :  { %s21885_s16 = scalar_lea.vmem %s45_s13, 384  ;;  %p21890_p2 = scmp.lt.s32.totalorder %s45_s13, %s45_s13 }
  0x2a   :  { %p21886_p1 = scmp.ne.s32.totalorder %s45_s13, %s21885_s16  ;;  %p21891_p3 = scmp.lt.s32.totalorder %s21885_s16, %s21885_s16 }
  0x2c   :  { %p21892_p4 = por %p21891_p3, %p21890_p2 }
  0x2e   :  { %p21893_p5 = pnand %p21892_p4, %p21886_p1 }
  0x30   :  { %21896 = shalt.err (!%p21893_p5)
}
  0x31   :  { %47 = dma.hbm_to_vmem [thread:$0]  %s23051_s2, 384, %s45_s13, [#allocation6]  }
  0x32   :  { %s21905_s19 = scalar_lea.vmem %s67_s15, 96  ;;  %p21910_p7 = scmp.lt.s32.totalorder %s67_s15, %s67_s15 }
  0x33   :  { %p21906_p6 = scmp.ne.s32.totalorder %s67_s15, %s21905_s19  ;;  %p21911_p8 = scmp.lt.s32.totalorder %s21905_s19, %s21905_s19 }
  0x35   :  { %p21912_p9 = por %p21911_p8, %p21910_p7 }
  0x37   :  { %p21913_p10 = pnand %p21912_p9, %p21906_p6 }
  0x39   :  { %21916 = shalt.err (!%p21913_p10)
}
  0x3a   :  { %69 = dma.hbm_to_vmem [thread:$0]  %s23053_s4, 96, %s67_s15, [#allocation9]  }
  0x3b   :  { %21937 = dma.done.wait [#allocation3], 1536  }
  0x3c   :  { %21938 = vsyncadd [#allocation3], 4294965760 }
  0x3d   :  { %21939 = dma.done.wait [#allocation6], 147840  }
  0x3e   :  { %21940 = vsyncadd [#allocation6], 4294819456 }
  0x3f   :  { %21941 = dma.done.wait [#allocation9], 147552  }
  0x40   :  { %21942 = vsyncadd [#allocation9], 4294819744  ;;  %v271_v0 = vld [vmem:[#allocation5 + $0x540] sm:$0xff]  ;;  %v86_v54 = vld [vmem:[#allocation2 + $0x8] sm:$0xff]  ;;  %s21956_s2 = smov [#allocation11]  }
  0x41   :  { %v283_v1 = vld [vmem:[#allocation5 + $0x5a0] sm:$0xff]  ;;  %v92_v55 = vld [vmem:[#allocation2 + $0x38] sm:$0xff]  ;;  %v94_v60 = vld [vmem:[#allocation2 + $0x48] sm:$0xff]  ;;  %s17654_s4 = sshll.u32 %s21956_s2, 4  ;;  %s17655_s4 = int_to_ptr.vmem [resolvable:$true] %s17654_s4 }
  0x42   :  { %v655_v2 = vld [vmem:[#allocation5 + $0x1140] sm:$0xff]  ;;  %v17837_v3 = vcombine.high %v271_v0, %v283_v1  ;;  %v17836_v5 = vcombine.low %v271_v0, %v283_v1  ;;  %v22005_v58 = vpack.c.bf16 %v92_v55, %v86_v54  ;;  %v88_v59 = vld [vmem:[#allocation2 + $0x18] sm:$0xff]  ;;  %s21917_s21 = scalar_lea.vmem %s17655_s4, 1536  ;;  %p21922_p12 = scmp.lt.s32.totalorder %s17655_s4, %s17655_s4 }
  0x43   :  { %v667_v4 = vld [vmem:[#allocation5 + $0x11a0] sm:$0xff]  ;;  %v22007_v63 = vpack.c.bf16 %v94_v60, %v88_v59  ;;  %p21918_p11 = scmp.ne.s32.totalorder %s17655_s4, %s21917_s21  ;;  %p21923_p13 = scmp.lt.s32.totalorder %s21917_s21, %s21917_s21 }
  0x44   :  { %v247_v6 = vld [vmem:[#allocation5 + $0x480] sm:$0xff]  ;;  %v18221_v8 = vcombine.high %v655_v2, %v667_v4  ;;  %v18220_v9 = vcombine.low %v655_v2, %v667_v4  ;;  %7141 = vmatprep.subr.bf16.mxu0 %v17837_v3  ;;  %7173 = vmatprep.mubr.bf16.mxu0 %v22005_v58 }
  0x45   :  { %v259_v7 = vld [vmem:[#allocation5 + $0x4e0] sm:$0xff]  ;;  %7142 = vmatpush1.bf16.msra.mxu0 %v17836_v5  ;;  %7216 = vmatprep.mubr.bf16.mxu1 %v22007_v63  ;;  %p21924_p0 = por %p21923_p13, %p21922_p12 }
  0x46   :  { %v17813_v10 = vcombine.high %v247_v6, %v259_v7  ;;  %v631_v11 = vld [vmem:[#allocation5 + $0x1080] sm:$0xff]  ;;  %7184 = vmatprep.subr.bf16.mxu1 %v18221_v8  ;;  %v17812_v18 = vcombine.low %v247_v6, %v259_v7 }
  0x47   :  { %v643_v12 = vld [vmem:[#allocation5 + $0x10e0] sm:$0xff]  ;;  %7185 = vmatpush1.bf16.msra.mxu1 %v18220_v9  ;;  %p21925_p1 = pnand %p21924_p0, %p21918_p11 }
  0x48   :  { %v223_v13 = vld [vmem:[#allocation5 + $0x3c0] sm:$0xff]  ;;  %v18197_v14 = vcombine.high %v631_v11, %v643_v12  ;;  %7143 = vmatprep.subr.bf16.mxu0 %v17813_v10  ;;  %v18196_v19 = vcombine.low %v631_v11, %v643_v12 }
  0x49   :  { %v235_v15 = vld [vmem:[#allocation5 + $0x420] sm:$0xff]  ;;  %7144 = vmatpush1.bf16.msra.mxu0 %v17812_v18 }
  0x4a   :  { %v607_v16 = vld [vmem:[#allocation5 + $0xfc0] sm:$0xff]  ;;  %v17789_v20 = vcombine.high %v223_v13, %v235_v15  ;;  %7186 = vmatprep.subr.bf16.mxu1 %v18197_v14  ;;  %v17788_v26 = vcombine.low %v223_v13, %v235_v15 }
  0x4b   :  { %v619_v17 = vld [vmem:[#allocation5 + $0x1020] sm:$0xff]  ;;  %7187 = vmatpush1.bf16.msra.mxu1 %v18196_v19 }
  0x4c   :  { %v18173_v21 = vcombine.high %v607_v16, %v619_v17  ;;  %v199_v22 = vld [vmem:[#allocation5 + $0x300] sm:$0xff]  ;;  %7145 = vmatprep.subr.bf16.mxu0 %v17789_v20  ;;  %v18172_v27 = vcombine.low %v607_v16, %v619_v17 }
  0x4d   :  { %v211_v23 = vld [vmem:[#allocation5 + $0x360] sm:$0xff]  ;;  %7146 = vmatpush1.bf16.msra.mxu0 %v17788_v26 }
  0x4e   :  { %v583_v24 = vld [vmem:[#allocation5 + $0xf00] sm:$0xff]  ;;  %v17765_v28 = vcombine.high %v199_v22, %v211_v23  ;;  %7188 = vmatprep.subr.bf16.mxu1 %v18173_v21  ;;  %v17764_v34 = vcombine.low %v199_v22, %v211_v23 }
  0x4f   :  { %v595_v25 = vld [vmem:[#allocation5 + $0xf60] sm:$0xff]  ;;  %7189 = vmatpush1.bf16.msra.mxu1 %v18172_v27 }
  0x50   :  { %v18149_v29 = vcombine.high %v583_v24, %v595_v25  ;;  %v175_v30 = vld [vmem:[#allocation5 + $0x240] sm:$0xff]  ;;  %7147 = vmatprep.subr.bf16.mxu0 %v17765_v28  ;;  %v18148_v35 = vcombine.low %v583_v24, %v595_v25 }
  0x51   :  { %v187_v31 = vld [vmem:[#allocation5 + $0x2a0] sm:$0xff]  ;;  %7148 = vmatpush1.bf16.msra.mxu0 %v17764_v34 }
  0x52   :  { %v559_v32 = vld [vmem:[#allocation5 + $0xe40] sm:$0xff]  ;;  %v17741_v36 = vcombine.high %v175_v30, %v187_v31  ;;  %7190 = vmatprep.subr.bf16.mxu1 %v18149_v29  ;;  %v17740_v42 = vcombine.low %v175_v30, %v187_v31 }
  0x53   :  { %v571_v33 = vld [vmem:[#allocation5 + $0xea0] sm:$0xff]  ;;  %7191 = vmatpush1.bf16.msra.mxu1 %v18148_v35 }
  0x54   :  { %v18125_v37 = vcombine.high %v559_v32, %v571_v33  ;;  %v151_v38 = vld [vmem:[#allocation5 + $0x180] sm:$0xff]  ;;  %7149 = vmatprep.subr.bf16.mxu0 %v17741_v36  ;;  %v18124_v43 = vcombine.low %v559_v32, %v571_v33 }
  0x55   :  { %v163_v39 = vld [vmem:[#allocation5 + $0x1e0] sm:$0xff]  ;;  %7150 = vmatpush1.bf16.msra.mxu0 %v17740_v42 }
  0x56   :  { %v535_v40 = vld [vmem:[#allocation5 + $0xd80] sm:$0xff]  ;;  %v17717_v44 = vcombine.high %v151_v38, %v163_v39  ;;  %7192 = vmatprep.subr.bf16.mxu1 %v18125_v37  ;;  %v17716_v50 = vcombine.low %v151_v38, %v163_v39 }
  0x57   :  { %v547_v41 = vld [vmem:[#allocation5 + $0xde0] sm:$0xff]  ;;  %7193 = vmatpush1.bf16.msra.mxu1 %v18124_v43 }
  0x58   :  { %v18101_v45 = vcombine.high %v535_v40, %v547_v41  ;;  %v127_v46 = vld [vmem:[#allocation5 + $0xc0] sm:$0xff]  ;;  %7151 = vmatprep.subr.bf16.mxu0 %v17717_v44  ;;  %v18100_v51 = vcombine.low %v535_v40, %v547_v41 }
  0x59   :  { %v139_v47 = vld [vmem:[#allocation5 + $0x120] sm:$0xff]  ;;  %7152 = vmatpush1.bf16.msra.mxu0 %v17716_v50 }
  0x5a   :  { %v511_v48 = vld [vmem:[#allocation5 + $0xcc0] sm:$0xff]  ;;  %v17693_v52 = vcombine.high %v127_v46, %v139_v47  ;;  %7194 = vmatprep.subr.bf16.mxu1 %v18101_v45  ;;  %v17692_v0 = vcombine.low %v127_v46, %v139_v47 }
  0x5b   :  { %v523_v49 = vld [vmem:[#allocation5 + $0xd20] sm:$0xff]  ;;  %7195 = vmatpush1.bf16.msra.mxu1 %v18100_v51 }
  0x5c   :  { %v103_v53 = vld [vmem:[#allocation5] sm:$0xff]  ;;  %v18077_v56 = vcombine.high %v511_v48, %v523_v49  ;;  %7153 = vmatprep.subr.bf16.mxu0 %v17693_v52  ;;  %v18076_v1 = vcombine.low %v511_v48, %v523_v49 }
  0x5d   :  { %v115_v57 = vld [vmem:[#allocation5 + $0x60] sm:$0xff]  ;;  %7154 = vmatpush1.bf16.msra.mxu0 %v17692_v0 }
  0x5e   :  { %v487_v61 = vld [vmem:[#allocation5 + $0xc00] sm:$0xff]  ;;  %v17669_v2 = vcombine.high %v103_v53, %v115_v57  ;;  %7196 = vmatprep.subr.bf16.mxu1 %v18077_v56  ;;  %v17668_v8 = vcombine.low %v103_v53, %v115_v57 }
  0x5f   :  { %v499_v62 = vld [vmem:[#allocation5 + $0xc60] sm:$0xff]  ;;  %7197 = vmatpush1.bf16.msra.mxu1 %v18076_v1 }
  0x60   :  { %v18053_v3 = vcombine.high %v487_v61, %v499_v62  ;;  %v463_v4 = vld [vmem:[#allocation5 + $0xb40] sm:$0xff]  ;;  %7155 = vmatprep.subr.bf16.mxu0 %v17669_v2  ;;  %v18052_v9 = vcombine.low %v487_v61, %v499_v62 }
  0x61   :  { %v475_v5 = vld [vmem:[#allocation5 + $0xba0] sm:$0xff]  ;;  %7156 = vmatpush1.bf16.msra.mxu0 %v17668_v8  ;;  %v272_v8 = vld [vmem:[#allocation5 + $0x548] sm:$0xff] }
  0x62   :  { %v847_v6 = vld [vmem:[#allocation5 + $0x1740] sm:$0xff]  ;;  %v18029_v10 = vcombine.high %v463_v4, %v475_v5  ;;  %7198 = vmatprep.subr.bf16.mxu1 %v18053_v3  ;;  %v18028_v16 = vcombine.low %v463_v4, %v475_v5 }
  0x63   :  { %v859_v7 = vld [vmem:[#allocation5 + $0x17a0] sm:$0xff]  ;;  %7199 = vmatpush1.bf16.msra.mxu1 %v18052_v9  ;;  %v284_v9 = vld [vmem:[#allocation5 + $0x5a8] sm:$0xff] }
  0x64   :  { %v18413_v11 = vcombine.high %v847_v6, %v859_v7  ;;  %v439_v12 = vld [vmem:[#allocation5 + $0xa80] sm:$0xff]  ;;  %7157 = vmatprep.subr.bf16.mxu0 %v18029_v10  ;;  %v18412_v17 = vcombine.low %v847_v6, %v859_v7 }
  0x65   :  { %v451_v13 = vld [vmem:[#allocation5 + $0xae0] sm:$0xff]  ;;  %7158 = vmatpush2.bf16.msra.mxu0 %v18028_v16 }
  0x66   :  { %v823_v14 = vld [vmem:[#allocation5 + $0x1680] sm:$0xff]  ;;  %v18005_v18 = vcombine.high %v439_v12, %v451_v13  ;;  %7200 = vmatprep.subr.bf16.mxu1 %v18413_v11  ;;  %v18004_v24 = vcombine.low %v439_v12, %v451_v13  ;;  %v91_v12 = vld [vmem:[#allocation2 + $0x30] sm:$0xff] }
  0x67   :  { %v835_v15 = vld [vmem:[#allocation5 + $0x16e0] sm:$0xff]  ;;  %7201 = vmatpush2.bf16.msra.mxu1 %v18412_v17  ;;  %v17839_v17 = vcombine.high %v272_v8, %v284_v9 }
  0x68   :  { %v18389_v19 = vcombine.high %v823_v14, %v835_v15  ;;  %v415_v20 = vld [vmem:[#allocation5 + $0x9c0] sm:$0xff]  ;;  %7159 = vmatprep.subr.bf16.mxu0 %v18005_v18  ;;  %v18388_v25 = vcombine.low %v823_v14, %v835_v15  ;;  %v87_v14 = vld [vmem:[#allocation2 + $0x10] sm:$0xff] }
  0x69   :  { %v427_v21 = vld [vmem:[#allocation5 + $0xa20] sm:$0xff]  ;;  %7160 = vmatpush2.bf16.msra.mxu0 %v18004_v24  ;;  %v96_v24 = vld [vmem:[#allocation2 + $0x58] sm:$0xff] }
  0x6a   :  { %v799_v22 = vld [vmem:[#allocation5 + $0x15c0] sm:$0xff]  ;;  %v17981_v26 = vcombine.high %v415_v20, %v427_v21  ;;  %7202 = vmatprep.subr.bf16.mxu1 %v18389_v19  ;;  %v17980_v32 = vcombine.low %v415_v20, %v427_v21  ;;  %v248_v20 = vld [vmem:[#allocation5 + $0x488] sm:$0xff] }
  0x6b   :  { %v811_v23 = vld [vmem:[#allocation5 + $0x1620] sm:$0xff]  ;;  %7203 = vmatpush2.bf16.msra.mxu1 %v18388_v25 }
  0x6c   :  { %v18365_v27 = vcombine.high %v799_v22, %v811_v23  ;;  %v391_v28 = vld [vmem:[#allocation5 + $0x900] sm:$0xff]  ;;  %7161 = vmatprep.subr.bf16.mxu0 %v17981_v26  ;;  %v18364_v33 = vcombine.low %v799_v22, %v811_v23  ;;  %v260_v22 = vld [vmem:[#allocation5 + $0x4e8] sm:$0xff] }
  0x6d   :  { %v403_v29 = vld [vmem:[#allocation5 + $0x960] sm:$0xff]  ;;  %7162 = vmatpush2.bf16.msra.mxu0 %v17980_v32  ;;  %v90_v23 = vld [vmem:[#allocation2 + $0x28] sm:$0xff] }
  0x6e   :  { %v775_v30 = vld [vmem:[#allocation5 + $0x1500] sm:$0xff]  ;;  %v17957_v34 = vcombine.high %v391_v28, %v403_v29  ;;  %7204 = vmatprep.subr.bf16.mxu1 %v18365_v27  ;;  %v17956_v40 = vcombine.low %v391_v28, %v403_v29  ;;  %v17838_v27 = vcombine.low %v272_v8, %v284_v9  ;;  %v17815_v29 = vcombine.high %v248_v20, %v260_v22 }
  0x6f   :  { %v787_v31 = vld [vmem:[#allocation5 + $0x1560] sm:$0xff]  ;;  %7205 = vmatpush2.bf16.msra.mxu1 %v18364_v33  ;;  %v22015_v32 = vpack.c.bf16 %v96_v24, %v90_v23  ;;  %v224_v33 = vld [vmem:[#allocation5 + $0x3c8] sm:$0xff] }
  0x70   :  { %v18341_v35 = vcombine.high %v775_v30, %v787_v31  ;;  %v367_v36 = vld [vmem:[#allocation5 + $0x840] sm:$0xff]  ;;  %7163 = vmatprep.subr.bf16.mxu0 %v17957_v34  ;;  %v18340_v41 = vcombine.low %v775_v30, %v787_v31  ;;  %v236_v34 = vld [vmem:[#allocation5 + $0x428] sm:$0xff] }
  0x71   :  { %v379_v37 = vld [vmem:[#allocation5 + $0x8a0] sm:$0xff]  ;;  %7164 = vmatpush2.bf16.msra.mxu0 %v17956_v40  ;;  %v17791_v40 = vcombine.high %v224_v33, %v236_v34 }
  0x72   :  { %v751_v38 = vld [vmem:[#allocation5 + $0x1440] sm:$0xff]  ;;  %v17933_v42 = vcombine.high %v367_v36, %v379_v37  ;;  %7206 = vmatprep.subr.bf16.mxu1 %v18341_v35  ;;  %v17932_v48 = vcombine.low %v367_v36, %v379_v37  ;;  %v17814_v36 = vcombine.low %v248_v20, %v260_v22  ;;  %v476_v20 = vld [vmem:[#allocation5 + $0xba8] sm:$0xff] }
  0x73   :  { %v763_v39 = vld [vmem:[#allocation5 + $0x14a0] sm:$0xff]  ;;  %7207 = vmatpush2.bf16.msra.mxu1 %v18340_v41  ;;  %v200_v41 = vld [vmem:[#allocation5 + $0x308] sm:$0xff] }
  0x74   :  { %v18317_v43 = vcombine.high %v751_v38, %v763_v39  ;;  %v343_v44 = vld [vmem:[#allocation5 + $0x780] sm:$0xff]  ;;  %7165 = vmatprep.subr.bf16.mxu0 %v17933_v42  ;;  %v18316_v49 = vcombine.low %v751_v38, %v763_v39  ;;  %v212_v42 = vld [vmem:[#allocation5 + $0x368] sm:$0xff] }
  0x75   :  { %v355_v45 = vld [vmem:[#allocation5 + $0x7e0] sm:$0xff]  ;;  %7166 = vmatpush2.bf16.msra.mxu0 %v17932_v48  ;;  %v176_v48 = vld [vmem:[#allocation5 + $0x248] sm:$0xff] }
  0x76   :  { %v727_v46 = vld [vmem:[#allocation5 + $0x1380] sm:$0xff]  ;;  %v17909_v50 = vcombine.high %v343_v44, %v355_v45  ;;  %7208 = vmatprep.subr.bf16.mxu1 %v18317_v43  ;;  %v17908_v56 = vcombine.low %v343_v44, %v355_v45  ;;  %v17790_v44 = vcombine.low %v224_v33, %v236_v34 }
  0x77   :  { %v739_v47 = vld [vmem:[#allocation5 + $0x13e0] sm:$0xff]  ;;  %7209 = vmatpush2.bf16.msra.mxu1 %v18316_v49  ;;  %v17767_v49 = vcombine.high %v200_v41, %v212_v42 }
  0x78   :  { %v18293_v51 = vcombine.high %v727_v46, %v739_v47  ;;  %v319_v52 = vld [vmem:[#allocation5 + $0x6c0] sm:$0xff]  ;;  %7167 = vmatprep.subr.bf16.mxu0 %v17909_v50  ;;  %v18292_v57 = vcombine.low %v727_v46, %v739_v47  ;;  %v188_v50 = vld [vmem:[#allocation5 + $0x2a8] sm:$0xff] }
  0x79   :  { %v331_v53 = vld [vmem:[#allocation5 + $0x720] sm:$0xff]  ;;  %7168 = vmatpush2.bf16.msra.mxu0 %v17908_v56  ;;  %v152_v56 = vld [vmem:[#allocation5 + $0x188] sm:$0xff] }
  0x7a   :  { %v703_v54 = vld [vmem:[#allocation5 + $0x12c0] sm:$0xff]  ;;  %v17885_v59 = vcombine.high %v319_v52, %v331_v53  ;;  %7210 = vmatprep.subr.bf16.mxu1 %v18293_v51  ;;  %v17884_v2 = vcombine.low %v319_v52, %v331_v53  ;;  %v17766_v52 = vcombine.low %v200_v41, %v212_v42 }
  0x7b   :  { %v715_v55 = vld [vmem:[#allocation5 + $0x1320] sm:$0xff]  ;;  %7211 = vmatpush2.bf16.msra.mxu1 %v18292_v57  ;;  %v17743_v57 = vcombine.high %v176_v48, %v188_v50 }
  0x7c   :  { %v18269_v60 = vcombine.high %v703_v54, %v715_v55  ;;  %v295_v61 = vld [vmem:[#allocation5 + $0x600] sm:$0xff]  ;;  %7169 = vmatprep.subr.bf16.mxu0 %v17885_v59  ;;  %v18268_v3 = vcombine.low %v703_v54, %v715_v55  ;;  %v164_v59 = vld [vmem:[#allocation5 + $0x1e8] sm:$0xff] }
  0x7d   :  { %v307_v62 = vld [vmem:[#allocation5 + $0x660] sm:$0xff]  ;;  %7170 = vmatpush2.bf16.msra.mxu0 %v17884_v2  ;;  %v128_v2 = vld [vmem:[#allocation5 + $0xc8] sm:$0xff] }
  0x7e   :  { %v679_v0 = vld [vmem:[#allocation5 + $0x1200] sm:$0xff]  ;;  %v17861_v4 = vcombine.high %v295_v61, %v307_v62  ;;  %7212 = vmatprep.subr.bf16.mxu1 %v18269_v60  ;;  %v17860_v10 = vcombine.low %v295_v61, %v307_v62  ;;  %v17742_v61 = vcombine.low %v176_v48, %v188_v50 }
  0x7f   :  { %v691_v1 = vld [vmem:[#allocation5 + $0x1260] sm:$0xff]  ;;  %7213 = vmatpush2.bf16.msra.mxu1 %v18268_v3  ;;  %v17719_v3 = vcombine.high %v152_v56, %v164_v59 }
  0x80   :  { %v18245_v5 = vcombine.high %v679_v0, %v691_v1  ;;  %v1039_v6 = vld [vmem:[#allocation5 + $0x1d40] sm:$0xff]  ;;  %7171 = vmatprep.subr.bf16.mxu0 %v17861_v4  ;;  %v18244_v13 = vcombine.low %v679_v0, %v691_v1  ;;  %v140_v4 = vld [vmem:[#allocation5 + $0x128] sm:$0xff] }
  0x81   :  { %v1051_v7 = vld [vmem:[#allocation5 + $0x1da0] sm:$0xff]  ;;  %7172 = vmatpush2.bf16.msra.mxu0 %v17860_v10  ;;  %v104_v10 = vld [vmem:[#allocation5 + $0x8] sm:$0xff] }
  0x82   :  { %v85_v11 = vld [vmem:[#allocation2] sm:$0xff]  ;;  %v18605_v16 = vcombine.high %v1039_v6, %v1051_v7  ;;  %7214 = vmatprep.subr.bf16.mxu1 %v18245_v5  ;;  %v18604_v26 = vcombine.low %v1039_v6, %v1051_v7  ;;  %v17718_v6 = vcombine.low %v152_v56, %v164_v59 }
  0x83   :  { %v93_v15 = vld [vmem:[#allocation2 + $0x40] sm:$0xff]  ;;  %v22011_v21 = vpack.c.bf16 %v91_v12, %v85_v11  ;;  %7215 = vmatpush2.bf16.msra.mxu1 %v18244_v13  ;;  %v17695_v11 = vcombine.high %v128_v2, %v140_v4  ;;  %v116_v12 = vld [vmem:[#allocation5 + $0x68] sm:$0xff] }
  0x84   :  { %v1015_v18 = vld [vmem:[#allocation5 + $0x1c80] sm:$0xff]  ;;  %v22013_v25 = vpack.c.bf16 %v93_v15, %v87_v14  ;;  %7227 = vmatprep.subr.bf16.mxu0 %v18605_v16  ;;  %7270 = vmatprep.subr.bf16.mxu1 %v17839_v17  ;;  %v17694_v14 = vcombine.low %v128_v2, %v140_v4  ;;  %v17670_v23 = vcombine.low %v104_v10, %v116_v12 }
  0x85   :  { %v1027_v19 = vld [vmem:[#allocation5 + $0x1ce0] sm:$0xff]  ;;  %7174 = vmatmul.mubr.bf16.vlgmr.msra.gmra.mxu0 %v22011_v21 }
  0x86   :  { %v18581_v28 = vcombine.high %v1015_v18, %v1027_v19  ;;  %v991_v30 = vld [vmem:[#allocation5 + $0x1bc0] sm:$0xff]  ;;  %7217 = vmatmul.mubr.bf16.vlgmr.msra.gmra.mxu1 %v22013_v25  ;;  %7228 = vmatpush1.bf16.msra.mxu0 %v18604_v26  ;;  %v18580_v35 = vcombine.low %v1015_v18, %v1027_v19  ;;  %v464_v18 = vld [vmem:[#allocation5 + $0xb48] sm:$0xff]  ;;  %v17671_v19 = vcombine.high %v104_v10, %v116_v12 }
  0x87   :  { %v1003_v31 = vld [vmem:[#allocation5 + $0x1c20] sm:$0xff]  ;;  %7271 = vmatpush1.bf16.msra.mxu1 %v17838_v27  ;;  %7259 = vmatprep.mubr.bf16.mxu0 %v22015_v32  ;;  %v18030_v33 = vcombine.low %v464_v18, %v476_v20 }
  0x88   :  { %7229 = vmatprep.subr.bf16.mxu0 %v18581_v28  ;;  %v18557_v37 = vcombine.high %v991_v30, %v1003_v31  ;;  %v967_v38 = vld [vmem:[#allocation5 + $0x1b00] sm:$0xff]  ;;  %7272 = vmatprep.subr.bf16.mxu1 %v17815_v29  ;;  %v18556_v43 = vcombine.low %v991_v30, %v1003_v31  ;;  %v440_v28 = vld [vmem:[#allocation5 + $0xa88] sm:$0xff]  ;;  %v18031_v29 = vcombine.high %v464_v18, %v476_v20 }
  0x89   :  { %v979_v39 = vld [vmem:[#allocation5 + $0x1b60] sm:$0xff]  ;;  %7302 = vmatprep.mubr.bf16.mxu1 %v22005_v58  ;;  %v452_v30 = vld [vmem:[#allocation5 + $0xae8] sm:$0xff] }
  0x8a   :  { %7230 = vmatpush1.bf16.msra.mxu0 %v18580_v35  ;;  %v18533_v45 = vcombine.high %v967_v38, %v979_v39  ;;  %v943_v46 = vld [vmem:[#allocation5 + $0x1a40] sm:$0xff]  ;;  %v18532_v51 = vcombine.low %v967_v38, %v979_v39  ;;  %v18007_v38 = vcombine.high %v440_v28, %v452_v30  ;;  %v428_v39 = vld [vmem:[#allocation5 + $0xa28] sm:$0xff]  ;;  %v18006_v41 = vcombine.low %v440_v28, %v452_v30  ;;  %v95_v28 = vld [vmem:[#allocation2 + $0x50] sm:$0xff] }
  0x8b   :  { %7273 = vmatpush1.bf16.msra.mxu1 %v17814_v36  ;;  %7231 = vmatprep.subr.bf16.mxu0 %v18557_v37  ;;  %v955_v47 = vld [vmem:[#allocation5 + $0x1aa0] sm:$0xff]  ;;  %v416_v37 = vld [vmem:[#allocation5 + $0x9c8] sm:$0xff] }
  0x8c   :  { %7274 = vmatprep.subr.bf16.mxu1 %v17791_v40  ;;  %v18509_v53 = vcombine.high %v943_v46, %v955_v47  ;;  %v919_v54 = vld [vmem:[#allocation5 + $0x1980] sm:$0xff]  ;;  %v18508_v60 = vcombine.low %v943_v46, %v955_v47  ;;  %v17983_v46 = vcombine.high %v416_v37, %v428_v39  ;;  %v404_v47 = vld [vmem:[#allocation5 + $0x968] sm:$0xff] }
  0x8d   :  { %v931_v55 = vld [vmem:[#allocation5 + $0x19e0] sm:$0xff] }
  0x8e   :  { %7232 = vmatpush1.bf16.msra.mxu0 %v18556_v43  ;;  %v18485_v62 = vcombine.high %v919_v54, %v931_v55  ;;  %v895_v0 = vld [vmem:[#allocation5 + $0x18c0] sm:$0xff]  ;;  %v18484_v5 = vcombine.low %v919_v54, %v931_v55  ;;  %v380_v55 = vld [vmem:[#allocation5 + $0x8a8] sm:$0xff] }
  0x8f   :  { %7275 = vmatpush1.bf16.msra.mxu1 %v17790_v44  ;;  %7233 = vmatprep.subr.bf16.mxu0 %v18533_v45  ;;  %v907_v1 = vld [vmem:[#allocation5 + $0x1920] sm:$0xff]  ;;  %v392_v45 = vld [vmem:[#allocation5 + $0x908] sm:$0xff] }
  0x90   :  { %7276 = vmatprep.subr.bf16.mxu1 %v17767_v49  ;;  %v18461_v7 = vcombine.high %v895_v0, %v907_v1  ;;  %v871_v8 = vld [vmem:[#allocation5 + $0x1800] sm:$0xff]  ;;  %v18460_v13 = vcombine.low %v895_v0, %v907_v1  ;;  %v17982_v49 = vcombine.low %v416_v37, %v428_v39  ;;  %v17959_v54 = vcombine.high %v392_v45, %v404_v47  ;;  %v356_v1 = vld [vmem:[#allocation5 + $0x7e8] sm:$0xff] }
  0x91   :  { %v883_v9 = vld [vmem:[#allocation5 + $0x1860] sm:$0xff] }
  0x92   :  { %7234 = vmatpush1.bf16.msra.mxu0 %v18532_v51  ;;  %v18437_v15 = vcombine.high %v871_v8, %v883_v9  ;;  %v1231_v16 = vld [vmem:[#allocation5 + $0x2340] sm:$0xff]  ;;  %v18436_v22 = vcombine.low %v871_v8, %v883_v9  ;;  %v332_v9 = vld [vmem:[#allocation5 + $0x728] sm:$0xff] }
  0x93   :  { %7277 = vmatpush1.bf16.msra.mxu1 %v17766_v52  ;;  %7235 = vmatprep.subr.bf16.mxu0 %v18509_v53  ;;  %v1243_v17 = vld [vmem:[#allocation5 + $0x23a0] sm:$0xff]  ;;  %v368_v53 = vld [vmem:[#allocation5 + $0x848] sm:$0xff] }
  0x94   :  { %7278 = vmatprep.subr.bf16.mxu1 %v17743_v57  ;;  %v18797_v24 = vcombine.high %v1231_v16, %v1243_v17  ;;  %v1207_v26 = vld [vmem:[#allocation5 + $0x2280] sm:$0xff]  ;;  %v18796_v31 = vcombine.low %v1231_v16, %v1243_v17  ;;  %v17958_v57 = vcombine.low %v392_v45, %v404_v47  ;;  %v17935_v0 = vcombine.high %v368_v53, %v380_v55  ;;  %v308_v17 = vld [vmem:[#allocation5 + $0x668] sm:$0xff] }
  0x95   :  { %v1219_v27 = vld [vmem:[#allocation5 + $0x22e0] sm:$0xff]  ;;  %v1004_v47 = vld [vmem:[#allocation5 + $0x1c28] sm:$0xff] }
  0x96   :  { %7236 = vmatpush1.bf16.msra.mxu0 %v18508_v60  ;;  %v18773_v34 = vcombine.high %v1207_v26, %v1219_v27  ;;  %v1183_v35 = vld [vmem:[#allocation5 + $0x21c0] sm:$0xff]  ;;  %v18772_v40 = vcombine.low %v1207_v26, %v1219_v27 }
  0x97   :  { %7279 = vmatpush1.bf16.msra.mxu1 %v17742_v61  ;;  %7237 = vmatprep.subr.bf16.mxu0 %v18485_v62  ;;  %v1195_v36 = vld [vmem:[#allocation5 + $0x2220] sm:$0xff]  ;;  %v344_v62 = vld [vmem:[#allocation5 + $0x788] sm:$0xff] }
  0x98   :  { %7280 = vmatprep.subr.bf16.mxu1 %v17719_v3  ;;  %v18749_v42 = vcombine.high %v1183_v35, %v1195_v36  ;;  %v1159_v43 = vld [vmem:[#allocation5 + $0x2100] sm:$0xff]  ;;  %v18748_v48 = vcombine.low %v1183_v35, %v1195_v36  ;;  %v17934_v3 = vcombine.low %v368_v53, %v380_v55  ;;  %v17911_v8 = vcombine.high %v344_v62, %v356_v1  ;;  %v644_v35 = vld [vmem:[#allocation5 + $0x10e8] sm:$0xff] }
  0x99   :  { %v1171_v44 = vld [vmem:[#allocation5 + $0x2160] sm:$0xff]  ;;  %v1016_v36 = vld [vmem:[#allocation5 + $0x1c88] sm:$0xff] }
  0x9a   :  { %7238 = vmatpush1.bf16.msra.mxu0 %v18484_v5  ;;  %v18725_v50 = vcombine.high %v1159_v43, %v1171_v44  ;;  %v1135_v51 = vld [vmem:[#allocation5 + $0x2040] sm:$0xff]  ;;  %v18724_v56 = vcombine.low %v1159_v43, %v1171_v44  ;;  %v608_v43 = vld [vmem:[#allocation5 + $0xfc8] sm:$0xff] }
  0x9b   :  { %7281 = vmatpush1.bf16.msra.mxu1 %v17718_v6  ;;  %7239 = vmatprep.subr.bf16.mxu0 %v18461_v7  ;;  %v1147_v52 = vld [vmem:[#allocation5 + $0x20a0] sm:$0xff]  ;;  %v320_v7 = vld [vmem:[#allocation5 + $0x6c8] sm:$0xff] }
  0x9c   :  { %7282 = vmatprep.subr.bf16.mxu1 %v17695_v11  ;;  %v18701_v59 = vcombine.high %v1135_v51, %v1147_v52  ;;  %v1111_v60 = vld [vmem:[#allocation5 + $0x1f80] sm:$0xff]  ;;  %v18700_v2 = vcombine.low %v1135_v51, %v1147_v52  ;;  %v17910_v11 = vcombine.low %v344_v62, %v356_v1  ;;  %v17887_v16 = vcombine.high %v320_v7, %v332_v9  ;;  %v620_v44 = vld [vmem:[#allocation5 + $0x1028] sm:$0xff] }
  0x9d   :  { %v1123_v61 = vld [vmem:[#allocation5 + $0x1fe0] sm:$0xff]  ;;  %v584_v51 = vld [vmem:[#allocation5 + $0xf08] sm:$0xff] }
  0x9e   :  { %7240 = vmatpush1.bf16.msra.mxu0 %v18460_v13  ;;  %v18677_v4 = vcombine.high %v1111_v60, %v1123_v61  ;;  %v1087_v5 = vld [vmem:[#allocation5 + $0x1ec0] sm:$0xff]  ;;  %v18676_v10 = vcombine.low %v1111_v60, %v1123_v61  ;;  %v596_v52 = vld [vmem:[#allocation5 + $0xf68] sm:$0xff] }
  0x9f   :  { %7283 = vmatpush1.bf16.msra.mxu1 %v17694_v14  ;;  %7241 = vmatprep.subr.bf16.mxu0 %v18437_v15  ;;  %v1099_v6 = vld [vmem:[#allocation5 + $0x1f20] sm:$0xff]  ;;  %v296_v15 = vld [vmem:[#allocation5 + $0x608] sm:$0xff] }
  0xa0   :  { %7284 = vmatprep.subr.bf16.mxu1 %v17671_v19  ;;  %v18653_v12 = vcombine.high %v1087_v5, %v1099_v6  ;;  %v1063_v13 = vld [vmem:[#allocation5 + $0x1e00] sm:$0xff]  ;;  %v18652_v18 = vcombine.low %v1087_v5, %v1099_v6  ;;  %v17886_v19 = vcombine.low %v320_v7, %v332_v9  ;;  %v17863_v26 = vcombine.high %v296_v15, %v308_v17  ;;  %v968_v53 = vld [vmem:[#allocation5 + $0x1b08] sm:$0xff] }
  0xa1   :  { %v1075_v14 = vld [vmem:[#allocation5 + $0x1e60] sm:$0xff]  ;;  %v980_v55 = vld [vmem:[#allocation5 + $0x1b68] sm:$0xff] }
  0xa2   :  { %7242 = vmatpush1.bf16.msra.mxu0 %v18436_v22  ;;  %v18629_v20 = vcombine.high %v1063_v13, %v1075_v14  ;;  %v656_v22 = vld [vmem:[#allocation5 + $0x1148] sm:$0xff]  ;;  %v89_v27 = vld [vmem:[#allocation2 + $0x20] sm:$0xff]  ;;  %v18628_v30 = vcombine.low %v1063_v13, %v1075_v14 }
  0xa3   :  { %7285 = vmatpush1.bf16.msra.mxu1 %v17670_v23  ;;  %7243 = vmatprep.subr.bf16.mxu0 %v18797_v24  ;;  %v668_v23 = vld [vmem:[#allocation5 + $0x11a8] sm:$0xff]  ;;  %v22021_v39 = vpack.c.bf16 %v95_v28, %v89_v27 }
  0xa4   :  { %7286 = vmatprep.subr.bf16.mxu1 %v18031_v29  ;;  %v1040_v24 = vld [vmem:[#allocation5 + $0x1d48] sm:$0xff] }
  0xa5   :  { %v1052_v29 = vld [vmem:[#allocation5 + $0x1da8] sm:$0xff] }
  0xa6   :  { %7244 = vmatpush2.bf16.msra.mxu0 %v18796_v31  ;;  %v17862_v31 = vcombine.low %v296_v15, %v308_v17  ;;  %v18607_v37 = vcombine.high %v1040_v24, %v1052_v29  ;;  %v560_v60 = vld [vmem:[#allocation5 + $0xe48] sm:$0xff] }
  0xa7   :  { %7287 = vmatpush2.bf16.msra.mxu1 %v18030_v33  ;;  %7245 = vmatprep.subr.bf16.mxu0 %v18773_v34  ;;  %v18223_v33 = vcombine.high %v656_v22, %v668_v23  ;;  %v632_v34 = vld [vmem:[#allocation5 + $0x1088] sm:$0xff] }
  0xa8   :  { %7288 = vmatprep.subr.bf16.mxu1 %v18007_v38  ;;  %v1028_v38 = vld [vmem:[#allocation5 + $0x1ce8] sm:$0xff] }
  0xa9   :  { %v18583_v45 = vcombine.high %v1016_v36, %v1028_v38  ;;  %v572_v61 = vld [vmem:[#allocation5 + $0xea8] sm:$0xff] }
  0xaa   :  { %7246 = vmatpush2.bf16.msra.mxu0 %v18772_v40  ;;  %v18222_v40 = vcombine.low %v656_v22, %v668_v23  ;;  %v944_v62 = vld [vmem:[#allocation5 + $0x1a48] sm:$0xff] }
  0xab   :  { %7289 = vmatpush2.bf16.msra.mxu1 %v18006_v41  ;;  %7247 = vmatprep.subr.bf16.mxu0 %v18749_v42  ;;  %v18606_v41 = vcombine.low %v1040_v24, %v1052_v29  ;;  %v18199_v42 = vcombine.high %v632_v34, %v644_v35  ;;  %v956_v1 = vld [vmem:[#allocation5 + $0x1aa8] sm:$0xff] }
  0xac   :  { %7290 = vmatprep.subr.bf16.mxu1 %v17983_v46  ;;  %v992_v46 = vld [vmem:[#allocation5 + $0x1bc8] sm:$0xff] }
  0xad   :  { %v536_v5 = vld [vmem:[#allocation5 + $0xd88] sm:$0xff] }
  0xae   :  { %7248 = vmatpush2.bf16.msra.mxu0 %v18748_v48  ;;  %v18198_v48 = vcombine.low %v632_v34, %v644_v35  ;;  %v548_v6 = vld [vmem:[#allocation5 + $0xde8] sm:$0xff] }
  0xaf   :  { %7291 = vmatpush2.bf16.msra.mxu1 %v17982_v49  ;;  %7249 = vmatprep.subr.bf16.mxu0 %v18725_v50  ;;  %v18582_v49 = vcombine.low %v1016_v36, %v1028_v38  ;;  %v18175_v50 = vcombine.high %v608_v43, %v620_v44  ;;  %v920_v7 = vld [vmem:[#allocation5 + $0x1988] sm:$0xff] }
  0xb0   :  { %7292 = vmatprep.subr.bf16.mxu1 %v17959_v54  ;;  %v18559_v54 = vcombine.high %v992_v46, %v1004_v47  ;;  %v932_v9 = vld [vmem:[#allocation5 + $0x19e8] sm:$0xff] }
  0xb1   :  { %v512_v13 = vld [vmem:[#allocation5 + $0xcc8] sm:$0xff] }
  0xb2   :  { %7250 = vmatpush2.bf16.msra.mxu0 %v18724_v56  ;;  %v18174_v56 = vcombine.low %v608_v43, %v620_v44  ;;  %v524_v14 = vld [vmem:[#allocation5 + $0xd28] sm:$0xff] }
  0xb3   :  { %7293 = vmatpush2.bf16.msra.mxu1 %v17958_v57  ;;  %7251 = vmatprep.subr.bf16.mxu0 %v18701_v59  ;;  %v18558_v57 = vcombine.low %v992_v46, %v1004_v47  ;;  %v18151_v59 = vcombine.high %v584_v51, %v596_v52  ;;  %v896_v15 = vld [vmem:[#allocation5 + $0x18c8] sm:$0xff]  ;;  %v18078_v28 = vcombine.low %v512_v13, %v524_v14 }
  0xb4   :  { %7294 = vmatprep.subr.bf16.mxu1 %v17935_v0  ;;  %v18535_v0 = vcombine.high %v968_v53, %v980_v55  ;;  %v908_v17 = vld [vmem:[#allocation5 + $0x1928] sm:$0xff] }
  0xb5   :  { %v488_v22 = vld [vmem:[#allocation5 + $0xc08] sm:$0xff]  ;;  %v18462_v29 = vcombine.low %v896_v15, %v908_v17 }
  0xb6   :  { %7252 = vmatpush2.bf16.msra.mxu0 %v18700_v2  ;;  %v18150_v2 = vcombine.low %v584_v51, %v596_v52  ;;  %v500_v23 = vld [vmem:[#allocation5 + $0xc68] sm:$0xff] }
  0xb7   :  { %7295 = vmatpush2.bf16.msra.mxu1 %v17934_v3  ;;  %7253 = vmatprep.subr.bf16.mxu0 %v18677_v4  ;;  %v18534_v3 = vcombine.low %v968_v53, %v980_v55  ;;  %v18127_v4 = vcombine.high %v560_v60, %v572_v61  ;;  %v872_v24 = vld [vmem:[#allocation5 + $0x1808] sm:$0xff] }
  0xb8   :  { %7296 = vmatprep.subr.bf16.mxu1 %v17911_v8  ;;  %v18511_v8 = vcombine.high %v944_v62, %v956_v1  ;;  %v884_v27 = vld [vmem:[#allocation5 + $0x1868] sm:$0xff] }
  0xb9   :  { %v1232_v34 = vld [vmem:[#allocation5 + $0x2348] sm:$0xff]  ;;  %v18439_v35 = vcombine.high %v872_v24, %v884_v27  ;;  %v18438_v38 = vcombine.low %v872_v24, %v884_v27 }
  0xba   :  { %7254 = vmatpush2.bf16.msra.mxu0 %v18676_v10  ;;  %v18126_v10 = vcombine.low %v560_v60, %v572_v61  ;;  %v1244_v36 = vld [vmem:[#allocation5 + $0x23a8] sm:$0xff] }
  0xbb   :  { %7297 = vmatpush2.bf16.msra.mxu1 %v17910_v11  ;;  %7255 = vmatprep.subr.bf16.mxu0 %v18653_v12  ;;  %v18510_v11 = vcombine.low %v944_v62, %v956_v1  ;;  %v18103_v12 = vcombine.high %v536_v5, %v548_v6  ;;  %v1208_v43 = vld [vmem:[#allocation5 + $0x2288] sm:$0xff]  ;;  %v18799_v44 = vcombine.high %v1232_v34, %v1244_v36 }
  0xbc   :  { %7298 = vmatprep.subr.bf16.mxu1 %v17887_v16  ;;  %v18487_v16 = vcombine.high %v920_v7, %v932_v9  ;;  %v18798_v47 = vcombine.low %v1232_v34, %v1244_v36  ;;  %v1184_v51 = vld [vmem:[#allocation5 + $0x21c8] sm:$0xff] }
  0xbd   :  { %v1196_v53 = vld [vmem:[#allocation5 + $0x2228] sm:$0xff] }
  0xbe   :  { %7256 = vmatpush2.bf16.msra.mxu0 %v18652_v18  ;;  %v18102_v18 = vcombine.low %v536_v5, %v548_v6  ;;  %v1160_v60 = vld [vmem:[#allocation5 + $0x2108] sm:$0xff]  ;;  %v18751_v61 = vcombine.high %v1184_v51, %v1196_v53  ;;  %v18750_v1 = vcombine.low %v1184_v51, %v1196_v53  ;;  %v645_v51 = vld [vmem:[#allocation5 + $0x10f0] sm:$0xff] }
  0xbf   :  { %7299 = vmatpush2.bf16.msra.mxu1 %v17886_v19  ;;  %7257 = vmatprep.subr.bf16.mxu0 %v18629_v20  ;;  %v18486_v19 = vcombine.low %v920_v7, %v932_v9  ;;  %v18079_v20 = vcombine.high %v512_v13, %v524_v14  ;;  %v1172_v62 = vld [vmem:[#allocation5 + $0x2168] sm:$0xff] }
  0xc0   :  { %7300 = vmatprep.subr.bf16.mxu1 %v17863_v26  ;;  %v18463_v26 = vcombine.high %v896_v15, %v908_v17  ;;  %v1136_v5 = vld [vmem:[#allocation5 + $0x2048] sm:$0xff]  ;;  %v18727_v6 = vcombine.high %v1160_v60, %v1172_v62  ;;  %v18726_v9 = vcombine.low %v1160_v60, %v1172_v62  ;;  %v621_v60 = vld [vmem:[#allocation5 + $0x1030] sm:$0xff] }
  0xc1   :  { %v1148_v7 = vld [vmem:[#allocation5 + $0x20a8] sm:$0xff] }
  0xc2   :  { %7258 = vmatpush2.bf16.msra.mxu0 %v18628_v30  ;;  %v18055_v30 = vcombine.high %v488_v22, %v500_v23  ;;  %v1112_v13 = vld [vmem:[#allocation5 + $0x1f88] sm:$0xff]  ;;  %v18703_v14 = vcombine.high %v1136_v5, %v1148_v7  ;;  %v18702_v17 = vcombine.low %v1136_v5, %v1148_v7  ;;  %v597_v5 = vld [vmem:[#allocation5 + $0xf70] sm:$0xff] }
  0xc3   :  { %7301 = vmatpush2.bf16.msra.mxu1 %v17862_v31  ;;  %7313 = vmatprep.subr.bf16.mxu0 %v18223_v33  ;;  %v848_v31 = vld [vmem:[#allocation5 + $0x1748] sm:$0xff] }
  0xc4   :  { %7356 = vmatprep.subr.bf16.mxu1 %v18607_v37  ;;  %v860_v33 = vld [vmem:[#allocation5 + $0x17a8] sm:$0xff]  ;;  %v18054_v37 = vcombine.low %v488_v22, %v500_v23 }
  0xc5   :  { %7260 = vmatmul.mubr.bf16.vlgmr.msra.gmra.mxu0 %v22021_v39  ;;  %v18414_v46 = vcombine.low %v848_v31, %v860_v33  ;;  %v1124_v15 = vld [vmem:[#allocation5 + $0x1fe8] sm:$0xff] }
  0xc6   :  { %7303 = vmatmul.mubr.bf16.vlgmr.msra.gmra.mxu1 %v22011_v21  ;;  %7314 = vmatpush1.bf16.msra.mxu0 %v18222_v40  ;;  %v18415_v40 = vcombine.high %v848_v31, %v860_v33  ;;  %v1088_v22 = vld [vmem:[#allocation5 + $0x1ec8] sm:$0xff]  ;;  %v18679_v23 = vcombine.high %v1112_v13, %v1124_v15  ;;  %v18678_v27 = vcombine.low %v1112_v13, %v1124_v15  ;;  %v573_v13 = vld [vmem:[#allocation5 + $0xeb0] sm:$0xff] }
  0xc7   :  { %7357 = vmatpush1.bf16.msra.mxu1 %v18606_v41  ;;  %7315 = vmatprep.subr.bf16.mxu0 %v18199_v42  ;;  %v824_v41 = vld [vmem:[#allocation5 + $0x1688] sm:$0xff] }
  0xc8   :  { %7358 = vmatprep.subr.bf16.mxu1 %v18583_v45  ;;  %7345 = vmatprep.mubr.bf16.mxu0 %v22007_v63  ;;  %v836_v42 = vld [vmem:[#allocation5 + $0x16e8] sm:$0xff] }
  0xc9   :  { %7388 = vmatprep.mubr.bf16.mxu1 %v22015_v32  ;;  %v1220_v45 = vld [vmem:[#allocation5 + $0x22e8] sm:$0xff] }
  0xca   :  { %7316 = vmatpush1.bf16.msra.mxu0 %v18198_v48  ;;  %v18391_v48 = vcombine.high %v824_v41, %v836_v42  ;;  %v18775_v52 = vcombine.high %v1208_v43, %v1220_v45  ;;  %v18774_v55 = vcombine.low %v1208_v43, %v1220_v45  ;;  %v1100_v24 = vld [vmem:[#allocation5 + $0x1f28] sm:$0xff]  ;;  %v669_v43 = vld [vmem:[#allocation5 + $0x11b0] sm:$0xff] }
  0xcb   :  { %7359 = vmatpush1.bf16.msra.mxu1 %v18582_v49  ;;  %7317 = vmatprep.subr.bf16.mxu0 %v18175_v50  ;;  %v800_v49 = vld [vmem:[#allocation5 + $0x15c8] sm:$0xff]  ;;  %v18655_v33 = vcombine.high %v1088_v22, %v1100_v24  ;;  %v18654_v36 = vcombine.low %v1088_v22, %v1100_v24  ;;  %v549_v22 = vld [vmem:[#allocation5 + $0xdf0] sm:$0xff] }
  0xcc   :  { %7360 = vmatprep.subr.bf16.mxu1 %v18559_v54  ;;  %v812_v50 = vld [vmem:[#allocation5 + $0x1628] sm:$0xff]  ;;  %v18390_v54 = vcombine.low %v824_v41, %v836_v42  ;;  %v657_v41 = vld [vmem:[#allocation5 + $0x1150] sm:$0xff] }
  0xcd   :  { %v1064_v31 = vld [vmem:[#allocation5 + $0x1e08] sm:$0xff]  ;;  %v18224_v53 = vcombine.low %v657_v41, %v669_v43 }
  0xce   :  { %7318 = vmatpush1.bf16.msra.mxu0 %v18174_v56  ;;  %v18367_v56 = vcombine.high %v800_v49, %v812_v50  ;;  %v1076_v34 = vld [vmem:[#allocation5 + $0x1e68] sm:$0xff] }
  0xcf   :  { %7361 = vmatpush1.bf16.msra.mxu1 %v18558_v57  ;;  %7319 = vmatprep.subr.bf16.mxu0 %v18151_v59  ;;  %v776_v57 = vld [vmem:[#allocation5 + $0x1508] sm:$0xff]  ;;  %v18631_v42 = vcombine.high %v1064_v31, %v1076_v34  ;;  %v18630_v45 = vcombine.low %v1064_v31, %v1076_v34  ;;  %v525_v31 = vld [vmem:[#allocation5 + $0xd30] sm:$0xff] }
  0xd0   :  { %7362 = vmatprep.subr.bf16.mxu1 %v18535_v0  ;;  %v788_v59 = vld [vmem:[#allocation5 + $0x1568] sm:$0xff]  ;;  %v18366_v0 = vcombine.low %v800_v49, %v812_v50  ;;  %v633_v49 = vld [vmem:[#allocation5 + $0x1090] sm:$0xff]  ;;  %v18225_v50 = vcombine.high %v657_v41, %v669_v43 }
  0xd1   :  { %v18200_v62 = vcombine.low %v633_v49, %v645_v51  ;;  %v501_v41 = vld [vmem:[#allocation5 + $0xc70] sm:$0xff] }
  0xd2   :  { %7320 = vmatpush1.bf16.msra.mxu0 %v18150_v2  ;;  %v18343_v2 = vcombine.high %v776_v57, %v788_v59 }
  0xd3   :  { %7363 = vmatpush1.bf16.msra.mxu1 %v18534_v3  ;;  %7321 = vmatprep.subr.bf16.mxu0 %v18127_v4  ;;  %v752_v3 = vld [vmem:[#allocation5 + $0x1448] sm:$0xff] }
  0xd4   :  { %7364 = vmatprep.subr.bf16.mxu1 %v18511_v8  ;;  %v764_v4 = vld [vmem:[#allocation5 + $0x14a8] sm:$0xff]  ;;  %v18342_v8 = vcombine.low %v776_v57, %v788_v59  ;;  %v609_v57 = vld [vmem:[#allocation5 + $0xfd0] sm:$0xff]  ;;  %v18201_v59 = vcombine.high %v633_v49, %v645_v51 }
  0xd5   :  { %v18176_v7 = vcombine.low %v609_v57, %v621_v60  ;;  %v861_v49 = vld [vmem:[#allocation5 + $0x17b0] sm:$0xff] }
  0xd6   :  { %7322 = vmatpush1.bf16.msra.mxu0 %v18126_v10  ;;  %v18319_v10 = vcombine.high %v752_v3, %v764_v4 }
  0xd7   :  { %7365 = vmatpush1.bf16.msra.mxu1 %v18510_v11  ;;  %7323 = vmatprep.subr.bf16.mxu0 %v18103_v12  ;;  %v728_v11 = vld [vmem:[#allocation5 + $0x1388] sm:$0xff] }
  0xd8   :  { %7366 = vmatprep.subr.bf16.mxu1 %v18487_v16  ;;  %v740_v12 = vld [vmem:[#allocation5 + $0x13e8] sm:$0xff]  ;;  %v18318_v16 = vcombine.low %v752_v3, %v764_v4  ;;  %v585_v3 = vld [vmem:[#allocation5 + $0xf10] sm:$0xff]  ;;  %v18177_v4 = vcombine.high %v609_v57, %v621_v60 }
  0xd9   :  { %v18152_v15 = vcombine.low %v585_v3, %v597_v5  ;;  %v837_v57 = vld [vmem:[#allocation5 + $0x16f0] sm:$0xff] }
  0xda   :  { %7324 = vmatpush1.bf16.msra.mxu0 %v18102_v18  ;;  %v18295_v18 = vcombine.high %v728_v11, %v740_v12 }
  0xdb   :  { %7367 = vmatpush1.bf16.msra.mxu1 %v18486_v19  ;;  %7325 = vmatprep.subr.bf16.mxu0 %v18079_v20  ;;  %v704_v19 = vld [vmem:[#allocation5 + $0x12c8] sm:$0xff] }
  0xdc   :  { %7368 = vmatprep.subr.bf16.mxu1 %v18463_v26  ;;  %v716_v20 = vld [vmem:[#allocation5 + $0x1328] sm:$0xff]  ;;  %v18294_v26 = vcombine.low %v728_v11, %v740_v12  ;;  %v561_v11 = vld [vmem:[#allocation5 + $0xe50] sm:$0xff]  ;;  %v18153_v12 = vcombine.high %v585_v3, %v597_v5 }
  0xdd   :  { %v18128_v24 = vcombine.low %v561_v11, %v573_v13  ;;  %v813_v3 = vld [vmem:[#allocation5 + $0x1630] sm:$0xff] }
  0xde   :  { %7326 = vmatpush1.bf16.msra.mxu0 %v18078_v28  ;;  %v18271_v28 = vcombine.high %v704_v19, %v716_v20 }
  0xdf   :  { %7369 = vmatpush1.bf16.msra.mxu1 %v18462_v29  ;;  %7327 = vmatprep.subr.bf16.mxu0 %v18055_v30  ;;  %v680_v29 = vld [vmem:[#allocation5 + $0x1208] sm:$0xff] }
  0xe0   :  { %7370 = vmatprep.subr.bf16.mxu1 %v18439_v35  ;;  %v692_v30 = vld [vmem:[#allocation5 + $0x1268] sm:$0xff]  ;;  %v18270_v35 = vcombine.low %v704_v19, %v716_v20  ;;  %v537_v19 = vld [vmem:[#allocation5 + $0xd90] sm:$0xff]  ;;  %v18129_v20 = vcombine.high %v561_v11, %v573_v13 }
  0xe1   :  { %v18104_v34 = vcombine.low %v537_v19, %v549_v22  ;;  %v789_v11 = vld [vmem:[#allocation5 + $0x1570] sm:$0xff] }
  0xe2   :  { %7328 = vmatpush1.bf16.msra.mxu0 %v18054_v37  ;;  %v18247_v37 = vcombine.high %v680_v29, %v692_v30 }
  0xe3   :  { %7371 = vmatpush1.bf16.msra.mxu1 %v18438_v38  ;;  %7329 = vmatprep.subr.bf16.mxu0 %v18415_v40  ;;  %v273_v38 = vld [vmem:[#allocation5 + $0x550] sm:$0xff] }
  0xe4   :  { %7372 = vmatprep.subr.bf16.mxu1 %v18799_v44  ;;  %v285_v40 = vld [vmem:[#allocation5 + $0x5b0] sm:$0xff]  ;;  %v18246_v44 = vcombine.low %v680_v29, %v692_v30  ;;  %v18105_v30 = vcombine.high %v537_v19, %v549_v22 }
  0xe5   :  { %v513_v29 = vld [vmem:[#allocation5 + $0xcd0] sm:$0xff] }
  0xe6   :  { %7330 = vmatpush2.bf16.msra.mxu0 %v18414_v46  ;;  %v17841_v46 = vcombine.high %v273_v38, %v285_v40  ;;  %v18080_v43 = vcombine.low %v513_v29, %v525_v31  ;;  %v765_v19 = vld [vmem:[#allocation5 + $0x14b0] sm:$0xff] }
  0xe7   :  { %7373 = vmatpush2.bf16.msra.mxu1 %v18798_v47  ;;  %7331 = vmatprep.subr.bf16.mxu0 %v18391_v48  ;;  %v249_v47 = vld [vmem:[#allocation5 + $0x490] sm:$0xff] }
  0xe8   :  { %7374 = vmatprep.subr.bf16.mxu1 %v18775_v52  ;;  %v261_v48 = vld [vmem:[#allocation5 + $0x4f0] sm:$0xff]  ;;  %v17840_v52 = vcombine.low %v273_v38, %v285_v40  ;;  %v18081_v40 = vcombine.high %v513_v29, %v525_v31 }
  0xe9   :  { %v489_v38 = vld [vmem:[#allocation5 + $0xc10] sm:$0xff] }
  0xea   :  { %7332 = vmatpush2.bf16.msra.mxu0 %v18390_v54  ;;  %v17817_v54 = vcombine.high %v249_v47, %v261_v48  ;;  %v18056_v51 = vcombine.low %v489_v38, %v501_v41  ;;  %v741_v29 = vld [vmem:[#allocation5 + $0x13f0] sm:$0xff] }
  0xeb   :  { %7375 = vmatpush2.bf16.msra.mxu1 %v18774_v55  ;;  %7333 = vmatprep.subr.bf16.mxu0 %v18367_v56  ;;  %v225_v55 = vld [vmem:[#allocation5 + $0x3d0] sm:$0xff] }
  0xec   :  { %7376 = vmatprep.subr.bf16.mxu1 %v18751_v61  ;;  %v237_v56 = vld [vmem:[#allocation5 + $0x430] sm:$0xff]  ;;  %v17816_v61 = vcombine.low %v249_v47, %v261_v48  ;;  %v18057_v48 = vcombine.high %v489_v38, %v501_v41  ;;  %v1261_v41 = vlaneseq }
  0xed   :  { %v849_v47 = vld [vmem:[#allocation5 + $0x1750] sm:$0xff] }
  0xee   :  { %7334 = vmatpush2.bf16.msra.mxu0 %v18366_v0  ;;  %v17793_v0 = vcombine.high %v225_v55, %v237_v56  ;;  %v18416_v60 = vcombine.low %v849_v47, %v861_v49  ;;  %v717_v38 = vld [vmem:[#allocation5 + $0x1330] sm:$0xff] }
  0xef   :  { %7377 = vmatpush2.bf16.msra.mxu1 %v18750_v1  ;;  %7335 = vmatprep.subr.bf16.mxu0 %v18343_v2  ;;  %v201_v1 = vld [vmem:[#allocation5 + $0x310] sm:$0xff] }
  0xf0   :  { %7378 = vmatprep.subr.bf16.mxu1 %v18727_v6  ;;  %v213_v2 = vld [vmem:[#allocation5 + $0x370] sm:$0xff]  ;;  %v17792_v6 = vcombine.low %v225_v55, %v237_v56  ;;  %v18417_v56 = vcombine.high %v849_v47, %v861_v49 }
  0xf1   :  { %v825_v55 = vld [vmem:[#allocation5 + $0x1690] sm:$0xff] }
  0xf2   :  { %7336 = vmatpush2.bf16.msra.mxu0 %v18342_v8  ;;  %v17769_v8 = vcombine.high %v201_v1, %v213_v2  ;;  %v18392_v5 = vcombine.low %v825_v55, %v837_v57 }
  0xf3   :  { %7379 = vmatpush2.bf16.msra.mxu1 %v18726_v9  ;;  %7337 = vmatprep.subr.bf16.mxu0 %v18319_v10  ;;  %v177_v9 = vld [vmem:[#allocation5 + $0x250] sm:$0xff] }
  0xf4   :  { %7380 = vmatprep.subr.bf16.mxu1 %v18703_v14  ;;  %v189_v10 = vld [vmem:[#allocation5 + $0x2b0] sm:$0xff]  ;;  %v17768_v14 = vcombine.low %v201_v1, %v213_v2  ;;  %v18393_v2 = vcombine.high %v825_v55, %v837_v57  ;;  %v274_v55 = vld [vmem:[#allocation5 + $0x558] sm:$0xff] }
  0xf5   :  { %v801_v1 = vld [vmem:[#allocation5 + $0x15d0] sm:$0xff]  ;;  %v286_v57 = vld [vmem:[#allocation5 + $0x5b8] sm:$0xff] }
  0xf6   :  { %7338 = vmatpush2.bf16.msra.mxu0 %v18318_v16  ;;  %v17745_v16 = vcombine.high %v177_v9, %v189_v10  ;;  %v18368_v13 = vcombine.low %v801_v1, %v813_v3 }
  0xf7   :  { %7381 = vmatpush2.bf16.msra.mxu1 %v18702_v17  ;;  %7339 = vmatprep.subr.bf16.mxu0 %v18295_v18  ;;  %v153_v17 = vld [vmem:[#allocation5 + $0x190] sm:$0xff] }
  0xf8   :  { %7382 = vmatprep.subr.bf16.mxu1 %v18679_v23  ;;  %v165_v18 = vld [vmem:[#allocation5 + $0x1f0] sm:$0xff]  ;;  %v17744_v23 = vcombine.low %v177_v9, %v189_v10  ;;  %v18369_v10 = vcombine.high %v801_v1, %v813_v3  ;;  %v250_v3 = vld [vmem:[#allocation5 + $0x498] sm:$0xff] }
  0xf9   :  { %v777_v9 = vld [vmem:[#allocation5 + $0x1510] sm:$0xff] }
  0xfa   :  { %7340 = vmatpush2.bf16.msra.mxu0 %v18294_v26  ;;  %v17721_v26 = vcombine.high %v153_v17, %v165_v18  ;;  %v18344_v22 = vcombine.low %v777_v9, %v789_v11  ;;  %v1017_v1 = vld [vmem:[#allocation5 + $0x1c90] sm:$0xff] }
  0xfb   :  { %7383 = vmatpush2.bf16.msra.mxu1 %v18678_v27  ;;  %7341 = vmatprep.subr.bf16.mxu0 %v18271_v28  ;;  %v129_v27 = vld [vmem:[#allocation5 + $0xd0] sm:$0xff] }
  0xfc   :  { %7384 = vmatprep.subr.bf16.mxu1 %v18655_v33  ;;  %v141_v28 = vld [vmem:[#allocation5 + $0x130] sm:$0xff]  ;;  %v17720_v33 = vcombine.low %v153_v17, %v165_v18  ;;  %v18345_v18 = vcombine.high %v777_v9, %v789_v11 }
  0xfd   :  { %v753_v17 = vld [vmem:[#allocation5 + $0x1450] sm:$0xff] }
  0xfe   :  { %7342 = vmatpush2.bf16.msra.mxu0 %v18270_v35  ;;  %v17697_v35 = vcombine.high %v129_v27, %v141_v28  ;;  %v18320_v31 = vcombine.low %v753_v17, %v765_v19  ;;  %v1005_v11 = vld [vmem:[#allocation5 + $0x1c30] sm:$0xff] }
  0xff   :  { %7385 = vmatpush2.bf16.msra.mxu1 %v18654_v36  ;;  %7343 = vmatprep.subr.bf16.mxu0 %v18247_v37  ;;  %v105_v36 = vld [vmem:[#allocation5 + $0x10] sm:$0xff] }
 0x100   :  { %7386 = vmatprep.subr.bf16.mxu1 %v18631_v42  ;;  %v117_v37 = vld [vmem:[#allocation5 + $0x70] sm:$0xff]  ;;  %v17696_v42 = vcombine.low %v129_v27, %v141_v28  ;;  %v18321_v28 = vcombine.high %v753_v17, %v765_v19 }
 0x101   :  { %v729_v27 = vld [vmem:[#allocation5 + $0x1390] sm:$0xff] }
 0x102   :  { %7344 = vmatpush2.bf16.msra.mxu0 %v18246_v44  ;;  %v17673_v44 = vcombine.high %v105_v36, %v117_v37 }
 0x103   :  { %7387 = vmatpush2.bf16.msra.mxu1 %v18630_v45  ;;  %7399 = vmatprep.subr.bf16.mxu0 %v17841_v46  ;;  %v465_v45 = vld [vmem:[#allocation5 + $0xb50] sm:$0xff] }
 0x104   :  { %7442 = vmatprep.subr.bf16.mxu1 %v18225_v50  ;;  %v477_v46 = vld [vmem:[#allocation5 + $0xbb0] sm:$0xff]  ;;  %v17672_v50 = vcombine.low %v105_v36, %v117_v37  ;;  %v18297_v37 = vcombine.high %v729_v27, %v741_v29 }
 0x105   :  { %7346 = vmatmul.mubr.bf16.vlgmr.msra.gmra.mxu0 %v22013_v25  ;;  %v705_v36 = vld [vmem:[#allocation5 + $0x12d0] sm:$0xff] }
 0x106   :  { %7389 = vmatmul.mubr.bf16.vlgmr.msra.gmra.mxu1 %v22021_v39  ;;  %7400 = vmatpush1.bf16.msra.mxu0 %v17840_v52  ;;  %v18033_v52 = vcombine.high %v465_v45, %v477_v46  ;;  %v18273_v47 = vcombine.high %v705_v36, %v717_v38 }
 0x107   :  { %7443 = vmatpush1.bf16.msra.mxu1 %v18224_v53  ;;  %7401 = vmatprep.subr.bf16.mxu0 %v17817_v54  ;;  %v441_v53 = vld [vmem:[#allocation5 + $0xa90] sm:$0xff] }
 0x108   :  { %7444 = vmatprep.subr.bf16.mxu1 %v18201_v59  ;;  %7431 = vmatprep.mubr.bf16.mxu0 %v22005_v58  ;;  %v453_v54 = vld [vmem:[#allocation5 + $0xaf0] sm:$0xff]  ;;  %v18032_v59 = vcombine.low %v465_v45, %v477_v46 }
 0x109   :  { %7474 = vmatprep.mubr.bf16.mxu1 %v22007_v63  ;;  %v309_v45 = vld [vmem:[#allocation5 + $0x670] sm:$0xff] }
 0x10a   :  { %7402 = vmatpush1.bf16.msra.mxu0 %v17816_v61  ;;  %v18009_v61 = vcombine.high %v441_v53, %v453_v54  ;;  %v681_v46 = vld [vmem:[#allocation5 + $0x1210] sm:$0xff] }
 0x10b   :  { %7445 = vmatpush1.bf16.msra.mxu1 %v18200_v62  ;;  %7403 = vmatprep.subr.bf16.mxu0 %v17793_v0  ;;  %v417_v62 = vld [vmem:[#allocation5 + $0x9d0] sm:$0xff] }
 0x10c   :  { %7446 = vmatprep.subr.bf16.mxu1 %v18177_v4  ;;  %v429_v0 = vld [vmem:[#allocation5 + $0xa30] sm:$0xff]  ;;  %v18008_v4 = vcombine.low %v441_v53, %v453_v54 }
 0x10d   :  { %v1041_v53 = vld [vmem:[#allocation5 + $0x1d50] sm:$0xff] }
 0x10e   :  { %7404 = vmatpush1.bf16.msra.mxu0 %v17792_v6  ;;  %v17985_v6 = vcombine.high %v417_v62, %v429_v0  ;;  %v1053_v54 = vld [vmem:[#allocation5 + $0x1db0] sm:$0xff] }
 0x10f   :  { %7447 = vmatpush1.bf16.msra.mxu1 %v18176_v7  ;;  %7405 = vmatprep.subr.bf16.mxu0 %v17769_v8  ;;  %v393_v7 = vld [vmem:[#allocation5 + $0x910] sm:$0xff] }
 0x110   :  { %7448 = vmatprep.subr.bf16.mxu1 %v18153_v12  ;;  %v405_v8 = vld [vmem:[#allocation5 + $0x970] sm:$0xff]  ;;  %v17984_v12 = vcombine.low %v417_v62, %v429_v0  ;;  %v18609_v0 = vcombine.high %v1041_v53, %v1053_v54 }
 0x112   :  { %7406 = vmatpush1.bf16.msra.mxu0 %v17768_v14  ;;  %v17961_v14 = vcombine.high %v393_v7, %v405_v8 }
 0x113   :  { %7449 = vmatpush1.bf16.msra.mxu1 %v18152_v15  ;;  %7407 = vmatprep.subr.bf16.mxu0 %v17745_v16  ;;  %v369_v15 = vld [vmem:[#allocation5 + $0x850] sm:$0xff] }
 0x114   :  { %7450 = vmatprep.subr.bf16.mxu1 %v18129_v20  ;;  %v381_v16 = vld [vmem:[#allocation5 + $0x8b0] sm:$0xff]  ;;  %v17960_v20 = vcombine.low %v393_v7, %v405_v8  ;;  %v18608_v7 = vcombine.low %v1041_v53, %v1053_v54  ;;  %v17842_v8 = vcombine.low %v274_v55, %v286_v57  ;;  %v166_v53 = vld [vmem:[#allocation5 + $0x1f8] sm:$0xff] }
 0x116   :  { %7408 = vmatpush1.bf16.msra.mxu0 %v17744_v23  ;;  %v17937_v23 = vcombine.high %v369_v15, %v381_v16 }
 0x117   :  { %7451 = vmatpush1.bf16.msra.mxu1 %v18128_v24  ;;  %7409 = vmatprep.subr.bf16.mxu0 %v17721_v26  ;;  %v345_v24 = vld [vmem:[#allocation5 + $0x790] sm:$0xff] }
 0x118   :  { %7452 = vmatprep.subr.bf16.mxu1 %v18105_v30  ;;  %v357_v26 = vld [vmem:[#allocation5 + $0x7f0] sm:$0xff]  ;;  %v17936_v30 = vcombine.low %v369_v15, %v381_v16 }
 0x11a   :  { %7410 = vmatpush1.bf16.msra.mxu0 %v17720_v33  ;;  %v17913_v33 = vcombine.high %v345_v24, %v357_v26 }
 0x11b   :  { %7453 = vmatpush1.bf16.msra.mxu1 %v18104_v34  ;;  %7411 = vmatprep.subr.bf16.mxu0 %v17697_v35  ;;  %v321_v34 = vld [vmem:[#allocation5 + $0x6d0] sm:$0xff] }
 0x11c   :  { %7454 = vmatprep.subr.bf16.mxu1 %v18081_v40  ;;  %v333_v35 = vld [vmem:[#allocation5 + $0x730] sm:$0xff]  ;;  %v17912_v40 = vcombine.low %v345_v24, %v357_v26  ;;  %v202_v26 = vld [vmem:[#allocation5 + $0x318] sm:$0xff] }
 0x11d   :  { %v17888_v49 = vcombine.low %v321_v34, %v333_v35  ;;  %v981_v24 = vld [vmem:[#allocation5 + $0x1b70] sm:$0xff] }
 0x11e   :  { %7412 = vmatpush1.bf16.msra.mxu0 %v17696_v42  ;;  %v18296_v42 = vcombine.low %v729_v27, %v741_v29 }
 0x11f   :  { %7455 = vmatpush1.bf16.msra.mxu1 %v18080_v43  ;;  %7413 = vmatprep.subr.bf16.mxu0 %v17673_v44  ;;  %v17889_v43 = vcombine.high %v321_v34, %v333_v35  ;;  %v297_v44 = vld [vmem:[#allocation5 + $0x610] sm:$0xff] }
 0x120   :  { %7456 = vmatprep.subr.bf16.mxu1 %v18057_v48  ;;  %v693_v48 = vld [vmem:[#allocation5 + $0x1270] sm:$0xff] }
 0x121   :  { %v18248_v62 = vcombine.low %v681_v46, %v693_v48 }
 0x122   :  { %7414 = vmatpush1.bf16.msra.mxu0 %v17672_v50  ;;  %v22031_v50 = vshrl.u32 %v1261_v41, 7  ;;  %v178_v41 = vld [vmem:[#allocation5 + $0x258] sm:$0xff] }
 0x123   :  { %7457 = vmatpush1.bf16.msra.mxu1 %v18056_v51  ;;  %7415 = vmatprep.subr.bf16.mxu0 %v18033_v52  ;;  %v18272_v51 = vcombine.low %v705_v36, %v717_v38  ;;  %v17865_v52 = vcombine.high %v297_v44, %v309_v45  ;;  %v945_v38 = vld [vmem:[#allocation5 + $0x1a50] sm:$0xff] }
 0x124   :  { %7458 = vmatprep.subr.bf16.mxu1 %v18417_v56  ;;  %v18249_v56 = vcombine.high %v681_v46, %v693_v48  ;;  %v921_v48 = vld [vmem:[#allocation5 + $0x1990] sm:$0xff] }
 0x126   :  { %7416 = vmatpush2.bf16.msra.mxu0 %v18032_v59  ;;  %v1255_v59 = vld [vmem:[#allocation7] sm:$0xff] }
 0x127   :  { %7459 = vmatpush2.bf16.msra.mxu1 %v18416_v60  ;;  %7417 = vmatprep.subr.bf16.mxu0 %v18009_v61  ;;  %v17864_v60 = vcombine.low %v297_v44, %v309_v45  ;;  %v22034_v61 = vsub.s32 0, %v22031_v50  ;;  %v190_v44 = vld [vmem:[#allocation5 + $0x2b8] sm:$0xff] }
 0x128   :  { %7460 = vmatprep.subr.bf16.mxu1 %v18393_v2  ;;  %v1029_v2 = vld [vmem:[#allocation5 + $0x1cf0] sm:$0xff] }
 0x129   :  { %23072 = vst [vmem:[#allocation16_spill] sm:$0xff] %v22034_v61  ;;  %v18585_v9 = vcombine.high %v1017_v1, %v1029_v2 }
 0x12a   :  { %7418 = vmatpush2.bf16.msra.mxu0 %v18008_v4  ;;  %v17843_v4 = vcombine.high %v274_v55, %v286_v57  ;;  %v17746_v55 = vcombine.low %v178_v41, %v190_v44  ;;  %v897_v57 = vld [vmem:[#allocation5 + $0x18d0] sm:$0xff] }
 0x12b   :  { %7461 = vmatpush2.bf16.msra.mxu1 %v18392_v5  ;;  %7419 = vmatprep.subr.bf16.mxu0 %v17985_v6  ;;  %v262_v5 = vld [vmem:[#allocation5 + $0x4f8] sm:$0xff]  ;;  %v1264_v6 = vrot.slane %v1255_v59, %v22034_v61  ;;  %v909_v59 = vld [vmem:[#allocation5 + $0x1930] sm:$0xff] }
 0x12c   :  { %7462 = vmatprep.subr.bf16.mxu1 %v18369_v10  ;;  %v993_v10 = vld [vmem:[#allocation5 + $0x1bd0] sm:$0xff] }
 0x12d   :  { %v18560_v34 = vcombine.low %v993_v10, %v1005_v11 }
 0x12e   :  { %7420 = vmatpush2.bf16.msra.mxu0 %v17984_v12  ;;  %v226_v12 = vld [vmem:[#allocation5 + $0x3d8] sm:$0xff] }
 0x12f   :  { %7463 = vmatpush2.bf16.msra.mxu1 %v18368_v13  ;;  %7421 = vmatprep.subr.bf16.mxu0 %v17961_v14  ;;  %v17819_v13 = vcombine.high %v250_v3, %v262_v5  ;;  %v238_v14 = vld [vmem:[#allocation5 + $0x438] sm:$0xff] }
 0x130   :  { %7464 = vmatprep.subr.bf16.mxu1 %v18345_v18  ;;  %v18584_v18 = vcombine.low %v1017_v1, %v1029_v2  ;;  %v17795_v29 = vcombine.high %v226_v12, %v238_v14  ;;  %v17794_v36 = vcombine.low %v226_v12, %v238_v14  ;;  %v1233_v12 = vld [vmem:[#allocation5 + $0x2350] sm:$0xff]  ;;  %v466_v14 = vld [vmem:[#allocation5 + $0xb58] sm:$0xff] }
 0x132   :  { %7422 = vmatpush2.bf16.msra.mxu0 %v17960_v20  ;;  %v17818_v20 = vcombine.low %v250_v3, %v262_v5  ;;  %v18465_v3 = vcombine.high %v897_v57, %v909_v59  ;;  %v885_v5 = vld [vmem:[#allocation5 + $0x1870] sm:$0xff] }
 0x133   :  { %7465 = vmatpush2.bf16.msra.mxu1 %v18344_v22  ;;  %7423 = vmatprep.subr.bf16.mxu0 %v17937_v23  ;;  %v18561_v22 = vcombine.high %v993_v10, %v1005_v11  ;;  %v969_v23 = vld [vmem:[#allocation5 + $0x1b10] sm:$0xff] }
 0x134   :  { %7466 = vmatprep.subr.bf16.mxu1 %v18321_v28  ;;  %v18536_v45 = vcombine.low %v969_v23, %v981_v24 }
 0x136   :  { %7424 = vmatpush2.bf16.msra.mxu0 %v17936_v30  ;;  %v214_v30 = vld [vmem:[#allocation5 + $0x378] sm:$0xff] }
 0x137   :  { %7467 = vmatpush2.bf16.msra.mxu1 %v18320_v31  ;;  %7425 = vmatprep.subr.bf16.mxu0 %v17913_v33  ;;  %v17770_v46 = vcombine.low %v202_v26, %v214_v30 }
 0x138   :  { %7468 = vmatprep.subr.bf16.mxu1 %v18297_v37  ;;  %v18537_v37 = vcombine.high %v969_v23, %v981_v24  ;;  %v1221_v23 = vld [vmem:[#allocation5 + $0x22f0] sm:$0xff]  ;;  %v442_v24 = vld [vmem:[#allocation5 + $0xa98] sm:$0xff] }
 0x13a   :  { %7426 = vmatpush2.bf16.msra.mxu0 %v17912_v40  ;;  %v957_v40 = vld [vmem:[#allocation5 + $0x1ab0] sm:$0xff] }
 0x13b   :  { %7469 = vmatpush2.bf16.msra.mxu1 %v18296_v42  ;;  %7427 = vmatprep.subr.bf16.mxu0 %v17889_v43  ;;  %v17771_v43 = vcombine.high %v202_v26, %v214_v30  ;;  %v18512_v54 = vcombine.low %v945_v38, %v957_v40 }
 0x13c   :  { %7470 = vmatprep.subr.bf16.mxu1 %v18273_v47  ;;  %v18513_v47 = vcombine.high %v945_v38, %v957_v40  ;;  %v430_v38 = vld [vmem:[#allocation5 + $0xa38] sm:$0xff] }
 0x13e   :  { %7428 = vmatpush2.bf16.msra.mxu0 %v17888_v49  ;;  %v933_v49 = vld [vmem:[#allocation5 + $0x19f0] sm:$0xff] }
 0x13f   :  { %7471 = vmatpush2.bf16.msra.mxu1 %v18272_v51  ;;  %7429 = vmatprep.subr.bf16.mxu0 %v17865_v52  ;;  %v154_v51 = vld [vmem:[#allocation5 + $0x198] sm:$0xff]  ;;  %v17747_v52 = vcombine.high %v178_v41, %v190_v44  ;;  %v18488_v1 = vcombine.low %v921_v48, %v933_v49  ;;  %v1161_v44 = vld [vmem:[#allocation5 + $0x2110] sm:$0xff] }
 0x140   :  { %7472 = vmatprep.subr.bf16.mxu1 %v18249_v56  ;;  %v18489_v56 = vcombine.high %v921_v48, %v933_v49  ;;  %v17722_v2 = vcombine.low %v154_v51, %v166_v53  ;;  %v406_v48 = vld [vmem:[#allocation5 + $0x978] sm:$0xff] }
 0x142   :  { %7430 = vmatpush2.bf16.msra.mxu0 %v17864_v60  ;;  %v130_v60 = vld [vmem:[#allocation5 + $0xd8] sm:$0xff] }
 0x143   :  { %7473 = vmatpush2.bf16.msra.mxu1 %v18248_v62  ;;  %7485 = vmatprep.subr.bf16.mxu0 %v18609_v0  ;;  %v17723_v62 = vcombine.high %v154_v51, %v166_v53  ;;  %v142_v0 = vld [vmem:[#allocation5 + $0x138] sm:$0xff]  ;;  %v1137_v53 = vld [vmem:[#allocation5 + $0x2050] sm:$0xff] }
 0x144   :  { %7528 = vmatprep.subr.bf16.mxu1 %v17843_v4  ;;  %v873_v4 = vld [vmem:[#allocation5 + $0x1810] sm:$0xff]  ;;  %v17698_v10 = vcombine.low %v130_v60, %v142_v0 }
 0x145   :  { %v7175_v15 = vpop.f32.mrf.mxu0  ;;  %7432 = vmatmul.mubr.bf16.vlgmr.msra.gmra.mxu0 %v22011_v21  ;;  %v18441_v11 = vcombine.high %v873_v4, %v885_v5 }
 0x146   :  { %v7176_v16 = vadd.f32 %v7175_v15, %v1264_v6  ;;  %v7218_v17 = vpop.f32.mrf.mxu1  ;;  %7475 = vmatmul.mubr.bf16.vlgmr.msra.gmra.mxu1 %v22013_v25  ;;  %7486 = vmatpush1.bf16.msra.mxu0 %v18608_v7  ;;  %v17699_v7 = vcombine.high %v130_v60, %v142_v0  ;;  %v1113_v0 = vld [vmem:[#allocation5 + $0x1f90] sm:$0xff] }
 0x147   :  { %7529 = vmatpush1.bf16.msra.mxu1 %v17842_v8  ;;  %v22039_v19 = vpop.f32.mrf.mxu0  ;;  %7487 = vmatprep.subr.bf16.mxu0 %v18585_v9  ;;  %v118_v8 = vld [vmem:[#allocation5 + $0x78] sm:$0xff]  ;;  %v18464_v9 = vcombine.low %v897_v57, %v909_v59 }
 0x148   :  { %v22041_v27 = vadd.f32 %v7218_v17, %v7176_v16  ;;  %v22043_v28 = vpop.f32.mrf.mxu1  ;;  %7530 = vmatprep.subr.bf16.mxu1 %v17819_v13  ;;  %7517 = vmatprep.mubr.bf16.mxu0 %v22015_v32  ;;  %v1245_v13 = vld [vmem:[#allocation5 + $0x23b0] sm:$0xff]  ;;  %v478_v16 = vld [vmem:[#allocation5 + $0xbb8] sm:$0xff]  ;;  %v18440_v17 = vcombine.low %v873_v4, %v885_v5 }
 0x149   :  { %v7179_v31 = vpop.f32.mrf.mxu0  ;;  %7560 = vmatprep.mubr.bf16.mxu1 %v22005_v58  ;;  %v18035_v26 = vcombine.high %v466_v14, %v478_v16  ;;  %v18800_v30 = vcombine.low %v1233_v12, %v1245_v13  ;;  %v382_v57 = vld [vmem:[#allocation5 + $0x8b8] sm:$0xff] }
 0x14a   :  { %v7180_v33 = vadd.f32 %v7179_v31, %v1264_v6  ;;  %7488 = vmatpush1.bf16.msra.mxu0 %v18584_v18  ;;  %v7222_v35 = vpop.f32.mrf.mxu1  ;;  %v106_v6 = vld [vmem:[#allocation5 + $0x18] sm:$0xff]  ;;  %v18034_v31 = vcombine.low %v466_v14, %v478_v16  ;;  %v1065_v16 = vld [vmem:[#allocation5 + $0x1e10] sm:$0xff] }
 0x14b   :  { %7531 = vmatpush1.bf16.msra.mxu1 %v17818_v20  ;;  %7489 = vmatprep.subr.bf16.mxu0 %v18561_v22  ;;  %v17675_v15 = vcombine.high %v106_v6, %v118_v8  ;;  %v17674_v18 = vcombine.low %v106_v6, %v118_v8  ;;  %v18801_v20 = vcombine.high %v1233_v12, %v1245_v13  ;;  %v1209_v22 = vld [vmem:[#allocation5 + $0x2290] sm:$0xff]  ;;  %v358_v4 = vld [vmem:[#allocation5 + $0x7f8] sm:$0xff] }
 0x14c   :  { %v22047_v42 = vadd.f32 %v7222_v35, %v7180_v33  ;;  %7532 = vmatprep.subr.bf16.mxu1 %v17795_v29  ;;  %v454_v29 = vld [vmem:[#allocation5 + $0xaf8] sm:$0xff]  ;;  %v18777_v33 = vcombine.high %v1209_v22, %v1221_v23  ;;  %v1197_v35 = vld [vmem:[#allocation5 + $0x2230] sm:$0xff]  ;;  %v18776_v40 = vcombine.low %v1209_v22, %v1221_v23 }
 0x14d   :  { %v18010_v41 = vcombine.low %v442_v24, %v454_v29  ;;  %v1089_v8 = vld [vmem:[#allocation5 + $0x1ed0] sm:$0xff]  ;;  %v334_v12 = vld [vmem:[#allocation5 + $0x738] sm:$0xff] }
 0x14e   :  { %7490 = vmatpush1.bf16.msra.mxu0 %v18560_v34  ;;  %v1185_v34 = vld [vmem:[#allocation5 + $0x21d0] sm:$0xff]  ;;  %v310_v22 = vld [vmem:[#allocation5 + $0x678] sm:$0xff] }
 0x14f   :  { %7533 = vmatpush1.bf16.msra.mxu1 %v17794_v36  ;;  %7491 = vmatprep.subr.bf16.mxu0 %v18537_v37  ;;  %v418_v36 = vld [vmem:[#allocation5 + $0x9d8] sm:$0xff]  ;;  %v18011_v37 = vcombine.high %v442_v24, %v454_v29  ;;  %v18752_v49 = vcombine.low %v1185_v34, %v1197_v35 }
 0x150   :  { %7534 = vmatprep.subr.bf16.mxu1 %v17771_v43  ;;  %v18753_v43 = vcombine.high %v1185_v34, %v1197_v35  ;;  %v17986_v51 = vcombine.low %v418_v36, %v430_v38  ;;  %v658_v29 = vld [vmem:[#allocation5 + $0x1158] sm:$0xff] }
 0x151   :  { %v1054_v34 = vld [vmem:[#allocation5 + $0x1db8] sm:$0xff] }
 0x152   :  { %7492 = vmatpush1.bf16.msra.mxu0 %v18536_v45  ;;  %v1173_v45 = vld [vmem:[#allocation5 + $0x2170] sm:$0xff] }
 0x153   :  { %7535 = vmatpush1.bf16.msra.mxu1 %v17770_v46  ;;  %7493 = vmatprep.subr.bf16.mxu0 %v18513_v47  ;;  %v394_v46 = vld [vmem:[#allocation5 + $0x918] sm:$0xff]  ;;  %v17987_v47 = vcombine.high %v418_v36, %v430_v38  ;;  %v18728_v59 = vcombine.low %v1161_v44, %v1173_v45 }
 0x154   :  { %7536 = vmatprep.subr.bf16.mxu1 %v17747_v52  ;;  %v18729_v52 = vcombine.high %v1161_v44, %v1173_v45  ;;  %v17962_v60 = vcombine.low %v394_v46, %v406_v48  ;;  %v634_v38 = vld [vmem:[#allocation5 + $0x1098] sm:$0xff] }
 0x155   :  { %v1030_v44 = vld [vmem:[#allocation5 + $0x1cf8] sm:$0xff] }
 0x156   :  { %7494 = vmatpush1.bf16.msra.mxu0 %v18512_v54  ;;  %v1149_v54 = vld [vmem:[#allocation5 + $0x20b0] sm:$0xff] }
 0x157   :  { %7537 = vmatpush1.bf16.msra.mxu1 %v17746_v55  ;;  %7495 = vmatprep.subr.bf16.mxu0 %v18489_v56  ;;  %v370_v55 = vld [vmem:[#allocation5 + $0x858] sm:$0xff]  ;;  %v17963_v56 = vcombine.high %v394_v46, %v406_v48  ;;  %v18704_v5 = vcombine.low %v1137_v53, %v1149_v54  ;;  %v22049_v46 = vpop.f32.mrf.mxu0 }
 0x158   :  { %7538 = vmatprep.subr.bf16.mxu1 %v17723_v62  ;;  %v18705_v62 = vcombine.high %v1137_v53, %v1149_v54  ;;  %v17938_v6 = vcombine.low %v370_v55, %v382_v57  ;;  %v1006_v54 = vld [vmem:[#allocation5 + $0x1c38] sm:$0xff] }
 0x15a   :  { %7496 = vmatpush1.bf16.msra.mxu0 %v18488_v1  ;;  %v1125_v1 = vld [vmem:[#allocation5 + $0x1ff0] sm:$0xff] }
 0x15b   :  { %7539 = vmatpush1.bf16.msra.mxu1 %v17722_v2  ;;  %7497 = vmatprep.subr.bf16.mxu0 %v18465_v3  ;;  %v346_v2 = vld [vmem:[#allocation5 + $0x798] sm:$0xff]  ;;  %v17939_v3 = vcombine.high %v370_v55, %v382_v57  ;;  %v18680_v13 = vcombine.low %v1113_v0, %v1125_v1 }
 0x15c   :  { %7540 = vmatprep.subr.bf16.mxu1 %v17699_v7  ;;  %v18681_v7 = vcombine.high %v1113_v0, %v1125_v1  ;;  %v17914_v14 = vcombine.low %v346_v2, %v358_v4  ;;  %v586_v0 = vld [vmem:[#allocation5 + $0xf18] sm:$0xff] }
 0x15d   :  { %v598_v1 = vld [vmem:[#allocation5 + $0xf78] sm:$0xff] }
 0x15e   :  { %7498 = vmatpush1.bf16.msra.mxu0 %v18464_v9  ;;  %v1101_v9 = vld [vmem:[#allocation5 + $0x1f30] sm:$0xff] }
 0x15f   :  { %7541 = vmatpush1.bf16.msra.mxu1 %v17698_v10  ;;  %7499 = vmatprep.subr.bf16.mxu0 %v18441_v11  ;;  %v322_v10 = vld [vmem:[#allocation5 + $0x6d8] sm:$0xff]  ;;  %v17915_v11 = vcombine.high %v346_v2, %v358_v4  ;;  %v18656_v23 = vcombine.low %v1089_v8, %v1101_v9 }
 0x160   :  { %7542 = vmatprep.subr.bf16.mxu1 %v17675_v15  ;;  %v18657_v15 = vcombine.high %v1089_v8, %v1101_v9  ;;  %v17890_v24 = vcombine.low %v322_v10, %v334_v12  ;;  %v970_v2 = vld [vmem:[#allocation5 + $0x1b18] sm:$0xff] }
 0x162   :  { %7500 = vmatpush1.bf16.msra.mxu0 %v18440_v17  ;;  %v1077_v17 = vld [vmem:[#allocation5 + $0x1e70] sm:$0xff] }
 0x163   :  { %7543 = vmatpush1.bf16.msra.mxu1 %v17674_v18  ;;  %7501 = vmatprep.subr.bf16.mxu0 %v18801_v20  ;;  %v298_v18 = vld [vmem:[#allocation5 + $0x618] sm:$0xff]  ;;  %v17891_v20 = vcombine.high %v322_v10, %v334_v12  ;;  %v18632_v35 = vcombine.low %v1065_v16, %v1077_v17  ;;  %v18155_v10 = vcombine.high %v586_v0, %v598_v1 }
 0x164   :  { %7544 = vmatprep.subr.bf16.mxu1 %v18035_v26  ;;  %v18633_v26 = vcombine.high %v1065_v16, %v1077_v17  ;;  %v17866_v36 = vcombine.low %v298_v18, %v310_v22  ;;  %v574_v12 = vld [vmem:[#allocation5 + $0xeb8] sm:$0xff] }
 0x165   :  { %v958_v17 = vld [vmem:[#allocation5 + $0x1ab8] sm:$0xff] }
 0x166   :  { %7502 = vmatpush2.bf16.msra.mxu0 %v18800_v30  ;;  %v670_v30 = vld [vmem:[#allocation5 + $0x11b8] sm:$0xff] }
 0x167   :  { %7545 = vmatpush2.bf16.msra.mxu1 %v18034_v31  ;;  %7503 = vmatprep.subr.bf16.mxu0 %v18777_v33  ;;  %v1042_v31 = vld [vmem:[#allocation5 + $0x1d58] sm:$0xff]  ;;  %v17867_v33 = vcombine.high %v298_v18, %v310_v22  ;;  %v18226_v45 = vcombine.low %v658_v29, %v670_v30 }
 0x168   :  { %7546 = vmatprep.subr.bf16.mxu1 %v18011_v37  ;;  %v18227_v37 = vcombine.high %v658_v29, %v670_v30  ;;  %v922_v29 = vld [vmem:[#allocation5 + $0x1998] sm:$0xff] }
 0x16a   :  { %7504 = vmatpush2.bf16.msra.mxu0 %v18776_v40  ;;  %v646_v40 = vld [vmem:[#allocation5 + $0x10f8] sm:$0xff] }
 0x16b   :  { %7547 = vmatpush2.bf16.msra.mxu1 %v18010_v41  ;;  %7505 = vmatprep.subr.bf16.mxu0 %v18753_v43  ;;  %v1018_v41 = vld [vmem:[#allocation5 + $0x1c98] sm:$0xff]  ;;  %v18611_v43 = vcombine.high %v1042_v31, %v1054_v34  ;;  %v18203_v48 = vcombine.high %v634_v38, %v646_v40  ;;  %v18202_v57 = vcombine.low %v634_v38, %v646_v40 }
 0x16c   :  { %7548 = vmatprep.subr.bf16.mxu1 %v17987_v47  ;;  %v18610_v47 = vcombine.low %v1042_v31, %v1054_v34  ;;  %v18587_v53 = vcombine.high %v1018_v41, %v1030_v44  ;;  %v934_v34 = vld [vmem:[#allocation5 + $0x19f8] sm:$0xff] }
 0x16d   :  { %v514_v40 = vld [vmem:[#allocation5 + $0xcd8] sm:$0xff] }
 0x16e   :  { %7506 = vmatpush2.bf16.msra.mxu0 %v18752_v49  ;;  %v610_v49 = vld [vmem:[#allocation5 + $0xfd8] sm:$0xff] }
 0x16f   :  { %7549 = vmatpush2.bf16.msra.mxu1 %v17986_v51  ;;  %7507 = vmatprep.subr.bf16.mxu0 %v18729_v52  ;;  %v622_v51 = vld [vmem:[#allocation5 + $0x1038] sm:$0xff] }
 0x170   :  { %7550 = vmatprep.subr.bf16.mxu1 %v17963_v56  ;;  %v994_v52 = vld [vmem:[#allocation5 + $0x1bd8] sm:$0xff]  ;;  %v18178_v8 = vcombine.low %v610_v49, %v622_v51 }
 0x171   :  { %v18563_v4 = vcombine.high %v994_v52, %v1006_v54  ;;  %v18562_v9 = vcombine.low %v994_v52, %v1006_v54  ;;  %v490_v52 = vld [vmem:[#allocation5 + $0xc18] sm:$0xff] }
 0x172   :  { %7508 = vmatpush2.bf16.msra.mxu0 %v18728_v59  ;;  %v874_v54 = vld [vmem:[#allocation5 + $0x1818] sm:$0xff] }
 0x173   :  { %7551 = vmatpush2.bf16.msra.mxu1 %v17962_v60  ;;  %7509 = vmatprep.subr.bf16.mxu0 %v18705_v62  ;;  %v18586_v60 = vcombine.low %v1018_v41, %v1030_v44  ;;  %v18179_v62 = vcombine.high %v610_v49, %v622_v51  ;;  %v526_v41 = vld [vmem:[#allocation5 + $0xd38] sm:$0xff]  ;;  %v18490_v49 = vcombine.low %v922_v29, %v934_v34 }
 0x174   :  { %7552 = vmatprep.subr.bf16.mxu1 %v17939_v3  ;;  %v18083_v51 = vcombine.high %v514_v40, %v526_v41 }
 0x176   :  { %7510 = vmatpush2.bf16.msra.mxu0 %v18704_v5  ;;  %v982_v5 = vld [vmem:[#allocation5 + $0x1b78] sm:$0xff] }
 0x177   :  { %7553 = vmatpush2.bf16.msra.mxu1 %v17938_v6  ;;  %7511 = vmatprep.subr.bf16.mxu0 %v18681_v7  ;;  %v18539_v16 = vcombine.high %v970_v2, %v982_v5  ;;  %v18538_v22 = vcombine.low %v970_v2, %v982_v5  ;;  %v862_v2 = vld [vmem:[#allocation5 + $0x17b8] sm:$0xff] }
 0x178   :  { %7554 = vmatprep.subr.bf16.mxu1 %v17915_v11  ;;  %v562_v11 = vld [vmem:[#allocation5 + $0xe58] sm:$0xff] }
 0x179   :  { %v1246_v5 = vld [vmem:[#allocation5 + $0x23b8] sm:$0xff] }
 0x17a   :  { %7512 = vmatpush2.bf16.msra.mxu0 %v18680_v13  ;;  %v946_v13 = vld [vmem:[#allocation5 + $0x1a58] sm:$0xff] }
 0x17b   :  { %7555 = vmatpush2.bf16.msra.mxu1 %v17914_v14  ;;  %7513 = vmatprep.subr.bf16.mxu0 %v18657_v15 }
 0x17c   :  { %7556 = vmatprep.subr.bf16.mxu1 %v17891_v20  ;;  %v18154_v20 = vcombine.low %v586_v0, %v598_v1  ;;  %v850_v1 = vld [vmem:[#allocation5 + $0x1758] sm:$0xff] }
 0x17e   :  { %7514 = vmatpush2.bf16.msra.mxu0 %v18656_v23  ;;  %v18131_v23 = vcombine.high %v562_v11, %v574_v12 }
 0x17f   :  { %7557 = vmatpush2.bf16.msra.mxu1 %v17890_v24  ;;  %7515 = vmatprep.subr.bf16.mxu0 %v18633_v26  ;;  %v538_v24 = vld [vmem:[#allocation5 + $0xd98] sm:$0xff] }
 0x180   :  { %7558 = vmatprep.subr.bf16.mxu1 %v17867_v33  ;;  %v550_v26 = vld [vmem:[#allocation5 + $0xdf8] sm:$0xff]  ;;  %v18515_v33 = vcombine.high %v946_v13, %v958_v17 }
 0x181   :  { %v18107_v38 = vcombine.high %v538_v24, %v550_v26 }
 0x182   :  { %7516 = vmatpush2.bf16.msra.mxu0 %v18632_v35 }
 0x183   :  { %7559 = vmatpush2.bf16.msra.mxu1 %v17866_v36  ;;  %7571 = vmatprep.subr.bf16.mxu0 %v18227_v37  ;;  %v18130_v36 = vcombine.low %v562_v11, %v574_v12  ;;  %v18514_v37 = vcombine.low %v946_v13, %v958_v17  ;;  %v838_v11 = vld [vmem:[#allocation5 + $0x16f8] sm:$0xff] }
 0x184   :  { %7614 = vmatprep.subr.bf16.mxu1 %v18611_v43  ;;  %v898_v43 = vld [vmem:[#allocation5 + $0x18d8] sm:$0xff] }
 0x185   :  { %v7261_v55 = vpop.f32.mrf.mxu0  ;;  %7518 = vmatmul.mubr.bf16.vlgmr.msra.gmra.mxu0 %v22021_v39  ;;  %v1210_v12 = vld [vmem:[#allocation5 + $0x2298] sm:$0xff] }
 0x186   :  { %v22053_v56 = vadd.f32 %v7261_v55, %v22041_v27  ;;  %7561 = vmatmul.mubr.bf16.vlgmr.msra.gmra.mxu1 %v22011_v21  ;;  %7572 = vmatpush1.bf16.msra.mxu0 %v18226_v45  ;;  %v18491_v45 = vcombine.high %v922_v29, %v934_v34 }
 0x187   :  { %7615 = vmatpush1.bf16.msra.mxu1 %v18610_v47  ;;  %v22056_v59 = vpop.f32.mrf.mxu0  ;;  %7573 = vmatprep.subr.bf16.mxu0 %v18203_v48  ;;  %v910_v47 = vld [vmem:[#allocation5 + $0x1938] sm:$0xff]  ;;  %v18106_v48 = vcombine.low %v538_v24, %v550_v26 }
 0x188   :  { %v8737_v3 = vmul.f32 0.044715, %v22053_v56  ;;  %7616 = vmatprep.subr.bf16.mxu1 %v18587_v53  ;;  %7603 = vmatprep.mubr.bf16.mxu0 %v22007_v63  ;;  %v502_v53 = vld [vmem:[#allocation5 + $0xc78] sm:$0xff]  ;;  %v18467_v55 = vcombine.high %v898_v43, %v910_v47  ;;  %v8689_v29 = vmul.f32 0.5, %v22053_v56 }
 0x189   :  { %v7265_v27 = vpop.f32.mrf.mxu0  ;;  %7646 = vmatprep.mubr.bf16.mxu1 %v22015_v32  ;;  %v18059_v0 = vcombine.high %v490_v52, %v502_v53  ;;  %v1198_v26 = vld [vmem:[#allocation5 + $0x2238] sm:$0xff] }
 0x18a   :  { %v8785_v6 = vmul.f32 %v8737_v3, %v22053_v56  ;;  %v22063_v7 = vadd.f32 %v7265_v27, %v22047_v42  ;;  %7574 = vmatpush1.bf16.msra.mxu0 %v18202_v57  ;;  %v886_v57 = vld [vmem:[#allocation5 + $0x1878] sm:$0xff]  ;;  %v18058_v27 = vcombine.low %v490_v52, %v502_v53 }
 0x18b   :  { %7617 = vmatpush1.bf16.msra.mxu1 %v18586_v60  ;;  %7575 = vmatprep.subr.bf16.mxu0 %v18179_v62  ;;  %v18082_v60 = vcombine.low %v514_v40, %v526_v41  ;;  %v18466_v62 = vcombine.low %v898_v43, %v910_v47  ;;  %v1234_v3 = vld [vmem:[#allocation5 + $0x2358] sm:$0xff] }
 0x18c   :  { %v8833_v14 = vmul.f32 %v8785_v6, %v22053_v56  ;;  %v8761_v15 = vmul.f32 0.044715, %v22063_v7  ;;  %7618 = vmatprep.subr.bf16.mxu1 %v18563_v4  ;;  %v18443_v4 = vcombine.high %v874_v54, %v886_v57  ;;  %v18803_v13 = vcombine.high %v1234_v3, %v1246_v5  ;;  %v790_v40 = vld [vmem:[#allocation5 + $0x1578] sm:$0xff] }
 0x18d   :  { %v1162_v41 = vld [vmem:[#allocation5 + $0x2118] sm:$0xff] }
 0x18e   :  { %v8881_v18 = vadd.f32 %v8833_v14, %v22053_v56  ;;  %v8809_v42 = vmul.f32 %v8761_v15, %v22063_v7  ;;  %7576 = vmatpush1.bf16.msra.mxu0 %v18178_v8  ;;  %v18442_v8 = vcombine.low %v874_v54, %v886_v57  ;;  %v1222_v14 = vld [vmem:[#allocation5 + $0x22f8] sm:$0xff]  ;;  %v18418_v15 = vcombine.low %v850_v1, %v862_v2 }
 0x18f   :  { %7619 = vmatpush1.bf16.msra.mxu1 %v18562_v9  ;;  %7577 = vmatprep.subr.bf16.mxu0 %v18155_v10  ;;  %v18419_v9 = vcombine.high %v850_v1, %v862_v2  ;;  %v826_v10 = vld [vmem:[#allocation5 + $0x1698] sm:$0xff]  ;;  %v18779_v24 = vcombine.high %v1210_v12, %v1222_v14 }
 0x190   :  { %v8929_v30 = vmul.f32 0.7978846, %v8881_v18  ;;  %v8857_v31 = vmul.f32 %v8809_v42, %v22063_v7  ;;  %7620 = vmatprep.subr.bf16.mxu1 %v18539_v16  ;;  %v18802_v18 = vcombine.low %v1234_v3, %v1246_v5  ;;  %v18395_v42 = vcombine.high %v826_v10, %v838_v11  ;;  %v1150_v53 = vld [vmem:[#allocation5 + $0x20b8] sm:$0xff] }
 0x191   :  { %v1126_v2 = vld [vmem:[#allocation5 + $0x1ff8] sm:$0xff] }
 0x192   :  { %21712 = vtanh.f32 %v8929_v30  ;;  %v8905_v35 = vadd.f32 %v8857_v31, %v22063_v7  ;;  %7578 = vmatpush1.bf16.msra.mxu0 %v18154_v20  ;;  %v802_v20 = vld [vmem:[#allocation5 + $0x15d8] sm:$0xff]  ;;  %v8713_v30 = vmul.f32 0.5, %v22063_v7 }
 0x193   :  { %7621 = vmatpush1.bf16.msra.mxu1 %v18538_v22  ;;  %7579 = vmatprep.subr.bf16.mxu0 %v18131_v23  ;;  %v814_v22 = vld [vmem:[#allocation5 + $0x1638] sm:$0xff] }
 0x194   :  { %v8953_v44 = vmul.f32 0.7978846, %v8905_v35  ;;  %7622 = vmatprep.subr.bf16.mxu1 %v18515_v33  ;;  %v1186_v23 = vld [vmem:[#allocation5 + $0x21d8] sm:$0xff]  ;;  %v18394_v33 = vcombine.low %v826_v10, %v838_v11  ;;  %v18370_v56 = vcombine.low %v802_v20, %v814_v22  ;;  %v22075_v11 = vpop.f32.mrf.mxu1 }
 0x195   :  { %v18755_v43 = vcombine.high %v1186_v23, %v1198_v26  ;;  %v18754_v7 = vcombine.low %v1186_v23, %v1198_v26  ;;  %v1102_v10 = vld [vmem:[#allocation5 + $0x1f38] sm:$0xff]  ;;  %v275_v26 = vld [vmem:[#allocation5 + $0x560] sm:$0xff] }
 0x196   :  { %21714 = vtanh.f32 %v8953_v44  ;;  %7580 = vmatpush1.bf16.msra.mxu0 %v18130_v36  ;;  %v18778_v36 = vcombine.low %v1210_v12, %v1222_v14  ;;  %v1174_v44 = vld [vmem:[#allocation5 + $0x2178] sm:$0xff] }
 0x197   :  { %7623 = vmatpush1.bf16.msra.mxu1 %v18514_v37  ;;  %7581 = vmatprep.subr.bf16.mxu0 %v18107_v38  ;;  %v18371_v37 = vcombine.high %v802_v20, %v814_v22  ;;  %v778_v38 = vld [vmem:[#allocation5 + $0x1518] sm:$0xff]  ;;  %v18731_v52 = vcombine.high %v1162_v41, %v1174_v44 }
 0x198   :  { %7624 = vmatprep.subr.bf16.mxu1 %v18491_v45  ;;  %v18347_v47 = vcombine.high %v778_v38, %v790_v40  ;;  %v18346_v54 = vcombine.low %v778_v38, %v790_v40  ;;  %v1078_v20 = vld [vmem:[#allocation5 + $0x1e78] sm:$0xff]  ;;  %v251_v40 = vld [vmem:[#allocation5 + $0x4a0] sm:$0xff] }
 0x19a   :  { %7582 = vmatpush1.bf16.msra.mxu0 %v18106_v48  ;;  %v754_v48 = vld [vmem:[#allocation5 + $0x1458] sm:$0xff] }
 0x19b   :  { %7625 = vmatpush1.bf16.msra.mxu1 %v18490_v49  ;;  %7583 = vmatprep.subr.bf16.mxu0 %v18083_v51  ;;  %v766_v49 = vld [vmem:[#allocation5 + $0x14b8] sm:$0xff] }
 0x19c   :  { %7626 = vmatprep.subr.bf16.mxu1 %v18467_v55  ;;  %v1138_v51 = vld [vmem:[#allocation5 + $0x2058] sm:$0xff]  ;;  %v18730_v55 = vcombine.low %v1162_v41, %v1174_v44  ;;  %v18323_v57 = vcombine.high %v754_v48, %v766_v49  ;;  %v18322_v3 = vcombine.low %v754_v48, %v766_v49  ;;  %v263_v41 = vld [vmem:[#allocation5 + $0x500] sm:$0xff] }
 0x19d   :  { %v18707_v1 = vcombine.high %v1138_v51, %v1150_v53  ;;  %v22082_v44 = vld [vmem:[#allocation7] sm:$0xff] }
 0x19e   :  { %7584 = vmatpush1.bf16.msra.mxu0 %v18082_v60  ;;  %v730_v60 = vld [vmem:[#allocation5 + $0x1398] sm:$0xff]  ;;  %v647_v48 = vld [vmem:[#allocation5 + $0x1100] sm:$0xff] }
 0x19f   :  { %v21713_v6 = vpop.eup %21712  ;;  %7627 = vmatpush1.bf16.msra.mxu1 %v18466_v62  ;;  %7585 = vmatprep.subr.bf16.mxu0 %v18059_v0  ;;  %v742_v62 = vld [vmem:[#allocation5 + $0x13f8] sm:$0xff] }
 0x1a0   :  { %7628 = vmatprep.subr.bf16.mxu1 %v18443_v4  ;;  %v9025_v16 = vadd.f32 1.0, %v21713_v6  ;;  %v1114_v0 = vld [vmem:[#allocation5 + $0x1f98] sm:$0xff]  ;;  %v18706_v4 = vcombine.low %v1138_v51, %v1150_v53  ;;  %v18299_v5 = vcombine.high %v730_v60, %v742_v62  ;;  %v18298_v12 = vcombine.low %v730_v60, %v742_v62  ;;  %v22086_v51 = vpop.f32.mrf.mxu0 }
 0x1a1   :  { %v718_v6 = vld [vmem:[#allocation5 + $0x1338] sm:$0xff]  ;;  %v17821_v53 = vcombine.high %v251_v40, %v263_v41 }
 0x1a2   :  { %7586 = vmatpush1.bf16.msra.mxu0 %v18058_v27  ;;  %v9073_v34 = vmul.f32 %v9025_v16, %v8689_v29  ;;  %v706_v27 = vld [vmem:[#allocation5 + $0x12d8] sm:$0xff]  ;;  %v287_v29 = vld [vmem:[#allocation5 + $0x5c0] sm:$0xff] }
 0x1a3   :  { %v21715_v17 = vpop.eup %21714  ;;  %7629 = vmatpush1.bf16.msra.mxu1 %v18442_v8  ;;  %7587 = vmatprep.subr.bf16.mxu0 %v18419_v9  ;;  %v1090_v8 = vld [vmem:[#allocation5 + $0x1ed8] sm:$0xff]  ;;  %v18683_v9 = vcombine.high %v1114_v0, %v1126_v2  ;;  %v18275_v14 = vcombine.high %v706_v27, %v718_v6  ;;  %v18274_v22 = vcombine.low %v706_v27, %v718_v6 }
 0x1a4   :  { %7630 = vmatprep.subr.bf16.mxu1 %v18803_v13  ;;  %v9049_v31 = vadd.f32 1.0, %v21715_v17  ;;  %v18682_v13 = vcombine.low %v1114_v0, %v1126_v2  ;;  %v694_v16 = vld [vmem:[#allocation5 + $0x1278] sm:$0xff]  ;;  %v18658_v23 = vcombine.low %v1090_v8, %v1102_v10  ;;  %v17845_v38 = vcombine.high %v275_v26, %v287_v29 }
 0x1a5   :  { %v1066_v17 = vld [vmem:[#allocation5 + $0x1e18] sm:$0xff]  ;;  %v17844_v49 = vcombine.low %v275_v26, %v287_v29  ;;  %v179_v29 = vld [vmem:[#allocation5 + $0x260] sm:$0xff] }
 0x1a6   :  { %7588 = vmatpush2.bf16.msra.mxu0 %v18418_v15  ;;  %v9097_v35 = vmul.f32 %v9049_v31, %v8713_v30  ;;  %v682_v15 = vld [vmem:[#allocation5 + $0x1218] sm:$0xff]  ;;  %v659_v30 = vld [vmem:[#allocation5 + $0x1160] sm:$0xff]  ;;  %v22078_v31 = vsub.s32 2, %v22031_v50 }
 0x1a7   :  { %7631 = vmatpush2.bf16.msra.mxu1 %v18802_v18  ;;  %7589 = vmatprep.subr.bf16.mxu0 %v18395_v42  ;;  %v7304_v18 = vpop.f32.mrf.mxu1  ;;  %v18659_v42 = vcombine.high %v1090_v8, %v1102_v10  ;;  %v215_v10 = vld [vmem:[#allocation5 + $0x380] sm:$0xff] }
 0x1a8   :  { %7632 = vmatprep.subr.bf16.mxu1 %v18779_v24  ;;  %v22073_v45 = vpack.c.bf16 %v9097_v35, %v9073_v34  ;;  %v18251_v24 = vcombine.high %v682_v15, %v694_v16  ;;  %23074 = vst [vmem:[#allocation18_spill] sm:$0xff] %v22078_v31  ;;  %v18635_v34 = vcombine.high %v1066_v17, %v1078_v20  ;;  %v671_v35 = vld [vmem:[#allocation5 + $0x11c0] sm:$0xff] }
 0x1aa   :  { %23073 = vst [vmem:[#allocation17_spill] sm:$0xff] %v22073_v45  ;;  %7590 = vmatpush2.bf16.msra.mxu0 %v18394_v33  ;;  %v22080_v33 = vpop.f32.mrf.mxu1  ;;  %v962_v45 = vld [vmem:[#allocation5 + $0x1ad8] sm:$0xff] }
 0x1ab   :  { %7633 = vmatpush2.bf16.msra.mxu1 %v18778_v36  ;;  %7591 = vmatprep.subr.bf16.mxu0 %v18371_v37  ;;  %v18250_v36 = vcombine.low %v682_v15, %v694_v16  ;;  %v18634_v37 = vcombine.low %v1066_v17, %v1078_v20  ;;  %v599_v17 = vld [vmem:[#allocation5 + $0xf80] sm:$0xff] }
 0x1ac   :  { %7634 = vmatprep.subr.bf16.mxu1 %v18755_v43  ;;  %v635_v43 = vld [vmem:[#allocation5 + $0x10a0] sm:$0xff] }
 0x1ad   :  { %v18205_v0 = vcombine.high %v635_v43, %v647_v48  ;;  %v18204_v6 = vcombine.low %v635_v43, %v647_v48  ;;  %v167_v48 = vld [vmem:[#allocation5 + $0x200] sm:$0xff] }
 0x1ae   :  { %7592 = vmatpush2.bf16.msra.mxu0 %v18370_v56  ;;  %v1272_v56 = vrot.slane %v22082_v44, %v22078_v31 }
 0x1af   :  { %7635 = vmatpush2.bf16.msra.mxu1 %v18754_v7  ;;  %7593 = vmatprep.subr.bf16.mxu0 %v18347_v47  ;;  %v7308_v7 = vpop.f32.mrf.mxu1  ;;  %v18229_v47 = vcombine.high %v659_v30, %v671_v35 }
 0x1b0   :  { %7636 = vmatprep.subr.bf16.mxu1 %v18731_v52  ;;  %v18228_v52 = vcombine.low %v659_v30, %v671_v35  ;;  %v7305_v60 = vadd.f32 %v7304_v18, %v1272_v56  ;;  %v191_v30 = vld [vmem:[#allocation5 + $0x2c0] sm:$0xff] }
 0x1b1   :  { %v22088_v62 = vpop.f32.mrf.mxu1 }
 0x1b2   :  { %7594 = vmatpush2.bf16.msra.mxu0 %v18346_v54  ;;  %v227_v54 = vld [vmem:[#allocation5 + $0x3e0] sm:$0xff] }
 0x1b3   :  { %7637 = vmatpush2.bf16.msra.mxu1 %v18730_v55  ;;  %7595 = vmatprep.subr.bf16.mxu0 %v18323_v57  ;;  %v239_v55 = vld [vmem:[#allocation5 + $0x440] sm:$0xff] }
 0x1b4   :  { %7638 = vmatprep.subr.bf16.mxu1 %v18707_v1  ;;  %v611_v57 = vld [vmem:[#allocation5 + $0xfe0] sm:$0xff]  ;;  %v17797_v8 = vcombine.high %v227_v54, %v239_v55 }
 0x1b5   :  { %v623_v1 = vld [vmem:[#allocation5 + $0x1040] sm:$0xff] }
 0x1b6   :  { %7596 = vmatpush2.bf16.msra.mxu0 %v18322_v3  ;;  %v18181_v16 = vcombine.high %v611_v57, %v623_v1 }
 0x1b7   :  { %7639 = vmatpush2.bf16.msra.mxu1 %v18706_v4  ;;  %7597 = vmatprep.subr.bf16.mxu0 %v18299_v5  ;;  %v17820_v5 = vcombine.low %v251_v40, %v263_v41 }
 0x1b8   :  { %7640 = vmatprep.subr.bf16.mxu1 %v18683_v9  ;;  %v203_v9 = vld [vmem:[#allocation5 + $0x320] sm:$0xff] }
 0x1b9   :  { %v17773_v26 = vcombine.high %v203_v9, %v215_v10  ;;  %v17772_v43 = vcombine.low %v203_v9, %v215_v10  ;;  %v527_v9 = vld [vmem:[#allocation5 + $0xd40] sm:$0xff] }
 0x1ba   :  { %7598 = vmatpush2.bf16.msra.mxu0 %v18298_v12  ;;  %v587_v12 = vld [vmem:[#allocation5 + $0xf20] sm:$0xff] }
 0x1bb   :  { %7641 = vmatpush2.bf16.msra.mxu1 %v18682_v13  ;;  %7599 = vmatprep.subr.bf16.mxu0 %v18275_v14  ;;  %v7309_v13 = vadd.f32 %v7308_v7, %v1272_v56  ;;  %v18156_v56 = vcombine.low %v587_v12, %v599_v17  ;;  %v17749_v7 = vcombine.high %v179_v29, %v191_v30 }
 0x1bc   :  { %7642 = vmatprep.subr.bf16.mxu1 %v18659_v42 }
 0x1be   :  { %7600 = vmatpush2.bf16.msra.mxu0 %v18274_v22  ;;  %v17796_v22 = vcombine.low %v227_v54, %v239_v55  ;;  %v551_v55 = vld [vmem:[#allocation5 + $0xe00] sm:$0xff] }
 0x1bf   :  { %7643 = vmatpush2.bf16.msra.mxu1 %v18658_v23  ;;  %7601 = vmatprep.subr.bf16.mxu0 %v18251_v24  ;;  %v18180_v24 = vcombine.low %v611_v57, %v623_v1 }
 0x1c0   :  { %7644 = vmatprep.subr.bf16.mxu1 %v18635_v34  ;;  %v563_v34 = vld [vmem:[#allocation5 + $0xe60] sm:$0xff] }
 0x1c2   :  { %7602 = vmatpush2.bf16.msra.mxu0 %v18250_v36 }
 0x1c3   :  { %7645 = vmatpush2.bf16.msra.mxu1 %v18634_v37  ;;  %7657 = vmatprep.subr.bf16.mxu0 %v17845_v38  ;;  %v18157_v37 = vcombine.high %v587_v12, %v599_v17  ;;  %v575_v38 = vld [vmem:[#allocation5 + $0xec0] sm:$0xff] }
 0x1c4   :  { %7700 = vmatprep.subr.bf16.mxu1 %v18229_v47  ;;  %v155_v47 = vld [vmem:[#allocation5 + $0x1a0] sm:$0xff]  ;;  %v18133_v54 = vcombine.high %v563_v34, %v575_v38  ;;  %v18132_v1 = vcombine.low %v563_v34, %v575_v38 }
 0x1c5   :  { %v7347_v2 = vpop.f32.mrf.mxu0  ;;  %7604 = vmatmul.mubr.bf16.vlgmr.msra.gmra.mxu0 %v22013_v25  ;;  %v17724_v12 = vcombine.low %v155_v47, %v167_v48  ;;  %v107_v17 = vld [vmem:[#allocation5 + $0x20] sm:$0xff] }
 0x1c6   :  { %v7348_v3 = vadd.f32 %v7347_v2, %v7305_v60  ;;  %v7390_v4 = vpop.f32.mrf.mxu1  ;;  %7647 = vmatmul.mubr.bf16.vlgmr.msra.gmra.mxu1 %v22021_v39  ;;  %7658 = vmatpush1.bf16.msra.mxu0 %v17844_v49  ;;  %v539_v49 = vld [vmem:[#allocation5 + $0xda0] sm:$0xff]  ;;  %v17725_v2 = vcombine.high %v155_v47, %v167_v48 }
 0x1c7   :  { %7701 = vmatpush1.bf16.msra.mxu1 %v18228_v52  ;;  %v22092_v27 = vpop.f32.mrf.mxu0  ;;  %7659 = vmatprep.subr.bf16.mxu0 %v17821_v53  ;;  %v851_v34 = vld [vmem:[#allocation5 + $0x1760] sm:$0xff] }
 0x1c8   :  { %v22094_v14 = vadd.f32 %v7390_v4, %v7348_v3  ;;  %v22096_v15 = vpop.f32.mrf.mxu1  ;;  %7702 = vmatprep.subr.bf16.mxu1 %v18205_v0  ;;  %7689 = vmatprep.mubr.bf16.mxu0 %v22005_v58  ;;  %v17748_v0 = vcombine.low %v179_v29, %v191_v30  ;;  %v131_v3 = vld [vmem:[#allocation5 + $0xe0] sm:$0xff] }
 0x1c9   :  { %v7351_v18 = vpop.f32.mrf.mxu0  ;;  %7732 = vmatprep.mubr.bf16.mxu1 %v22007_v63  ;;  %v143_v4 = vld [vmem:[#allocation5 + $0x140] sm:$0xff] }
 0x1ca   :  { %v8739_v42 = vmul.f32 0.044715, %v22094_v14  ;;  %v7352_v20 = vadd.f32 %v7351_v18, %v7309_v13  ;;  %7660 = vmatpush1.bf16.msra.mxu0 %v17820_v5  ;;  %v7394_v23 = vpop.f32.mrf.mxu1  ;;  %v515_v5 = vld [vmem:[#allocation5 + $0xce0] sm:$0xff]  ;;  %v18108_v13 = vcombine.low %v539_v49, %v551_v55 }
 0x1cb   :  { %7703 = vmatpush1.bf16.msra.mxu1 %v18204_v6  ;;  %7661 = vmatprep.subr.bf16.mxu0 %v17797_v8  ;;  %v18109_v8 = vcombine.high %v539_v49, %v551_v55  ;;  %v119_v18 = vld [vmem:[#allocation5 + $0x80] sm:$0xff] }
 0x1cc   :  { %v8787_v35 = vmul.f32 %v8739_v42, %v22094_v14  ;;  %v22102_v36 = vadd.f32 %v7394_v23, %v7352_v20  ;;  %7704 = vmatprep.subr.bf16.mxu1 %v18181_v16  ;;  %v17701_v16 = vcombine.high %v131_v3, %v143_v4  ;;  %v491_v42 = vld [vmem:[#allocation5 + $0xc20] sm:$0xff]  ;;  %v18085_v20 = vcombine.high %v515_v5, %v527_v9 }
 0x1cd   :  { %v17700_v23 = vcombine.low %v131_v3, %v143_v4  ;;  %v467_v29 = vld [vmem:[#allocation5 + $0xb60] sm:$0xff]  ;;  %v17676_v38 = vcombine.low %v107_v17, %v119_v18 }
 0x1ce   :  { %v8835_v40 = vmul.f32 %v8787_v35, %v22094_v14  ;;  %v8763_v41 = vmul.f32 0.044715, %v22102_v36  ;;  %7662 = vmatpush1.bf16.msra.mxu0 %v17796_v22  ;;  %v503_v22 = vld [vmem:[#allocation5 + $0xc80] sm:$0xff] }
 0x1cf   :  { %7705 = vmatpush1.bf16.msra.mxu1 %v18180_v24  ;;  %7663 = vmatprep.subr.bf16.mxu0 %v17773_v26  ;;  %v18084_v24 = vcombine.low %v515_v5, %v527_v9  ;;  %v17677_v26 = vcombine.high %v107_v17, %v119_v18  ;;  %v479_v30 = vld [vmem:[#allocation5 + $0xbc0] sm:$0xff]  ;;  %v18061_v35 = vcombine.high %v491_v42, %v503_v22  ;;  %v8691_v5 = vmul.f32 0.5, %v22094_v14 }
 0x1d0   :  { %v8883_v52 = vadd.f32 %v8835_v40, %v22094_v14  ;;  %v8811_v53 = vmul.f32 %v8763_v41, %v22102_v36  ;;  %7706 = vmatprep.subr.bf16.mxu1 %v18157_v37  ;;  %v863_v37 = vld [vmem:[#allocation5 + $0x17c0] sm:$0xff]  ;;  %v18060_v40 = vcombine.low %v491_v42, %v503_v22  ;;  %v18037_v41 = vcombine.high %v467_v29, %v479_v30 }
 0x1d1   :  { %v18421_v47 = vcombine.high %v851_v34, %v863_v37  ;;  %v839_v48 = vld [vmem:[#allocation5 + $0x1700] sm:$0xff] }
 0x1d2   :  { %v8931_v57 = vmul.f32 0.7978846, %v8883_v52  ;;  %v8859_v60 = vmul.f32 %v8811_v53, %v22102_v36  ;;  %7664 = vmatpush1.bf16.msra.mxu0 %v17772_v43  ;;  %v443_v43 = vld [vmem:[#allocation5 + $0xaa0] sm:$0xff]  ;;  %v18036_v52 = vcombine.low %v467_v29, %v479_v30  ;;  %v18420_v53 = vcombine.low %v851_v34, %v863_v37 }
 0x1d3   :  { %7707 = vmatpush1.bf16.msra.mxu1 %v18156_v56  ;;  %7665 = vmatprep.subr.bf16.mxu0 %v17749_v7  ;;  %v455_v56 = vld [vmem:[#allocation5 + $0xb00] sm:$0xff] }
 0x1d4   :  { %21716 = vtanh.f32 %v8931_v57  ;;  %v8907_v6 = vadd.f32 %v8859_v60, %v22102_v36  ;;  %7708 = vmatprep.subr.bf16.mxu1 %v18133_v54  ;;  %v827_v7 = vld [vmem:[#allocation5 + $0x16a0] sm:$0xff]  ;;  %v18013_v54 = vcombine.high %v443_v43, %v455_v56  ;;  %v18012_v4 = vcombine.low %v443_v43, %v455_v56 }
 0x1d5   :  { %v419_v55 = vld [vmem:[#allocation5 + $0x9e0] sm:$0xff]  ;;  %v18396_v9 = vcombine.low %v827_v7, %v839_v48 }
 0x1d6   :  { %v8955_v10 = vmul.f32 0.7978846, %v8907_v6  ;;  %7666 = vmatpush1.bf16.msra.mxu0 %v17748_v0  ;;  %v431_v57 = vld [vmem:[#allocation5 + $0xa40] sm:$0xff]  ;;  %v18397_v0 = vcombine.high %v827_v7, %v839_v48  ;;  %v8715_v6 = vmul.f32 0.5, %v22102_v36 }
 0x1d7   :  { %7709 = vmatpush1.bf16.msra.mxu1 %v18132_v1  ;;  %7667 = vmatprep.subr.bf16.mxu0 %v17725_v2  ;;  %v803_v60 = vld [vmem:[#allocation5 + $0x15e0] sm:$0xff]  ;;  %v17988_v22 = vcombine.low %v419_v55, %v431_v57 }
 0x1d8   :  { %21718 = vtanh.f32 %v8955_v10  ;;  %7710 = vmatprep.subr.bf16.mxu1 %v18109_v8  ;;  %v815_v1 = vld [vmem:[#allocation5 + $0x1640] sm:$0xff]  ;;  %v17989_v10 = vcombine.high %v419_v55, %v431_v57 }
 0x1d9   :  { %v18373_v17 = vcombine.high %v803_v60, %v815_v1  ;;  %v791_v18 = vld [vmem:[#allocation5 + $0x1580] sm:$0xff]  ;;  %v18372_v14 = vcombine.low %v803_v60, %v815_v1 }
 0x1da   :  { %7668 = vmatpush1.bf16.msra.mxu0 %v17724_v12  ;;  %v395_v12 = vld [vmem:[#allocation5 + $0x920] sm:$0xff] }
 0x1db   :  { %7711 = vmatpush1.bf16.msra.mxu1 %v18108_v13  ;;  %7669 = vmatprep.subr.bf16.mxu0 %v17701_v16  ;;  %v407_v13 = vld [vmem:[#allocation5 + $0x980] sm:$0xff] }
 0x1dc   :  { %7712 = vmatprep.subr.bf16.mxu1 %v18085_v20  ;;  %v779_v16 = vld [vmem:[#allocation5 + $0x1520] sm:$0xff]  ;;  %v17965_v36 = vcombine.high %v395_v12, %v407_v13 }
 0x1dd   :  { %v755_v29 = vld [vmem:[#allocation5 + $0x1460] sm:$0xff]  ;;  %v18349_v30 = vcombine.high %v779_v16, %v791_v18  ;;  %v18348_v37 = vcombine.low %v779_v16, %v791_v18  ;;  %v276_v16 = vld [vmem:[#allocation5 + $0x568] sm:$0xff] }
 0x1de   :  { %7670 = vmatpush1.bf16.msra.mxu0 %v17700_v23  ;;  %v767_v34 = vld [vmem:[#allocation5 + $0x14c0] sm:$0xff]  ;;  %v288_v18 = vld [vmem:[#allocation5 + $0x5c8] sm:$0xff] }
 0x1df   :  { %7713 = vmatpush1.bf16.msra.mxu1 %v18084_v24  ;;  %7671 = vmatprep.subr.bf16.mxu0 %v17677_v26  ;;  %v371_v24 = vld [vmem:[#allocation5 + $0x860] sm:$0xff]  ;;  %v18325_v56 = vcombine.high %v755_v29, %v767_v34  ;;  %v18324_v48 = vcombine.low %v755_v29, %v767_v34  ;;  %v17847_v29 = vcombine.high %v276_v16, %v288_v18 }
 0x1e0   :  { %7714 = vmatprep.subr.bf16.mxu1 %v18061_v35  ;;  %v383_v26 = vld [vmem:[#allocation5 + $0x8c0] sm:$0xff]  ;;  %v17964_v35 = vcombine.low %v395_v12, %v407_v13 }
 0x1e1   :  { %v21717_v49 = vpop.eup %21716  ;;  %v731_v43 = vld [vmem:[#allocation5 + $0x13a0] sm:$0xff] }
 0x1e2   :  { %7672 = vmatpush1.bf16.msra.mxu0 %v17676_v38  ;;  %v9027_v2 = vadd.f32 1.0, %v21717_v49  ;;  %v17941_v38 = vcombine.high %v371_v24, %v383_v26  ;;  %v743_v7 = vld [vmem:[#allocation5 + $0x1400] sm:$0xff] }
 0x1e3   :  { %7715 = vmatpush1.bf16.msra.mxu1 %v18060_v40  ;;  %7673 = vmatprep.subr.bf16.mxu0 %v18037_v41  ;;  %v347_v40 = vld [vmem:[#allocation5 + $0x7a0] sm:$0xff]  ;;  %v18301_v55 = vcombine.high %v731_v43, %v743_v7 }
 0x1e4   :  { %7716 = vmatprep.subr.bf16.mxu1 %v18421_v47  ;;  %v9075_v42 = vmul.f32 %v9027_v2, %v8691_v5  ;;  %v359_v41 = vld [vmem:[#allocation5 + $0x800] sm:$0xff]  ;;  %v17940_v47 = vcombine.low %v371_v24, %v383_v26  ;;  %v252_v26 = vld [vmem:[#allocation5 + $0x4a8] sm:$0xff] }
 0x1e5   :  { %v21719_v3 = vpop.eup %21718  ;;  %v17917_v49 = vcombine.high %v347_v40, %v359_v41  ;;  %v719_v57 = vld [vmem:[#allocation5 + $0x1340] sm:$0xff]  ;;  %v17916_v60 = vcombine.low %v347_v40, %v359_v41 }
 0x1e6   :  { %7674 = vmatpush2.bf16.msra.mxu0 %v18036_v52  ;;  %v9051_v8 = vadd.f32 1.0, %v21719_v3  ;;  %v323_v52 = vld [vmem:[#allocation5 + $0x6e0] sm:$0xff] }
 0x1e7   :  { %7717 = vmatpush2.bf16.msra.mxu1 %v18420_v53  ;;  %7675 = vmatprep.subr.bf16.mxu0 %v18013_v54  ;;  %v335_v53 = vld [vmem:[#allocation5 + $0x740] sm:$0xff] }
 0x1e8   :  { %7718 = vmatprep.subr.bf16.mxu1 %v18397_v0  ;;  %v9099_v20 = vmul.f32 %v9051_v8, %v8715_v6  ;;  %v707_v54 = vld [vmem:[#allocation5 + $0x12e0] sm:$0xff]  ;;  %v18300_v0 = vcombine.low %v731_v43, %v743_v7  ;;  %v17893_v1 = vcombine.high %v323_v52, %v335_v53  ;;  %v17892_v8 = vcombine.low %v323_v52, %v335_v53  ;;  %v22121_v7 = vpop.f32.mrf.mxu1 }
 0x1e9   :  { %v299_v2 = vld [vmem:[#allocation5 + $0x620] sm:$0xff]  ;;  %v18277_v5 = vcombine.high %v707_v54, %v719_v57 }
 0x1ea   :  { %7676 = vmatpush2.bf16.msra.mxu0 %v18012_v4  ;;  %v22112_v23 = vpack.c.bf16 %v9099_v20, %v9075_v42  ;;  %v311_v3 = vld [vmem:[#allocation5 + $0x680] sm:$0xff]  ;;  %v22115_v20 = vsub.s32 4, %v22031_v50 }
 0x1eb   :  { %7719 = vmatpush2.bf16.msra.mxu1 %v18396_v9  ;;  %7677 = vmatprep.subr.bf16.mxu0 %v17989_v10  ;;  %v683_v4 = vld [vmem:[#allocation5 + $0x1220] sm:$0xff]  ;;  %v18276_v9 = vcombine.low %v707_v54, %v719_v57  ;;  %v17869_v10 = vcombine.high %v299_v2, %v311_v3  ;;  %v17868_v42 = vcombine.low %v299_v2, %v311_v3 }
 0x1ec   :  { %23075 = vst [vmem:[#allocation19_spill] sm:$0xff] %v22112_v23  ;;  %7720 = vmatprep.subr.bf16.mxu1 %v18373_v17  ;;  %v695_v6 = vld [vmem:[#allocation5 + $0x1280] sm:$0xff]  ;;  %23076 = vst [vmem:[#allocation20_spill] sm:$0xff] %v22115_v20  ;;  %v1280_v34 = vrot.slane %v22082_v44, %v22115_v20 }
 0x1ed   :  { %v1043_v12 = vld [vmem:[#allocation5 + $0x1d60] sm:$0xff]  ;;  %v18253_v17 = vcombine.high %v683_v4, %v695_v6 }
 0x1ee   :  { %7678 = vmatpush2.bf16.msra.mxu0 %v17988_v22  ;;  %v1055_v13 = vld [vmem:[#allocation5 + $0x1dc0] sm:$0xff]  ;;  %v18252_v22 = vcombine.low %v683_v4, %v695_v6 }
 0x1ef   :  { %7721 = vmatpush2.bf16.msra.mxu1 %v18372_v14  ;;  %7679 = vmatprep.subr.bf16.mxu0 %v17965_v36  ;;  %v18613_v14 = vcombine.high %v1043_v12, %v1055_v13  ;;  %v1019_v36 = vld [vmem:[#allocation5 + $0x1ca0] sm:$0xff] }
 0x1f0   :  { %7722 = vmatprep.subr.bf16.mxu1 %v18349_v30  ;;  %v1031_v24 = vld [vmem:[#allocation5 + $0x1d00] sm:$0xff]  ;;  %v264_v30 = vld [vmem:[#allocation5 + $0x508] sm:$0xff] }
 0x1f1   :  { %v18589_v40 = vcombine.high %v1019_v36, %v1031_v24  ;;  %v995_v41 = vld [vmem:[#allocation5 + $0x1be0] sm:$0xff]  ;;  %v18588_v53 = vcombine.low %v1019_v36, %v1031_v24 }
 0x1f2   :  { %7680 = vmatpush2.bf16.msra.mxu0 %v17964_v35  ;;  %v18612_v35 = vcombine.low %v1043_v12, %v1055_v13  ;;  %v1007_v43 = vld [vmem:[#allocation5 + $0x1c40] sm:$0xff] }
 0x1f3   :  { %7723 = vmatpush2.bf16.msra.mxu1 %v18348_v37  ;;  %7681 = vmatprep.subr.bf16.mxu0 %v17941_v38  ;;  %v22119_v37 = vpop.f32.mrf.mxu0  ;;  %v17846_v38 = vcombine.low %v276_v16, %v288_v18  ;;  %v18565_v57 = vcombine.high %v995_v41, %v1007_v43  ;;  %v947_v16 = vld [vmem:[#allocation5 + $0x1a60] sm:$0xff]  ;;  %v180_v18 = vld [vmem:[#allocation5 + $0x268] sm:$0xff] }
 0x1f4   :  { %7724 = vmatprep.subr.bf16.mxu1 %v18325_v56  ;;  %v228_v56 = vld [vmem:[#allocation5 + $0x3e8] sm:$0xff] }
 0x1f6   :  { %7682 = vmatpush2.bf16.msra.mxu0 %v17940_v47  ;;  %v17823_v47 = vcombine.high %v252_v26, %v264_v30 }
 0x1f7   :  { %7725 = vmatpush2.bf16.msra.mxu1 %v18324_v48  ;;  %7683 = vmatprep.subr.bf16.mxu0 %v17917_v49  ;;  %v240_v48 = vld [vmem:[#allocation5 + $0x448] sm:$0xff] }
 0x1f8   :  { %7726 = vmatprep.subr.bf16.mxu1 %v18301_v55  ;;  %v17822_v55 = vcombine.low %v252_v26, %v264_v30  ;;  %v17799_v4 = vcombine.high %v228_v56, %v240_v48  ;;  %v17798_v12 = vcombine.low %v228_v56, %v240_v48  ;;  %v935_v30 = vld [vmem:[#allocation5 + $0x1a00] sm:$0xff]  ;;  %v132_v48 = vld [vmem:[#allocation5 + $0xe8] sm:$0xff] }
 0x1f9   :  { %v899_v56 = vld [vmem:[#allocation5 + $0x18e0] sm:$0xff] }
 0x1fa   :  { %7684 = vmatpush2.bf16.msra.mxu0 %v17916_v60  ;;  %v971_v60 = vld [vmem:[#allocation5 + $0x1b20] sm:$0xff] }
 0x1fb   :  { %7727 = vmatpush2.bf16.msra.mxu1 %v18300_v0  ;;  %7685 = vmatprep.subr.bf16.mxu0 %v17893_v1  ;;  %v983_v0 = vld [vmem:[#allocation5 + $0x1b80] sm:$0xff]  ;;  %v204_v1 = vld [vmem:[#allocation5 + $0x328] sm:$0xff] }
 0x1fc   :  { %7728 = vmatprep.subr.bf16.mxu1 %v18277_v5  ;;  %v216_v5 = vld [vmem:[#allocation5 + $0x388] sm:$0xff]  ;;  %v18541_v13 = vcombine.high %v971_v60, %v983_v0  ;;  %v18540_v36 = vcombine.low %v971_v60, %v983_v0  ;;  %v887_v60 = vld [vmem:[#allocation5 + $0x1880] sm:$0xff] }
 0x1fd   :  { %v17774_v24 = vcombine.low %v204_v1, %v216_v5  ;;  %v108_v0 = vld [vmem:[#allocation5 + $0x28] sm:$0xff] }
 0x1fe   :  { %7686 = vmatpush2.bf16.msra.mxu0 %v17892_v8 }
 0x1ff   :  { %7729 = vmatpush2.bf16.msra.mxu1 %v18276_v9  ;;  %7687 = vmatprep.subr.bf16.mxu0 %v17869_v10  ;;  %v18564_v9 = vcombine.low %v995_v41, %v1007_v43 }
 0x200   :  { %7730 = vmatprep.subr.bf16.mxu1 %v18253_v17  ;;  %v959_v17 = vld [vmem:[#allocation5 + $0x1ac0] sm:$0xff] }
 0x201   :  { %v18517_v26 = vcombine.high %v947_v16, %v959_v17 }
 0x202   :  { %7688 = vmatpush2.bf16.msra.mxu0 %v17868_v42 }
 0x203   :  { %7731 = vmatpush2.bf16.msra.mxu1 %v18252_v22  ;;  %7743 = vmatprep.subr.bf16.mxu0 %v18613_v14  ;;  %v17775_v22 = vcombine.high %v204_v1, %v216_v5  ;;  %v192_v14 = vld [vmem:[#allocation5 + $0x2c8] sm:$0xff] }
 0x204   :  { %7786 = vmatprep.subr.bf16.mxu1 %v17847_v29  ;;  %v923_v29 = vld [vmem:[#allocation5 + $0x19a0] sm:$0xff]  ;;  %v17750_v41 = vcombine.low %v180_v18, %v192_v14 }
 0x205   :  { %v7433_v49 = vpop.f32.mrf.mxu0  ;;  %7690 = vmatmul.mubr.bf16.vlgmr.msra.gmra.mxu0 %v22011_v21  ;;  %v18493_v43 = vcombine.high %v923_v29, %v935_v30 }
 0x206   :  { %v7434_v52 = vadd.f32 %v7433_v49, %v1280_v34  ;;  %v7476_v44 = vpop.f32.mrf.mxu1  ;;  %7733 = vmatmul.mubr.bf16.vlgmr.msra.gmra.mxu1 %v22013_v25  ;;  %7744 = vmatpush1.bf16.msra.mxu0 %v18612_v35  ;;  %v17751_v35 = vcombine.high %v180_v18, %v192_v14  ;;  %v1211_v14 = vld [vmem:[#allocation5 + $0x22a0] sm:$0xff] }
 0x207   :  { %7787 = vmatpush1.bf16.msra.mxu1 %v17846_v38  ;;  %v22125_v54 = vpop.f32.mrf.mxu0  ;;  %7745 = vmatprep.subr.bf16.mxu0 %v18589_v40  ;;  %v168_v38 = vld [vmem:[#allocation5 + $0x208] sm:$0xff]  ;;  %v18516_v40 = vcombine.low %v947_v16, %v959_v17 }
 0x208   :  { %v22127_v2 = vadd.f32 %v7476_v44, %v7434_v52  ;;  %v22129_v3 = vpop.f32.mrf.mxu1  ;;  %7788 = vmatprep.subr.bf16.mxu1 %v17823_v47  ;;  %7775 = vmatprep.mubr.bf16.mxu0 %v22015_v32  ;;  %v911_v47 = vld [vmem:[#allocation5 + $0x1940] sm:$0xff]  ;;  %v144_v52 = vld [vmem:[#allocation5 + $0x148] sm:$0xff]  ;;  %v18492_v44 = vcombine.low %v923_v29, %v935_v30 }
 0x209   :  { %v7437_v6 = vpop.f32.mrf.mxu0  ;;  %7818 = vmatprep.mubr.bf16.mxu1 %v22005_v58  ;;  %v17703_v1 = vcombine.high %v132_v48, %v144_v52  ;;  %v18468_v5 = vcombine.low %v899_v56, %v911_v47  ;;  %v480_v16 = vld [vmem:[#allocation5 + $0xbc8] sm:$0xff] }
 0x20a   :  { %v7438_v8 = vadd.f32 %v7437_v6, %v1280_v34  ;;  %7746 = vmatpush1.bf16.msra.mxu0 %v18588_v53  ;;  %v7480_v10 = vpop.f32.mrf.mxu1  ;;  %v156_v34 = vld [vmem:[#allocation5 + $0x1a8] sm:$0xff]  ;;  %v17702_v6 = vcombine.low %v132_v48, %v144_v52  ;;  %v1163_v52 = vld [vmem:[#allocation5 + $0x2120] sm:$0xff] }
 0x20b   :  { %7789 = vmatpush1.bf16.msra.mxu1 %v17822_v55  ;;  %7747 = vmatprep.subr.bf16.mxu0 %v18565_v57  ;;  %v17727_v49 = vcombine.high %v156_v34, %v168_v38  ;;  %v17726_v53 = vcombine.low %v156_v34, %v168_v38  ;;  %v18469_v55 = vcombine.high %v899_v56, %v911_v47  ;;  %v875_v57 = vld [vmem:[#allocation5 + $0x1820] sm:$0xff]  ;;  %v456_v29 = vld [vmem:[#allocation5 + $0xb08] sm:$0xff] }
 0x20c   :  { %v22133_v42 = vadd.f32 %v7480_v10, %v7438_v8  ;;  %7790 = vmatprep.subr.bf16.mxu1 %v17799_v4  ;;  %v120_v4 = vld [vmem:[#allocation5 + $0x88] sm:$0xff]  ;;  %v18445_v8 = vcombine.high %v875_v57, %v887_v60  ;;  %v1247_v10 = vld [vmem:[#allocation5 + $0x23c0] sm:$0xff]  ;;  %v18444_v17 = vcombine.low %v875_v57, %v887_v60 }
 0x20d   :  { %v17678_v18 = vcombine.low %v108_v0, %v120_v4  ;;  %v1187_v38 = vld [vmem:[#allocation5 + $0x21e0] sm:$0xff]  ;;  %v432_v56 = vld [vmem:[#allocation5 + $0xa48] sm:$0xff] }
 0x20e   :  { %7748 = vmatpush1.bf16.msra.mxu0 %v18564_v9  ;;  %v1235_v9 = vld [vmem:[#allocation5 + $0x2360] sm:$0xff]  ;;  %v408_v57 = vld [vmem:[#allocation5 + $0x988] sm:$0xff] }
 0x20f   :  { %7791 = vmatpush1.bf16.msra.mxu1 %v17798_v12  ;;  %7749 = vmatprep.subr.bf16.mxu0 %v18541_v13  ;;  %v468_v12 = vld [vmem:[#allocation5 + $0xb68] sm:$0xff]  ;;  %v17679_v13 = vcombine.high %v108_v0, %v120_v4  ;;  %v18804_v30 = vcombine.low %v1235_v9, %v1247_v10  ;;  %v1139_v4 = vld [vmem:[#allocation5 + $0x2060] sm:$0xff] }
 0x210   :  { %7792 = vmatprep.subr.bf16.mxu1 %v17775_v22  ;;  %v18805_v22 = vcombine.high %v1235_v9, %v1247_v10  ;;  %v18038_v34 = vcombine.low %v468_v12, %v480_v16  ;;  %v384_v9 = vld [vmem:[#allocation5 + $0x8c8] sm:$0xff] }
 0x212   :  { %7750 = vmatpush1.bf16.msra.mxu0 %v18540_v36  ;;  %v1223_v36 = vld [vmem:[#allocation5 + $0x2300] sm:$0xff] }
 0x213   :  { %7793 = vmatpush1.bf16.msra.mxu1 %v17774_v24  ;;  %7751 = vmatprep.subr.bf16.mxu0 %v18517_v26  ;;  %v444_v24 = vld [vmem:[#allocation5 + $0xaa8] sm:$0xff]  ;;  %v18039_v26 = vcombine.high %v468_v12, %v480_v16  ;;  %v18780_v47 = vcombine.low %v1211_v14, %v1223_v36  ;;  %v1115_v16 = vld [vmem:[#allocation5 + $0x1fa0] sm:$0xff] }
 0x214   :  { %7794 = vmatprep.subr.bf16.mxu1 %v17751_v35  ;;  %v18781_v35 = vcombine.high %v1211_v14, %v1223_v36  ;;  %v18014_v48 = vcombine.low %v444_v24, %v456_v29  ;;  %v360_v14 = vld [vmem:[#allocation5 + $0x808] sm:$0xff] }
 0x216   :  { %7752 = vmatpush1.bf16.msra.mxu0 %v18516_v40  ;;  %v1199_v40 = vld [vmem:[#allocation5 + $0x2240] sm:$0xff] }
 0x217   :  { %7795 = vmatpush1.bf16.msra.mxu1 %v17750_v41  ;;  %7753 = vmatprep.subr.bf16.mxu0 %v18493_v43  ;;  %v420_v41 = vld [vmem:[#allocation5 + $0x9e8] sm:$0xff]  ;;  %v18015_v43 = vcombine.high %v444_v24, %v456_v29  ;;  %v18756_v60 = vcombine.low %v1187_v38, %v1199_v40  ;;  %v1091_v29 = vld [vmem:[#allocation5 + $0x1ee0] sm:$0xff] }
 0x218   :  { %7796 = vmatprep.subr.bf16.mxu1 %v17727_v49  ;;  %v18757_v49 = vcombine.high %v1187_v38, %v1199_v40  ;;  %v17990_v0 = vcombine.low %v420_v41, %v432_v56  ;;  %v336_v38 = vld [vmem:[#allocation5 + $0x748] sm:$0xff] }
 0x21a   :  { %7754 = vmatpush1.bf16.msra.mxu0 %v18492_v44  ;;  %v1175_v44 = vld [vmem:[#allocation5 + $0x2180] sm:$0xff] }
 0x21b   :  { %7797 = vmatpush1.bf16.msra.mxu1 %v17726_v53  ;;  %7755 = vmatprep.subr.bf16.mxu0 %v18469_v55  ;;  %v396_v53 = vld [vmem:[#allocation5 + $0x928] sm:$0xff]  ;;  %v17991_v55 = vcombine.high %v420_v41, %v432_v56  ;;  %v18732_v10 = vcombine.low %v1163_v52, %v1175_v44  ;;  %v1067_v56 = vld [vmem:[#allocation5 + $0x1e20] sm:$0xff] }
 0x21c   :  { %7798 = vmatprep.subr.bf16.mxu1 %v17703_v1  ;;  %v18733_v1 = vcombine.high %v1163_v52, %v1175_v44  ;;  %v17966_v12 = vcombine.low %v396_v53, %v408_v57  ;;  %v312_v52 = vld [vmem:[#allocation5 + $0x688] sm:$0xff] }
 0x21e   :  { %7756 = vmatpush1.bf16.msra.mxu0 %v18468_v5  ;;  %v1151_v5 = vld [vmem:[#allocation5 + $0x20c0] sm:$0xff] }
 0x21f   :  { %7799 = vmatpush1.bf16.msra.mxu1 %v17702_v6  ;;  %7757 = vmatprep.subr.bf16.mxu0 %v18445_v8  ;;  %v372_v6 = vld [vmem:[#allocation5 + $0x868] sm:$0xff]  ;;  %v17967_v8 = vcombine.high %v396_v53, %v408_v57  ;;  %v18708_v36 = vcombine.low %v1139_v4, %v1151_v5 }
 0x220   :  { %7800 = vmatprep.subr.bf16.mxu1 %v17679_v13  ;;  %v18709_v13 = vcombine.high %v1139_v4, %v1151_v5  ;;  %v17942_v24 = vcombine.low %v372_v6, %v384_v9  ;;  %v660_v57 = vld [vmem:[#allocation5 + $0x1168] sm:$0xff] }
 0x221   :  { %v1056_v4 = vld [vmem:[#allocation5 + $0x1dc8] sm:$0xff] }
 0x222   :  { %7758 = vmatpush1.bf16.msra.mxu0 %v18444_v17  ;;  %v1127_v17 = vld [vmem:[#allocation5 + $0x2000] sm:$0xff] }
 0x223   :  { %7801 = vmatpush1.bf16.msra.mxu1 %v17678_v18  ;;  %7759 = vmatprep.subr.bf16.mxu0 %v18805_v22  ;;  %v348_v18 = vld [vmem:[#allocation5 + $0x7a8] sm:$0xff]  ;;  %v17943_v22 = vcombine.high %v372_v6, %v384_v9  ;;  %v18684_v40 = vcombine.low %v1115_v16, %v1127_v17 }
 0x224   :  { %7802 = vmatprep.subr.bf16.mxu1 %v18039_v26  ;;  %v18685_v26 = vcombine.high %v1115_v16, %v1127_v17  ;;  %v17918_v41 = vcombine.low %v348_v18, %v360_v14  ;;  %v636_v9 = vld [vmem:[#allocation5 + $0x10a8] sm:$0xff] }
 0x225   :  { %v1032_v16 = vld [vmem:[#allocation5 + $0x1d08] sm:$0xff] }
 0x226   :  { %7760 = vmatpush2.bf16.msra.mxu0 %v18804_v30  ;;  %v1103_v30 = vld [vmem:[#allocation5 + $0x1f40] sm:$0xff] }
 0x227   :  { %7803 = vmatpush2.bf16.msra.mxu1 %v18038_v34  ;;  %7761 = vmatprep.subr.bf16.mxu0 %v18781_v35  ;;  %v324_v34 = vld [vmem:[#allocation5 + $0x6e8] sm:$0xff]  ;;  %v17919_v35 = vcombine.high %v348_v18, %v360_v14  ;;  %v18660_v44 = vcombine.low %v1091_v29, %v1103_v30  ;;  %v22135_v18 = vpop.f32.mrf.mxu0 }
 0x228   :  { %7804 = vmatprep.subr.bf16.mxu1 %v18015_v43  ;;  %v18661_v43 = vcombine.high %v1091_v29, %v1103_v30  ;;  %v17894_v53 = vcombine.low %v324_v34, %v336_v38  ;;  %v996_v29 = vld [vmem:[#allocation5 + $0x1be8] sm:$0xff] }
 0x229   :  { %v1008_v30 = vld [vmem:[#allocation5 + $0x1c48] sm:$0xff] }
 0x22a   :  { %7762 = vmatpush2.bf16.msra.mxu0 %v18780_v47  ;;  %v1079_v47 = vld [vmem:[#allocation5 + $0x1e80] sm:$0xff] }
 0x22b   :  { %7805 = vmatpush2.bf16.msra.mxu1 %v18014_v48  ;;  %7763 = vmatprep.subr.bf16.mxu0 %v18757_v49  ;;  %v300_v48 = vld [vmem:[#allocation5 + $0x628] sm:$0xff]  ;;  %v17895_v49 = vcombine.high %v324_v34, %v336_v38  ;;  %v18636_v5 = vcombine.low %v1067_v56, %v1079_v47 }
 0x22c   :  { %7806 = vmatprep.subr.bf16.mxu1 %v17991_v55  ;;  %v18637_v55 = vcombine.high %v1067_v56, %v1079_v47  ;;  %v17870_v6 = vcombine.low %v300_v48, %v312_v52  ;;  %v588_v56 = vld [vmem:[#allocation5 + $0xf28] sm:$0xff] }
 0x22d   :  { %v600_v47 = vld [vmem:[#allocation5 + $0xf88] sm:$0xff] }
 0x22e   :  { %7764 = vmatpush2.bf16.msra.mxu0 %v18756_v60  ;;  %v672_v60 = vld [vmem:[#allocation5 + $0x11c8] sm:$0xff] }
 0x22f   :  { %7807 = vmatpush2.bf16.msra.mxu1 %v17990_v0  ;;  %7765 = vmatprep.subr.bf16.mxu0 %v18733_v1  ;;  %v1044_v0 = vld [vmem:[#allocation5 + $0x1d68] sm:$0xff]  ;;  %v17871_v1 = vcombine.high %v300_v48, %v312_v52  ;;  %v18230_v17 = vcombine.low %v660_v57, %v672_v60  ;;  %v18567_v52 = vcombine.high %v996_v29, %v1008_v30 }
 0x230   :  { %7808 = vmatprep.subr.bf16.mxu1 %v17967_v8  ;;  %v18231_v8 = vcombine.high %v660_v57, %v672_v60  ;;  %v972_v48 = vld [vmem:[#allocation5 + $0x1b28] sm:$0xff]  ;;  %v18566_v60 = vcombine.low %v996_v29, %v1008_v30 }
 0x231   :  { %v936_v30 = vld [vmem:[#allocation5 + $0x1a08] sm:$0xff] }
 0x232   :  { %7766 = vmatpush2.bf16.msra.mxu0 %v18732_v10  ;;  %v648_v10 = vld [vmem:[#allocation5 + $0x1108] sm:$0xff] }
 0x233   :  { %7809 = vmatpush2.bf16.msra.mxu1 %v17966_v12  ;;  %7767 = vmatprep.subr.bf16.mxu0 %v18709_v13  ;;  %v1020_v12 = vld [vmem:[#allocation5 + $0x1ca8] sm:$0xff]  ;;  %v18615_v13 = vcombine.high %v1044_v0, %v1056_v4  ;;  %v18207_v14 = vcombine.high %v636_v9, %v648_v10  ;;  %v18206_v38 = vcombine.low %v636_v9, %v648_v10 }
 0x234   :  { %7810 = vmatprep.subr.bf16.mxu1 %v17943_v22  ;;  %v18614_v22 = vcombine.low %v1044_v0, %v1056_v4  ;;  %v18159_v0 = vcombine.high %v588_v56, %v600_v47  ;;  %v576_v4 = vld [vmem:[#allocation5 + $0xec8] sm:$0xff] }
 0x235   :  { %v960_v10 = vld [vmem:[#allocation5 + $0x1ac8] sm:$0xff] }
 0x236   :  { %7768 = vmatpush2.bf16.msra.mxu0 %v18708_v36  ;;  %v612_v36 = vld [vmem:[#allocation5 + $0xfe8] sm:$0xff] }
 0x237   :  { %7811 = vmatpush2.bf16.msra.mxu1 %v17942_v24  ;;  %7769 = vmatprep.subr.bf16.mxu0 %v18685_v26  ;;  %v624_v24 = vld [vmem:[#allocation5 + $0x1048] sm:$0xff]  ;;  %v18591_v26 = vcombine.high %v1020_v12, %v1032_v16 }
 0x238   :  { %7812 = vmatprep.subr.bf16.mxu1 %v17919_v35  ;;  %v18182_v57 = vcombine.low %v612_v36, %v624_v24 }
 0x23a   :  { %7770 = vmatpush2.bf16.msra.mxu0 %v18684_v40 }
 0x23b   :  { %7813 = vmatpush2.bf16.msra.mxu1 %v17918_v41  ;;  %7771 = vmatprep.subr.bf16.mxu0 %v18661_v43  ;;  %v18590_v41 = vcombine.low %v1020_v12, %v1032_v16  ;;  %v18183_v43 = vcombine.high %v612_v36, %v624_v24  ;;  %v924_v36 = vld [vmem:[#allocation5 + $0x19a8] sm:$0xff] }
 0x23c   :  { %7814 = vmatprep.subr.bf16.mxu1 %v17895_v49 }
 0x23e   :  { %7772 = vmatpush2.bf16.msra.mxu0 %v18660_v44  ;;  %v984_v44 = vld [vmem:[#allocation5 + $0x1b88] sm:$0xff] }
 0x23f   :  { %7815 = vmatpush2.bf16.msra.mxu1 %v17894_v53  ;;  %7773 = vmatprep.subr.bf16.mxu0 %v18637_v55  ;;  %v18543_v9 = vcombine.high %v972_v48, %v984_v44  ;;  %v18542_v16 = vcombine.low %v972_v48, %v984_v44  ;;  %v900_v48 = vld [vmem:[#allocation5 + $0x18e8] sm:$0xff] }
 0x240   :  { %7816 = vmatprep.subr.bf16.mxu1 %v17871_v1  ;;  %v564_v1 = vld [vmem:[#allocation5 + $0xe68] sm:$0xff] }
 0x241   :  { %v912_v44 = vld [vmem:[#allocation5 + $0x1948] sm:$0xff] }
 0x242   :  { %7774 = vmatpush2.bf16.msra.mxu0 %v18636_v5  ;;  %v948_v5 = vld [vmem:[#allocation5 + $0x1a68] sm:$0xff] }
 0x243   :  { %7817 = vmatpush2.bf16.msra.mxu1 %v17870_v6  ;;  %7829 = vmatprep.subr.bf16.mxu0 %v18231_v8  ;;  %v18519_v29 = vcombine.high %v948_v5, %v960_v10 }
 0x244   :  { %7872 = vmatprep.subr.bf16.mxu1 %v18615_v13  ;;  %v18158_v13 = vcombine.low %v588_v56, %v600_v47  ;;  %v516_v56 = vld [vmem:[#allocation5 + $0xce8] sm:$0xff] }
 0x245   :  { %v7519_v34 = vpop.f32.mrf.mxu0  ;;  %7776 = vmatmul.mubr.bf16.vlgmr.msra.gmra.mxu0 %v22021_v39  ;;  %v528_v47 = vld [vmem:[#allocation5 + $0xd48] sm:$0xff] }
 0x246   :  { %v22139_v35 = vadd.f32 %v7519_v34, %v22127_v2  ;;  %7819 = vmatmul.mubr.bf16.vlgmr.msra.gmra.mxu1 %v22011_v21  ;;  %7830 = vmatpush1.bf16.msra.mxu0 %v18230_v17  ;;  %v18135_v17 = vcombine.high %v564_v1, %v576_v4 }
 0x247   :  { %7873 = vmatpush1.bf16.msra.mxu1 %v18614_v22  ;;  %v22142_v40 = vpop.f32.mrf.mxu0  ;;  %7831 = vmatprep.subr.bf16.mxu0 %v18207_v14  ;;  %v540_v22 = vld [vmem:[#allocation5 + $0xda8] sm:$0xff] }
 0x248   :  { %v8741_v49 = vmul.f32 0.044715, %v22139_v35  ;;  %7874 = vmatprep.subr.bf16.mxu1 %v18591_v26  ;;  %7861 = vmatprep.mubr.bf16.mxu0 %v22007_v63  ;;  %v552_v14 = vld [vmem:[#allocation5 + $0xe08] sm:$0xff] }
 0x249   :  { %v7523_v2 = vpop.f32.mrf.mxu0  ;;  %7904 = vmatprep.mubr.bf16.mxu1 %v22015_v32 }
 0x24a   :  { %v8789_v53 = vmul.f32 %v8741_v49, %v22139_v35  ;;  %v22149_v55 = vadd.f32 %v7523_v2, %v22133_v42  ;;  %7832 = vmatpush1.bf16.msra.mxu0 %v18206_v38  ;;  %v18134_v38 = vcombine.low %v564_v1, %v576_v4  ;;  %v18110_v2 = vcombine.low %v540_v22, %v552_v14  ;;  %v876_v1 = vld [vmem:[#allocation5 + $0x1828] sm:$0xff] }
 0x24b   :  { %7875 = vmatpush1.bf16.msra.mxu1 %v18590_v41  ;;  %7833 = vmatprep.subr.bf16.mxu0 %v18183_v43  ;;  %v18518_v41 = vcombine.low %v948_v5, %v960_v10  ;;  %v18111_v43 = vcombine.high %v540_v22, %v552_v14  ;;  %v18471_v4 = vcombine.high %v900_v48, %v912_v44  ;;  %v888_v5 = vld [vmem:[#allocation5 + $0x1888] sm:$0xff] }
 0x24c   :  { %v8837_v6 = vmul.f32 %v8789_v53, %v22139_v35  ;;  %v8765_v8 = vmul.f32 0.044715, %v22149_v55  ;;  %7876 = vmatprep.subr.bf16.mxu1 %v18567_v52  ;;  %v18495_v52 = vcombine.high %v924_v36, %v936_v30  ;;  %v18494_v53 = vcombine.low %v924_v36, %v936_v30  ;;  %v852_v10 = vld [vmem:[#allocation5 + $0x1768] sm:$0xff] }
 0x24d   :  { %v18446_v14 = vcombine.low %v876_v1, %v888_v5 }
 0x24e   :  { %v8885_v12 = vadd.f32 %v8837_v6, %v22139_v35  ;;  %v8813_v42 = vmul.f32 %v8765_v8, %v22149_v55  ;;  %7834 = vmatpush1.bf16.msra.mxu0 %v18182_v57  ;;  %v18087_v57 = vcombine.high %v516_v56, %v528_v47  ;;  %v18086_v6 = vcombine.low %v516_v56, %v528_v47 }
 0x24f   :  { %7877 = vmatpush1.bf16.msra.mxu1 %v18566_v60  ;;  %7835 = vmatprep.subr.bf16.mxu0 %v18159_v0  ;;  %v492_v60 = vld [vmem:[#allocation5 + $0xc28] sm:$0xff]  ;;  %v18470_v8 = vcombine.low %v900_v48, %v912_v44 }
 0x250   :  { %v8933_v24 = vmul.f32 0.7978846, %v8885_v12  ;;  %v8861_v26 = vmul.f32 %v8813_v42, %v22149_v55  ;;  %7878 = vmatprep.subr.bf16.mxu1 %v18543_v9  ;;  %v504_v0 = vld [vmem:[#allocation5 + $0xc88] sm:$0xff] }
 0x251   :  { %v18063_v9 = vcombine.high %v492_v60, %v504_v0  ;;  %v864_v12 = vld [vmem:[#allocation5 + $0x17c8] sm:$0xff] }
 0x252   :  { %21720 = vtanh.f32 %v8933_v24  ;;  %v8909_v34 = vadd.f32 %v8861_v26, %v22149_v55  ;;  %7836 = vmatpush1.bf16.msra.mxu0 %v18158_v13  ;;  %v1236_v42 = vld [vmem:[#allocation5 + $0x2368] sm:$0xff]  ;;  %v18447_v13 = vcombine.high %v876_v1, %v888_v5  ;;  %v18423_v36 = vcombine.high %v852_v10, %v864_v12 }
 0x253   :  { %7879 = vmatpush1.bf16.msra.mxu1 %v18542_v16  ;;  %7837 = vmatprep.subr.bf16.mxu0 %v18135_v17  ;;  %v1248_v16 = vld [vmem:[#allocation5 + $0x23c8] sm:$0xff]  ;;  %v18062_v17 = vcombine.low %v492_v60, %v504_v0 }
 0x254   :  { %v8957_v49 = vmul.f32 0.7978846, %v8909_v34  ;;  %7880 = vmatprep.subr.bf16.mxu1 %v18519_v29  ;;  %v828_v24 = vld [vmem:[#allocation5 + $0x16a8] sm:$0xff]  ;;  %v18807_v30 = vcombine.high %v1236_v42, %v1248_v16  ;;  %v18806_v56 = vcombine.low %v1236_v42, %v1248_v16 }
 0x255   :  { %v840_v26 = vld [vmem:[#allocation5 + $0x1708] sm:$0xff] }
 0x256   :  { %21722 = vtanh.f32 %v8957_v49  ;;  %7838 = vmatpush1.bf16.msra.mxu0 %v18134_v38  ;;  %v1212_v29 = vld [vmem:[#allocation5 + $0x22a8] sm:$0xff]  ;;  %v18422_v38 = vcombine.low %v852_v10, %v864_v12  ;;  %v18399_v47 = vcombine.high %v828_v24, %v840_v26  ;;  %v18398_v0 = vcombine.low %v828_v24, %v840_v26 }
 0x257   :  { %7881 = vmatpush1.bf16.msra.mxu1 %v18518_v41  ;;  %7839 = vmatprep.subr.bf16.mxu0 %v18111_v43  ;;  %v1224_v34 = vld [vmem:[#allocation5 + $0x2308] sm:$0xff] }
 0x258   :  { %7882 = vmatprep.subr.bf16.mxu1 %v18495_v52  ;;  %v804_v48 = vld [vmem:[#allocation5 + $0x15e8] sm:$0xff]  ;;  %v18783_v44 = vcombine.high %v1212_v29, %v1224_v34  ;;  %v18782_v5 = vcombine.low %v1212_v29, %v1224_v34 }
 0x259   :  { %v816_v49 = vld [vmem:[#allocation5 + $0x1648] sm:$0xff] }
 0x25a   :  { %7840 = vmatpush1.bf16.msra.mxu0 %v18110_v2  ;;  %v1188_v52 = vld [vmem:[#allocation5 + $0x21e8] sm:$0xff] }
 0x25b   :  { %7883 = vmatpush1.bf16.msra.mxu1 %v18494_v53  ;;  %7841 = vmatprep.subr.bf16.mxu0 %v18087_v57  ;;  %v1200_v2 = vld [vmem:[#allocation5 + $0x2248] sm:$0xff]  ;;  %v8693_v53 = vmul.f32 0.5, %v22139_v35  ;;  %v8717_v57 = vmul.f32 0.5, %v22149_v55  ;;  %v18374_v35 = vcombine.low %v804_v48, %v816_v49 }
 0x25c   :  { %7884 = vmatprep.subr.bf16.mxu1 %v18471_v4  ;;  %v1164_v10 = vld [vmem:[#allocation5 + $0x2128] sm:$0xff]  ;;  %v18759_v12 = vcombine.high %v1188_v52, %v1200_v2  ;;  %v18758_v55 = vcombine.low %v1188_v52, %v1200_v2 }
 0x25d   :  { %v1176_v42 = vld [vmem:[#allocation5 + $0x2188] sm:$0xff] }
 0x25e   :  { %7842 = vmatpush1.bf16.msra.mxu0 %v18086_v6  ;;  %v18375_v6 = vcombine.high %v804_v48, %v816_v49  ;;  %v1152_v24 = vld [vmem:[#allocation5 + $0x20c8] sm:$0xff]  ;;  %v18734_v29 = vcombine.low %v1164_v10, %v1176_v42 }
 0x25f   :  { %v21721_v22 = vpop.eup %21720  ;;  %7885 = vmatpush1.bf16.msra.mxu1 %v18470_v8  ;;  %7843 = vmatprep.subr.bf16.mxu0 %v18063_v9  ;;  %v780_v8 = vld [vmem:[#allocation5 + $0x1528] sm:$0xff] }
 0x260   :  { %7886 = vmatprep.subr.bf16.mxu1 %v18447_v13  ;;  %v9029_v41 = vadd.f32 1.0, %v21721_v22  ;;  %v792_v9 = vld [vmem:[#allocation5 + $0x1588] sm:$0xff] }
 0x261   :  { %v18351_v16 = vcombine.high %v780_v8, %v792_v9  ;;  %v768_v22 = vld [vmem:[#allocation5 + $0x14c8] sm:$0xff]  ;;  %v18350_v26 = vcombine.low %v780_v8, %v792_v9 }
 0x262   :  { %7844 = vmatpush1.bf16.msra.mxu0 %v18062_v17  ;;  %v9077_v1 = vmul.f32 %v9029_v41, %v8693_v53  ;;  %v756_v17 = vld [vmem:[#allocation5 + $0x1468] sm:$0xff] }
 0x263   :  { %v21723_v43 = vpop.eup %21722  ;;  %7887 = vmatpush1.bf16.msra.mxu1 %v18446_v14  ;;  %7845 = vmatprep.subr.bf16.mxu0 %v18423_v36  ;;  %v1140_v14 = vld [vmem:[#allocation5 + $0x2068] sm:$0xff]  ;;  %v18735_v36 = vcombine.high %v1164_v10, %v1176_v42 }
 0x264   :  { %7888 = vmatprep.subr.bf16.mxu1 %v18807_v30  ;;  %v9053_v60 = vadd.f32 1.0, %v21723_v43  ;;  %v18327_v30 = vcombine.high %v756_v17, %v768_v22  ;;  %v732_v34 = vld [vmem:[#allocation5 + $0x13a8] sm:$0xff]  ;;  %v18711_v43 = vcombine.high %v1140_v14, %v1152_v24  ;;  %v18710_v48 = vcombine.low %v1140_v14, %v1152_v24 }
 0x265   :  { %v1116_v41 = vld [vmem:[#allocation5 + $0x1fa8] sm:$0xff]  ;;  %v22164_v14 = vsub.s32 6, %v22031_v50 }
 0x266   :  { %7846 = vmatpush2.bf16.msra.mxu0 %v18422_v38  ;;  %v9101_v4 = vmul.f32 %v9053_v60, %v8717_v57  ;;  %v744_v38 = vld [vmem:[#allocation5 + $0x1408] sm:$0xff]  ;;  %v22161_v60 = vpop.f32.mrf.mxu1 }
 0x267   :  { %7889 = vmatpush2.bf16.msra.mxu1 %v18806_v56  ;;  %7847 = vmatprep.subr.bf16.mxu0 %v18399_v47  ;;  %v1128_v56 = vld [vmem:[#allocation5 + $0x2008] sm:$0xff]  ;;  %v18326_v47 = vcombine.low %v756_v17, %v768_v22  ;;  %v18303_v49 = vcombine.high %v732_v34, %v744_v38  ;;  %v289_v17 = vld [vmem:[#allocation5 + $0x5d0] sm:$0xff]  ;;  %23078 = vst [vmem:[#allocation22_spill] sm:$0xff] %v22164_v14 }
 0x268   :  { %7890 = vmatprep.subr.bf16.mxu1 %v18783_v44  ;;  %v22159_v13 = vpack.c.bf16 %v9101_v4, %v9077_v1  ;;  %v708_v52 = vld [vmem:[#allocation5 + $0x12e8] sm:$0xff]  ;;  %v18687_v53 = vcombine.high %v1116_v41, %v1128_v56  ;;  %v18686_v1 = vcombine.low %v1116_v41, %v1128_v56  ;;  %v7562_v9 = vpop.f32.mrf.mxu1  ;;  %v661_v22 = vld [vmem:[#allocation5 + $0x1170] sm:$0xff]  ;;  %v21809_v56 = vld [vmem:[#allocation7] sm:$0xff] }
 0x269   :  { %v720_v44 = vld [vmem:[#allocation5 + $0x1348] sm:$0xff]  ;;  %v265_v41 = vld [vmem:[#allocation5 + $0x510] sm:$0xff] }
 0x26a   :  { %23077 = vst [vmem:[#allocation21_spill] sm:$0xff] %v22159_v13  ;;  %7848 = vmatpush2.bf16.msra.mxu0 %v18398_v0  ;;  %v1092_v2 = vld [vmem:[#allocation5 + $0x1ee8] sm:$0xff]  ;;  %v18302_v0 = vcombine.low %v732_v34, %v744_v38  ;;  %v18279_v4 = vcombine.high %v708_v52, %v720_v44  ;;  %v18278_v42 = vcombine.low %v708_v52, %v720_v44  ;;  %v253_v38 = vld [vmem:[#allocation5 + $0x4b0] sm:$0xff] }
 0x26b   :  { %7891 = vmatpush2.bf16.msra.mxu1 %v18782_v5  ;;  %7849 = vmatprep.subr.bf16.mxu0 %v18375_v6  ;;  %v1104_v57 = vld [vmem:[#allocation5 + $0x1f48] sm:$0xff]  ;;  %v649_v52 = vld [vmem:[#allocation5 + $0x1110] sm:$0xff] }
 0x26c   :  { %7892 = vmatprep.subr.bf16.mxu1 %v18759_v12  ;;  %v684_v5 = vld [vmem:[#allocation5 + $0x1228] sm:$0xff]  ;;  %v18663_v10 = vcombine.high %v1092_v2, %v1104_v57 }
 0x26d   :  { %v696_v6 = vld [vmem:[#allocation5 + $0x1288] sm:$0xff] }
 0x26e   :  { %7850 = vmatpush2.bf16.msra.mxu0 %v18374_v35  ;;  %v1068_v8 = vld [vmem:[#allocation5 + $0x1e28] sm:$0xff]  ;;  %v18662_v35 = vcombine.low %v1092_v2, %v1104_v57  ;;  %v22169_v2 = vpop.f32.mrf.mxu0  ;;  %v17825_v57 = vcombine.high %v253_v38, %v265_v41 }
 0x26f   :  { %7893 = vmatpush2.bf16.msra.mxu1 %v18758_v55  ;;  %7851 = vmatprep.subr.bf16.mxu0 %v18351_v16  ;;  %v1080_v12 = vld [vmem:[#allocation5 + $0x1e88] sm:$0xff]  ;;  %v18255_v55 = vcombine.high %v684_v5, %v696_v6  ;;  %v277_v16 = vld [vmem:[#allocation5 + $0x570] sm:$0xff] }
 0x270   :  { %7894 = vmatprep.subr.bf16.mxu1 %v18735_v36  ;;  %v22166_v36 = vpop.f32.mrf.mxu1  ;;  %v18639_v24 = vcombine.high %v1068_v8, %v1080_v12  ;;  %v17849_v34 = vcombine.high %v277_v16, %v289_v17  ;;  %v17848_v44 = vcombine.low %v277_v16, %v289_v17 }
 0x272   :  { %7852 = vmatpush2.bf16.msra.mxu0 %v18350_v26  ;;  %v673_v26 = vld [vmem:[#allocation5 + $0x11d0] sm:$0xff] }
 0x273   :  { %7895 = vmatpush2.bf16.msra.mxu1 %v18734_v29  ;;  %7853 = vmatprep.subr.bf16.mxu0 %v18327_v30  ;;  %v18254_v29 = vcombine.low %v684_v5, %v696_v6  ;;  %v18638_v30 = vcombine.low %v1068_v8, %v1080_v12 }
 0x274   :  { %7896 = vmatprep.subr.bf16.mxu1 %v18711_v43  ;;  %v637_v43 = vld [vmem:[#allocation5 + $0x10b0] sm:$0xff] }
 0x275   :  { %v18209_v8 = vcombine.high %v637_v43, %v649_v52  ;;  %v18208_v17 = vcombine.low %v637_v43, %v649_v52 }
 0x276   :  { %7854 = vmatpush2.bf16.msra.mxu0 %v18326_v47  ;;  %v1288_v47 = vrot.slane %v21809_v56, %v22164_v14 }
 0x277   :  { %7897 = vmatpush2.bf16.msra.mxu1 %v18710_v48  ;;  %7855 = vmatprep.subr.bf16.mxu0 %v18303_v49  ;;  %v7566_v48 = vpop.f32.mrf.mxu1  ;;  %v18233_v49 = vcombine.high %v661_v22, %v673_v26 }
 0x278   :  { %7898 = vmatprep.subr.bf16.mxu1 %v18687_v53  ;;  %v18232_v53 = vcombine.low %v661_v22, %v673_v26  ;;  %v7563_v5 = vadd.f32 %v7562_v9, %v1288_v47  ;;  %v205_v22 = vld [vmem:[#allocation5 + $0x330] sm:$0xff] }
 0x279   :  { %v22171_v6 = vpop.f32.mrf.mxu1  ;;  %v589_v26 = vld [vmem:[#allocation5 + $0xf30] sm:$0xff] }
 0x27a   :  { %7856 = vmatpush2.bf16.msra.mxu0 %v18302_v0  ;;  %v229_v0 = vld [vmem:[#allocation5 + $0x3f0] sm:$0xff] }
 0x27b   :  { %7899 = vmatpush2.bf16.msra.mxu1 %v18686_v1  ;;  %7857 = vmatprep.subr.bf16.mxu0 %v18279_v4  ;;  %v241_v1 = vld [vmem:[#allocation5 + $0x450] sm:$0xff] }
 0x27c   :  { %7900 = vmatprep.subr.bf16.mxu1 %v18663_v10  ;;  %v613_v4 = vld [vmem:[#allocation5 + $0xff0] sm:$0xff]  ;;  %v17801_v9 = vcombine.high %v229_v0, %v241_v1  ;;  %v17800_v52 = vcombine.low %v229_v0, %v241_v1 }
 0x27d   :  { %v625_v10 = vld [vmem:[#allocation5 + $0x1050] sm:$0xff] }
 0x27e   :  { %7858 = vmatpush2.bf16.msra.mxu0 %v18278_v42  ;;  %v18185_v56 = vcombine.high %v613_v4, %v625_v10 }
 0x27f   :  { %7901 = vmatpush2.bf16.msra.mxu1 %v18662_v35  ;;  %7859 = vmatprep.subr.bf16.mxu0 %v18255_v55  ;;  %v17824_v55 = vcombine.low %v253_v38, %v265_v41 }
 0x280   :  { %7902 = vmatprep.subr.bf16.mxu1 %v18639_v24  ;;  %v217_v24 = vld [vmem:[#allocation5 + $0x390] sm:$0xff] }
 0x281   :  { %v17776_v0 = vcombine.low %v205_v22, %v217_v24 }
 0x282   :  { %7860 = vmatpush2.bf16.msra.mxu0 %v18254_v29  ;;  %v7567_v29 = vadd.f32 %v7566_v48, %v1288_v47  ;;  %v18184_v47 = vcombine.low %v613_v4, %v625_v10  ;;  %v17777_v48 = vcombine.high %v205_v22, %v217_v24  ;;  %v157_v10 = vld [vmem:[#allocation5 + $0x1b0] sm:$0xff] }
 0x283   :  { %7903 = vmatpush2.bf16.msra.mxu1 %v18638_v30  ;;  %7915 = vmatprep.subr.bf16.mxu0 %v17849_v34 }
 0x284   :  { %7958 = vmatprep.subr.bf16.mxu1 %v18233_v49  ;;  %v601_v49 = vld [vmem:[#allocation5 + $0xf90] sm:$0xff] }
 0x285   :  { %v7605_v12 = vpop.f32.mrf.mxu0  ;;  %7862 = vmatmul.mubr.bf16.vlgmr.msra.gmra.mxu0 %v22013_v25  ;;  %v18160_v1 = vcombine.low %v589_v26, %v601_v49 }
 0x286   :  { %v7606_v42 = vadd.f32 %v7605_v12, %v7563_v5  ;;  %v7648_v35 = vpop.f32.mrf.mxu1  ;;  %7905 = vmatmul.mubr.bf16.vlgmr.msra.gmra.mxu1 %v22021_v39  ;;  %7916 = vmatpush1.bf16.msra.mxu0 %v17848_v44  ;;  %v565_v5 = vld [vmem:[#allocation5 + $0xe70] sm:$0xff] }
 0x287   :  { %7959 = vmatpush1.bf16.msra.mxu1 %v18232_v53  ;;  %v22175_v16 = vpop.f32.mrf.mxu0  ;;  %7917 = vmatprep.subr.bf16.mxu0 %v17825_v57  ;;  %v181_v53 = vld [vmem:[#allocation5 + $0x270] sm:$0xff] }
 0x288   :  { %v22177_v30 = vadd.f32 %v7648_v35, %v7606_v42  ;;  %v22179_v34 = vpop.f32.mrf.mxu1  ;;  %7960 = vmatprep.subr.bf16.mxu1 %v18209_v8  ;;  %7947 = vmatprep.mubr.bf16.mxu0 %v22005_v58  ;;  %v193_v57 = vld [vmem:[#allocation5 + $0x2d0] sm:$0xff]  ;;  %v18161_v42 = vcombine.high %v589_v26, %v601_v49 }
 0x289   :  { %23079 = vst [vmem:[#allocation23_spill] sm:$0xff] %v22179_v34  ;;  %v7609_v38 = vpop.f32.mrf.mxu0  ;;  %7990 = vmatprep.mubr.bf16.mxu1 %v22007_v63  ;;  %v577_v35 = vld [vmem:[#allocation5 + $0xed0] sm:$0xff]  ;;  %v17753_v4 = vcombine.high %v181_v53, %v193_v57  ;;  %v1178_v34 = vld [vmem:[#allocation5 + $0x2198] sm:$0xff] }
 0x28a   :  { %v8743_v41 = vmul.f32 0.044715, %v22177_v30  ;;  %v7610_v43 = vadd.f32 %v7609_v38, %v7567_v29  ;;  %7918 = vmatpush1.bf16.msra.mxu0 %v17824_v55  ;;  %v7652_v44 = vpop.f32.mrf.mxu1  ;;  %v18136_v22 = vcombine.low %v565_v5, %v577_v35  ;;  %v133_v26 = vld [vmem:[#allocation5 + $0xf0] sm:$0xff] }
 0x28b   :  { %7961 = vmatpush1.bf16.msra.mxu1 %v18208_v17  ;;  %7919 = vmatprep.subr.bf16.mxu0 %v17801_v9  ;;  %v169_v17 = vld [vmem:[#allocation5 + $0x210] sm:$0xff] }
 0x28c   :  { %v8791_v8 = vmul.f32 %v8743_v41, %v22177_v30  ;;  %v22185_v12 = vadd.f32 %v7652_v44, %v7610_v43  ;;  %7962 = vmatprep.subr.bf16.mxu1 %v18185_v56  ;;  %v541_v9 = vld [vmem:[#allocation5 + $0xdb0] sm:$0xff]  ;;  %v18137_v56 = vcombine.high %v565_v5, %v577_v35  ;;  %v17729_v24 = vcombine.high %v157_v10, %v169_v17 }
 0x28d   :  { %v553_v41 = vld [vmem:[#allocation5 + $0xe10] sm:$0xff] }
 0x28e   :  { %v8839_v13 = vmul.f32 %v8791_v8, %v22177_v30  ;;  %v8767_v55 = vmul.f32 0.044715, %v22185_v12  ;;  %7920 = vmatpush1.bf16.msra.mxu0 %v17800_v52  ;;  %v17752_v52 = vcombine.low %v181_v53, %v193_v57  ;;  %v145_v49 = vld [vmem:[#allocation5 + $0x150] sm:$0xff] }
 0x28f   :  { %7963 = vmatpush1.bf16.msra.mxu1 %v18184_v47  ;;  %7921 = vmatprep.subr.bf16.mxu0 %v17777_v48  ;;  %v517_v47 = vld [vmem:[#allocation5 + $0xcf0] sm:$0xff]  ;;  %v18113_v48 = vcombine.high %v541_v9, %v553_v41  ;;  %v17705_v53 = vcombine.high %v133_v26, %v145_v49 }
 0x290   :  { %v8887_v29 = vadd.f32 %v8839_v13, %v22177_v30  ;;  %v8815_v38 = vmul.f32 %v8767_v55, %v22185_v12  ;;  %7964 = vmatprep.subr.bf16.mxu1 %v18161_v42  ;;  %v529_v8 = vld [vmem:[#allocation5 + $0xd50] sm:$0xff]  ;;  %v17728_v55 = vcombine.low %v157_v10, %v169_v17 }
 0x291   :  { %v109_v57 = vld [vmem:[#allocation5 + $0x30] sm:$0xff]  ;;  %v18089_v35 = vcombine.high %v517_v47, %v529_v8 }
 0x292   :  { %v8935_v43 = vmul.f32 0.7978846, %v8887_v29  ;;  %v8863_v44 = vmul.f32 %v8815_v38, %v22185_v12  ;;  %7922 = vmatpush1.bf16.msra.mxu0 %v17776_v0  ;;  %v18112_v0 = vcombine.low %v541_v9, %v553_v41  ;;  %v493_v5 = vld [vmem:[#allocation5 + $0xc30] sm:$0xff]  ;;  %v17704_v29 = vcombine.low %v133_v26, %v145_v49 }
 0x293   :  { %7965 = vmatpush1.bf16.msra.mxu1 %v18160_v1  ;;  %7923 = vmatprep.subr.bf16.mxu0 %v17753_v4  ;;  %v121_v1 = vld [vmem:[#allocation5 + $0x90] sm:$0xff]  ;;  %v18088_v38 = vcombine.low %v517_v47, %v529_v8 }
 0x294   :  { %21724 = vtanh.f32 %v8935_v43  ;;  %v8911_v13 = vadd.f32 %v8863_v44, %v22185_v12  ;;  %7966 = vmatprep.subr.bf16.mxu1 %v18137_v56  ;;  %v505_v4 = vld [vmem:[#allocation5 + $0xc90] sm:$0xff]  ;;  %v17681_v56 = vcombine.high %v109_v57, %v121_v1  ;;  %v17680_v41 = vcombine.low %v109_v57, %v121_v1 }
 0x295   :  { %v469_v43 = vld [vmem:[#allocation5 + $0xb70] sm:$0xff]  ;;  %v18065_v17 = vcombine.high %v493_v5, %v505_v4 }
 0x296   :  { %v8959_v42 = vmul.f32 0.7978846, %v8911_v13  ;;  %7924 = vmatpush1.bf16.msra.mxu0 %v17752_v52  ;;  %v481_v44 = vld [vmem:[#allocation5 + $0xbd0] sm:$0xff]  ;;  %v18064_v52 = vcombine.low %v493_v5, %v505_v4 }
 0x297   :  { %7967 = vmatpush1.bf16.msra.mxu1 %v18136_v22  ;;  %7925 = vmatprep.subr.bf16.mxu0 %v17729_v24  ;;  %v853_v10 = vld [vmem:[#allocation5 + $0x1770] sm:$0xff]  ;;  %v18041_v22 = vcombine.high %v469_v43, %v481_v44  ;;  %v18040_v8 = vcombine.low %v469_v43, %v481_v44 }
 0x298   :  { %21726 = vtanh.f32 %v8959_v42  ;;  %7968 = vmatprep.subr.bf16.mxu1 %v18113_v48  ;;  %v865_v9 = vld [vmem:[#allocation5 + $0x17d0] sm:$0xff] }
 0x299   :  { %v445_v24 = vld [vmem:[#allocation5 + $0xab0] sm:$0xff]  ;;  %v18425_v26 = vcombine.high %v853_v10, %v865_v9  ;;  %v18424_v42 = vcombine.low %v853_v10, %v865_v9 }
 0x29a   :  { %7926 = vmatpush1.bf16.msra.mxu0 %v17728_v55  ;;  %v457_v13 = vld [vmem:[#allocation5 + $0xb10] sm:$0xff] }
 0x29b   :  { %7969 = vmatpush1.bf16.msra.mxu1 %v18112_v0  ;;  %7927 = vmatprep.subr.bf16.mxu0 %v17705_v53  ;;  %v829_v48 = vld [vmem:[#allocation5 + $0x16b0] sm:$0xff]  ;;  %v18017_v55 = vcombine.high %v445_v24, %v457_v13 }
 0x29c   :  { %7970 = vmatprep.subr.bf16.mxu1 %v18089_v35  ;;  %v841_v49 = vld [vmem:[#allocation5 + $0x1710] sm:$0xff] }
 0x29d   :  { %v421_v0 = vld [vmem:[#allocation5 + $0x9f0] sm:$0xff]  ;;  %v18401_v1 = vcombine.high %v829_v48, %v841_v49  ;;  %v18400_v43 = vcombine.low %v829_v48, %v841_v49 }
 0x29e   :  { %7928 = vmatpush1.bf16.msra.mxu0 %v17704_v29  ;;  %v433_v53 = vld [vmem:[#allocation5 + $0xa50] sm:$0xff]  ;;  %v18016_v29 = vcombine.low %v445_v24, %v457_v13 }
 0x29f   :  { %7971 = vmatpush1.bf16.msra.mxu1 %v18088_v38  ;;  %7929 = vmatprep.subr.bf16.mxu0 %v17681_v56  ;;  %v805_v57 = vld [vmem:[#allocation5 + $0x15f0] sm:$0xff]  ;;  %v8695_v38 = vmul.f32 0.5, %v22177_v30  ;;  %v8719_v56 = vmul.f32 0.5, %v22185_v12  ;;  %v17993_v44 = vcombine.high %v421_v0, %v433_v53 }
 0x2a0   :  { %7972 = vmatprep.subr.bf16.mxu1 %v18065_v17  ;;  %v817_v5 = vld [vmem:[#allocation5 + $0x1650] sm:$0xff] }
 0x2a1   :  { %v21725_v47 = vpop.eup %21724  ;;  %v397_v10 = vld [vmem:[#allocation5 + $0x930] sm:$0xff]  ;;  %v18376_v30 = vcombine.low %v805_v57, %v817_v5 }
 0x2a2   :  { %7930 = vmatpush1.bf16.msra.mxu0 %v17680_v41  ;;  %v9031_v35 = vadd.f32 1.0, %v21725_v47  ;;  %v409_v9 = vld [vmem:[#allocation5 + $0x990] sm:$0xff] }
 0x2a3   :  { %7973 = vmatpush1.bf16.msra.mxu1 %v18064_v52  ;;  %7931 = vmatprep.subr.bf16.mxu0 %v18041_v22  ;;  %v781_v41 = vld [vmem:[#allocation5 + $0x1530] sm:$0xff]  ;;  %v18377_v52 = vcombine.high %v805_v57, %v817_v5  ;;  %v17969_v12 = vcombine.high %v397_v10, %v409_v9 }
 0x2a4   :  { %7974 = vmatprep.subr.bf16.mxu1 %v18425_v26  ;;  %v793_v22 = vld [vmem:[#allocation5 + $0x1590] sm:$0xff]  ;;  %v9079_v26 = vmul.f32 %v9031_v35, %v8695_v38 }
 0x2a5   :  { %v21727_v4 = vpop.eup %21726  ;;  %v373_v13 = vld [vmem:[#allocation5 + $0x870] sm:$0xff]  ;;  %v18353_v49 = vcombine.high %v781_v41, %v793_v22  ;;  %v18352_v35 = vcombine.low %v781_v41, %v793_v22 }
 0x2a6   :  { %7932 = vmatpush2.bf16.msra.mxu0 %v18040_v8  ;;  %v9055_v17 = vadd.f32 1.0, %v21727_v4  ;;  %v17992_v8 = vcombine.low %v421_v0, %v433_v53  ;;  %v757_v48 = vld [vmem:[#allocation5 + $0x1470] sm:$0xff] }
 0x2a7   :  { %7975 = vmatpush2.bf16.msra.mxu1 %v18424_v42  ;;  %7933 = vmatprep.subr.bf16.mxu0 %v18017_v55  ;;  %v385_v42 = vld [vmem:[#allocation5 + $0x8d0] sm:$0xff] }
 0x2a8   :  { %7976 = vmatprep.subr.bf16.mxu1 %v18401_v1  ;;  %v9103_v47 = vmul.f32 %v9055_v17, %v8719_v56  ;;  %v769_v55 = vld [vmem:[#allocation5 + $0x14d0] sm:$0xff]  ;;  %v17968_v1 = vcombine.low %v397_v10, %v409_v9  ;;  %v17945_v4 = vcombine.high %v373_v13, %v385_v42  ;;  %v17944_v57 = vcombine.low %v373_v13, %v385_v42 }
 0x2a9   :  { %v361_v0 = vld [vmem:[#allocation5 + $0x810] sm:$0xff]  ;;  %v18329_v38 = vcombine.high %v757_v48, %v769_v55  ;;  %v18328_v5 = vcombine.low %v757_v48, %v769_v55 }
 0x2aa   :  { %7934 = vmatpush2.bf16.msra.mxu0 %v18016_v29  ;;  %v22195_v24 = vpack.c.bf16 %v9103_v47, %v9079_v26  ;;  %v349_v29 = vld [vmem:[#allocation5 + $0x7b0] sm:$0xff] }
 0x2ab   :  { %7977 = vmatpush2.bf16.msra.mxu1 %v18400_v43  ;;  %7935 = vmatprep.subr.bf16.mxu0 %v17993_v44  ;;  %v733_v53 = vld [vmem:[#allocation5 + $0x13b0] sm:$0xff]  ;;  %v17921_v17 = vcombine.high %v349_v29, %v361_v0  ;;  %v17920_v41 = vcombine.low %v349_v29, %v361_v0  ;;  %v290_v29 = vld [vmem:[#allocation5 + $0x5d8] sm:$0xff]  ;;  %v22197_v0 = vld [vmem:[#allocation7 + $0x8] sm:$0xff] }
 0x2ac   :  { %23080 = vst [vmem:[#allocation24_spill] sm:$0xff] %v22195_v24  ;;  %7978 = vmatprep.subr.bf16.mxu1 %v18377_v52  ;;  %v745_v56 = vld [vmem:[#allocation5 + $0x1410] sm:$0xff]  ;;  %v206_v24 = vld [vmem:[#allocation5 + $0x338] sm:$0xff] }
 0x2ad   :  { %v325_v43 = vld [vmem:[#allocation5 + $0x6f0] sm:$0xff]  ;;  %v18305_v10 = vcombine.high %v733_v53, %v745_v56  ;;  %v18304_v22 = vcombine.low %v733_v53, %v745_v56 }
 0x2ae   :  { %7936 = vmatpush2.bf16.msra.mxu0 %v17992_v8  ;;  %v337_v44 = vld [vmem:[#allocation5 + $0x750] sm:$0xff] }
 0x2af   :  { %7979 = vmatpush2.bf16.msra.mxu1 %v18376_v30  ;;  %7937 = vmatprep.subr.bf16.mxu0 %v17969_v12  ;;  %v709_v52 = vld [vmem:[#allocation5 + $0x12f0] sm:$0xff]  ;;  %v17897_v26 = vcombine.high %v325_v43, %v337_v44  ;;  %v17896_v42 = vcombine.low %v325_v43, %v337_v44  ;;  %v266_v44 = vld [vmem:[#allocation5 + $0x518] sm:$0xff] }
 0x2b0   :  { %7980 = vmatprep.subr.bf16.mxu1 %v18353_v49  ;;  %v721_v9 = vld [vmem:[#allocation5 + $0x1350] sm:$0xff] }
 0x2b1   :  { %v301_v47 = vld [vmem:[#allocation5 + $0x630] sm:$0xff]  ;;  %v18281_v12 = vcombine.high %v709_v52, %v721_v9  ;;  %v18280_v48 = vcombine.low %v709_v52, %v721_v9  ;;  %v1296_v52 = vrot.slane %v22197_v0, %v22034_v61  ;;  %v22201_v9 = vpop.f32.mrf.mxu0 }
 0x2b2   :  { %7938 = vmatpush2.bf16.msra.mxu0 %v17968_v1  ;;  %v313_v8 = vld [vmem:[#allocation5 + $0x690] sm:$0xff] }
 0x2b3   :  { %7981 = vmatpush2.bf16.msra.mxu1 %v18352_v35  ;;  %7939 = vmatprep.subr.bf16.mxu0 %v17945_v4  ;;  %v685_v30 = vld [vmem:[#allocation5 + $0x1230] sm:$0xff]  ;;  %v17873_v49 = vcombine.high %v301_v47, %v313_v8  ;;  %v278_v35 = vld [vmem:[#allocation5 + $0x578] sm:$0xff]  ;;  %v17872_v53 = vcombine.low %v301_v47, %v313_v8 }
 0x2b4   :  { %7982 = vmatprep.subr.bf16.mxu1 %v18329_v38  ;;  %v697_v13 = vld [vmem:[#allocation5 + $0x1290] sm:$0xff]  ;;  %v17851_v43 = vcombine.high %v278_v35, %v290_v29  ;;  %v230_v8 = vld [vmem:[#allocation5 + $0x3f8] sm:$0xff] }
 0x2b5   :  { %v1045_v55 = vld [vmem:[#allocation5 + $0x1d70] sm:$0xff]  ;;  %v18257_v4 = vcombine.high %v685_v30, %v697_v13  ;;  %v18256_v38 = vcombine.low %v685_v30, %v697_v13  ;;  %v22203_v30 = vpop.f32.mrf.mxu1  ;;  %v242_v13 = vld [vmem:[#allocation5 + $0x458] sm:$0xff] }
 0x2b6   :  { %7940 = vmatpush2.bf16.msra.mxu0 %v17944_v57  ;;  %v1057_v1 = vld [vmem:[#allocation5 + $0x1dd0] sm:$0xff] }
 0x2b7   :  { %7983 = vmatpush2.bf16.msra.mxu1 %v18328_v5  ;;  %7941 = vmatprep.subr.bf16.mxu0 %v17921_v17  ;;  %v18617_v56 = vcombine.high %v1045_v55, %v1057_v1  ;;  %v1021_v57 = vld [vmem:[#allocation5 + $0x1cb0] sm:$0xff]  ;;  %v254_v17 = vld [vmem:[#allocation5 + $0x4b8] sm:$0xff] }
 0x2b8   :  { %7984 = vmatprep.subr.bf16.mxu1 %v18305_v10  ;;  %v1033_v5 = vld [vmem:[#allocation5 + $0x1d10] sm:$0xff]  ;;  %v18616_v10 = vcombine.low %v1045_v55, %v1057_v1 }
 0x2b9   :  { %v1009_v47 = vld [vmem:[#allocation5 + $0x1c50] sm:$0xff]  ;;  %v18592_v55 = vcombine.low %v1021_v57, %v1033_v5 }
 0x2ba   :  { %7942 = vmatpush2.bf16.msra.mxu0 %v17920_v41  ;;  %v17850_v41 = vcombine.low %v278_v35, %v290_v29  ;;  %v17826_v35 = vcombine.low %v254_v17, %v266_v44  ;;  %v973_v29 = vld [vmem:[#allocation5 + $0x1b30] sm:$0xff] }
 0x2bb   :  { %7985 = vmatpush2.bf16.msra.mxu1 %v18304_v22  ;;  %7943 = vmatprep.subr.bf16.mxu0 %v17897_v26  ;;  %v18593_v22 = vcombine.high %v1021_v57, %v1033_v5  ;;  %v997_v26 = vld [vmem:[#allocation5 + $0x1bf0] sm:$0xff] }
 0x2bc   :  { %7986 = vmatprep.subr.bf16.mxu1 %v18281_v12  ;;  %v17827_v12 = vcombine.high %v254_v17, %v266_v44  ;;  %v18568_v5 = vcombine.low %v997_v26, %v1009_v47  ;;  %v17802_v44 = vcombine.low %v230_v8, %v242_v13 }
 0x2be   :  { %7944 = vmatpush2.bf16.msra.mxu0 %v17896_v42 }
 0x2bf   :  { %7987 = vmatpush2.bf16.msra.mxu1 %v18280_v48  ;;  %7945 = vmatprep.subr.bf16.mxu0 %v17873_v49 }
 0x2c0   :  { %7988 = vmatprep.subr.bf16.mxu1 %v18257_v4  ;;  %v18569_v4 = vcombine.high %v997_v26, %v1009_v47  ;;  %v925_v47 = vld [vmem:[#allocation5 + $0x19b0] sm:$0xff] }
 0x2c2   :  { %7946 = vmatpush2.bf16.msra.mxu0 %v17872_v53 }
 0x2c3   :  { %7989 = vmatpush2.bf16.msra.mxu1 %v18256_v38  ;;  %8001 = vmatprep.subr.bf16.mxu0 %v18617_v56  ;;  %v17803_v56 = vcombine.high %v230_v8, %v242_v13  ;;  %v158_v8 = vld [vmem:[#allocation5 + $0x1b8] sm:$0xff] }
 0x2c4   :  { %8044 = vmatprep.subr.bf16.mxu1 %v17851_v43  ;;  %v985_v43 = vld [vmem:[#allocation5 + $0x1b90] sm:$0xff]  ;;  %v170_v13 = vld [vmem:[#allocation5 + $0x218] sm:$0xff] }
 0x2c5   :  { %v7691_v42 = vpop.f32.mrf.mxu0  ;;  %7948 = vmatmul.mubr.bf16.vlgmr.msra.gmra.mxu0 %v22011_v21  ;;  %v18544_v23 = vcombine.low %v973_v29, %v985_v43 }
 0x2c6   :  { %v7692_v48 = vadd.f32 %v7691_v42, %v1296_v52  ;;  %v7734_v49 = vpop.f32.mrf.mxu1  ;;  %7991 = vmatmul.mubr.bf16.vlgmr.msra.gmra.mxu1 %v22013_v25  ;;  %8002 = vmatpush1.bf16.msra.mxu0 %v18616_v10  ;;  %v218_v10 = vld [vmem:[#allocation5 + $0x398] sm:$0xff] }
 0x2c7   :  { %8045 = vmatpush1.bf16.msra.mxu1 %v17850_v41  ;;  %v22207_v1 = vpop.f32.mrf.mxu0  ;;  %8003 = vmatprep.subr.bf16.mxu0 %v18593_v22  ;;  %v18545_v41 = vcombine.high %v973_v29, %v985_v43  ;;  %v913_v29 = vld [vmem:[#allocation5 + $0x1950] sm:$0xff]  ;;  %v134_v43 = vld [vmem:[#allocation5 + $0xf8] sm:$0xff] }
 0x2c8   :  { %23081 = vst [vmem:[#allocation25_spill] sm:$0xff] %v22207_v1  ;;  %v22209_v53 = vadd.f32 %v7734_v49, %v7692_v48  ;;  %v22211_v38 = vpop.f32.mrf.mxu1  ;;  %8046 = vmatprep.subr.bf16.mxu1 %v17827_v12  ;;  %8033 = vmatprep.mubr.bf16.mxu0 %v22015_v32  ;;  %v17779_v12 = vcombine.high %v206_v24, %v218_v10  ;;  %v949_v48 = vld [vmem:[#allocation5 + $0x1a70] sm:$0xff]  ;;  %v194_v1 = vld [vmem:[#allocation5 + $0x2d8] sm:$0xff] }
 0x2c9   :  { %23082 = vst [vmem:[#allocation26_spill] sm:$0xff] %v22211_v38  ;;  %v7695_v42 = vpop.f32.mrf.mxu0  ;;  %8076 = vmatprep.mubr.bf16.mxu1 %v22005_v58  ;;  %v961_v49 = vld [vmem:[#allocation5 + $0x1ad0] sm:$0xff]  ;;  %v182_v38 = vld [vmem:[#allocation5 + $0x278] sm:$0xff] }
 0x2ca   :  { %v7696_v57 = vadd.f32 %v7695_v42, %v1296_v52  ;;  %8004 = vmatpush1.bf16.msra.mxu0 %v18592_v55  ;;  %v7738_v17 = vpop.f32.mrf.mxu1  ;;  %v17778_v52 = vcombine.low %v206_v24, %v218_v10  ;;  %v18521_v55 = vcombine.high %v949_v48, %v961_v49  ;;  %v17755_v26 = vcombine.high %v182_v38, %v194_v1 }
 0x2cb   :  { %8047 = vmatpush1.bf16.msra.mxu1 %v17826_v35  ;;  %8005 = vmatprep.subr.bf16.mxu0 %v18569_v4  ;;  %v937_v35 = vld [vmem:[#allocation5 + $0x1a10] sm:$0xff]  ;;  %v18520_v4 = vcombine.low %v949_v48, %v961_v49  ;;  %v17730_v10 = vcombine.low %v158_v8, %v170_v13  ;;  %v110_v48 = vld [vmem:[#allocation5 + $0x38] sm:$0xff] }
 0x2cc   :  { %v22215_v22 = vadd.f32 %v7738_v17, %v7696_v57  ;;  %8048 = vmatprep.subr.bf16.mxu1 %v17803_v56  ;;  %v17754_v56 = vcombine.low %v182_v38, %v194_v1  ;;  %v18497_v42 = vcombine.high %v925_v47, %v937_v35  ;;  %v17731_v57 = vcombine.high %v158_v8, %v170_v13  ;;  %v146_v17 = vld [vmem:[#allocation5 + $0x158] sm:$0xff] }
 0x2cd   :  { %v18496_v24 = vcombine.low %v925_v47, %v937_v35  ;;  %v122_v49 = vld [vmem:[#allocation5 + $0x98] sm:$0xff]  ;;  %v17706_v38 = vcombine.low %v134_v43, %v146_v17  ;;  %v1249_v47 = vld [vmem:[#allocation5 + $0x23d0] sm:$0xff] }
 0x2ce   :  { %8006 = vmatpush1.bf16.msra.mxu0 %v18568_v5  ;;  %v901_v5 = vld [vmem:[#allocation5 + $0x18f0] sm:$0xff]  ;;  %v470_v35 = vld [vmem:[#allocation5 + $0xb78] sm:$0xff]  ;;  %v17682_v13 = vcombine.low %v110_v48, %v122_v49 }
 0x2cf   :  { %8049 = vmatpush1.bf16.msra.mxu1 %v17802_v44  ;;  %8007 = vmatprep.subr.bf16.mxu0 %v18545_v41  ;;  %v18473_v44 = vcombine.high %v901_v5, %v913_v29  ;;  %v17707_v41 = vcombine.high %v134_v43, %v146_v17  ;;  %v18472_v1 = vcombine.low %v901_v5, %v913_v29  ;;  %v1225_v5 = vld [vmem:[#allocation5 + $0x2310] sm:$0xff]  ;;  %v446_v29 = vld [vmem:[#allocation5 + $0xab8] sm:$0xff] }
 0x2d0   :  { %8050 = vmatprep.subr.bf16.mxu1 %v17779_v12  ;;  %v889_v12 = vld [vmem:[#allocation5 + $0x1890] sm:$0xff] }
 0x2d2   :  { %8008 = vmatpush1.bf16.msra.mxu0 %v18544_v23  ;;  %v877_v23 = vld [vmem:[#allocation5 + $0x1830] sm:$0xff] }
 0x2d3   :  { %8051 = vmatpush1.bf16.msra.mxu1 %v17778_v52  ;;  %8009 = vmatprep.subr.bf16.mxu0 %v18521_v55  ;;  %v18449_v52 = vcombine.high %v877_v23, %v889_v12  ;;  %v17683_v55 = vcombine.high %v110_v48, %v122_v49  ;;  %v18448_v8 = vcombine.low %v877_v23, %v889_v12  ;;  %v1201_v23 = vld [vmem:[#allocation5 + $0x2250] sm:$0xff]  ;;  %v422_v12 = vld [vmem:[#allocation5 + $0x9f8] sm:$0xff] }
 0x2d4   :  { %8052 = vmatprep.subr.bf16.mxu1 %v17755_v26  ;;  %v1237_v26 = vld [vmem:[#allocation5 + $0x2370] sm:$0xff] }
 0x2d5   :  { %v18808_v43 = vcombine.low %v1237_v26, %v1249_v47 }
 0x2d6   :  { %8010 = vmatpush1.bf16.msra.mxu0 %v18520_v4  ;;  %v482_v4 = vld [vmem:[#allocation5 + $0xbd8] sm:$0xff] }
 0x2d7   :  { %8053 = vmatpush1.bf16.msra.mxu1 %v17754_v56  ;;  %8011 = vmatprep.subr.bf16.mxu0 %v18497_v42  ;;  %v18809_v56 = vcombine.high %v1237_v26, %v1249_v47  ;;  %v18043_v42 = vcombine.high %v470_v35, %v482_v4  ;;  %v18042_v17 = vcombine.low %v470_v35, %v482_v4  ;;  %v1177_v26 = vld [vmem:[#allocation5 + $0x2190] sm:$0xff]  ;;  %v398_v47 = vld [vmem:[#allocation5 + $0x938] sm:$0xff] }
 0x2d8   :  { %8054 = vmatprep.subr.bf16.mxu1 %v17731_v57  ;;  %v1213_v57 = vld [vmem:[#allocation5 + $0x22b0] sm:$0xff] }
 0x2d9   :  { %v18784_v48 = vcombine.low %v1213_v57, %v1225_v5 }
 0x2da   :  { %8012 = vmatpush1.bf16.msra.mxu0 %v18496_v24  ;;  %v458_v24 = vld [vmem:[#allocation5 + $0xb18] sm:$0xff] }
 0x2db   :  { %8055 = vmatpush1.bf16.msra.mxu1 %v17730_v10  ;;  %8013 = vmatprep.subr.bf16.mxu0 %v18473_v44  ;;  %v18785_v10 = vcombine.high %v1213_v57, %v1225_v5  ;;  %v18019_v44 = vcombine.high %v446_v29, %v458_v24  ;;  %v18018_v49 = vcombine.low %v446_v29, %v458_v24  ;;  %v1153_v57 = vld [vmem:[#allocation5 + $0x20d0] sm:$0xff]  ;;  %v374_v5 = vld [vmem:[#allocation5 + $0x878] sm:$0xff] }
 0x2dc   :  { %8056 = vmatprep.subr.bf16.mxu1 %v17707_v41  ;;  %v1189_v41 = vld [vmem:[#allocation5 + $0x21f0] sm:$0xff] }
 0x2dd   :  { %v18760_v35 = vcombine.low %v1189_v41, %v1201_v23 }
 0x2de   :  { %8014 = vmatpush1.bf16.msra.mxu0 %v18472_v1  ;;  %v434_v1 = vld [vmem:[#allocation5 + $0xa58] sm:$0xff] }
 0x2df   :  { %8057 = vmatpush1.bf16.msra.mxu1 %v17706_v38  ;;  %8015 = vmatprep.subr.bf16.mxu0 %v18449_v52  ;;  %v18761_v38 = vcombine.high %v1189_v41, %v1201_v23  ;;  %v17995_v52 = vcombine.high %v422_v12, %v434_v1  ;;  %v17994_v4 = vcombine.low %v422_v12, %v434_v1  ;;  %v1129_v41 = vld [vmem:[#allocation5 + $0x2010] sm:$0xff]  ;;  %v350_v23 = vld [vmem:[#allocation5 + $0x7b8] sm:$0xff] }
 0x2e0   :  { %8058 = vmatprep.subr.bf16.mxu1 %v17683_v55  ;;  %v1165_v55 = vld [vmem:[#allocation5 + $0x2130] sm:$0xff] }
 0x2e1   :  { %v18736_v29 = vcombine.low %v1165_v55, %v1177_v26 }
 0x2e2   :  { %8016 = vmatpush1.bf16.msra.mxu0 %v18448_v8  ;;  %v410_v8 = vld [vmem:[#allocation5 + $0x998] sm:$0xff] }
 0x2e3   :  { %8059 = vmatpush1.bf16.msra.mxu1 %v17682_v13  ;;  %8017 = vmatprep.subr.bf16.mxu0 %v18809_v56  ;;  %v18737_v13 = vcombine.high %v1165_v55, %v1177_v26  ;;  %v17971_v56 = vcombine.high %v398_v47, %v410_v8  ;;  %v17970_v24 = vcombine.low %v398_v47, %v410_v8  ;;  %v1105_v55 = vld [vmem:[#allocation5 + $0x1f50] sm:$0xff]  ;;  %v326_v26 = vld [vmem:[#allocation5 + $0x6f8] sm:$0xff] }
 0x2e4   :  { %8060 = vmatprep.subr.bf16.mxu1 %v18043_v42  ;;  %v1141_v42 = vld [vmem:[#allocation5 + $0x2070] sm:$0xff] }
 0x2e5   :  { %v18712_v12 = vcombine.low %v1141_v42, %v1153_v57 }
 0x2e6   :  { %8018 = vmatpush2.bf16.msra.mxu0 %v18808_v43  ;;  %v386_v43 = vld [vmem:[#allocation5 + $0x8d8] sm:$0xff] }
 0x2e7   :  { %8061 = vmatpush2.bf16.msra.mxu1 %v18042_v17  ;;  %8019 = vmatprep.subr.bf16.mxu0 %v18785_v10  ;;  %v18713_v17 = vcombine.high %v1141_v42, %v1153_v57  ;;  %v17947_v10 = vcombine.high %v374_v5, %v386_v43  ;;  %v17946_v1 = vcombine.low %v374_v5, %v386_v43  ;;  %v1081_v42 = vld [vmem:[#allocation5 + $0x1e90] sm:$0xff]  ;;  %v302_v57 = vld [vmem:[#allocation5 + $0x638] sm:$0xff] }
 0x2e8   :  { %8062 = vmatprep.subr.bf16.mxu1 %v18019_v44  ;;  %v1117_v44 = vld [vmem:[#allocation5 + $0x1fb0] sm:$0xff] }
 0x2e9   :  { %v18688_v47 = vcombine.low %v1117_v44, %v1129_v41 }
 0x2ea   :  { %8020 = vmatpush2.bf16.msra.mxu0 %v18784_v48  ;;  %v362_v48 = vld [vmem:[#allocation5 + $0x818] sm:$0xff] }
 0x2eb   :  { %8063 = vmatpush2.bf16.msra.mxu1 %v18018_v49  ;;  %8021 = vmatprep.subr.bf16.mxu0 %v18761_v38  ;;  %v18689_v49 = vcombine.high %v1117_v44, %v1129_v41  ;;  %v17923_v38 = vcombine.high %v350_v23, %v362_v48  ;;  %v17922_v8 = vcombine.low %v350_v23, %v362_v48  ;;  %v674_v44 = vld [vmem:[#allocation5 + $0x11d8] sm:$0xff] }
 0x2ec   :  { %8064 = vmatprep.subr.bf16.mxu1 %v17995_v52  ;;  %v1093_v52 = vld [vmem:[#allocation5 + $0x1ef0] sm:$0xff]  ;;  %v1046_v41 = vld [vmem:[#allocation5 + $0x1d78] sm:$0xff] }
 0x2ed   :  { %v18664_v5 = vcombine.low %v1093_v52, %v1105_v55 }
 0x2ee   :  { %8022 = vmatpush2.bf16.msra.mxu0 %v18760_v35  ;;  %v338_v35 = vld [vmem:[#allocation5 + $0x758] sm:$0xff] }
 0x2ef   :  { %8065 = vmatpush2.bf16.msra.mxu1 %v17994_v4  ;;  %8023 = vmatprep.subr.bf16.mxu0 %v18737_v13  ;;  %v18665_v4 = vcombine.high %v1093_v52, %v1105_v55  ;;  %v17899_v13 = vcombine.high %v326_v26, %v338_v35  ;;  %v17898_v43 = vcombine.low %v326_v26, %v338_v35  ;;  %v650_v52 = vld [vmem:[#allocation5 + $0x1118] sm:$0xff]  ;;  %v22217_v35 = vpop.f32.mrf.mxu0 }
 0x2f0   :  { %8066 = vmatprep.subr.bf16.mxu1 %v17971_v56  ;;  %v1069_v56 = vld [vmem:[#allocation5 + $0x1e30] sm:$0xff]  ;;  %v1022_v55 = vld [vmem:[#allocation5 + $0x1cb8] sm:$0xff]  ;;  %23083 = vst [vmem:[#allocation27_spill] sm:$0xff] %v22217_v35 }
 0x2f1   :  { %v18640_v23 = vcombine.low %v1069_v56, %v1081_v42  ;;  %v950_v35 = vld [vmem:[#allocation5 + $0x1a78] sm:$0xff] }
 0x2f2   :  { %8024 = vmatpush2.bf16.msra.mxu0 %v18736_v29  ;;  %v314_v29 = vld [vmem:[#allocation5 + $0x698] sm:$0xff] }
 0x2f3   :  { %8067 = vmatpush2.bf16.msra.mxu1 %v17970_v24  ;;  %8025 = vmatprep.subr.bf16.mxu0 %v18713_v17  ;;  %v18641_v24 = vcombine.high %v1069_v56, %v1081_v42  ;;  %v17875_v17 = vcombine.high %v302_v57, %v314_v29  ;;  %v17874_v48 = vcombine.low %v302_v57, %v314_v29  ;;  %v614_v56 = vld [vmem:[#allocation5 + $0xff8] sm:$0xff] }
 0x2f4   :  { %8068 = vmatprep.subr.bf16.mxu1 %v17947_v10  ;;  %v662_v10 = vld [vmem:[#allocation5 + $0x1178] sm:$0xff] }
 0x2f5   :  { %v18234_v26 = vcombine.low %v662_v10, %v674_v44  ;;  %v626_v42 = vld [vmem:[#allocation5 + $0x1058] sm:$0xff] }
 0x2f6   :  { %8026 = vmatpush2.bf16.msra.mxu0 %v18712_v12  ;;  %v1058_v12 = vld [vmem:[#allocation5 + $0x1dd8] sm:$0xff] }
 0x2f7   :  { %8069 = vmatpush2.bf16.msra.mxu1 %v17946_v1  ;;  %8027 = vmatprep.subr.bf16.mxu0 %v18689_v49  ;;  %v18235_v1 = vcombine.high %v662_v10, %v674_v44  ;;  %v18619_v49 = vcombine.high %v1046_v41, %v1058_v12  ;;  %v998_v29 = vld [vmem:[#allocation5 + $0x1bf8] sm:$0xff]  ;;  %v18187_v44 = vcombine.high %v614_v56, %v626_v42 }
 0x2f8   :  { %8070 = vmatprep.subr.bf16.mxu1 %v17923_v38  ;;  %v638_v38 = vld [vmem:[#allocation5 + $0x10b8] sm:$0xff] }
 0x2fa   :  { %8028 = vmatpush2.bf16.msra.mxu0 %v18688_v47  ;;  %v1034_v47 = vld [vmem:[#allocation5 + $0x1d18] sm:$0xff] }
 0x2fb   :  { %8071 = vmatpush2.bf16.msra.mxu1 %v17922_v8  ;;  %8029 = vmatprep.subr.bf16.mxu0 %v18665_v4  ;;  %v18618_v8 = vcombine.low %v1046_v41, %v1058_v12  ;;  %v18211_v4 = vcombine.high %v638_v38, %v650_v52  ;;  %v18594_v10 = vcombine.low %v1022_v55, %v1034_v47 }
 0x2fc   :  { %8072 = vmatprep.subr.bf16.mxu1 %v17899_v13  ;;  %v18595_v13 = vcombine.high %v1022_v55, %v1034_v47  ;;  %v18186_v55 = vcombine.low %v614_v56, %v626_v42 }
 0x2fe   :  { %8030 = vmatpush2.bf16.msra.mxu0 %v18664_v5  ;;  %v1010_v5 = vld [vmem:[#allocation5 + $0x1c58] sm:$0xff] }
 0x2ff   :  { %8073 = vmatpush2.bf16.msra.mxu1 %v17898_v43  ;;  %8031 = vmatprep.subr.bf16.mxu0 %v18641_v24  ;;  %v18210_v24 = vcombine.low %v638_v38, %v650_v52  ;;  %v18571_v12 = vcombine.high %v998_v29, %v1010_v5  ;;  %v18570_v47 = vcombine.low %v998_v29, %v1010_v5 }
 0x300   :  { %8074 = vmatprep.subr.bf16.mxu1 %v17875_v17 }
 0x302   :  { %8032 = vmatpush2.bf16.msra.mxu0 %v18640_v23  ;;  %v590_v23 = vld [vmem:[#allocation5 + $0xf38] sm:$0xff] }
 0x303   :  { %8075 = vmatpush2.bf16.msra.mxu1 %v17874_v48  ;;  %8087 = vmatprep.subr.bf16.mxu0 %v18235_v1  ;;  %v602_v48 = vld [vmem:[#allocation5 + $0xf98] sm:$0xff] }
 0x304   :  { %8130 = vmatprep.subr.bf16.mxu1 %v18619_v49  ;;  %v974_v1 = vld [vmem:[#allocation5 + $0x1b38] sm:$0xff]  ;;  %v18162_v56 = vcombine.low %v590_v23, %v602_v48 }
 0x305   :  { %v7777_v57 = vpop.f32.mrf.mxu0  ;;  %8034 = vmatmul.mubr.bf16.vlgmr.msra.gmra.mxu0 %v22021_v39  ;;  %v986_v49 = vld [vmem:[#allocation5 + $0x1b98] sm:$0xff] }
 0x306   :  { %v22221_v43 = vadd.f32 %v7777_v57, %v22209_v53  ;;  %8077 = vmatmul.mubr.bf16.vlgmr.msra.gmra.mxu1 %v22011_v21  ;;  %8088 = vmatpush1.bf16.msra.mxu0 %v18234_v26  ;;  %v18163_v26 = vcombine.high %v590_v23, %v602_v48  ;;  %v566_v57 = vld [vmem:[#allocation5 + $0xe78] sm:$0xff]  ;;  %v18546_v42 = vcombine.low %v974_v1, %v986_v49 }
 0x307   :  { %8131 = vmatpush1.bf16.msra.mxu1 %v18618_v8  ;;  %v22224_v17 = vpop.f32.mrf.mxu0  ;;  %8089 = vmatprep.subr.bf16.mxu0 %v18211_v4  ;;  %v18522_v23 = vcombine.low %v950_v35, %v962_v45 }
 0x308   :  { %23084 = vst [vmem:[#allocation28_spill] sm:$0xff] %v22224_v17  ;;  %v8745_v41 = vmul.f32 0.044715, %v22221_v43  ;;  %8132 = vmatprep.subr.bf16.mxu1 %v18595_v13  ;;  %8119 = vmatprep.mubr.bf16.mxu0 %v22007_v63  ;;  %v18547_v13 = vcombine.high %v974_v1, %v986_v49  ;;  %v578_v17 = vld [vmem:[#allocation5 + $0xed8] sm:$0xff] }
 0x309   :  { %v7781_v53 = vpop.f32.mrf.mxu0  ;;  %8162 = vmatprep.mubr.bf16.mxu1 %v22015_v32  ;;  %v18139_v29 = vcombine.high %v566_v57, %v578_v17 }
 0x30a   :  { %v8793_v38 = vmul.f32 %v8745_v41, %v22221_v43  ;;  %v22231_v52 = vadd.f32 %v7781_v53, %v22215_v22  ;;  %8090 = vmatpush1.bf16.msra.mxu0 %v18210_v24  ;;  %v926_v53 = vld [vmem:[#allocation5 + $0x19b8] sm:$0xff] }
 0x30b   :  { %8133 = vmatpush1.bf16.msra.mxu1 %v18594_v10  ;;  %8091 = vmatprep.subr.bf16.mxu0 %v18187_v44  ;;  %v18523_v10 = vcombine.high %v950_v35, %v962_v45  ;;  %v542_v44 = vld [vmem:[#allocation5 + $0xdb8] sm:$0xff] }
 0x30c   :  { %v8841_v8 = vmul.f32 %v8793_v38, %v22221_v43  ;;  %v8769_v4 = vmul.f32 0.044715, %v22231_v52  ;;  %8134 = vmatprep.subr.bf16.mxu1 %v18571_v12  ;;  %v554_v12 = vld [vmem:[#allocation5 + $0xe18] sm:$0xff] }
 0x30d   :  { %v938_v38 = vld [vmem:[#allocation5 + $0x1a18] sm:$0xff]  ;;  %v18115_v48 = vcombine.high %v542_v44, %v554_v12 }
 0x30e   :  { %v8889_v41 = vadd.f32 %v8841_v8, %v22221_v43  ;;  %v8817_v22 = vmul.f32 %v8769_v4, %v22231_v52  ;;  %8092 = vmatpush1.bf16.msra.mxu0 %v18186_v55  ;;  %v18138_v4 = vcombine.low %v566_v57, %v578_v17  ;;  %v18499_v49 = vcombine.high %v926_v53, %v938_v38  ;;  %v518_v55 = vld [vmem:[#allocation5 + $0xcf8] sm:$0xff] }
 0x30f   :  { %8135 = vmatpush1.bf16.msra.mxu1 %v18570_v47  ;;  %8093 = vmatprep.subr.bf16.mxu0 %v18163_v26  ;;  %v530_v47 = vld [vmem:[#allocation5 + $0xd58] sm:$0xff] }
 0x310   :  { %v8937_v5 = vmul.f32 0.7978846, %v8889_v41  ;;  %v8865_v24 = vmul.f32 %v8817_v22, %v22231_v52  ;;  %8136 = vmatprep.subr.bf16.mxu1 %v18547_v13  ;;  %v902_v26 = vld [vmem:[#allocation5 + $0x18f8] sm:$0xff]  ;;  %v18114_v41 = vcombine.low %v542_v44, %v554_v12  ;;  %v18498_v22 = vcombine.low %v926_v53, %v938_v38 }
 0x311   :  { %v914_v13 = vld [vmem:[#allocation5 + $0x1958] sm:$0xff] }
 0x312   :  { %21728 = vtanh.f32 %v8937_v5  ;;  %v8913_v8 = vadd.f32 %v8865_v24, %v22231_v52  ;;  %8094 = vmatpush1.bf16.msra.mxu0 %v18162_v56  ;;  %v18091_v5 = vcombine.high %v518_v55, %v530_v47  ;;  %v18475_v17 = vcombine.high %v902_v26, %v914_v13  ;;  %v494_v57 = vld [vmem:[#allocation5 + $0xc38] sm:$0xff] }
 0x313   :  { %8137 = vmatpush1.bf16.msra.mxu1 %v18546_v42  ;;  %8095 = vmatprep.subr.bf16.mxu0 %v18139_v29  ;;  %v506_v56 = vld [vmem:[#allocation5 + $0xc98] sm:$0xff]  ;;  %v18090_v42 = vcombine.low %v518_v55, %v530_v47  ;;  %v18474_v29 = vcombine.low %v902_v26, %v914_v13 }
 0x314   :  { %v8961_v1 = vmul.f32 0.7978846, %v8913_v8  ;;  %8138 = vmatprep.subr.bf16.mxu1 %v18523_v10  ;;  %v878_v45 = vld [vmem:[#allocation5 + $0x1838] sm:$0xff]  ;;  %v18067_v24 = vcombine.high %v494_v57, %v506_v56  ;;  %v18066_v53 = vcombine.low %v494_v57, %v506_v56 }
 0x315   :  { %v890_v35 = vld [vmem:[#allocation5 + $0x1898] sm:$0xff] }
 0x316   :  { %21730 = vtanh.f32 %v8961_v1  ;;  %8096 = vmatpush1.bf16.msra.mxu0 %v18138_v4  ;;  %v18451_v10 = vcombine.high %v878_v45, %v890_v35  ;;  %v854_v8 = vld [vmem:[#allocation5 + $0x1778] sm:$0xff] }
 0x317   :  { %8139 = vmatpush1.bf16.msra.mxu1 %v18522_v23  ;;  %8097 = vmatprep.subr.bf16.mxu0 %v18115_v48  ;;  %v866_v44 = vld [vmem:[#allocation5 + $0x17d8] sm:$0xff]  ;;  %v18450_v23 = vcombine.low %v878_v45, %v890_v35  ;;  %v8697_v45 = vmul.f32 0.5, %v22221_v43  ;;  %v8721_v35 = vmul.f32 0.5, %v22231_v52 }
 0x318   :  { %8140 = vmatprep.subr.bf16.mxu1 %v18499_v49  ;;  %v1238_v12 = vld [vmem:[#allocation5 + $0x2378] sm:$0xff]  ;;  %v18427_v48 = vcombine.high %v854_v8, %v866_v44  ;;  %v18426_v13 = vcombine.low %v854_v8, %v866_v44 }
 0x319   :  { %v1250_v4 = vld [vmem:[#allocation5 + $0x23d8] sm:$0xff] }
 0x31a   :  { %8098 = vmatpush1.bf16.msra.mxu0 %v18114_v41  ;;  %v18811_v1 = vcombine.high %v1238_v12, %v1250_v4  ;;  %v830_v49 = vld [vmem:[#allocation5 + $0x16b8] sm:$0xff] }
 0x31b   :  { %8141 = vmatpush1.bf16.msra.mxu1 %v18498_v22  ;;  %8099 = vmatprep.subr.bf16.mxu0 %v18091_v5  ;;  %v842_v55 = vld [vmem:[#allocation5 + $0x1718] sm:$0xff]  ;;  %v18810_v5 = vcombine.low %v1238_v12, %v1250_v4 }
 0x31c   :  { %8142 = vmatprep.subr.bf16.mxu1 %v18475_v17  ;;  %v1214_v47 = vld [vmem:[#allocation5 + $0x22b8] sm:$0xff]  ;;  %v18403_v17 = vcombine.high %v830_v49, %v842_v55 }
 0x31d   :  { %v1226_v26 = vld [vmem:[#allocation5 + $0x2318] sm:$0xff] }
 0x31e   :  { %8100 = vmatpush1.bf16.msra.mxu0 %v18090_v42  ;;  %v18787_v57 = vcombine.high %v1214_v47, %v1226_v26  ;;  %v806_v56 = vld [vmem:[#allocation5 + $0x15f8] sm:$0xff] }
 0x31f   :  { %v21729_v38 = vpop.eup %21728  ;;  %8143 = vmatpush1.bf16.msra.mxu1 %v18474_v29  ;;  %8101 = vmatprep.subr.bf16.mxu0 %v18067_v24  ;;  %v818_v42 = vld [vmem:[#allocation5 + $0x1658] sm:$0xff] }
 0x320   :  { %8144 = vmatprep.subr.bf16.mxu1 %v18451_v10  ;;  %v9033_v41 = vadd.f32 1.0, %v21729_v38  ;;  %v1190_v24 = vld [vmem:[#allocation5 + $0x21f8] sm:$0xff]  ;;  %v18786_v38 = vcombine.low %v1214_v47, %v1226_v26  ;;  %v18379_v12 = vcombine.high %v806_v56, %v818_v42  ;;  %v18378_v52 = vcombine.low %v806_v56, %v818_v42 }
 0x321   :  { %v1202_v10 = vld [vmem:[#allocation5 + $0x2258] sm:$0xff] }
 0x322   :  { %8102 = vmatpush1.bf16.msra.mxu0 %v18066_v53  ;;  %v18402_v53 = vcombine.low %v830_v49, %v842_v55  ;;  %v9081_v8 = vmul.f32 %v9033_v41, %v8697_v45  ;;  %v18763_v4 = vcombine.high %v1190_v24, %v1202_v10  ;;  %v1166_v43 = vld [vmem:[#allocation5 + $0x2138] sm:$0xff] }
 0x323   :  { %v21731_v22 = vpop.eup %21730  ;;  %8145 = vmatpush1.bf16.msra.mxu1 %v18450_v23  ;;  %8103 = vmatprep.subr.bf16.mxu0 %v18427_v48  ;;  %v782_v23 = vld [vmem:[#allocation5 + $0x1538] sm:$0xff]  ;;  %v18739_v55 = vcombine.high %v1166_v43, %v1178_v34 }
 0x324   :  { %8146 = vmatprep.subr.bf16.mxu1 %v18811_v1  ;;  %v9057_v29 = vadd.f32 1.0, %v21731_v22  ;;  %v794_v48 = vld [vmem:[#allocation5 + $0x1598] sm:$0xff] }
 0x325   :  { %v18355_v49 = vcombine.high %v782_v23, %v794_v48  ;;  %v758_v41 = vld [vmem:[#allocation5 + $0x1478] sm:$0xff] }
 0x326   :  { %8104 = vmatpush2.bf16.msra.mxu0 %v18426_v13  ;;  %v9105_v44 = vmul.f32 %v9057_v29, %v8721_v35  ;;  %v18762_v13 = vcombine.low %v1190_v24, %v1202_v10  ;;  %v770_v22 = vld [vmem:[#allocation5 + $0x14d8] sm:$0xff] }
 0x327   :  { %8147 = vmatpush2.bf16.msra.mxu1 %v18810_v5  ;;  %8105 = vmatprep.subr.bf16.mxu0 %v18403_v17  ;;  %v1142_v47 = vld [vmem:[#allocation5 + $0x2078] sm:$0xff]  ;;  %v18354_v5 = vcombine.low %v782_v23, %v794_v48  ;;  %v18738_v17 = vcombine.low %v1166_v43, %v1178_v34  ;;  %v18330_v24 = vcombine.low %v758_v41, %v770_v22  ;;  %v22243_v34 = vpop.f32.mrf.mxu1 }
 0x328   :  { %8148 = vmatprep.subr.bf16.mxu1 %v18787_v57  ;;  %v22241_v1 = vpack.c.bf16 %v9105_v44, %v9081_v8  ;;  %v1154_v26 = vld [vmem:[#allocation5 + $0x20d8] sm:$0xff]  ;;  %v18331_v57 = vcombine.high %v758_v41, %v770_v22  ;;  %23086 = vst [vmem:[#allocation30_spill] sm:$0xff] %v22243_v34  ;;  %v579_v34 = vld [vmem:[#allocation5 + $0xee0] sm:$0xff] }
 0x329   :  { %v18715_v45 = vcombine.high %v1142_v47, %v1154_v26  ;;  %v734_v35 = vld [vmem:[#allocation5 + $0x13b8] sm:$0xff]  ;;  %v18714_v10 = vcombine.low %v1142_v47, %v1154_v26 }
 0x32a   :  { %23085 = vst [vmem:[#allocation29_spill] sm:$0xff] %v22241_v1  ;;  %8106 = vmatpush2.bf16.msra.mxu0 %v18402_v53  ;;  %v746_v56 = vld [vmem:[#allocation5 + $0x1418] sm:$0xff] }
 0x32b   :  { %8149 = vmatpush2.bf16.msra.mxu1 %v18786_v38  ;;  %8107 = vmatprep.subr.bf16.mxu0 %v18379_v12  ;;  %v1118_v42 = vld [vmem:[#allocation5 + $0x1fb8] sm:$0xff]  ;;  %v18307_v53 = vcombine.high %v734_v35, %v746_v56  ;;  %v18306_v23 = vcombine.low %v734_v35, %v746_v56  ;;  %v291_v35 = vld [vmem:[#allocation5 + $0x5e0] sm:$0xff] }
 0x32c   :  { %8150 = vmatprep.subr.bf16.mxu1 %v18763_v4  ;;  %v1130_v29 = vld [vmem:[#allocation5 + $0x2018] sm:$0xff]  ;;  %v663_v56 = vld [vmem:[#allocation5 + $0x1180] sm:$0xff] }
 0x32d   :  { %v18691_v8 = vcombine.high %v1118_v42, %v1130_v29  ;;  %v710_v44 = vld [vmem:[#allocation5 + $0x12f8] sm:$0xff]  ;;  %v18690_v48 = vcombine.low %v1118_v42, %v1130_v29  ;;  %v675_v42 = vld [vmem:[#allocation5 + $0x11e0] sm:$0xff] }
 0x32e   :  { %8108 = vmatpush2.bf16.msra.mxu0 %v18378_v52  ;;  %v722_v38 = vld [vmem:[#allocation5 + $0x1358] sm:$0xff]  ;;  %v7820_v52 = vpop.f32.mrf.mxu1 }
 0x32f   :  { %8151 = vmatpush2.bf16.msra.mxu1 %v18762_v13  ;;  %8109 = vmatprep.subr.bf16.mxu0 %v18355_v49  ;;  %v1094_v12 = vld [vmem:[#allocation5 + $0x1ef8] sm:$0xff]  ;;  %v18283_v43 = vcombine.high %v710_v44, %v722_v38  ;;  %v18282_v47 = vcombine.low %v710_v44, %v722_v38  ;;  %v18237_v44 = vcombine.high %v663_v56, %v675_v42  ;;  %v255_v38 = vld [vmem:[#allocation5 + $0x4c0] sm:$0xff] }
 0x330   :  { %8152 = vmatprep.subr.bf16.mxu1 %v18739_v55  ;;  %v1106_v4 = vld [vmem:[#allocation5 + $0x1f58] sm:$0xff] }
 0x331   :  { %v18667_v13 = vcombine.high %v1094_v12, %v1106_v4  ;;  %v686_v49 = vld [vmem:[#allocation5 + $0x1238] sm:$0xff]  ;;  %v18666_v26 = vcombine.low %v1094_v12, %v1106_v4  ;;  %v267_v12 = vld [vmem:[#allocation5 + $0x520] sm:$0xff] }
 0x332   :  { %8110 = vmatpush2.bf16.msra.mxu0 %v18354_v5  ;;  %v698_v55 = vld [vmem:[#allocation5 + $0x1298] sm:$0xff]  ;;  %v639_v4 = vld [vmem:[#allocation5 + $0x10c0] sm:$0xff] }
 0x333   :  { %8153 = vmatpush2.bf16.msra.mxu1 %v18738_v17  ;;  %8111 = vmatprep.subr.bf16.mxu0 %v18331_v57  ;;  %v1070_v41 = vld [vmem:[#allocation5 + $0x1e38] sm:$0xff]  ;;  %v18259_v5 = vcombine.high %v686_v49, %v698_v55  ;;  %v22245_v17 = vpop.f32.mrf.mxu1  ;;  %v18258_v29 = vcombine.low %v686_v49, %v698_v55  ;;  %v17829_v49 = vcombine.high %v255_v38, %v267_v12 }
 0x334   :  { %8154 = vmatprep.subr.bf16.mxu1 %v18715_v45  ;;  %v1082_v22 = vld [vmem:[#allocation5 + $0x1e98] sm:$0xff]  ;;  %23087 = vst [vmem:[#allocation31_spill] sm:$0xff] %v22245_v17  ;;  %v279_v45 = vld [vmem:[#allocation5 + $0x580] sm:$0xff] }
 0x335   :  { %v18643_v57 = vcombine.high %v1070_v41, %v1082_v22 }
 0x336   :  { %8112 = vmatpush2.bf16.msra.mxu0 %v18330_v24  ;;  %v18642_v24 = vcombine.low %v1070_v41, %v1082_v22  ;;  %v231_v22 = vld [vmem:[#allocation5 + $0x400] sm:$0xff] }
 0x337   :  { %8155 = vmatpush2.bf16.msra.mxu1 %v18714_v10  ;;  %8113 = vmatprep.subr.bf16.mxu0 %v18307_v53  ;;  %v17853_v10 = vcombine.high %v279_v45, %v291_v35  ;;  %v1304_v53 = vrot.slane %v22197_v0, %v22078_v31 }
 0x338   :  { %8156 = vmatprep.subr.bf16.mxu1 %v18691_v8  ;;  %v7824_v8 = vpop.f32.mrf.mxu1 }
 0x339   :  { %v7821_v55 = vadd.f32 %v7820_v52, %v1304_v53 }
 0x33a   :  { %8114 = vmatpush2.bf16.msra.mxu0 %v18306_v23  ;;  %v651_v23 = vld [vmem:[#allocation5 + $0x1120] sm:$0xff]  ;;  %v22251_v41 = vpop.f32.mrf.mxu1 }
 0x33b   :  { %8157 = vmatpush2.bf16.msra.mxu1 %v18690_v48  ;;  %8115 = vmatprep.subr.bf16.mxu0 %v18283_v43  ;;  %v17852_v48 = vcombine.low %v279_v45, %v291_v35  ;;  %v22249_v43 = vpop.f32.mrf.mxu0  ;;  %23089 = vst [vmem:[#allocation33_spill] sm:$0xff] %v22251_v41  ;;  %v18213_v0 = vcombine.high %v639_v4, %v651_v23  ;;  %v1180_v41 = vld [vmem:[#allocation5 + $0x21a8] sm:$0xff] }
 0x33c   :  { %8158 = vmatprep.subr.bf16.mxu1 %v18667_v13  ;;  %23088 = vst [vmem:[#allocation32_spill] sm:$0xff] %v22249_v43  ;;  %v18236_v13 = vcombine.low %v663_v56, %v675_v42  ;;  %v17828_v35 = vcombine.low %v255_v38, %v267_v12  ;;  %v18212_v52 = vcombine.low %v639_v4, %v651_v23  ;;  %v207_v43 = vld [vmem:[#allocation5 + $0x340] sm:$0xff] }
 0x33d   :  { %v603_v38 = vld [vmem:[#allocation5 + $0xfa0] sm:$0xff] }
 0x33e   :  { %8116 = vmatpush2.bf16.msra.mxu0 %v18282_v47  ;;  %v243_v47 = vld [vmem:[#allocation5 + $0x460] sm:$0xff] }
 0x33f   :  { %8159 = vmatpush2.bf16.msra.mxu1 %v18666_v26  ;;  %8117 = vmatprep.subr.bf16.mxu0 %v18259_v5  ;;  %v615_v5 = vld [vmem:[#allocation5 + $0x1000] sm:$0xff]  ;;  %v17805_v42 = vcombine.high %v231_v22, %v243_v47 }
 0x340   :  { %8160 = vmatprep.subr.bf16.mxu1 %v18643_v57  ;;  %v627_v57 = vld [vmem:[#allocation5 + $0x1060] sm:$0xff] }
 0x341   :  { %v18189_v1 = vcombine.high %v615_v5, %v627_v57  ;;  %v18188_v23 = vcombine.low %v615_v5, %v627_v57 }
 0x342   :  { %8118 = vmatpush2.bf16.msra.mxu0 %v18258_v29 }
 0x343   :  { %8161 = vmatpush2.bf16.msra.mxu1 %v18642_v24  ;;  %8173 = vmatprep.subr.bf16.mxu0 %v17853_v10  ;;  %v7825_v24 = vadd.f32 %v7824_v8, %v1304_v53  ;;  %v17804_v53 = vcombine.low %v231_v22, %v243_v47 }
 0x344   :  { %8216 = vmatprep.subr.bf16.mxu1 %v18237_v44 }
 0x345   :  { %v7863_v26 = vpop.f32.mrf.mxu0  ;;  %8120 = vmatmul.mubr.bf16.vlgmr.msra.gmra.mxu0 %v22013_v25 }
 0x346   :  { %v7864_v29 = vadd.f32 %v7863_v26, %v7821_v55  ;;  %v7906_v45 = vpop.f32.mrf.mxu1  ;;  %8163 = vmatmul.mubr.bf16.vlgmr.msra.gmra.mxu1 %v22021_v39  ;;  %8174 = vmatpush1.bf16.msra.mxu0 %v17852_v48  ;;  %v219_v55 = vld [vmem:[#allocation5 + $0x3a0] sm:$0xff] }
 0x347   :  { %8217 = vmatpush1.bf16.msra.mxu1 %v18236_v13  ;;  %v22255_v56 = vpop.f32.mrf.mxu0  ;;  %8175 = vmatprep.subr.bf16.mxu0 %v17829_v49  ;;  %v591_v48 = vld [vmem:[#allocation5 + $0xf40] sm:$0xff]  ;;  %v17781_v13 = vcombine.high %v207_v43, %v219_v55  ;;  %v17780_v22 = vcombine.low %v207_v43, %v219_v55 }
 0x348   :  { %23090 = vst [vmem:[#allocation34_spill] sm:$0xff] %v22255_v56  ;;  %v22257_v10 = vadd.f32 %v7906_v45, %v7864_v29  ;;  %v22259_v44 = vpop.f32.mrf.mxu1  ;;  %8218 = vmatprep.subr.bf16.mxu1 %v18213_v0  ;;  %8205 = vmatprep.mubr.bf16.mxu0 %v22005_v58  ;;  %v18165_v29 = vcombine.high %v591_v48, %v603_v38  ;;  %v183_v45 = vld [vmem:[#allocation5 + $0x280] sm:$0xff] }
 0x349   :  { %23091 = vst [vmem:[#allocation35_spill] sm:$0xff] %v22259_v44  ;;  %v7867_v26 = vpop.f32.mrf.mxu0  ;;  %8248 = vmatprep.mubr.bf16.mxu1 %v22007_v63  ;;  %v195_v44 = vld [vmem:[#allocation5 + $0x2e0] sm:$0xff]  ;;  %v18164_v47 = vcombine.low %v591_v48, %v603_v38 }
 0x34a   :  { %v8747_v12 = vmul.f32 0.044715, %v22257_v10  ;;  %v7868_v4 = vadd.f32 %v7867_v26, %v7825_v24  ;;  %8176 = vmatpush1.bf16.msra.mxu0 %v17828_v35  ;;  %v7910_v8 = vpop.f32.mrf.mxu1  ;;  %v567_v56 = vld [vmem:[#allocation5 + $0xe80] sm:$0xff]  ;;  %v17757_v5 = vcombine.high %v183_v45, %v195_v44 }
 0x34b   :  { %8219 = vmatpush1.bf16.msra.mxu1 %v18212_v52  ;;  %8177 = vmatprep.subr.bf16.mxu0 %v17805_v42  ;;  %v159_v42 = vld [vmem:[#allocation5 + $0x1c0] sm:$0xff]  ;;  %v18140_v43 = vcombine.low %v567_v56, %v579_v34 }
 0x34c   :  { %v8795_v49 = vmul.f32 %v8747_v12, %v22257_v10  ;;  %v22265_v0 = vadd.f32 %v7910_v8, %v7868_v4  ;;  %8220 = vmatprep.subr.bf16.mxu1 %v18189_v1  ;;  %v18141_v1 = vcombine.high %v567_v56, %v579_v34  ;;  %v171_v24 = vld [vmem:[#allocation5 + $0x220] sm:$0xff] }
 0x34d   :  { %v543_v26 = vld [vmem:[#allocation5 + $0xdc0] sm:$0xff]  ;;  %v17733_v55 = vcombine.high %v159_v42, %v171_v24 }
 0x34e   :  { %v8843_v17 = vmul.f32 %v8795_v49, %v22257_v10  ;;  %v8771_v35 = vmul.f32 0.044715, %v22265_v0  ;;  %8178 = vmatpush1.bf16.msra.mxu0 %v17804_v53  ;;  %v555_v12 = vld [vmem:[#allocation5 + $0xe20] sm:$0xff]  ;;  %v17756_v53 = vcombine.low %v183_v45, %v195_v44 }
 0x34f   :  { %8221 = vmatpush1.bf16.msra.mxu1 %v18188_v23  ;;  %8179 = vmatprep.subr.bf16.mxu0 %v17781_v13  ;;  %v18117_v48 = vcombine.high %v543_v26, %v555_v12  ;;  %v135_v38 = vld [vmem:[#allocation5 + $0x100] sm:$0xff] }
 0x350   :  { %v8891_v57 = vadd.f32 %v8843_v17, %v22257_v10  ;;  %v8819_v52 = vmul.f32 %v8771_v35, %v22265_v0  ;;  %8222 = vmatprep.subr.bf16.mxu1 %v18165_v29  ;;  %v147_v23 = vld [vmem:[#allocation5 + $0x160] sm:$0xff]  ;;  %v17732_v35 = vcombine.low %v159_v42, %v171_v24 }
 0x351   :  { %v519_v13 = vld [vmem:[#allocation5 + $0xd00] sm:$0xff]  ;;  %v17709_v44 = vcombine.high %v135_v38, %v147_v23 }
 0x352   :  { %v8939_v4 = vmul.f32 0.7978846, %v8891_v57  ;;  %v8867_v8 = vmul.f32 %v8819_v52, %v22265_v0  ;;  %8180 = vmatpush1.bf16.msra.mxu0 %v17780_v22  ;;  %v531_v49 = vld [vmem:[#allocation5 + $0xd60] sm:$0xff]  ;;  %v18116_v22 = vcombine.low %v543_v26, %v555_v12  ;;  %v17708_v57 = vcombine.low %v135_v38, %v147_v23 }
 0x353   :  { %8223 = vmatpush1.bf16.msra.mxu1 %v18164_v47  ;;  %8181 = vmatprep.subr.bf16.mxu0 %v17757_v5  ;;  %v18093_v34 = vcombine.high %v519_v13, %v531_v49  ;;  %v111_v56 = vld [vmem:[#allocation5 + $0x40] sm:$0xff]  ;;  %v18092_v52 = vcombine.low %v519_v13, %v531_v49 }
 0x354   :  { %21732 = vtanh.f32 %v8939_v4  ;;  %v8915_v17 = vadd.f32 %v8867_v8, %v22265_v0  ;;  %8224 = vmatprep.subr.bf16.mxu1 %v18141_v1  ;;  %v123_v45 = vld [vmem:[#allocation5 + $0xa0] sm:$0xff] }
 0x355   :  { %v495_v47 = vld [vmem:[#allocation5 + $0xc40] sm:$0xff]  ;;  %v17685_v1 = vcombine.high %v111_v56, %v123_v45  ;;  %v17684_v12 = vcombine.low %v111_v56, %v123_v45 }
 0x356   :  { %v8963_v29 = vmul.f32 0.7978846, %v8915_v17  ;;  %8182 = vmatpush1.bf16.msra.mxu0 %v17756_v53  ;;  %v507_v5 = vld [vmem:[#allocation5 + $0xca0] sm:$0xff] }
 0x357   :  { %8225 = vmatpush1.bf16.msra.mxu1 %v18140_v43  ;;  %8183 = vmatprep.subr.bf16.mxu0 %v17733_v55  ;;  %v18069_v4 = vcombine.high %v495_v47, %v507_v5  ;;  %v471_v42 = vld [vmem:[#allocation5 + $0xb80] sm:$0xff]  ;;  %v18068_v53 = vcombine.low %v495_v47, %v507_v5 }
 0x358   :  { %21734 = vtanh.f32 %v8963_v29  ;;  %8226 = vmatprep.subr.bf16.mxu1 %v18117_v48  ;;  %v483_v24 = vld [vmem:[#allocation5 + $0xbe0] sm:$0xff] }
 0x359   :  { %v855_v8 = vld [vmem:[#allocation5 + $0x1780] sm:$0xff]  ;;  %v18045_v43 = vcombine.high %v471_v42, %v483_v24  ;;  %v18044_v49 = vcombine.low %v471_v42, %v483_v24 }
 0x35a   :  { %8184 = vmatpush1.bf16.msra.mxu0 %v17732_v35  ;;  %v867_v26 = vld [vmem:[#allocation5 + $0x17e0] sm:$0xff] }
 0x35b   :  { %8227 = vmatpush1.bf16.msra.mxu1 %v18116_v22  ;;  %8185 = vmatprep.subr.bf16.mxu0 %v17709_v44  ;;  %v18429_v55 = vcombine.high %v855_v8, %v867_v26  ;;  %v447_v17 = vld [vmem:[#allocation5 + $0xac0] sm:$0xff]  ;;  %v18428_v29 = vcombine.low %v855_v8, %v867_v26 }
 0x35c   :  { %8228 = vmatprep.subr.bf16.mxu1 %v18093_v34  ;;  %v459_v48 = vld [vmem:[#allocation5 + $0xb20] sm:$0xff] }
 0x35d   :  { %v831_v23 = vld [vmem:[#allocation5 + $0x16c0] sm:$0xff]  ;;  %v18021_v35 = vcombine.high %v447_v17, %v459_v48 }
 0x35e   :  { %8186 = vmatpush1.bf16.msra.mxu0 %v17708_v57  ;;  %v843_v13 = vld [vmem:[#allocation5 + $0x1720] sm:$0xff]  ;;  %v18020_v57 = vcombine.low %v447_v17, %v459_v48 }
 0x35f   :  { %8229 = vmatpush1.bf16.msra.mxu1 %v18092_v52  ;;  %8187 = vmatprep.subr.bf16.mxu0 %v17685_v1  ;;  %v18405_v22 = vcombine.high %v831_v23, %v843_v13  ;;  %v423_v44 = vld [vmem:[#allocation5 + $0xa00] sm:$0xff]  ;;  %v8699_v52 = vmul.f32 0.5, %v22257_v10  ;;  %v8723_v1 = vmul.f32 0.5, %v22265_v0  ;;  %v18404_v42 = vcombine.low %v831_v23, %v843_v13 }
 0x360   :  { %8230 = vmatprep.subr.bf16.mxu1 %v18069_v4  ;;  %v435_v34 = vld [vmem:[#allocation5 + $0xa60] sm:$0xff] }
 0x361   :  { %v21733_v38 = vpop.eup %21732  ;;  %v807_v47 = vld [vmem:[#allocation5 + $0x1600] sm:$0xff]  ;;  %v17997_v24 = vcombine.high %v423_v44, %v435_v34 }
 0x362   :  { %8188 = vmatpush1.bf16.msra.mxu0 %v17684_v12  ;;  %v9035_v56 = vadd.f32 1.0, %v21733_v38  ;;  %v819_v5 = vld [vmem:[#allocation5 + $0x1660] sm:$0xff] }
 0x363   :  { %8231 = vmatpush1.bf16.msra.mxu1 %v18068_v53  ;;  %8189 = vmatprep.subr.bf16.mxu0 %v18045_v43  ;;  %v18381_v8 = vcombine.high %v807_v47, %v819_v5  ;;  %v399_v26 = vld [vmem:[#allocation5 + $0x940] sm:$0xff]  ;;  %v18380_v10 = vcombine.low %v807_v47, %v819_v5 }
 0x364   :  { %8232 = vmatprep.subr.bf16.mxu1 %v18429_v55  ;;  %v411_v12 = vld [vmem:[#allocation5 + $0x9a0] sm:$0xff]  ;;  %v9083_v53 = vmul.f32 %v9035_v56, %v8699_v52 }
 0x365   :  { %v21735_v45 = vpop.eup %21734  ;;  %v783_v55 = vld [vmem:[#allocation5 + $0x1540] sm:$0xff]  ;;  %v17973_v0 = vcombine.high %v399_v26, %v411_v12 }
 0x366   :  { %8190 = vmatpush2.bf16.msra.mxu0 %v18044_v49  ;;  %v9059_v4 = vadd.f32 1.0, %v21735_v45  ;;  %v795_v38 = vld [vmem:[#allocation5 + $0x15a0] sm:$0xff]  ;;  %v17996_v49 = vcombine.low %v423_v44, %v435_v34 }
 0x367   :  { %8233 = vmatpush2.bf16.msra.mxu1 %v18428_v29  ;;  %8191 = vmatprep.subr.bf16.mxu0 %v18021_v35  ;;  %v18357_v48 = vcombine.high %v783_v55, %v795_v38  ;;  %v375_v23 = vld [vmem:[#allocation5 + $0x880] sm:$0xff]  ;;  %v18356_v56 = vcombine.low %v783_v55, %v795_v38 }
 0x368   :  { %8234 = vmatprep.subr.bf16.mxu1 %v18405_v22  ;;  %v9107_v43 = vmul.f32 %v9059_v4, %v8723_v1  ;;  %v387_v13 = vld [vmem:[#allocation5 + $0x8e0] sm:$0xff]  ;;  %v17972_v22 = vcombine.low %v399_v26, %v411_v12 }
 0x369   :  { %v759_v29 = vld [vmem:[#allocation5 + $0x1480] sm:$0xff]  ;;  %v17949_v45 = vcombine.high %v375_v23, %v387_v13  ;;  %v17948_v47 = vcombine.low %v375_v23, %v387_v13 }
 0x36a   :  { %8192 = vmatpush2.bf16.msra.mxu0 %v18020_v57  ;;  %v22275_v17 = vpack.c.bf16 %v9107_v43, %v9083_v53  ;;  %v771_v35 = vld [vmem:[#allocation5 + $0x14e0] sm:$0xff] }
 0x36b   :  { %8235 = vmatpush2.bf16.msra.mxu1 %v18404_v42  ;;  %8193 = vmatprep.subr.bf16.mxu0 %v17997_v24  ;;  %v18333_v44 = vcombine.high %v759_v29, %v771_v35  ;;  %v351_v34 = vld [vmem:[#allocation5 + $0x7c0] sm:$0xff]  ;;  %v18332_v5 = vcombine.low %v759_v29, %v771_v35 }
 0x36c   :  { %23092 = vst [vmem:[#allocation36_spill] sm:$0xff] %v22275_v17  ;;  %8236 = vmatprep.subr.bf16.mxu1 %v18381_v8  ;;  %v363_v57 = vld [vmem:[#allocation5 + $0x820] sm:$0xff]  ;;  %v208_v17 = vld [vmem:[#allocation5 + $0x348] sm:$0xff] }
 0x36d   :  { %v735_v52 = vld [vmem:[#allocation5 + $0x13c0] sm:$0xff]  ;;  %v17925_v4 = vcombine.high %v351_v34, %v363_v57  ;;  %v17924_v53 = vcombine.low %v351_v34, %v363_v57 }
 0x36e   :  { %8194 = vmatpush2.bf16.msra.mxu0 %v17996_v49  ;;  %v747_v1 = vld [vmem:[#allocation5 + $0x1420] sm:$0xff] }
 0x36f   :  { %8237 = vmatpush2.bf16.msra.mxu1 %v18380_v10  ;;  %8195 = vmatprep.subr.bf16.mxu0 %v17973_v0  ;;  %v18309_v42 = vcombine.high %v735_v52, %v747_v1  ;;  %v327_v24 = vld [vmem:[#allocation5 + $0x700] sm:$0xff]  ;;  %v18308_v43 = vcombine.low %v735_v52, %v747_v1 }
 0x370   :  { %8238 = vmatprep.subr.bf16.mxu1 %v18357_v48  ;;  %v339_v8 = vld [vmem:[#allocation5 + $0x760] sm:$0xff] }
 0x371   :  { %v711_v26 = vld [vmem:[#allocation5 + $0x1300] sm:$0xff]  ;;  %v17901_v55 = vcombine.high %v327_v24, %v339_v8  ;;  %v17900_v23 = vcombine.low %v327_v24, %v339_v8  ;;  %v22277_v24 = vld [vmem:[#allocation7 + $0x8] sm:$0xff] }
 0x372   :  { %8196 = vmatpush2.bf16.msra.mxu0 %v17972_v22  ;;  %v723_v12 = vld [vmem:[#allocation5 + $0x1360] sm:$0xff]  ;;  %v1312_v8 = vrot.slane %v22277_v24, %v22115_v20 }
 0x373   :  { %8239 = vmatpush2.bf16.msra.mxu1 %v18356_v56  ;;  %8197 = vmatprep.subr.bf16.mxu0 %v17949_v45  ;;  %v18285_v38 = vcombine.high %v711_v26, %v723_v12  ;;  %v303_v49 = vld [vmem:[#allocation5 + $0x640] sm:$0xff]  ;;  %v18284_v13 = vcombine.low %v711_v26, %v723_v12  ;;  %v280_v45 = vld [vmem:[#allocation5 + $0x588] sm:$0xff]  ;;  %v22281_v12 = vpop.f32.mrf.mxu0 }
 0x374   :  { %8240 = vmatprep.subr.bf16.mxu1 %v18333_v44  ;;  %v315_v10 = vld [vmem:[#allocation5 + $0x6a0] sm:$0xff]  ;;  %v292_v44 = vld [vmem:[#allocation5 + $0x5e8] sm:$0xff]  ;;  %23093 = vst [vmem:[#allocation37_spill] sm:$0xff] %v22281_v12 }
 0x375   :  { %v687_v0 = vld [vmem:[#allocation5 + $0x1240] sm:$0xff]  ;;  %v17877_v29 = vcombine.high %v303_v49, %v315_v10  ;;  %v17876_v34 = vcombine.low %v303_v49, %v315_v10  ;;  %v17855_v1 = vcombine.high %v280_v45, %v292_v44  ;;  %v964_v12 = vld [vmem:[#allocation5 + $0x1ae8] sm:$0xff] }
 0x376   :  { %8198 = vmatpush2.bf16.msra.mxu0 %v17948_v47  ;;  %v699_v48 = vld [vmem:[#allocation5 + $0x12a0] sm:$0xff] }
 0x377   :  { %8241 = vmatpush2.bf16.msra.mxu1 %v18332_v5  ;;  %8199 = vmatprep.subr.bf16.mxu0 %v17925_v4  ;;  %v18261_v35 = vcombine.high %v687_v0, %v699_v48  ;;  %v1047_v22 = vld [vmem:[#allocation5 + $0x1d80] sm:$0xff]  ;;  %v18260_v57 = vcombine.low %v687_v0, %v699_v48  ;;  %v256_v4 = vld [vmem:[#allocation5 + $0x4c8] sm:$0xff] }
 0x378   :  { %8242 = vmatprep.subr.bf16.mxu1 %v18309_v42  ;;  %v1059_v56 = vld [vmem:[#allocation5 + $0x1de0] sm:$0xff]  ;;  %v268_v42 = vld [vmem:[#allocation5 + $0x528] sm:$0xff] }
 0x379   :  { %v18621_v52 = vcombine.high %v1047_v22, %v1059_v56  ;;  %v1023_v47 = vld [vmem:[#allocation5 + $0x1cc0] sm:$0xff]  ;;  %v18620_v26 = vcombine.low %v1047_v22, %v1059_v56  ;;  %v232_v48 = vld [vmem:[#allocation5 + $0x408] sm:$0xff]  ;;  %v17830_v56 = vcombine.low %v256_v4, %v268_v42 }
 0x37a   :  { %8200 = vmatpush2.bf16.msra.mxu0 %v17924_v53  ;;  %v1035_v5 = vld [vmem:[#allocation5 + $0x1d20] sm:$0xff]  ;;  %v17854_v53 = vcombine.low %v280_v45, %v292_v44 }
 0x37b   :  { %8243 = vmatpush2.bf16.msra.mxu1 %v18308_v43  ;;  %8201 = vmatprep.subr.bf16.mxu0 %v17901_v55  ;;  %v18597_v43 = vcombine.high %v1023_v47, %v1035_v5  ;;  %v22283_v55 = vpop.f32.mrf.mxu1  ;;  %v999_v49 = vld [vmem:[#allocation5 + $0x1c00] sm:$0xff] }
 0x37c   :  { %8244 = vmatprep.subr.bf16.mxu1 %v18285_v38  ;;  %23094 = vst [vmem:[#allocation38_spill] sm:$0xff] %v22283_v55  ;;  %v17831_v38 = vcombine.high %v256_v4, %v268_v42  ;;  %v1011_v10 = vld [vmem:[#allocation5 + $0x1c60] sm:$0xff] }
 0x37d   :  { %v18573_v45 = vcombine.high %v999_v49, %v1011_v10 }
 0x37e   :  { %8202 = vmatpush2.bf16.msra.mxu0 %v17900_v23  ;;  %v244_v23 = vld [vmem:[#allocation5 + $0x468] sm:$0xff] }
 0x37f   :  { %8245 = vmatpush2.bf16.msra.mxu1 %v18284_v13  ;;  %8203 = vmatprep.subr.bf16.mxu0 %v17877_v29  ;;  %v17806_v42 = vcombine.low %v232_v48, %v244_v23 }
 0x380   :  { %8246 = vmatprep.subr.bf16.mxu1 %v18261_v35  ;;  %v18596_v35 = vcombine.low %v1023_v47, %v1035_v5  ;;  %v18572_v5 = vcombine.low %v999_v49, %v1011_v10  ;;  %v927_v10 = vld [vmem:[#allocation5 + $0x19c0] sm:$0xff] }
 0x382   :  { %8204 = vmatpush2.bf16.msra.mxu0 %v17876_v34 }
 0x383   :  { %8247 = vmatpush2.bf16.msra.mxu1 %v18260_v57  ;;  %8259 = vmatprep.subr.bf16.mxu0 %v18621_v52  ;;  %v17807_v57 = vcombine.high %v232_v48, %v244_v23  ;;  %v975_v52 = vld [vmem:[#allocation5 + $0x1b40] sm:$0xff]  ;;  %v160_v48 = vld [vmem:[#allocation5 + $0x1c8] sm:$0xff] }
 0x384   :  { %8302 = vmatprep.subr.bf16.mxu1 %v17855_v1  ;;  %v987_v1 = vld [vmem:[#allocation5 + $0x1ba0] sm:$0xff]  ;;  %v172_v23 = vld [vmem:[#allocation5 + $0x228] sm:$0xff] }
 0x385   :  { %v7949_v0 = vpop.f32.mrf.mxu0  ;;  %8206 = vmatmul.mubr.bf16.vlgmr.msra.gmra.mxu0 %v22011_v21  ;;  %v18548_v55 = vcombine.low %v975_v52, %v987_v1 }
 0x386   :  { %v7950_v13 = vadd.f32 %v7949_v0, %v1312_v8  ;;  %v7992_v29 = vpop.f32.mrf.mxu1  ;;  %8249 = vmatmul.mubr.bf16.vlgmr.msra.gmra.mxu1 %v22013_v25  ;;  %8260 = vmatpush1.bf16.msra.mxu0 %v18620_v26  ;;  %v220_v26 = vld [vmem:[#allocation5 + $0x3a8] sm:$0xff] }
 0x387   :  { %8303 = vmatpush1.bf16.msra.mxu1 %v17854_v53  ;;  %v22287_v22 = vpop.f32.mrf.mxu0  ;;  %8261 = vmatprep.subr.bf16.mxu0 %v18597_v43  ;;  %v18549_v53 = vcombine.high %v975_v52, %v987_v1  ;;  %v915_v52 = vld [vmem:[#allocation5 + $0x1960] sm:$0xff]  ;;  %v136_v1 = vld [vmem:[#allocation5 + $0x108] sm:$0xff] }
 0x388   :  { %23095 = vst [vmem:[#allocation39_spill] sm:$0xff] %v22287_v22  ;;  %v22289_v44 = vadd.f32 %v7992_v29, %v7950_v13  ;;  %v22291_v34 = vpop.f32.mrf.mxu1  ;;  %8304 = vmatprep.subr.bf16.mxu1 %v17831_v38  ;;  %8291 = vmatprep.mubr.bf16.mxu0 %v22015_v32  ;;  %v17783_v38 = vcombine.high %v208_v17, %v220_v26  ;;  %v951_v13 = vld [vmem:[#allocation5 + $0x1a80] sm:$0xff]  ;;  %v196_v22 = vld [vmem:[#allocation5 + $0x2e8] sm:$0xff] }
 0x389   :  { %23096 = vst [vmem:[#allocation40_spill] sm:$0xff] %v22291_v34  ;;  %v7953_v0 = vpop.f32.mrf.mxu0  ;;  %8334 = vmatprep.mubr.bf16.mxu1 %v22005_v58  ;;  %v963_v29 = vld [vmem:[#allocation5 + $0x1ae0] sm:$0xff]  ;;  %v184_v34 = vld [vmem:[#allocation5 + $0x288] sm:$0xff] }
 0x38a   :  { %v7954_v47 = vadd.f32 %v7953_v0, %v1312_v8  ;;  %8262 = vmatpush1.bf16.msra.mxu0 %v18596_v35  ;;  %v7996_v4 = vpop.f32.mrf.mxu1  ;;  %v17782_v8 = vcombine.low %v208_v17, %v220_v26  ;;  %v18525_v35 = vcombine.high %v951_v13, %v963_v29  ;;  %v17759_v49 = vcombine.high %v184_v34, %v196_v22 }
 0x38b   :  { %8305 = vmatpush1.bf16.msra.mxu1 %v17830_v56  ;;  %8263 = vmatprep.subr.bf16.mxu0 %v18573_v45  ;;  %v939_v56 = vld [vmem:[#allocation5 + $0x1a20] sm:$0xff]  ;;  %v18524_v45 = vcombine.low %v951_v13, %v963_v29  ;;  %v17734_v26 = vcombine.low %v160_v48, %v172_v23  ;;  %v112_v13 = vld [vmem:[#allocation5 + $0x48] sm:$0xff] }
 0x38c   :  { %v22295_v43 = vadd.f32 %v7996_v4, %v7954_v47  ;;  %8306 = vmatprep.subr.bf16.mxu1 %v17807_v57  ;;  %v17758_v57 = vcombine.low %v184_v34, %v196_v22  ;;  %v18501_v0 = vcombine.high %v927_v10, %v939_v56  ;;  %v17735_v47 = vcombine.high %v160_v48, %v172_v23  ;;  %v148_v4 = vld [vmem:[#allocation5 + $0x168] sm:$0xff] }
 0x38d   :  { %v18500_v17 = vcombine.low %v927_v10, %v939_v56  ;;  %v124_v29 = vld [vmem:[#allocation5 + $0xa8] sm:$0xff]  ;;  %v17710_v34 = vcombine.low %v136_v1, %v148_v4  ;;  %v1251_v10 = vld [vmem:[#allocation5 + $0x23e0] sm:$0xff] }
 0x38e   :  { %8264 = vmatpush1.bf16.msra.mxu0 %v18572_v5  ;;  %v903_v5 = vld [vmem:[#allocation5 + $0x1900] sm:$0xff]  ;;  %v472_v56 = vld [vmem:[#allocation5 + $0xb88] sm:$0xff]  ;;  %v17686_v23 = vcombine.low %v112_v13, %v124_v29 }
 0x38f   :  { %8307 = vmatpush1.bf16.msra.mxu1 %v17806_v42  ;;  %8265 = vmatprep.subr.bf16.mxu0 %v18549_v53  ;;  %v18477_v42 = vcombine.high %v903_v5, %v915_v52  ;;  %v17711_v53 = vcombine.high %v136_v1, %v148_v4  ;;  %v18476_v22 = vcombine.low %v903_v5, %v915_v52  ;;  %v1227_v5 = vld [vmem:[#allocation5 + $0x2320] sm:$0xff]  ;;  %v448_v52 = vld [vmem:[#allocation5 + $0xac8] sm:$0xff] }
 0x390   :  { %8308 = vmatprep.subr.bf16.mxu1 %v17783_v38  ;;  %v891_v38 = vld [vmem:[#allocation5 + $0x18a0] sm:$0xff] }
 0x392   :  { %8266 = vmatpush1.bf16.msra.mxu0 %v18548_v55  ;;  %v879_v55 = vld [vmem:[#allocation5 + $0x1840] sm:$0xff] }
 0x393   :  { %8309 = vmatpush1.bf16.msra.mxu1 %v17782_v8  ;;  %8267 = vmatprep.subr.bf16.mxu0 %v18525_v35  ;;  %v18453_v8 = vcombine.high %v879_v55, %v891_v38  ;;  %v17687_v35 = vcombine.high %v112_v13, %v124_v29  ;;  %v18452_v48 = vcombine.low %v879_v55, %v891_v38  ;;  %v1203_v55 = vld [vmem:[#allocation5 + $0x2260] sm:$0xff]  ;;  %v424_v38 = vld [vmem:[#allocation5 + $0xa08] sm:$0xff] }
 0x394   :  { %8310 = vmatprep.subr.bf16.mxu1 %v17759_v49  ;;  %v1239_v49 = vld [vmem:[#allocation5 + $0x2380] sm:$0xff] }
 0x395   :  { %v18812_v1 = vcombine.low %v1239_v49, %v1251_v10 }
 0x396   :  { %8268 = vmatpush1.bf16.msra.mxu0 %v18524_v45  ;;  %v484_v45 = vld [vmem:[#allocation5 + $0xbe8] sm:$0xff] }
 0x397   :  { %8311 = vmatpush1.bf16.msra.mxu1 %v17758_v57  ;;  %8269 = vmatprep.subr.bf16.mxu0 %v18501_v0  ;;  %v18813_v57 = vcombine.high %v1239_v49, %v1251_v10  ;;  %v18047_v0 = vcombine.high %v472_v56, %v484_v45  ;;  %v18046_v4 = vcombine.low %v472_v56, %v484_v45  ;;  %v1179_v49 = vld [vmem:[#allocation5 + $0x21a0] sm:$0xff]  ;;  %v400_v10 = vld [vmem:[#allocation5 + $0x948] sm:$0xff] }
 0x398   :  { %8312 = vmatprep.subr.bf16.mxu1 %v17735_v47  ;;  %v1215_v47 = vld [vmem:[#allocation5 + $0x22c0] sm:$0xff] }
 0x399   :  { %v18788_v13 = vcombine.low %v1215_v47, %v1227_v5 }
 0x39a   :  { %8270 = vmatpush1.bf16.msra.mxu0 %v18500_v17  ;;  %v460_v17 = vld [vmem:[#allocation5 + $0xb28] sm:$0xff] }
 0x39b   :  { %8313 = vmatpush1.bf16.msra.mxu1 %v17734_v26  ;;  %8271 = vmatprep.subr.bf16.mxu0 %v18477_v42  ;;  %v18789_v26 = vcombine.high %v1215_v47, %v1227_v5  ;;  %v18023_v42 = vcombine.high %v448_v52, %v460_v17  ;;  %v18022_v29 = vcombine.low %v448_v52, %v460_v17  ;;  %v1155_v47 = vld [vmem:[#allocation5 + $0x20e0] sm:$0xff]  ;;  %v376_v5 = vld [vmem:[#allocation5 + $0x888] sm:$0xff] }
 0x39c   :  { %8314 = vmatprep.subr.bf16.mxu1 %v17711_v53  ;;  %v1191_v53 = vld [vmem:[#allocation5 + $0x2200] sm:$0xff] }
 0x39d   :  { %v18764_v56 = vcombine.low %v1191_v53, %v1203_v55 }
 0x39e   :  { %8272 = vmatpush1.bf16.msra.mxu0 %v18476_v22  ;;  %v436_v22 = vld [vmem:[#allocation5 + $0xa68] sm:$0xff] }
 0x39f   :  { %8315 = vmatpush1.bf16.msra.mxu1 %v17710_v34  ;;  %8273 = vmatprep.subr.bf16.mxu0 %v18453_v8  ;;  %v18765_v34 = vcombine.high %v1191_v53, %v1203_v55  ;;  %v17999_v8 = vcombine.high %v424_v38, %v436_v22  ;;  %v17998_v45 = vcombine.low %v424_v38, %v436_v22  ;;  %v1131_v53 = vld [vmem:[#allocation5 + $0x2020] sm:$0xff]  ;;  %v352_v55 = vld [vmem:[#allocation5 + $0x7c8] sm:$0xff] }
 0x3a0   :  { %8316 = vmatprep.subr.bf16.mxu1 %v17687_v35  ;;  %v1167_v35 = vld [vmem:[#allocation5 + $0x2140] sm:$0xff] }
 0x3a1   :  { %v18740_v52 = vcombine.low %v1167_v35, %v1179_v49 }
 0x3a2   :  { %8274 = vmatpush1.bf16.msra.mxu0 %v18452_v48  ;;  %v412_v48 = vld [vmem:[#allocation5 + $0x9a8] sm:$0xff] }
 0x3a3   :  { %8317 = vmatpush1.bf16.msra.mxu1 %v17686_v23  ;;  %8275 = vmatprep.subr.bf16.mxu0 %v18813_v57  ;;  %v18741_v23 = vcombine.high %v1167_v35, %v1179_v49  ;;  %v17975_v57 = vcombine.high %v400_v10, %v412_v48  ;;  %v17974_v17 = vcombine.low %v400_v10, %v412_v48  ;;  %v1107_v35 = vld [vmem:[#allocation5 + $0x1f60] sm:$0xff]  ;;  %v328_v49 = vld [vmem:[#allocation5 + $0x708] sm:$0xff] }
 0x3a4   :  { %8318 = vmatprep.subr.bf16.mxu1 %v18047_v0  ;;  %v1143_v0 = vld [vmem:[#allocation5 + $0x2080] sm:$0xff] }
 0x3a5   :  { %v18716_v38 = vcombine.low %v1143_v0, %v1155_v47 }
 0x3a6   :  { %8276 = vmatpush2.bf16.msra.mxu0 %v18812_v1  ;;  %v388_v1 = vld [vmem:[#allocation5 + $0x8e8] sm:$0xff] }
 0x3a7   :  { %8319 = vmatpush2.bf16.msra.mxu1 %v18046_v4  ;;  %8277 = vmatprep.subr.bf16.mxu0 %v18789_v26  ;;  %v18717_v4 = vcombine.high %v1143_v0, %v1155_v47  ;;  %v17951_v26 = vcombine.high %v376_v5, %v388_v1  ;;  %v17950_v22 = vcombine.low %v376_v5, %v388_v1  ;;  %v1083_v0 = vld [vmem:[#allocation5 + $0x1ea0] sm:$0xff]  ;;  %v304_v47 = vld [vmem:[#allocation5 + $0x648] sm:$0xff] }
 0x3a8   :  { %8320 = vmatprep.subr.bf16.mxu1 %v18023_v42  ;;  %v1119_v42 = vld [vmem:[#allocation5 + $0x1fc0] sm:$0xff] }
 0x3a9   :  { %v18692_v10 = vcombine.low %v1119_v42, %v1131_v53 }
 0x3aa   :  { %8278 = vmatpush2.bf16.msra.mxu0 %v18788_v13  ;;  %v364_v13 = vld [vmem:[#allocation5 + $0x828] sm:$0xff] }
 0x3ab   :  { %8321 = vmatpush2.bf16.msra.mxu1 %v18022_v29  ;;  %8279 = vmatprep.subr.bf16.mxu0 %v18765_v34  ;;  %v18693_v29 = vcombine.high %v1119_v42, %v1131_v53  ;;  %v17927_v34 = vcombine.high %v352_v55, %v364_v13  ;;  %v17926_v48 = vcombine.low %v352_v55, %v364_v13  ;;  %v676_v42 = vld [vmem:[#allocation5 + $0x11e8] sm:$0xff] }
 0x3ac   :  { %8322 = vmatprep.subr.bf16.mxu1 %v17999_v8  ;;  %v1095_v8 = vld [vmem:[#allocation5 + $0x1f00] sm:$0xff]  ;;  %v1048_v53 = vld [vmem:[#allocation5 + $0x1d88] sm:$0xff] }
 0x3ad   :  { %v18668_v5 = vcombine.low %v1095_v8, %v1107_v35 }
 0x3ae   :  { %8280 = vmatpush2.bf16.msra.mxu0 %v18764_v56  ;;  %v340_v56 = vld [vmem:[#allocation5 + $0x768] sm:$0xff] }
 0x3af   :  { %8323 = vmatpush2.bf16.msra.mxu1 %v17998_v45  ;;  %8281 = vmatprep.subr.bf16.mxu0 %v18741_v23  ;;  %v18669_v45 = vcombine.high %v1095_v8, %v1107_v35  ;;  %v17903_v23 = vcombine.high %v328_v49, %v340_v56  ;;  %v17902_v1 = vcombine.low %v328_v49, %v340_v56  ;;  %v652_v8 = vld [vmem:[#allocation5 + $0x1128] sm:$0xff]  ;;  %v22297_v56 = vpop.f32.mrf.mxu0 }
 0x3b0   :  { %8324 = vmatprep.subr.bf16.mxu1 %v17975_v57  ;;  %v1071_v57 = vld [vmem:[#allocation5 + $0x1e40] sm:$0xff]  ;;  %v1024_v35 = vld [vmem:[#allocation5 + $0x1cc8] sm:$0xff]  ;;  %23097 = vst [vmem:[#allocation41_spill] sm:$0xff] %v22297_v56 }
 0x3b1   :  { %v18644_v55 = vcombine.low %v1071_v57, %v1083_v0  ;;  %v952_v56 = vld [vmem:[#allocation5 + $0x1a88] sm:$0xff] }
 0x3b2   :  { %8282 = vmatpush2.bf16.msra.mxu0 %v18740_v52  ;;  %v316_v52 = vld [vmem:[#allocation5 + $0x6a8] sm:$0xff] }
 0x3b3   :  { %8325 = vmatpush2.bf16.msra.mxu1 %v17974_v17  ;;  %8283 = vmatprep.subr.bf16.mxu0 %v18717_v4  ;;  %v18645_v17 = vcombine.high %v1071_v57, %v1083_v0  ;;  %v17879_v4 = vcombine.high %v304_v47, %v316_v52  ;;  %v17878_v13 = vcombine.low %v304_v47, %v316_v52  ;;  %v616_v57 = vld [vmem:[#allocation5 + $0x1008] sm:$0xff] }
 0x3b4   :  { %8326 = vmatprep.subr.bf16.mxu1 %v17951_v26  ;;  %v664_v26 = vld [vmem:[#allocation5 + $0x1188] sm:$0xff] }
 0x3b5   :  { %v18238_v49 = vcombine.low %v664_v26, %v676_v42  ;;  %v628_v0 = vld [vmem:[#allocation5 + $0x1068] sm:$0xff] }
 0x3b6   :  { %8284 = vmatpush2.bf16.msra.mxu0 %v18716_v38  ;;  %v1060_v38 = vld [vmem:[#allocation5 + $0x1de8] sm:$0xff] }
 0x3b7   :  { %8327 = vmatpush2.bf16.msra.mxu1 %v17950_v22  ;;  %8285 = vmatprep.subr.bf16.mxu0 %v18693_v29  ;;  %v18239_v22 = vcombine.high %v664_v26, %v676_v42  ;;  %v18623_v29 = vcombine.high %v1048_v53, %v1060_v38  ;;  %v1000_v52 = vld [vmem:[#allocation5 + $0x1c08] sm:$0xff]  ;;  %v18191_v42 = vcombine.high %v616_v57, %v628_v0 }
 0x3b8   :  { %8328 = vmatprep.subr.bf16.mxu1 %v17927_v34  ;;  %v640_v34 = vld [vmem:[#allocation5 + $0x10c8] sm:$0xff] }
 0x3ba   :  { %8286 = vmatpush2.bf16.msra.mxu0 %v18692_v10  ;;  %v1036_v10 = vld [vmem:[#allocation5 + $0x1d28] sm:$0xff] }
 0x3bb   :  { %8329 = vmatpush2.bf16.msra.mxu1 %v17926_v48  ;;  %8287 = vmatprep.subr.bf16.mxu0 %v18669_v45  ;;  %v18622_v48 = vcombine.low %v1048_v53, %v1060_v38  ;;  %v18215_v45 = vcombine.high %v640_v34, %v652_v8  ;;  %v18598_v26 = vcombine.low %v1024_v35, %v1036_v10 }
 0x3bc   :  { %8330 = vmatprep.subr.bf16.mxu1 %v17903_v23  ;;  %v18599_v23 = vcombine.high %v1024_v35, %v1036_v10  ;;  %v18190_v35 = vcombine.low %v616_v57, %v628_v0 }
 0x3be   :  { %8288 = vmatpush2.bf16.msra.mxu0 %v18668_v5  ;;  %v1012_v5 = vld [vmem:[#allocation5 + $0x1c68] sm:$0xff] }
 0x3bf   :  { %8331 = vmatpush2.bf16.msra.mxu1 %v17902_v1  ;;  %8289 = vmatprep.subr.bf16.mxu0 %v18645_v17  ;;  %v18214_v17 = vcombine.low %v640_v34, %v652_v8  ;;  %v18575_v38 = vcombine.high %v1000_v52, %v1012_v5  ;;  %v18574_v10 = vcombine.low %v1000_v52, %v1012_v5 }
 0x3c0   :  { %8332 = vmatprep.subr.bf16.mxu1 %v17879_v4 }
 0x3c2   :  { %8290 = vmatpush2.bf16.msra.mxu0 %v18644_v55  ;;  %v592_v55 = vld [vmem:[#allocation5 + $0xf48] sm:$0xff] }
 0x3c3   :  { %8333 = vmatpush2.bf16.msra.mxu1 %v17878_v13  ;;  %8345 = vmatprep.subr.bf16.mxu0 %v18239_v22  ;;  %v604_v13 = vld [vmem:[#allocation5 + $0xfa8] sm:$0xff] }
 0x3c4   :  { %8388 = vmatprep.subr.bf16.mxu1 %v18623_v29  ;;  %v976_v22 = vld [vmem:[#allocation5 + $0x1b48] sm:$0xff]  ;;  %v18166_v57 = vcombine.low %v592_v55, %v604_v13 }
 0x3c5   :  { %v8035_v47 = vpop.f32.mrf.mxu0  ;;  %8292 = vmatmul.mubr.bf16.vlgmr.msra.gmra.mxu0 %v22021_v39  ;;  %v988_v29 = vld [vmem:[#allocation5 + $0x1ba8] sm:$0xff] }
 0x3c6   :  { %v22301_v1 = vadd.f32 %v8035_v47, %v22289_v44  ;;  %8335 = vmatmul.mubr.bf16.vlgmr.msra.gmra.mxu1 %v22011_v21  ;;  %8346 = vmatpush1.bf16.msra.mxu0 %v18238_v49  ;;  %v18167_v49 = vcombine.high %v592_v55, %v604_v13  ;;  %v568_v47 = vld [vmem:[#allocation5 + $0xe88] sm:$0xff]  ;;  %v18550_v0 = vcombine.low %v976_v22, %v988_v29 }
 0x3c7   :  { %8389 = vmatpush1.bf16.msra.mxu1 %v18622_v48  ;;  %v22304_v4 = vpop.f32.mrf.mxu0  ;;  %8347 = vmatprep.subr.bf16.mxu0 %v18215_v45  ;;  %v18526_v55 = vcombine.low %v952_v56, %v964_v12 }
 0x3c8   :  { %23098 = vst [vmem:[#allocation42_spill] sm:$0xff] %v22304_v4  ;;  %v8749_v53 = vmul.f32 0.044715, %v22301_v1  ;;  %8390 = vmatprep.subr.bf16.mxu1 %v18599_v23  ;;  %8377 = vmatprep.mubr.bf16.mxu0 %v22007_v63  ;;  %v18551_v23 = vcombine.high %v976_v22, %v988_v29  ;;  %v580_v4 = vld [vmem:[#allocation5 + $0xee8] sm:$0xff] }
 0x3c9   :  { %v8039_v44 = vpop.f32.mrf.mxu0  ;;  %8420 = vmatprep.mubr.bf16.mxu1 %v22015_v32  ;;  %v18143_v52 = vcombine.high %v568_v47, %v580_v4 }
 0x3ca   :  { %v8797_v34 = vmul.f32 %v8749_v53, %v22301_v1  ;;  %v22311_v8 = vadd.f32 %v8039_v44, %v22295_v43  ;;  %8348 = vmatpush1.bf16.msra.mxu0 %v18214_v17  ;;  %v928_v44 = vld [vmem:[#allocation5 + $0x19c8] sm:$0xff] }
 0x3cb   :  { %8391 = vmatpush1.bf16.msra.mxu1 %v18598_v26  ;;  %8349 = vmatprep.subr.bf16.mxu0 %v18191_v42  ;;  %v18527_v26 = vcombine.high %v952_v56, %v964_v12  ;;  %v544_v42 = vld [vmem:[#allocation5 + $0xdc8] sm:$0xff] }
 0x3cc   :  { %v8845_v48 = vmul.f32 %v8797_v34, %v22301_v1  ;;  %v8773_v45 = vmul.f32 0.044715, %v22311_v8  ;;  %8392 = vmatprep.subr.bf16.mxu1 %v18575_v38  ;;  %v556_v38 = vld [vmem:[#allocation5 + $0xe28] sm:$0xff] }
 0x3cd   :  { %v940_v34 = vld [vmem:[#allocation5 + $0x1a28] sm:$0xff]  ;;  %v18119_v13 = vcombine.high %v544_v42, %v556_v38 }
 0x3ce   :  { %v8893_v53 = vadd.f32 %v8845_v48, %v22301_v1  ;;  %v8821_v43 = vmul.f32 %v8773_v45, %v22311_v8  ;;  %8350 = vmatpush1.bf16.msra.mxu0 %v18190_v35  ;;  %v18142_v45 = vcombine.low %v568_v47, %v580_v4  ;;  %v18503_v29 = vcombine.high %v928_v44, %v940_v34  ;;  %v520_v35 = vld [vmem:[#allocation5 + $0xd08] sm:$0xff] }
 0x3cf   :  { %8393 = vmatpush1.bf16.msra.mxu1 %v18574_v10  ;;  %8351 = vmatprep.subr.bf16.mxu0 %v18167_v49  ;;  %v532_v10 = vld [vmem:[#allocation5 + $0xd68] sm:$0xff] }
 0x3d0   :  { %v8941_v5 = vmul.f32 0.7978846, %v8893_v53  ;;  %v8869_v17 = vmul.f32 %v8821_v43, %v22311_v8  ;;  %8394 = vmatprep.subr.bf16.mxu1 %v18551_v23  ;;  %v904_v49 = vld [vmem:[#allocation5 + $0x1908] sm:$0xff]  ;;  %v18118_v53 = vcombine.low %v544_v42, %v556_v38  ;;  %v18502_v43 = vcombine.low %v928_v44, %v940_v34 }
 0x3d1   :  { %v916_v23 = vld [vmem:[#allocation5 + $0x1968] sm:$0xff] }
 0x3d2   :  { %21736 = vtanh.f32 %v8941_v5  ;;  %v8917_v48 = vadd.f32 %v8869_v17, %v22311_v8  ;;  %8352 = vmatpush1.bf16.msra.mxu0 %v18166_v57  ;;  %v18095_v5 = vcombine.high %v520_v35, %v532_v10  ;;  %v18479_v4 = vcombine.high %v904_v49, %v916_v23  ;;  %v496_v47 = vld [vmem:[#allocation5 + $0xc48] sm:$0xff] }
 0x3d3   :  { %8395 = vmatpush1.bf16.msra.mxu1 %v18550_v0  ;;  %8353 = vmatprep.subr.bf16.mxu0 %v18143_v52  ;;  %v508_v57 = vld [vmem:[#allocation5 + $0xca8] sm:$0xff]  ;;  %v18094_v0 = vcombine.low %v520_v35, %v532_v10  ;;  %v18478_v52 = vcombine.low %v904_v49, %v916_v23 }
 0x3d4   :  { %v8965_v22 = vmul.f32 0.7978846, %v8917_v48  ;;  %8396 = vmatprep.subr.bf16.mxu1 %v18527_v26  ;;  %v880_v12 = vld [vmem:[#allocation5 + $0x1848] sm:$0xff]  ;;  %v18071_v17 = vcombine.high %v496_v47, %v508_v57  ;;  %v18070_v44 = vcombine.low %v496_v47, %v508_v57 }
 0x3d5   :  { %v892_v56 = vld [vmem:[#allocation5 + $0x18a8] sm:$0xff] }
 0x3d6   :  { %21738 = vtanh.f32 %v8965_v22  ;;  %8354 = vmatpush1.bf16.msra.mxu0 %v18142_v45  ;;  %v18455_v26 = vcombine.high %v880_v12, %v892_v56  ;;  %v856_v48 = vld [vmem:[#allocation5 + $0x1788] sm:$0xff] }
 0x3d7   :  { %8397 = vmatpush1.bf16.msra.mxu1 %v18526_v55  ;;  %8355 = vmatprep.subr.bf16.mxu0 %v18119_v13  ;;  %v868_v42 = vld [vmem:[#allocation5 + $0x17e8] sm:$0xff]  ;;  %v18454_v55 = vcombine.low %v880_v12, %v892_v56  ;;  %v8701_v12 = vmul.f32 0.5, %v22301_v1  ;;  %v8725_v56 = vmul.f32 0.5, %v22311_v8 }
 0x3d8   :  { %8398 = vmatprep.subr.bf16.mxu1 %v18503_v29  ;;  %v1240_v38 = vld [vmem:[#allocation5 + $0x2388] sm:$0xff]  ;;  %v18431_v13 = vcombine.high %v856_v48, %v868_v42  ;;  %v18430_v23 = vcombine.low %v856_v48, %v868_v42 }
 0x3d9   :  { %v1252_v45 = vld [vmem:[#allocation5 + $0x23e8] sm:$0xff] }
 0x3da   :  { %8356 = vmatpush1.bf16.msra.mxu0 %v18118_v53  ;;  %v18815_v22 = vcombine.high %v1240_v38, %v1252_v45  ;;  %v832_v29 = vld [vmem:[#allocation5 + $0x16c8] sm:$0xff] }
 0x3db   :  { %8399 = vmatpush1.bf16.msra.mxu1 %v18502_v43  ;;  %8357 = vmatprep.subr.bf16.mxu0 %v18095_v5  ;;  %v844_v35 = vld [vmem:[#allocation5 + $0x1728] sm:$0xff]  ;;  %v18814_v5 = vcombine.low %v1240_v38, %v1252_v45 }
 0x3dc   :  { %8400 = vmatprep.subr.bf16.mxu1 %v18479_v4  ;;  %v1216_v10 = vld [vmem:[#allocation5 + $0x22c8] sm:$0xff]  ;;  %v18407_v4 = vcombine.high %v832_v29, %v844_v35 }
 0x3dd   :  { %v1228_v49 = vld [vmem:[#allocation5 + $0x2328] sm:$0xff] }
 0x3de   :  { %8358 = vmatpush1.bf16.msra.mxu0 %v18094_v0  ;;  %v18791_v47 = vcombine.high %v1216_v10, %v1228_v49  ;;  %v808_v57 = vld [vmem:[#allocation5 + $0x1608] sm:$0xff] }
 0x3df   :  { %v21737_v34 = vpop.eup %21736  ;;  %8401 = vmatpush1.bf16.msra.mxu1 %v18478_v52  ;;  %8359 = vmatprep.subr.bf16.mxu0 %v18071_v17  ;;  %v820_v0 = vld [vmem:[#allocation5 + $0x1668] sm:$0xff] }
 0x3e0   :  { %8402 = vmatprep.subr.bf16.mxu1 %v18455_v26  ;;  %v9037_v53 = vadd.f32 1.0, %v21737_v34  ;;  %v1192_v17 = vld [vmem:[#allocation5 + $0x2208] sm:$0xff]  ;;  %v18790_v34 = vcombine.low %v1216_v10, %v1228_v49  ;;  %v18383_v38 = vcombine.high %v808_v57, %v820_v0  ;;  %v18382_v8 = vcombine.low %v808_v57, %v820_v0 }
 0x3e1   :  { %v1204_v26 = vld [vmem:[#allocation5 + $0x2268] sm:$0xff] }
 0x3e2   :  { %8360 = vmatpush1.bf16.msra.mxu0 %v18070_v44  ;;  %v18406_v44 = vcombine.low %v832_v29, %v844_v35  ;;  %v9085_v48 = vmul.f32 %v9037_v53, %v8701_v12  ;;  %v18767_v45 = vcombine.high %v1192_v17, %v1204_v26  ;;  %v1168_v1 = vld [vmem:[#allocation5 + $0x2148] sm:$0xff] }
 0x3e3   :  { %v21739_v43 = vpop.eup %21738  ;;  %8403 = vmatpush1.bf16.msra.mxu1 %v18454_v55  ;;  %8361 = vmatprep.subr.bf16.mxu0 %v18431_v13  ;;  %v784_v55 = vld [vmem:[#allocation5 + $0x1548] sm:$0xff]  ;;  %v18743_v35 = vcombine.high %v1168_v1, %v1180_v41 }
 0x3e4   :  { %8404 = vmatprep.subr.bf16.mxu1 %v18815_v22  ;;  %v9061_v52 = vadd.f32 1.0, %v21739_v43  ;;  %v796_v13 = vld [vmem:[#allocation5 + $0x15a8] sm:$0xff] }
 0x3e5   :  { %v18359_v29 = vcombine.high %v784_v55, %v796_v13  ;;  %v760_v53 = vld [vmem:[#allocation5 + $0x1488] sm:$0xff] }
 0x3e6   :  { %8362 = vmatpush2.bf16.msra.mxu0 %v18430_v23  ;;  %v9109_v42 = vmul.f32 %v9061_v52, %v8725_v56  ;;  %v18766_v23 = vcombine.low %v1192_v17, %v1204_v26  ;;  %v772_v43 = vld [vmem:[#allocation5 + $0x14e8] sm:$0xff] }
 0x3e7   :  { %8405 = vmatpush2.bf16.msra.mxu1 %v18814_v5  ;;  %8363 = vmatprep.subr.bf16.mxu0 %v18407_v4  ;;  %v1144_v10 = vld [vmem:[#allocation5 + $0x2088] sm:$0xff]  ;;  %v18358_v5 = vcombine.low %v784_v55, %v796_v13  ;;  %v18742_v4 = vcombine.low %v1168_v1, %v1180_v41  ;;  %v18334_v17 = vcombine.low %v760_v53, %v772_v43  ;;  %v22323_v41 = vpop.f32.mrf.mxu1 }
 0x3e8   :  { %8406 = vmatprep.subr.bf16.mxu1 %v18791_v47  ;;  %v22321_v22 = vpack.c.bf16 %v9109_v42, %v9085_v48  ;;  %v1156_v49 = vld [vmem:[#allocation5 + $0x20e8] sm:$0xff]  ;;  %v18335_v47 = vcombine.high %v760_v53, %v772_v43  ;;  %23100 = vst [vmem:[#allocation44_spill] sm:$0xff] %v22323_v41 }
 0x3e9   :  { %v18719_v12 = vcombine.high %v1144_v10, %v1156_v49  ;;  %v736_v56 = vld [vmem:[#allocation5 + $0x13c8] sm:$0xff]  ;;  %v18718_v26 = vcombine.low %v1144_v10, %v1156_v49 }
 0x3ea   :  { %23099 = vst [vmem:[#allocation43_spill] sm:$0xff] %v22321_v22  ;;  %8364 = vmatpush2.bf16.msra.mxu0 %v18406_v44  ;;  %v748_v57 = vld [vmem:[#allocation5 + $0x1428] sm:$0xff] }
 0x3eb   :  { %8407 = vmatpush2.bf16.msra.mxu1 %v18790_v34  ;;  %8365 = vmatprep.subr.bf16.mxu0 %v18383_v38  ;;  %v1120_v0 = vld [vmem:[#allocation5 + $0x1fc8] sm:$0xff]  ;;  %v18311_v44 = vcombine.high %v736_v56, %v748_v57  ;;  %v18310_v55 = vcombine.low %v736_v56, %v748_v57  ;;  %v293_v56 = vld [vmem:[#allocation5 + $0x5f0] sm:$0xff] }
 0x3ec   :  { %8408 = vmatprep.subr.bf16.mxu1 %v18767_v45  ;;  %v1132_v52 = vld [vmem:[#allocation5 + $0x2028] sm:$0xff]  ;;  %v665_v57 = vld [vmem:[#allocation5 + $0x1190] sm:$0xff] }
 0x3ed   :  { %v18695_v48 = vcombine.high %v1120_v0, %v1132_v52  ;;  %v712_v42 = vld [vmem:[#allocation5 + $0x1308] sm:$0xff]  ;;  %v18694_v13 = vcombine.low %v1120_v0, %v1132_v52  ;;  %v677_v0 = vld [vmem:[#allocation5 + $0x11f0] sm:$0xff] }
 0x3ee   :  { %8366 = vmatpush2.bf16.msra.mxu0 %v18382_v8  ;;  %v724_v34 = vld [vmem:[#allocation5 + $0x1368] sm:$0xff]  ;;  %v8078_v8 = vpop.f32.mrf.mxu1 }
 0x3ef   :  { %8409 = vmatpush2.bf16.msra.mxu1 %v18766_v23  ;;  %8367 = vmatprep.subr.bf16.mxu0 %v18359_v29  ;;  %v1096_v38 = vld [vmem:[#allocation5 + $0x1f08] sm:$0xff]  ;;  %v18287_v1 = vcombine.high %v712_v42, %v724_v34  ;;  %v18286_v10 = vcombine.low %v712_v42, %v724_v34  ;;  %v18241_v42 = vcombine.high %v665_v57, %v677_v0  ;;  %v257_v34 = vld [vmem:[#allocation5 + $0x4d0] sm:$0xff] }
 0x3f0   :  { %8410 = vmatprep.subr.bf16.mxu1 %v18743_v35  ;;  %v1108_v45 = vld [vmem:[#allocation5 + $0x1f68] sm:$0xff] }
 0x3f1   :  { %v18671_v23 = vcombine.high %v1096_v38, %v1108_v45  ;;  %v688_v29 = vld [vmem:[#allocation5 + $0x1248] sm:$0xff]  ;;  %v18670_v49 = vcombine.low %v1096_v38, %v1108_v45  ;;  %v269_v38 = vld [vmem:[#allocation5 + $0x530] sm:$0xff] }
 0x3f2   :  { %8368 = vmatpush2.bf16.msra.mxu0 %v18358_v5  ;;  %v700_v35 = vld [vmem:[#allocation5 + $0x12a8] sm:$0xff]  ;;  %v641_v45 = vld [vmem:[#allocation5 + $0x10d0] sm:$0xff] }
 0x3f3   :  { %8411 = vmatpush2.bf16.msra.mxu1 %v18742_v4  ;;  %8369 = vmatprep.subr.bf16.mxu0 %v18335_v47  ;;  %v1072_v53 = vld [vmem:[#allocation5 + $0x1e48] sm:$0xff]  ;;  %v18263_v5 = vcombine.high %v688_v29, %v700_v35  ;;  %v22325_v4 = vpop.f32.mrf.mxu1  ;;  %v18262_v52 = vcombine.low %v688_v29, %v700_v35  ;;  %v17833_v29 = vcombine.high %v257_v34, %v269_v38 }
 0x3f4   :  { %8412 = vmatprep.subr.bf16.mxu1 %v18719_v12  ;;  %v1084_v43 = vld [vmem:[#allocation5 + $0x1ea8] sm:$0xff]  ;;  %v281_v12 = vld [vmem:[#allocation5 + $0x590] sm:$0xff] }
 0x3f5   :  { %v18647_v47 = vcombine.high %v1072_v53, %v1084_v43 }
 0x3f6   :  { %8370 = vmatpush2.bf16.msra.mxu0 %v18334_v17  ;;  %v18646_v17 = vcombine.low %v1072_v53, %v1084_v43  ;;  %v233_v43 = vld [vmem:[#allocation5 + $0x410] sm:$0xff] }
 0x3f7   :  { %8413 = vmatpush2.bf16.msra.mxu1 %v18718_v26  ;;  %8371 = vmatprep.subr.bf16.mxu0 %v18311_v44  ;;  %v17857_v26 = vcombine.high %v281_v12, %v293_v56  ;;  %v1320_v44 = vrot.slane %v22277_v24, %v22164_v14  ;;  %v209_v14 = vld [vmem:[#allocation5 + $0x350] sm:$0xff] }
 0x3f8   :  { %8414 = vmatprep.subr.bf16.mxu1 %v18695_v48  ;;  %v8082_v48 = vpop.f32.mrf.mxu1 }
 0x3f9   :  { %v8079_v35 = vadd.f32 %v8078_v8, %v1320_v44 }
 0x3fa   :  { %8372 = vmatpush2.bf16.msra.mxu0 %v18310_v55  ;;  %v653_v55 = vld [vmem:[#allocation5 + $0x1130] sm:$0xff]  ;;  %v22331_v53 = vpop.f32.mrf.mxu1 }
 0x3fb   :  { %8415 = vmatpush2.bf16.msra.mxu1 %v18694_v13  ;;  %8373 = vmatprep.subr.bf16.mxu0 %v18287_v1  ;;  %v17856_v13 = vcombine.low %v281_v12, %v293_v56  ;;  %v22329_v1 = vpop.f32.mrf.mxu0  ;;  %v18217_v24 = vcombine.high %v641_v45, %v653_v55  ;;  %v17832_v56 = vcombine.low %v257_v34, %v269_v38  ;;  %v605_v34 = vld [vmem:[#allocation5 + $0xfb0] sm:$0xff] }
 0x3fc   :  { %8416 = vmatprep.subr.bf16.mxu1 %v18671_v23  ;;  %23101 = vst [vmem:[#allocation45_spill] sm:$0xff] %v22329_v1  ;;  %v18240_v23 = vcombine.low %v665_v57, %v677_v0  ;;  %v18216_v8 = vcombine.low %v641_v45, %v653_v55  ;;  %v569_v1 = vld [vmem:[#allocation5 + $0xe90] sm:$0xff] }
 0x3fe   :  { %8374 = vmatpush2.bf16.msra.mxu0 %v18286_v10  ;;  %v245_v10 = vld [vmem:[#allocation5 + $0x470] sm:$0xff] }
 0x3ff   :  { %8417 = vmatpush2.bf16.msra.mxu1 %v18670_v49  ;;  %8375 = vmatprep.subr.bf16.mxu0 %v18263_v5  ;;  %v617_v5 = vld [vmem:[#allocation5 + $0x1010] sm:$0xff]  ;;  %v17809_v0 = vcombine.high %v233_v43, %v245_v10 }
 0x400   :  { %8418 = vmatprep.subr.bf16.mxu1 %v18647_v47  ;;  %v629_v47 = vld [vmem:[#allocation5 + $0x1070] sm:$0xff] }
 0x401   :  { %v18193_v22 = vcombine.high %v617_v5, %v629_v47  ;;  %v18192_v55 = vcombine.low %v617_v5, %v629_v47 }
 0x402   :  { %8376 = vmatpush2.bf16.msra.mxu0 %v18262_v52 }
 0x403   :  { %8419 = vmatpush2.bf16.msra.mxu1 %v18646_v17  ;;  %8431 = vmatprep.subr.bf16.mxu0 %v17857_v26  ;;  %v8083_v17 = vadd.f32 %v8082_v48, %v1320_v44  ;;  %v17808_v44 = vcombine.low %v233_v43, %v245_v10 }
 0x404   :  { %8474 = vmatprep.subr.bf16.mxu1 %v18241_v42 }
 0x405   :  { %v8121_v49 = vpop.f32.mrf.mxu0  ;;  %8378 = vmatmul.mubr.bf16.vlgmr.msra.gmra.mxu0 %v22013_v25 }
 0x406   :  { %v8122_v52 = vadd.f32 %v8121_v49, %v8079_v35  ;;  %v8164_v12 = vpop.f32.mrf.mxu1  ;;  %8421 = vmatmul.mubr.bf16.vlgmr.msra.gmra.mxu1 %v22021_v39  ;;  %8432 = vmatpush1.bf16.msra.mxu0 %v17856_v13  ;;  %v221_v35 = vld [vmem:[#allocation5 + $0x3b0] sm:$0xff] }
 0x407   :  { %8475 = vmatpush1.bf16.msra.mxu1 %v18240_v23  ;;  %v22335_v57 = vpop.f32.mrf.mxu0  ;;  %8433 = vmatprep.subr.bf16.mxu0 %v17833_v29  ;;  %v593_v13 = vld [vmem:[#allocation5 + $0xf50] sm:$0xff]  ;;  %v17785_v23 = vcombine.high %v209_v14, %v221_v35  ;;  %v17784_v43 = vcombine.low %v209_v14, %v221_v35 }
 0x408   :  { %23102 = vst [vmem:[#allocation46_spill] sm:$0xff] %v22335_v57  ;;  %v22337_v26 = vadd.f32 %v8164_v12, %v8122_v52  ;;  %v22339_v42 = vpop.f32.mrf.mxu1  ;;  %8476 = vmatprep.subr.bf16.mxu1 %v18217_v24  ;;  %8463 = vmatprep.mubr.bf16.mxu0 %v22005_v58  ;;  %v18169_v52 = vcombine.high %v593_v13, %v605_v34  ;;  %v185_v12 = vld [vmem:[#allocation5 + $0x290] sm:$0xff] }
 0x409   :  { %23103 = vst [vmem:[#allocation47_spill] sm:$0xff] %v22339_v42  ;;  %v8125_v49 = vpop.f32.mrf.mxu0  ;;  %8506 = vmatprep.mubr.bf16.mxu1 %v22007_v63  ;;  %v197_v42 = vld [vmem:[#allocation5 + $0x2f0] sm:$0xff]  ;;  %v18168_v10 = vcombine.low %v593_v13, %v605_v34 }
 0x40a   :  { %v8751_v38 = vmul.f32 0.044715, %v22337_v26  ;;  %v8126_v45 = vadd.f32 %v8125_v49, %v8083_v17  ;;  %8434 = vmatpush1.bf16.msra.mxu0 %v17832_v56  ;;  %v8168_v48 = vpop.f32.mrf.mxu1  ;;  %v581_v57 = vld [vmem:[#allocation5 + $0xef0] sm:$0xff]  ;;  %v17761_v5 = vcombine.high %v185_v12, %v197_v42 }
 0x40b   :  { %8477 = vmatpush1.bf16.msra.mxu1 %v18216_v8  ;;  %8435 = vmatprep.subr.bf16.mxu0 %v17809_v0  ;;  %v161_v0 = vld [vmem:[#allocation5 + $0x1d0] sm:$0xff]  ;;  %v18144_v14 = vcombine.low %v569_v1, %v581_v57 }
 0x40c   :  { %v8799_v29 = vmul.f32 %v8751_v38, %v22337_v26  ;;  %v22345_v24 = vadd.f32 %v8168_v48, %v8126_v45  ;;  %8478 = vmatprep.subr.bf16.mxu1 %v18193_v22  ;;  %v18145_v22 = vcombine.high %v569_v1, %v581_v57  ;;  %v173_v17 = vld [vmem:[#allocation5 + $0x230] sm:$0xff] }
 0x40d   :  { %v545_v49 = vld [vmem:[#allocation5 + $0xdd0] sm:$0xff]  ;;  %v17737_v35 = vcombine.high %v161_v0, %v173_v17 }
 0x40e   :  { %v8847_v41 = vmul.f32 %v8799_v29, %v22337_v26  ;;  %v8775_v56 = vmul.f32 0.044715, %v22345_v24  ;;  %8436 = vmatpush1.bf16.msra.mxu0 %v17808_v44  ;;  %v557_v38 = vld [vmem:[#allocation5 + $0xe30] sm:$0xff]  ;;  %v17760_v44 = vcombine.low %v185_v12, %v197_v42 }
 0x40f   :  { %8479 = vmatpush1.bf16.msra.mxu1 %v18192_v55  ;;  %8437 = vmatprep.subr.bf16.mxu0 %v17785_v23  ;;  %v18121_v13 = vcombine.high %v545_v49, %v557_v38  ;;  %v137_v34 = vld [vmem:[#allocation5 + $0x110] sm:$0xff] }
 0x410   :  { %v8895_v47 = vadd.f32 %v8847_v41, %v22337_v26  ;;  %v8823_v8 = vmul.f32 %v8775_v56, %v22345_v24  ;;  %8480 = vmatprep.subr.bf16.mxu1 %v18169_v52  ;;  %v149_v55 = vld [vmem:[#allocation5 + $0x170] sm:$0xff]  ;;  %v17736_v56 = vcombine.low %v161_v0, %v173_v17 }
 0x411   :  { %v521_v23 = vld [vmem:[#allocation5 + $0xd10] sm:$0xff]  ;;  %v17713_v42 = vcombine.high %v137_v34, %v149_v55 }
 0x412   :  { %v8943_v45 = vmul.f32 0.7978846, %v8895_v47  ;;  %v8871_v48 = vmul.f32 %v8823_v8, %v22345_v24  ;;  %8438 = vmatpush1.bf16.msra.mxu0 %v17784_v43  ;;  %v533_v29 = vld [vmem:[#allocation5 + $0xd70] sm:$0xff]  ;;  %v18120_v43 = vcombine.low %v545_v49, %v557_v38  ;;  %v17712_v47 = vcombine.low %v137_v34, %v149_v55 }
 0x413   :  { %8481 = vmatpush1.bf16.msra.mxu1 %v18168_v10  ;;  %8439 = vmatprep.subr.bf16.mxu0 %v17761_v5  ;;  %v18097_v1 = vcombine.high %v521_v23, %v533_v29  ;;  %v113_v57 = vld [vmem:[#allocation5 + $0x50] sm:$0xff]  ;;  %v18096_v8 = vcombine.low %v521_v23, %v533_v29 }
 0x414   :  { %21740 = vtanh.f32 %v8943_v45  ;;  %v8919_v41 = vadd.f32 %v8871_v48, %v22345_v24  ;;  %8482 = vmatprep.subr.bf16.mxu1 %v18145_v22  ;;  %v125_v12 = vld [vmem:[#allocation5 + $0xb0] sm:$0xff] }
 0x415   :  { %v497_v10 = vld [vmem:[#allocation5 + $0xc50] sm:$0xff]  ;;  %v17689_v22 = vcombine.high %v113_v57, %v125_v12  ;;  %v17688_v38 = vcombine.low %v113_v57, %v125_v12 }
 0x416   :  { %v8967_v52 = vmul.f32 0.7978846, %v8919_v41  ;;  %8440 = vmatpush1.bf16.msra.mxu0 %v17760_v44  ;;  %v509_v5 = vld [vmem:[#allocation5 + $0xcb0] sm:$0xff] }
 0x417   :  { %8483 = vmatpush1.bf16.msra.mxu1 %v18144_v14  ;;  %8441 = vmatprep.subr.bf16.mxu0 %v17737_v35  ;;  %v18073_v45 = vcombine.high %v497_v10, %v509_v5  ;;  %v473_v0 = vld [vmem:[#allocation5 + $0xb90] sm:$0xff]  ;;  %v18072_v44 = vcombine.low %v497_v10, %v509_v5 }
 0x418   :  { %21742 = vtanh.f32 %v8967_v52  ;;  %8484 = vmatprep.subr.bf16.mxu1 %v18121_v13  ;;  %v485_v17 = vld [vmem:[#allocation5 + $0xbf0] sm:$0xff] }
 0x419   :  { %v857_v48 = vld [vmem:[#allocation5 + $0x1790] sm:$0xff]  ;;  %v18049_v14 = vcombine.high %v473_v0, %v485_v17  ;;  %v18048_v29 = vcombine.low %v473_v0, %v485_v17 }
 0x41a   :  { %8442 = vmatpush1.bf16.msra.mxu0 %v17736_v56  ;;  %v869_v49 = vld [vmem:[#allocation5 + $0x17f0] sm:$0xff] }
 0x41b   :  { %8485 = vmatpush1.bf16.msra.mxu1 %v18120_v43  ;;  %8443 = vmatprep.subr.bf16.mxu0 %v17713_v42  ;;  %v18433_v35 = vcombine.high %v857_v48, %v869_v49  ;;  %v449_v41 = vld [vmem:[#allocation5 + $0xad0] sm:$0xff]  ;;  %v18432_v52 = vcombine.low %v857_v48, %v869_v49 }
 0x41c   :  { %8486 = vmatprep.subr.bf16.mxu1 %v18097_v1  ;;  %v461_v13 = vld [vmem:[#allocation5 + $0xb30] sm:$0xff] }
 0x41d   :  { %v833_v55 = vld [vmem:[#allocation5 + $0x16d0] sm:$0xff]  ;;  %v18025_v56 = vcombine.high %v449_v41, %v461_v13 }
 0x41e   :  { %8444 = vmatpush1.bf16.msra.mxu0 %v17712_v47  ;;  %v845_v23 = vld [vmem:[#allocation5 + $0x1730] sm:$0xff]  ;;  %v18024_v47 = vcombine.low %v449_v41, %v461_v13 }
 0x41f   :  { %8487 = vmatpush1.bf16.msra.mxu1 %v18096_v8  ;;  %8445 = vmatprep.subr.bf16.mxu0 %v17689_v22  ;;  %v18409_v43 = vcombine.high %v833_v55, %v845_v23  ;;  %v425_v42 = vld [vmem:[#allocation5 + $0xa10] sm:$0xff]  ;;  %v8703_v8 = vmul.f32 0.5, %v22337_v26  ;;  %v8727_v22 = vmul.f32 0.5, %v22345_v24  ;;  %v18408_v0 = vcombine.low %v833_v55, %v845_v23 }
 0x420   :  { %8488 = vmatprep.subr.bf16.mxu1 %v18073_v45  ;;  %v437_v1 = vld [vmem:[#allocation5 + $0xa70] sm:$0xff] }
 0x421   :  { %v21741_v34 = vpop.eup %21740  ;;  %v809_v10 = vld [vmem:[#allocation5 + $0x1610] sm:$0xff]  ;;  %v18001_v17 = vcombine.high %v425_v42, %v437_v1 }
 0x422   :  { %8446 = vmatpush1.bf16.msra.mxu0 %v17688_v38  ;;  %v9039_v57 = vadd.f32 1.0, %v21741_v34  ;;  %v821_v5 = vld [vmem:[#allocation5 + $0x1670] sm:$0xff] }
 0x423   :  { %8489 = vmatpush1.bf16.msra.mxu1 %v18072_v44  ;;  %8447 = vmatprep.subr.bf16.mxu0 %v18049_v14  ;;  %v18385_v48 = vcombine.high %v809_v10, %v821_v5  ;;  %v401_v49 = vld [vmem:[#allocation5 + $0x950] sm:$0xff]  ;;  %v18384_v26 = vcombine.low %v809_v10, %v821_v5 }
 0x424   :  { %8490 = vmatprep.subr.bf16.mxu1 %v18433_v35  ;;  %v413_v38 = vld [vmem:[#allocation5 + $0x9b0] sm:$0xff]  ;;  %v9087_v44 = vmul.f32 %v9039_v57, %v8703_v8 }
 0x425   :  { %v21743_v12 = vpop.eup %21742  ;;  %v785_v35 = vld [vmem:[#allocation5 + $0x1550] sm:$0xff]  ;;  %v17977_v24 = vcombine.high %v401_v49, %v413_v38 }
 0x426   :  { %8448 = vmatpush2.bf16.msra.mxu0 %v18048_v29  ;;  %v9063_v45 = vadd.f32 1.0, %v21743_v12  ;;  %v797_v34 = vld [vmem:[#allocation5 + $0x15b0] sm:$0xff]  ;;  %v18000_v29 = vcombine.low %v425_v42, %v437_v1 }
 0x427   :  { %8491 = vmatpush2.bf16.msra.mxu1 %v18432_v52  ;;  %8449 = vmatprep.subr.bf16.mxu0 %v18025_v56  ;;  %v18361_v13 = vcombine.high %v785_v35, %v797_v34  ;;  %v377_v55 = vld [vmem:[#allocation5 + $0x890] sm:$0xff]  ;;  %v18360_v57 = vcombine.low %v785_v35, %v797_v34 }
 0x428   :  { %8492 = vmatprep.subr.bf16.mxu1 %v18409_v43  ;;  %v9111_v14 = vmul.f32 %v9063_v45, %v8727_v22  ;;  %v389_v23 = vld [vmem:[#allocation5 + $0x8f0] sm:$0xff]  ;;  %v17976_v43 = vcombine.low %v401_v49, %v413_v38 }
 0x429   :  { %v761_v52 = vld [vmem:[#allocation5 + $0x1490] sm:$0xff]  ;;  %v17953_v12 = vcombine.high %v377_v55, %v389_v23  ;;  %v17952_v10 = vcombine.low %v377_v55, %v389_v23 }
 0x42a   :  { %8450 = vmatpush2.bf16.msra.mxu0 %v18024_v47  ;;  %v22355_v41 = vpack.c.bf16 %v9111_v14, %v9087_v44  ;;  %v773_v56 = vld [vmem:[#allocation5 + $0x14f0] sm:$0xff] }
 0x42b   :  { %8493 = vmatpush2.bf16.msra.mxu1 %v18408_v0  ;;  %8451 = vmatprep.subr.bf16.mxu0 %v18001_v17  ;;  %v18337_v42 = vcombine.high %v761_v52, %v773_v56  ;;  %v353_v1 = vld [vmem:[#allocation5 + $0x7d0] sm:$0xff]  ;;  %v18336_v5 = vcombine.low %v761_v52, %v773_v56 }
 0x42c   :  { %23104 = vst [vmem:[#allocation48_spill] sm:$0xff] %v22355_v41  ;;  %8494 = vmatprep.subr.bf16.mxu1 %v18385_v48  ;;  %v365_v47 = vld [vmem:[#allocation5 + $0x830] sm:$0xff]  ;;  %v186_v41 = vld [vmem:[#allocation5 + $0x298] sm:$0xff] }
 0x42d   :  { %v737_v8 = vld [vmem:[#allocation5 + $0x13d0] sm:$0xff]  ;;  %v17929_v45 = vcombine.high %v353_v1, %v365_v47  ;;  %v17928_v44 = vcombine.low %v353_v1, %v365_v47 }
 0x42e   :  { %8452 = vmatpush2.bf16.msra.mxu0 %v18000_v29  ;;  %v749_v22 = vld [vmem:[#allocation5 + $0x1430] sm:$0xff] }
 0x42f   :  { %8495 = vmatpush2.bf16.msra.mxu1 %v18384_v26  ;;  %8453 = vmatprep.subr.bf16.mxu0 %v17977_v24  ;;  %v18313_v0 = vcombine.high %v737_v8, %v749_v22  ;;  %v329_v17 = vld [vmem:[#allocation5 + $0x710] sm:$0xff]  ;;  %v18312_v14 = vcombine.low %v737_v8, %v749_v22 }
 0x430   :  { %8496 = vmatprep.subr.bf16.mxu1 %v18361_v13  ;;  %v341_v48 = vld [vmem:[#allocation5 + $0x770] sm:$0xff] }
 0x431   :  { %v713_v49 = vld [vmem:[#allocation5 + $0x1310] sm:$0xff]  ;;  %v17905_v35 = vcombine.high %v329_v17, %v341_v48  ;;  %v17904_v55 = vcombine.low %v329_v17, %v341_v48  ;;  %v270_v17 = vld [vmem:[#allocation5 + $0x538] sm:$0xff] }
 0x432   :  { %8454 = vmatpush2.bf16.msra.mxu0 %v17976_v43  ;;  %v725_v38 = vld [vmem:[#allocation5 + $0x1370] sm:$0xff] }
 0x433   :  { %8497 = vmatpush2.bf16.msra.mxu1 %v18360_v57  ;;  %8455 = vmatprep.subr.bf16.mxu0 %v17953_v12  ;;  %v18289_v34 = vcombine.high %v713_v49, %v725_v38  ;;  %v305_v29 = vld [vmem:[#allocation5 + $0x650] sm:$0xff]  ;;  %v18288_v23 = vcombine.low %v713_v49, %v725_v38  ;;  %v282_v12 = vld [vmem:[#allocation5 + $0x598] sm:$0xff]  ;;  %v22361_v38 = vpop.f32.mrf.mxu0 }
 0x434   :  { %8498 = vmatprep.subr.bf16.mxu1 %v18337_v42  ;;  %v317_v26 = vld [vmem:[#allocation5 + $0x6b0] sm:$0xff]  ;;  %v294_v42 = vld [vmem:[#allocation5 + $0x5f8] sm:$0xff]  ;;  %23105 = vst [vmem:[#allocation49_spill] sm:$0xff] %v22361_v38 }
 0x435   :  { %v689_v24 = vld [vmem:[#allocation5 + $0x1250] sm:$0xff]  ;;  %v17881_v52 = vcombine.high %v305_v29, %v317_v26  ;;  %v17880_v1 = vcombine.low %v305_v29, %v317_v26  ;;  %v558_v38 = vld [vmem:[#allocation5 + $0xe38] sm:$0xff] }
 0x436   :  { %8456 = vmatpush2.bf16.msra.mxu0 %v17952_v10  ;;  %v701_v13 = vld [vmem:[#allocation5 + $0x12b0] sm:$0xff]  ;;  %v17859_v10 = vcombine.high %v282_v12, %v294_v42 }
 0x437   :  { %8499 = vmatpush2.bf16.msra.mxu1 %v18336_v5  ;;  %8457 = vmatprep.subr.bf16.mxu0 %v17929_v45  ;;  %v18265_v56 = vcombine.high %v689_v24, %v701_v13  ;;  %v1049_v43 = vld [vmem:[#allocation5 + $0x1d90] sm:$0xff]  ;;  %v18264_v47 = vcombine.low %v689_v24, %v701_v13  ;;  %v234_v13 = vld [vmem:[#allocation5 + $0x418] sm:$0xff] }
 0x438   :  { %8500 = vmatprep.subr.bf16.mxu1 %v18313_v0  ;;  %v1061_v57 = vld [vmem:[#allocation5 + $0x1df0] sm:$0xff]  ;;  %v258_v0 = vld [vmem:[#allocation5 + $0x4d8] sm:$0xff] }
 0x439   :  { %v22357_v8 = vld [vmem:[#allocation7 + $0x10] sm:$0xff]  ;;  %v18625_v22 = vcombine.high %v1049_v43, %v1061_v57  ;;  %v18624_v49 = vcombine.low %v1049_v43, %v1061_v57  ;;  %v17834_v57 = vcombine.low %v258_v0, %v270_v17 }
 0x43a   :  { %8458 = vmatpush2.bf16.msra.mxu0 %v17928_v44  ;;  %v1025_v5 = vld [vmem:[#allocation5 + $0x1cd0] sm:$0xff]  ;;  %v1328_v48 = vrot.slane %v22357_v8, %v22034_v61  ;;  %v17858_v44 = vcombine.low %v282_v12, %v294_v42  ;;  %v210_v61 = vld [vmem:[#allocation5 + $0x358] sm:$0xff] }
 0x43b   :  { %8501 = vmatpush2.bf16.msra.mxu1 %v18312_v14  ;;  %8459 = vmatprep.subr.bf16.mxu0 %v17905_v35  ;;  %v1037_v45 = vld [vmem:[#allocation5 + $0x1d30] sm:$0xff]  ;;  %v22363_v35 = vpop.f32.mrf.mxu1 }
 0x43c   :  { %8502 = vmatprep.subr.bf16.mxu1 %v18289_v34  ;;  %v18601_v14 = vcombine.high %v1025_v5, %v1037_v45  ;;  %23106 = vst [vmem:[#allocation50_spill] sm:$0xff] %v22363_v35  ;;  %v17835_v34 = vcombine.high %v258_v0, %v270_v17  ;;  %v1001_v29 = vld [vmem:[#allocation5 + $0x1c10] sm:$0xff]  ;;  %v546_v35 = vld [vmem:[#allocation5 + $0xdd8] sm:$0xff] }
 0x43d   :  { %v1013_v26 = vld [vmem:[#allocation5 + $0x1c70] sm:$0xff] }
 0x43e   :  { %8460 = vmatpush2.bf16.msra.mxu0 %v17904_v55  ;;  %v246_v55 = vld [vmem:[#allocation5 + $0x478] sm:$0xff]  ;;  %v18577_v12 = vcombine.high %v1001_v29, %v1013_v26 }
 0x43f   :  { %8503 = vmatpush2.bf16.msra.mxu1 %v18288_v23  ;;  %8461 = vmatprep.subr.bf16.mxu0 %v17881_v52  ;;  %v17810_v17 = vcombine.low %v234_v13, %v246_v55 }
 0x440   :  { %8504 = vmatprep.subr.bf16.mxu1 %v18265_v56  ;;  %v18600_v56 = vcombine.low %v1025_v5, %v1037_v45  ;;  %v18576_v45 = vcombine.low %v1001_v29, %v1013_v26  ;;  %v929_v26 = vld [vmem:[#allocation5 + $0x19d0] sm:$0xff] }
 0x442   :  { %8462 = vmatpush2.bf16.msra.mxu0 %v17880_v1 }
 0x443   :  { %8505 = vmatpush2.bf16.msra.mxu1 %v18264_v47  ;;  %8517 = vmatprep.subr.bf16.mxu0 %v18625_v22  ;;  %v17811_v47 = vcombine.high %v234_v13, %v246_v55  ;;  %v977_v22 = vld [vmem:[#allocation5 + $0x1b50] sm:$0xff]  ;;  %v162_v13 = vld [vmem:[#allocation5 + $0x1d8] sm:$0xff] }
 0x444   :  { %8560 = vmatprep.subr.bf16.mxu1 %v17859_v10  ;;  %v989_v10 = vld [vmem:[#allocation5 + $0x1bb0] sm:$0xff]  ;;  %v174_v55 = vld [vmem:[#allocation5 + $0x238] sm:$0xff] }
 0x445   :  { %v8207_v24 = vpop.f32.mrf.mxu0  ;;  %8464 = vmatmul.mubr.bf16.vlgmr.msra.gmra.mxu0 %v22011_v21 }
 0x446   :  { %v8208_v23 = vadd.f32 %v8207_v24, %v1328_v48  ;;  %v8250_v52 = vpop.f32.mrf.mxu1  ;;  %8507 = vmatmul.mubr.bf16.vlgmr.msra.gmra.mxu1 %v22013_v25  ;;  %8518 = vmatpush1.bf16.msra.mxu0 %v18624_v49  ;;  %v222_v49 = vld [vmem:[#allocation5 + $0x3b8] sm:$0xff] }
 0x447   :  { %8561 = vmatpush1.bf16.msra.mxu1 %v17858_v44  ;;  %v22367_v43 = vpop.f32.mrf.mxu0  ;;  %8519 = vmatprep.subr.bf16.mxu0 %v18601_v14  ;;  %v18553_v44 = vcombine.high %v977_v22, %v989_v10 }
 0x448   :  { %23107 = vst [vmem:[#allocation51_spill] sm:$0xff] %v22367_v43  ;;  %v22369_v42 = vadd.f32 %v8250_v52, %v8208_v23  ;;  %v22371_v1 = vpop.f32.mrf.mxu1  ;;  %8562 = vmatprep.subr.bf16.mxu1 %v17835_v34  ;;  %8549 = vmatprep.mubr.bf16.mxu0 %v22015_v32  ;;  %v17787_v34 = vcombine.high %v210_v61, %v222_v49  ;;  %v953_v23 = vld [vmem:[#allocation5 + $0x1a90] sm:$0xff] }
 0x449   :  { %23108 = vst [vmem:[#allocation52_spill] sm:$0xff] %v22371_v1  ;;  %v8211_v24 = vpop.f32.mrf.mxu0  ;;  %8592 = vmatprep.mubr.bf16.mxu1 %v22005_v58  ;;  %v965_v52 = vld [vmem:[#allocation5 + $0x1af0] sm:$0xff]  ;;  %v198_v1 = vld [vmem:[#allocation5 + $0x2f8] sm:$0xff]  ;;  %v18552_v43 = vcombine.low %v977_v22, %v989_v10  ;;  %v17786_v58 = vcombine.low %v210_v61, %v222_v49  ;;  %v17738_v49 = vcombine.low %v162_v13, %v174_v55 }
 0x44a   :  { %v8212_v5 = vadd.f32 %v8211_v24, %v1328_v48  ;;  %8520 = vmatpush1.bf16.msra.mxu0 %v18600_v56  ;;  %v8254_v0 = vpop.f32.mrf.mxu1  ;;  %v18529_v48 = vcombine.high %v953_v23, %v965_v52  ;;  %v17763_v29 = vcombine.high %v186_v41, %v198_v1  ;;  %v941_v56 = vld [vmem:[#allocation5 + $0x1a30] sm:$0xff]  ;;  %v17739_v24 = vcombine.high %v162_v13, %v174_v55  ;;  %v138_v10 = vld [vmem:[#allocation5 + $0x118] sm:$0xff] }
 0x44b   :  { %8563 = vmatpush1.bf16.msra.mxu1 %v17834_v57  ;;  %8521 = vmatprep.subr.bf16.mxu0 %v18577_v12  ;;  %v18528_v57 = vcombine.low %v953_v23, %v965_v52  ;;  %v17762_v12 = vcombine.low %v186_v41, %v198_v1  ;;  %v917_v22 = vld [vmem:[#allocation5 + $0x1970] sm:$0xff]  ;;  %v18504_v61 = vcombine.low %v929_v26, %v941_v56  ;;  %v126_v23 = vld [vmem:[#allocation5 + $0xb8] sm:$0xff] }
 0x44c   :  { %v22375_v14 = vadd.f32 %v8254_v0, %v8212_v5  ;;  %8564 = vmatprep.subr.bf16.mxu1 %v17811_v47  ;;  %v18505_v47 = vcombine.high %v929_v26, %v941_v56  ;;  %v905_v5 = vld [vmem:[#allocation5 + $0x1910] sm:$0xff]  ;;  %v474_v26 = vld [vmem:[#allocation5 + $0xb98] sm:$0xff] }
 0x44d   :  { %v18481_v0 = vcombine.high %v905_v5, %v917_v22  ;;  %v18480_v41 = vcombine.low %v905_v5, %v917_v22  ;;  %v486_v56 = vld [vmem:[#allocation5 + $0xbf8] sm:$0xff] }
 0x44e   :  { %8522 = vmatpush1.bf16.msra.mxu0 %v18576_v45  ;;  %v150_v45 = vld [vmem:[#allocation5 + $0x178] sm:$0xff] }
 0x44f   :  { %8565 = vmatpush1.bf16.msra.mxu1 %v17810_v17  ;;  %8523 = vmatprep.subr.bf16.mxu0 %v18553_v44  ;;  %v17715_v17 = vcombine.high %v138_v10, %v150_v45  ;;  %v893_v44 = vld [vmem:[#allocation5 + $0x18b0] sm:$0xff]  ;;  %v17714_v1 = vcombine.low %v138_v10, %v150_v45  ;;  %v450_v5 = vld [vmem:[#allocation5 + $0xad8] sm:$0xff]  ;;  %v18050_v45 = vcombine.low %v474_v26, %v486_v56 }
 0x450   :  { %8566 = vmatprep.subr.bf16.mxu1 %v17787_v34  ;;  %v114_v34 = vld [vmem:[#allocation5 + $0x58] sm:$0xff] }
 0x451   :  { %v17690_v55 = vcombine.low %v114_v34, %v126_v23  ;;  %v462_v22 = vld [vmem:[#allocation5 + $0xb38] sm:$0xff] }
 0x452   :  { %8524 = vmatpush1.bf16.msra.mxu0 %v18552_v43  ;;  %v881_v43 = vld [vmem:[#allocation5 + $0x1850] sm:$0xff] }
 0x453   :  { %8567 = vmatpush1.bf16.msra.mxu1 %v17786_v58  ;;  %8525 = vmatprep.subr.bf16.mxu0 %v18529_v48  ;;  %v18457_v52 = vcombine.high %v881_v43, %v893_v44  ;;  %v17691_v58 = vcombine.high %v114_v34, %v126_v23  ;;  %v1241_v48 = vld [vmem:[#allocation5 + $0x2390] sm:$0xff]  ;;  %v18456_v13 = vcombine.low %v881_v43, %v893_v44  ;;  %v426_v43 = vld [vmem:[#allocation5 + $0xa18] sm:$0xff] }
 0x454   :  { %8568 = vmatprep.subr.bf16.mxu1 %v17763_v29  ;;  %v1253_v29 = vld [vmem:[#allocation5 + $0x23f0] sm:$0xff]  ;;  %v438_v44 = vld [vmem:[#allocation5 + $0xa78] sm:$0xff]  ;;  %v18026_v23 = vcombine.low %v450_v5, %v462_v22 }
 0x455   :  { %v18816_v10 = vcombine.low %v1241_v48, %v1253_v29 }
 0x456   :  { %8526 = vmatpush1.bf16.msra.mxu0 %v18528_v57  ;;  %v18817_v57 = vcombine.high %v1241_v48, %v1253_v29  ;;  %v402_v48 = vld [vmem:[#allocation5 + $0x958] sm:$0xff] }
 0x457   :  { %8569 = vmatpush1.bf16.msra.mxu1 %v17762_v12  ;;  %8527 = vmatprep.subr.bf16.mxu0 %v18505_v47  ;;  %v18051_v12 = vcombine.high %v474_v26, %v486_v56  ;;  %v1217_v47 = vld [vmem:[#allocation5 + $0x22d0] sm:$0xff]  ;;  %v414_v29 = vld [vmem:[#allocation5 + $0x9b8] sm:$0xff]  ;;  %v18002_v56 = vcombine.low %v426_v43, %v438_v44 }
 0x458   :  { %8570 = vmatprep.subr.bf16.mxu1 %v17739_v24  ;;  %v1229_v24 = vld [vmem:[#allocation5 + $0x2330] sm:$0xff] }
 0x459   :  { %v18792_v34 = vcombine.low %v1217_v47, %v1229_v24 }
 0x45a   :  { %8528 = vmatpush1.bf16.msra.mxu0 %v18504_v61  ;;  %v18793_v61 = vcombine.high %v1217_v47, %v1229_v24  ;;  %v378_v47 = vld [vmem:[#allocation5 + $0x898] sm:$0xff] }
 0x45b   :  { %8571 = vmatpush1.bf16.msra.mxu1 %v17738_v49  ;;  %8529 = vmatprep.subr.bf16.mxu0 %v18481_v0  ;;  %v18027_v49 = vcombine.high %v450_v5, %v462_v22  ;;  %v1193_v0 = vld [vmem:[#allocation5 + $0x2210] sm:$0xff]  ;;  %v390_v24 = vld [vmem:[#allocation5 + $0x8f8] sm:$0xff]  ;;  %v17978_v22 = vcombine.low %v402_v48, %v414_v29 }
 0x45c   :  { %8572 = vmatprep.subr.bf16.mxu1 %v17715_v17  ;;  %v1205_v17 = vld [vmem:[#allocation5 + $0x2270] sm:$0xff] }
 0x45d   :  { %v18768_v26 = vcombine.low %v1193_v0, %v1205_v17 }
 0x45e   :  { %8530 = vmatpush1.bf16.msra.mxu0 %v18480_v41  ;;  %v18769_v41 = vcombine.high %v1193_v0, %v1205_v17  ;;  %v354_v0 = vld [vmem:[#allocation5 + $0x7d8] sm:$0xff] }
 0x45f   :  { %8573 = vmatpush1.bf16.msra.mxu1 %v17714_v1  ;;  %8531 = vmatprep.subr.bf16.mxu0 %v18457_v52  ;;  %v18003_v1 = vcombine.high %v426_v43, %v438_v44  ;;  %v1169_v52 = vld [vmem:[#allocation5 + $0x2150] sm:$0xff]  ;;  %v366_v17 = vld [vmem:[#allocation5 + $0x838] sm:$0xff]  ;;  %v17954_v44 = vcombine.low %v378_v47, %v390_v24 }
 0x460   :  { %8574 = vmatprep.subr.bf16.mxu1 %v17691_v58  ;;  %v1181_v58 = vld [vmem:[#allocation5 + $0x21b0] sm:$0xff] }
 0x461   :  { %v18744_v5 = vcombine.low %v1169_v52, %v1181_v58 }
 0x462   :  { %8532 = vmatpush1.bf16.msra.mxu0 %v18456_v13  ;;  %v18745_v13 = vcombine.high %v1169_v52, %v1181_v58  ;;  %v330_v52 = vld [vmem:[#allocation5 + $0x718] sm:$0xff] }
 0x463   :  { %8575 = vmatpush1.bf16.msra.mxu1 %v17690_v55  ;;  %8533 = vmatprep.subr.bf16.mxu0 %v18817_v57  ;;  %v17979_v55 = vcombine.high %v402_v48, %v414_v29  ;;  %v1145_v57 = vld [vmem:[#allocation5 + $0x2090] sm:$0xff]  ;;  %v342_v58 = vld [vmem:[#allocation5 + $0x778] sm:$0xff]  ;;  %v17930_v29 = vcombine.low %v354_v0, %v366_v17 }
 0x464   :  { %8576 = vmatprep.subr.bf16.mxu1 %v18051_v12  ;;  %v1157_v12 = vld [vmem:[#allocation5 + $0x20f0] sm:$0xff] }
 0x465   :  { %v18720_v43 = vcombine.low %v1145_v57, %v1157_v12 }
 0x466   :  { %8534 = vmatpush2.bf16.msra.mxu0 %v18816_v10  ;;  %v18721_v10 = vcombine.high %v1145_v57, %v1157_v12  ;;  %v306_v57 = vld [vmem:[#allocation5 + $0x658] sm:$0xff] }
 0x467   :  { %8577 = vmatpush2.bf16.msra.mxu1 %v18050_v45  ;;  %8535 = vmatprep.subr.bf16.mxu0 %v18793_v61  ;;  %v17955_v45 = vcombine.high %v378_v47, %v390_v24  ;;  %v1121_v61 = vld [vmem:[#allocation5 + $0x1fd0] sm:$0xff]  ;;  %v318_v12 = vld [vmem:[#allocation5 + $0x6b8] sm:$0xff]  ;;  %v17906_v24 = vcombine.low %v330_v52, %v342_v58 }
 0x468   :  { %8578 = vmatprep.subr.bf16.mxu1 %v18027_v49  ;;  %v1133_v49 = vld [vmem:[#allocation5 + $0x2030] sm:$0xff] }
 0x469   :  { %v18696_v48 = vcombine.low %v1121_v61, %v1133_v49 }
 0x46a   :  { %8536 = vmatpush2.bf16.msra.mxu0 %v18792_v34  ;;  %v18697_v34 = vcombine.high %v1121_v61, %v1133_v49  ;;  %v1050_v61 = vld [vmem:[#allocation5 + $0x1d98] sm:$0xff] }
 0x46b   :  { %8579 = vmatpush2.bf16.msra.mxu1 %v18026_v23  ;;  %8537 = vmatprep.subr.bf16.mxu0 %v18769_v41  ;;  %v17931_v23 = vcombine.high %v354_v0, %v366_v17  ;;  %v1097_v41 = vld [vmem:[#allocation5 + $0x1f10] sm:$0xff]  ;;  %v1062_v49 = vld [vmem:[#allocation5 + $0x1df8] sm:$0xff]  ;;  %v17882_v17 = vcombine.low %v306_v57, %v318_v12 }
 0x46c   :  { %8580 = vmatprep.subr.bf16.mxu1 %v18003_v1  ;;  %v1109_v1 = vld [vmem:[#allocation5 + $0x1f70] sm:$0xff] }
 0x46d   :  { %v18672_v47 = vcombine.low %v1097_v41, %v1109_v1 }
 0x46e   :  { %8538 = vmatpush2.bf16.msra.mxu0 %v18768_v26  ;;  %v18673_v26 = vcombine.high %v1097_v41, %v1109_v1  ;;  %v1026_v41 = vld [vmem:[#allocation5 + $0x1cd8] sm:$0xff] }
 0x46f   :  { %8581 = vmatpush2.bf16.msra.mxu1 %v18002_v56  ;;  %8539 = vmatprep.subr.bf16.mxu0 %v18745_v13  ;;  %v17907_v56 = vcombine.high %v330_v52, %v342_v58  ;;  %v1073_v13 = vld [vmem:[#allocation5 + $0x1e50] sm:$0xff]  ;;  %v1038_v1 = vld [vmem:[#allocation5 + $0x1d38] sm:$0xff]  ;;  %v22377_v58 = vpop.f32.mrf.mxu0 }
 0x470   :  { %8582 = vmatprep.subr.bf16.mxu1 %v17979_v55  ;;  %v1085_v55 = vld [vmem:[#allocation5 + $0x1eb0] sm:$0xff]  ;;  %23109 = vst [vmem:[#allocation53_spill] sm:$0xff] %v22377_v58 }
 0x471   :  { %v18648_v0 = vcombine.low %v1073_v13, %v1085_v55 }
 0x472   :  { %8540 = vmatpush2.bf16.msra.mxu0 %v18744_v5  ;;  %v18649_v5 = vcombine.high %v1073_v13, %v1085_v55  ;;  %v630_v13 = vld [vmem:[#allocation5 + $0x1078] sm:$0xff] }
 0x473   :  { %8583 = vmatpush2.bf16.msra.mxu1 %v17978_v22  ;;  %8541 = vmatprep.subr.bf16.mxu0 %v18721_v10  ;;  %v17883_v22 = vcombine.high %v306_v57, %v318_v12  ;;  %v666_v10 = vld [vmem:[#allocation5 + $0x1198] sm:$0xff] }
 0x474   :  { %8584 = vmatprep.subr.bf16.mxu1 %v17955_v45  ;;  %v678_v45 = vld [vmem:[#allocation5 + $0x11f8] sm:$0xff] }
 0x475   :  { %v18242_v52 = vcombine.low %v666_v10, %v678_v45  ;;  %v1002_v57 = vld [vmem:[#allocation5 + $0x1c18] sm:$0xff] }
 0x476   :  { %8542 = vmatpush2.bf16.msra.mxu0 %v18720_v43  ;;  %v18243_v43 = vcombine.high %v666_v10, %v678_v45  ;;  %v1014_v12 = vld [vmem:[#allocation5 + $0x1c78] sm:$0xff]  ;;  %v18602_v10 = vcombine.low %v1026_v41, %v1038_v1 }
 0x477   :  { %8585 = vmatpush2.bf16.msra.mxu1 %v17954_v44  ;;  %8543 = vmatprep.subr.bf16.mxu0 %v18697_v34  ;;  %v18627_v44 = vcombine.high %v1050_v61, %v1062_v49  ;;  %v642_v34 = vld [vmem:[#allocation5 + $0x10d8] sm:$0xff] }
 0x478   :  { %8586 = vmatprep.subr.bf16.mxu1 %v17931_v23  ;;  %v654_v23 = vld [vmem:[#allocation5 + $0x1138] sm:$0xff] }
 0x47a   :  { %8544 = vmatpush2.bf16.msra.mxu0 %v18696_v48  ;;  %v18626_v48 = vcombine.low %v1050_v61, %v1062_v49  ;;  %v18579_v49 = vcombine.high %v1002_v57, %v1014_v12 }
 0x47b   :  { %8587 = vmatpush2.bf16.msra.mxu1 %v17930_v29  ;;  %8545 = vmatprep.subr.bf16.mxu0 %v18673_v26  ;;  %v18219_v29 = vcombine.high %v642_v34, %v654_v23  ;;  %v18603_v26 = vcombine.high %v1026_v41, %v1038_v1  ;;  %v22399_v1 = vld [vmem:[#allocation7] sm:$0xff] }
 0x47c   :  { %8588 = vmatprep.subr.bf16.mxu1 %v17907_v56  ;;  %v618_v56 = vld [vmem:[#allocation5 + $0x1018] sm:$0xff] }
 0x47d   :  { %v18195_v45 = vcombine.high %v618_v56, %v630_v13  ;;  %v18194_v41 = vcombine.low %v618_v56, %v630_v13  ;;  %v954_v13 = vld [vmem:[#allocation5 + $0x1a98] sm:$0xff] }
 0x47e   :  { %8546 = vmatpush2.bf16.msra.mxu0 %v18672_v47 }
 0x47f   :  { %8589 = vmatpush2.bf16.msra.mxu1 %v17906_v24  ;;  %8547 = vmatprep.subr.bf16.mxu0 %v18649_v5  ;;  %v18218_v24 = vcombine.low %v642_v34, %v654_v23  ;;  %v22385_v5 = vsub.s32 1, %v22031_v50 }
 0x480   :  { %8590 = vmatprep.subr.bf16.mxu1 %v17883_v22 }
 0x482   :  { %8548 = vmatpush2.bf16.msra.mxu0 %v18648_v0  ;;  %v594_v0 = vld [vmem:[#allocation5 + $0xf58] sm:$0xff] }
 0x483   :  { %8591 = vmatpush2.bf16.msra.mxu1 %v17882_v17  ;;  %8603 = vmatprep.subr.bf16.mxu0 %v18243_v43  ;;  %v978_v43 = vld [vmem:[#allocation5 + $0x1b58] sm:$0xff] }
 0x484   :  { %8646 = vmatprep.subr.bf16.mxu1 %v18627_v44  ;;  %v990_v44 = vld [vmem:[#allocation5 + $0x1bb8] sm:$0xff] }
 0x485   :  { %v8293_v55 = vpop.f32.mrf.mxu0  ;;  %8550 = vmatmul.mubr.bf16.vlgmr.msra.gmra.mxu0 %v22021_v39 }
 0x486   :  { %v22381_v47 = vadd.f32 %v8293_v55, %v22369_v42  ;;  %8593 = vmatmul.mubr.bf16.vlgmr.msra.gmra.mxu1 %v22011_v21  ;;  %8604 = vmatpush1.bf16.msra.mxu0 %v18242_v52  ;;  %v606_v42 = vld [vmem:[#allocation5 + $0xfb8] sm:$0xff]  ;;  %v22392_v21 = vsub.s32 3, %v22031_v50  ;;  %v18578_v52 = vcombine.low %v1002_v57, %v1014_v12 }
 0x487   :  { %8647 = vmatpush1.bf16.msra.mxu1 %v18626_v48  ;;  %v22387_v22 = vpop.f32.mrf.mxu0  ;;  %8605 = vmatprep.subr.bf16.mxu0 %v18219_v29  ;;  %v18171_v48 = vcombine.high %v594_v0, %v606_v42  ;;  %v570_v55 = vld [vmem:[#allocation5 + $0xe98] sm:$0xff]  ;;  %v18170_v12 = vcombine.low %v594_v0, %v606_v42 }
 0x488   :  { %23110 = vst [vmem:[#allocation54_spill] sm:$0xff] %v22387_v22  ;;  %v8753_v61 = vmul.f32 0.044715, %v22381_v47  ;;  %8648 = vmatprep.subr.bf16.mxu1 %v18603_v26  ;;  %8635 = vmatprep.mubr.bf16.mxu0 %v22007_v63  ;;  %23111 = vst [vmem:[#allocation55_spill] sm:$0xff] %v22392_v21  ;;  %v1268_v63 = vrot.slane %v22399_v1, %v22385_v5  ;;  %v18555_v26 = vcombine.high %v978_v43, %v990_v44  ;;  %v930_v0 = vld [vmem:[#allocation5 + $0x19d8] sm:$0xff] }
 0x489   :  { %v8297_v17 = vpop.f32.mrf.mxu0  ;;  %8678 = vmatprep.mubr.bf16.mxu1 %v22015_v32  ;;  %v1276_v56 = vrot.slane %v22399_v1, %v22392_v21  ;;  %v942_v42 = vld [vmem:[#allocation5 + $0x1a38] sm:$0xff] }
 0x48a   :  { %v8801_v34 = vmul.f32 %v8753_v61, %v22381_v47  ;;  %v22397_v23 = vadd.f32 %v8297_v17, %v22375_v14  ;;  %8606 = vmatpush1.bf16.msra.mxu0 %v18218_v24  ;;  %v582_v14 = vld [vmem:[#allocation5 + $0xef8] sm:$0xff]  ;;  %v7182_v24 = vadd.f32 %v22049_v46, %v1268_v63 }
 0x48b   :  { %8649 = vmatpush1.bf16.msra.mxu1 %v18602_v10  ;;  %8607 = vmatprep.subr.bf16.mxu0 %v18195_v45  ;;  %v966_v61 = vld [vmem:[#allocation5 + $0x1af8] sm:$0xff]  ;;  %v7178_v45 = vadd.f32 %v22039_v19, %v1268_v63  ;;  %v18147_v17 = vcombine.high %v570_v55, %v582_v14 }
 0x48c   :  { %v8849_v29 = vmul.f32 %v8801_v34, %v22381_v47  ;;  %v8777_v32 = vmul.f32 0.044715, %v22397_v23  ;;  %8650 = vmatprep.subr.bf16.mxu1 %v18579_v49  ;;  %v18554_v49 = vcombine.low %v978_v43, %v990_v44  ;;  %v7311_v34 = vadd.f32 %v22088_v62, %v1276_v56 }
 0x48d   :  { %v18531_v58 = vcombine.high %v954_v13, %v966_v61  ;;  %v18146_v62 = vcombine.low %v570_v55, %v582_v14  ;;  %v18530_v63 = vcombine.low %v954_v13, %v966_v61  ;;  %v18122_v14 = vcombine.low %v546_v35, %v558_v38  ;;  %v498_v13 = vld [vmem:[#allocation5 + $0xc58] sm:$0xff] }
 0x48e   :  { %v8897_v10 = vadd.f32 %v8849_v29, %v22381_v47  ;;  %v8825_v57 = vmul.f32 %v8777_v32, %v22397_v23  ;;  %8608 = vmatpush1.bf16.msra.mxu0 %v18194_v41  ;;  %v7225_v29 = vadd.f32 %v22075_v11, %v7182_v24  ;;  %v7307_v41 = vadd.f32 %v22080_v33, %v1276_v56  ;;  %v522_v32 = vld [vmem:[#allocation5 + $0xd18] sm:$0xff] }
 0x48f   :  { %8651 = vmatpush1.bf16.msra.mxu1 %v18578_v52  ;;  %8609 = vmatprep.subr.bf16.mxu0 %v18171_v48  ;;  %v7354_v19 = vadd.f32 %v22119_v37, %v7311_v34  ;;  %v18123_v52 = vcombine.high %v546_v35, %v558_v38  ;;  %v7221_v48 = vadd.f32 %v22043_v28, %v7178_v45  ;;  %v906_v24 = vld [vmem:[#allocation5 + $0x1918] sm:$0xff] }
 0x490   :  { %v8945_v46 = vmul.f32 0.7978846, %v8897_v10  ;;  %v8873_v22 = vmul.f32 %v8825_v57, %v22397_v23  ;;  %8652 = vmatprep.subr.bf16.mxu1 %v18555_v26  ;;  %v7350_v44 = vadd.f32 %v22092_v27, %v7307_v41  ;;  %v18507_v33 = vcombine.high %v930_v0, %v942_v42  ;;  %v534_v26 = vld [vmem:[#allocation5 + $0xd78] sm:$0xff] }
 0x491   :  { %v22420_v37 = vadd.f32 %v22086_v51, %v7225_v29  ;;  %v22423_v55 = vadd.f32 %v22056_v59, %v7221_v48  ;;  %v22426_v27 = vadd.f32 %v22121_v7, %v7354_v19  ;;  %v18099_v56 = vcombine.high %v522_v32, %v534_v26  ;;  %v510_v61 = vld [vmem:[#allocation5 + $0xcb8] sm:$0xff] }
 0x492   :  { %21744 = vtanh.f32 %v8945_v46  ;;  %v8921_v43 = vadd.f32 %v8873_v22, %v22397_v23  ;;  %8610 = vmatpush1.bf16.msra.mxu0 %v18170_v12  ;;  %v918_v22 = vld [vmem:[#allocation5 + $0x1978] sm:$0xff]  ;;  %v22429_v28 = vadd.f32 %v22096_v15, %v7350_v44  ;;  %v18098_v38 = vcombine.low %v522_v32, %v534_v26 }
 0x493   :  { %8653 = vmatpush1.bf16.msra.mxu1 %v18554_v49  ;;  %8611 = vmatprep.subr.bf16.mxu0 %v18147_v17  ;;  %v18483_v51 = vcombine.high %v906_v24, %v918_v22  ;;  %v8762_v59 = vmul.f32 0.044715, %v22420_v37  ;;  %v882_v10 = vld [vmem:[#allocation5 + $0x1858] sm:$0xff]  ;;  %v8738_v7 = vmul.f32 0.044715, %v22423_v55  ;;  %v18482_v35 = vcombine.low %v906_v24, %v918_v22 }
 0x494   :  { %v8969_v11 = vmul.f32 0.7978846, %v8921_v43  ;;  %8654 = vmatprep.subr.bf16.mxu1 %v18531_v58  ;;  %v18506_v58 = vcombine.low %v930_v0, %v942_v42  ;;  %v894_v57 = vld [vmem:[#allocation5 + $0x18b8] sm:$0xff]  ;;  %v8764_v12 = vmul.f32 0.044715, %v22426_v27  ;;  %v18075_v45 = vcombine.high %v498_v13, %v510_v61 }
 0x495   :  { %v8740_v15 = vmul.f32 0.044715, %v22429_v28  ;;  %v18459_v49 = vcombine.high %v882_v10, %v894_v57  ;;  %v858_v17 = vld [vmem:[#allocation5 + $0x1798] sm:$0xff]  ;;  %v8810_v46 = vmul.f32 %v8762_v59, %v22420_v37  ;;  %v8786_v0 = vmul.f32 %v8738_v7, %v22423_v55 }
 0x496   :  { %21746 = vtanh.f32 %v8969_v11  ;;  %8612 = vmatpush1.bf16.msra.mxu0 %v18146_v62  ;;  %v870_v34 = vld [vmem:[#allocation5 + $0x17f8] sm:$0xff]  ;;  %v8812_v42 = vmul.f32 %v8764_v12, %v22426_v27  ;;  %v18074_v19 = vcombine.low %v498_v13, %v510_v61  ;;  %v18458_v44 = vcombine.low %v882_v10, %v894_v57 }
 0x497   :  { %8655 = vmatpush1.bf16.msra.mxu1 %v18530_v63  ;;  %8613 = vmatprep.subr.bf16.mxu0 %v18123_v52  ;;  %v1242_v29 = vld [vmem:[#allocation5 + $0x2398] sm:$0xff]  ;;  %v8788_v62 = vmul.f32 %v8740_v15, %v22429_v28  ;;  %v18435_v63 = vcombine.high %v858_v17, %v870_v34  ;;  %v8834_v24 = vmul.f32 %v8786_v0, %v22423_v55  ;;  %v8705_v7 = vmul.f32 0.5, %v22381_v47 }
 0x498   :  { %8656 = vmatprep.subr.bf16.mxu1 %v18507_v33  ;;  %v1254_v41 = vld [vmem:[#allocation5 + $0x23f8] sm:$0xff]  ;;  %v8858_v33 = vmul.f32 %v8810_v46, %v22420_v37  ;;  %v8860_v22 = vmul.f32 %v8812_v42, %v22426_v27  ;;  %v8729_v12 = vmul.f32 0.5, %v22397_v23 }
 0x499   :  { %v18819_v52 = vcombine.high %v1242_v29, %v1254_v41  ;;  %v834_v48 = vld [vmem:[#allocation5 + $0x16d8] sm:$0xff]  ;;  %v18818_v13 = vcombine.low %v1242_v29, %v1254_v41  ;;  %v8882_v0 = vadd.f32 %v8834_v24, %v22423_v55 }
 0x49a   :  { %8614 = vmatpush1.bf16.msra.mxu0 %v18122_v14  ;;  %v846_v11 = vld [vmem:[#allocation5 + $0x1738] sm:$0xff]  ;;  %v18434_v14 = vcombine.low %v858_v17, %v870_v34  ;;  %v8908_v17 = vadd.f32 %v8860_v22, %v22426_v27 }
 0x49b   :  { %8657 = vmatpush1.bf16.msra.mxu1 %v18506_v58  ;;  %8615 = vmatprep.subr.bf16.mxu0 %v18099_v56  ;;  %v1218_v32 = vld [vmem:[#allocation5 + $0x22d8] sm:$0xff]  ;;  %v18411_v61 = vcombine.high %v834_v48, %v846_v11 }
 0x49c   :  { %8658 = vmatprep.subr.bf16.mxu1 %v18483_v51  ;;  %v1230_v26 = vld [vmem:[#allocation5 + $0x2338] sm:$0xff]  ;;  %v8836_v51 = vmul.f32 %v8788_v62, %v22429_v28 }
 0x49d   :  { %v18795_v59 = vcombine.high %v1218_v32, %v1230_v26  ;;  %v810_v10 = vld [vmem:[#allocation5 + $0x1618] sm:$0xff]  ;;  %v18794_v29 = vcombine.low %v1218_v32, %v1230_v26  ;;  %v8930_v32 = vmul.f32 0.7978846, %v8882_v0 }
 0x49e   :  { %8616 = vmatpush1.bf16.msra.mxu0 %v18098_v38  ;;  %v822_v57 = vld [vmem:[#allocation5 + $0x1678] sm:$0xff] }
 0x49f   :  { %v21745_v43 = vpop.eup %21744  ;;  %8659 = vmatpush1.bf16.msra.mxu1 %v18482_v35  ;;  %8617 = vmatprep.subr.bf16.mxu0 %v18075_v45  ;;  %v1194_v15 = vld [vmem:[#allocation5 + $0x2218] sm:$0xff]  ;;  %v8906_v45 = vadd.f32 %v8858_v33, %v22420_v37  ;;  %v18387_v41 = vcombine.high %v810_v10, %v822_v57 }
 0x4a0   :  { %8660 = vmatprep.subr.bf16.mxu1 %v18459_v49  ;;  %v9041_v58 = vadd.f32 1.0, %v21745_v43  ;;  %v1206_v35 = vld [vmem:[#allocation5 + $0x2278] sm:$0xff]  ;;  %v18410_v49 = vcombine.low %v834_v48, %v846_v11  ;;  %v8956_v48 = vmul.f32 0.7978846, %v8908_v17 }
 0x4a1   :  { %v18771_v47 = vcombine.high %v1194_v15, %v1206_v35  ;;  %v786_v23 = vld [vmem:[#allocation5 + $0x1558] sm:$0xff]  ;;  %v18770_v11 = vcombine.low %v1194_v15, %v1206_v35 }
 0x4a2   :  { %8618 = vmatpush1.bf16.msra.mxu0 %v18074_v19  ;;  %v9089_v34 = vmul.f32 %v9041_v58, %v8705_v7  ;;  %v798_v42 = vld [vmem:[#allocation5 + $0x15b8] sm:$0xff]  ;;  %v8884_v19 = vadd.f32 %v8836_v51, %v22429_v28 }
 0x4a3   :  { %v21747_v56 = vpop.eup %21746  ;;  %8661 = vmatpush1.bf16.msra.mxu1 %v18458_v44  ;;  %8619 = vmatprep.subr.bf16.mxu0 %v18435_v63  ;;  %v1170_v62 = vld [vmem:[#allocation5 + $0x2158] sm:$0xff]  ;;  %v8954_v63 = vmul.f32 0.7978846, %v8906_v45  ;;  %v18363_v33 = vcombine.high %v786_v23, %v798_v42  ;;  %v18362_v51 = vcombine.low %v786_v23, %v798_v42 }
 0x4a4   :  { %8662 = vmatprep.subr.bf16.mxu1 %v18819_v52  ;;  %v9065_v38 = vadd.f32 1.0, %v21747_v56  ;;  %v1182_v44 = vld [vmem:[#allocation5 + $0x21b8] sm:$0xff]  ;;  %v18386_v52 = vcombine.low %v810_v10, %v822_v57 }
 0x4a5   :  { %v18747_v26 = vcombine.high %v1170_v62, %v1182_v44  ;;  %v762_v24 = vld [vmem:[#allocation5 + $0x1498] sm:$0xff]  ;;  %21748 = vtanh.f32 %v8954_v63 }
 0x4a6   :  { %8620 = vmatpush2.bf16.msra.mxu0 %v18434_v14  ;;  %v9113_v46 = vmul.f32 %v9065_v38, %v8729_v12  ;;  %v774_v22 = vld [vmem:[#allocation5 + $0x14f8] sm:$0xff]  ;;  %v8932_v14 = vmul.f32 0.7978846, %v8884_v19  ;;  %21750 = vtanh.f32 %v8956_v48 }
 0x4a7   :  { %8663 = vmatpush2.bf16.msra.mxu1 %v18818_v13  ;;  %8621 = vmatprep.subr.bf16.mxu0 %v18411_v61  ;;  %v1146_v58 = vld [vmem:[#allocation5 + $0x2098] sm:$0xff]  ;;  %v18746_v13 = vcombine.low %v1170_v62, %v1182_v44  ;;  %v18339_v61 = vcombine.high %v762_v24, %v774_v22  ;;  %21752 = vtanh.f32 %v8930_v32  ;;  %v18338_v38 = vcombine.low %v762_v24, %v774_v22 }
 0x4a8   :  { %8664 = vmatprep.subr.bf16.mxu1 %v18795_v59  ;;  %v22449_v43 = vpack.c.bf16 %v9113_v46, %v9089_v34  ;;  %v1158_v56 = vld [vmem:[#allocation5 + $0x20f8] sm:$0xff]  ;;  %21754 = vtanh.f32 %v8932_v14 }
 0x4a9   :  { %v18723_v59 = vcombine.high %v1146_v58, %v1158_v56  ;;  %v738_v10 = vld [vmem:[#allocation5 + $0x13d8] sm:$0xff]  ;;  %v18722_v15 = vcombine.low %v1146_v58, %v1158_v56 }
 0x4aa   :  { %8622 = vmatpush2.bf16.msra.mxu0 %v18410_v49  ;;  %v750_v57 = vld [vmem:[#allocation5 + $0x1438] sm:$0xff] }
 0x4ab   :  { %8665 = vmatpush2.bf16.msra.mxu1 %v18794_v29  ;;  %8623 = vmatprep.subr.bf16.mxu0 %v18387_v41  ;;  %v1122_v7 = vld [vmem:[#allocation5 + $0x1fd8] sm:$0xff]  ;;  %v18315_v35 = vcombine.high %v738_v10, %v750_v57  ;;  %v22451_v29 = vpop.f32.mrf.mxu1  ;;  %v18314_v41 = vcombine.low %v738_v10, %v750_v57  ;;  %v1336_v57 = vrot.slane %v22357_v8, %v22078_v31 }
 0x4ac   :  { %8666 = vmatprep.subr.bf16.mxu1 %v18771_v47  ;;  %v1134_v12 = vld [vmem:[#allocation5 + $0x2038] sm:$0xff] }
 0x4ad   :  { %v18699_v45 = vcombine.high %v1122_v7, %v1134_v12  ;;  %v714_v49 = vld [vmem:[#allocation5 + $0x1318] sm:$0xff]  ;;  %v18698_v0 = vcombine.low %v1122_v7, %v1134_v12  ;;  %v8336_v23 = vpop.f32.mrf.mxu1  ;;  %v19989_v12 = vld [vmem:[#allocation8 + $0x454] ss:$24 sps:$4 sm:$0xff]  }
 0x4ae   :  { %8624 = vmatpush2.bf16.msra.mxu0 %v18386_v52  ;;  %v726_v17 = vld [vmem:[#allocation5 + $0x1378] sm:$0xff] }
 0x4af   :  { %8667 = vmatpush2.bf16.msra.mxu1 %v18770_v11  ;;  %8625 = vmatprep.subr.bf16.mxu0 %v18363_v33  ;;  %v1098_v34 = vld [vmem:[#allocation5 + $0x1f18] sm:$0xff]  ;;  %v18291_v47 = vcombine.high %v714_v49, %v726_v17  ;;  %v18290_v48 = vcombine.low %v714_v49, %v726_v17  ;;  %v22453_v24 = vpop.f32.mrf.mxu1  ;;  %v19984_v49 = vld [vmem:[#allocation8 + $0x150] ss:$24 sps:$4 sm:$0xff]   ;;  %v8692_v17 = vmul.f32 0.5, %v22429_v28 }
 0x4b0   :  { %8668 = vmatprep.subr.bf16.mxu1 %v18747_v26  ;;  %v1110_v46 = vld [vmem:[#allocation5 + $0x1f78] sm:$0xff] }
 0x4b1   :  { %v18675_v42 = vcombine.high %v1098_v34, %v1110_v46  ;;  %v690_v19 = vld [vmem:[#allocation5 + $0x1258] sm:$0xff]  ;;  %v18674_v33 = vcombine.low %v1098_v34, %v1110_v46  ;;  %v8340_v7 = vpop.f32.mrf.mxu1  ;;  %v22461_v46 = vpop.f32.mrf.mxu0 }
 0x4b2   :  { %8626 = vmatpush2.bf16.msra.mxu0 %v18362_v51  ;;  %v702_v62 = vld [vmem:[#allocation5 + $0x12b8] sm:$0xff]  ;;  %v21749_v52 = vpop.eup %21748 }
 0x4b3   :  { %8669 = vmatpush2.bf16.msra.mxu1 %v18746_v13  ;;  %8627 = vmatprep.subr.bf16.mxu0 %v18339_v61  ;;  %v1074_v44 = vld [vmem:[#allocation5 + $0x1e58] sm:$0xff]  ;;  %v21751_v11 = vpop.eup %21750  ;;  %v18267_v32 = vcombine.high %v690_v19, %v702_v62  ;;  %v9050_v58 = vadd.f32 1.0, %v21749_v52  ;;  %v18266_v56 = vcombine.low %v690_v19, %v702_v62  ;;  %v19986_v61 = vld [vmem:[#allocation8 + $0x154] ss:$24 sps:$4 sm:$0xff]  }
 0x4b4   :  { %8670 = vmatprep.subr.bf16.mxu1 %v18723_v59  ;;  %v1086_v63 = vld [vmem:[#allocation5 + $0x1eb8] sm:$0xff]  ;;  %v21753_v26 = vpop.eup %21752  ;;  %v9052_v51 = vadd.f32 1.0, %v21751_v11  ;;  %v8714_v59 = vmul.f32 0.5, %v22420_v37  ;;  %v19987_v37 = vld [vmem:[#allocation8 + $0x450] ss:$24 sps:$4 sm:$0xff]   ;;  %v8341_v11 = vadd.f32 %v8340_v7, %v1336_v57 }
 0x4b5   :  { %v18651_v22 = vcombine.high %v1074_v44, %v1086_v63  ;;  %v21755_v14 = vpop.eup %21754  ;;  %v18650_v13 = vcombine.low %v1074_v44, %v1086_v63  ;;  %v9026_v10 = vadd.f32 1.0, %v21753_v26  ;;  %v19995_v19 = vld [vmem:[#allocation8 + $0x424] ss:$24 sps:$4 sm:$0xff]   ;;  %v19990_v63 = vld [vmem:[#allocation8 + $0x120] ss:$24 sps:$4 sm:$0xff]  }
 0x4b6   :  { %8628 = vmatpush2.bf16.msra.mxu0 %v18338_v38  ;;  %v8716_v38 = vmul.f32 0.5, %v22426_v27  ;;  %v19993_v52 = vld [vmem:[#allocation8 + $0x420] ss:$24 sps:$4 sm:$0xff]  }
 0x4b7   :  { %8671 = vmatpush2.bf16.msra.mxu1 %v18722_v15  ;;  %8629 = vmatprep.subr.bf16.mxu0 %v18315_v35  ;;  %v9028_v15 = vadd.f32 1.0, %v21755_v14  ;;  %v8690_v35 = vmul.f32 0.5, %v22423_v55 }
 0x4b8   :  { %8672 = vmatprep.subr.bf16.mxu1 %v18699_v45  ;;  %v9098_v45 = vmul.f32 %v9050_v58, %v8714_v59  ;;  %v9100_v34 = vmul.f32 %v9052_v51, %v8716_v38 }
 0x4b9   :  { %v9074_v8 = vmul.f32 %v9026_v10, %v8690_v35  ;;  %v9076_v27 = vmul.f32 %v9028_v15, %v8692_v17  ;;  %v20002_v15 = vld [vmem:[#allocation8 + $0xc0] ss:$24 sps:$4 sm:$0xff]  }
 0x4ba   :  { %8630 = vmatpush2.bf16.msra.mxu0 %v18314_v41  ;;  %v8337_v41 = vadd.f32 %v8336_v23, %v1336_v57  ;;  %v20007_v57 = vld [vmem:[#allocation8 + $0x3c4] ss:$24 sps:$4 sm:$0xff]  }
 0x4bb   :  { %8673 = vmatpush2.bf16.msra.mxu1 %v18698_v0  ;;  %8631 = vmatprep.subr.bf16.mxu0 %v18291_v47  ;;  %v22463_v0 = vpop.f32.mrf.mxu1  ;;  %v19992_v47 = vld [vmem:[#allocation8 + $0x124] ss:$24 sps:$4 sm:$0xff]   ;;  %v22466_v55 = vpack.c.bf16 %v9098_v45, %v9074_v8  ;;  %v22469_v44 = vpack.c.bf16 %v9100_v34, %v9076_v27  ;;  %v20005_v45 = vld [vmem:[#allocation8 + $0x3c0] ss:$24 sps:$4 sm:$0xff]  }
 0x4bc   :  { %8674 = vmatprep.subr.bf16.mxu1 %v18675_v42 }
 0x4be   :  { %8632 = vmatpush2.bf16.msra.mxu0 %v18290_v48  ;;  %v19998_v48 = vld [vmem:[#allocation8 + $0xf4] ss:$24 sps:$4 sm:$0xff]  }
 0x4bf   :  { %8675 = vmatpush2.bf16.msra.mxu1 %v18674_v33  ;;  %8633 = vmatprep.subr.bf16.mxu0 %v18267_v32  ;;  %v22480_v32 = vsub.s32 5, %v22031_v50 }
 0x4c0   :  { %8676 = vmatprep.subr.bf16.mxu1 %v18651_v22  ;;  %v22483_v22 = vsub.s32 7, %v22031_v50 }
 0x4c1   :  { %23112 = vst [vmem:[#allocation56_spill] sm:$0xff] %v22480_v32  ;;  %v1284_v50 = vrot.slane %v22399_v1, %v22480_v32 }
 0x4c2   :  { %8634 = vmatpush2.bf16.msra.mxu0 %v18266_v56  ;;  %v19996_v56 = vld [vmem:[#allocation8 + $0xf0] ss:$24 sps:$4 sm:$0xff]   ;;  %v1292_v7 = vrot.slane %v22399_v1, %v22483_v22  ;;  %v20013_v1 = vld [vmem:[#allocation8 + $0x394] ss:$24 sps:$4 sm:$0xff]  }
 0x4c3   :  { %8677 = vmatpush2.bf16.msra.mxu1 %v18650_v13  ;;  %16089 = vmatprep.subr.bf16.mxu0 %v19986_v61  ;;  %v19999_v13 = vld [vmem:[#allocation8 + $0x3f0] ss:$24 sps:$4 sm:$0xff]   ;;  %v20004_v61 = vld [vmem:[#allocation8 + $0xc4] ss:$24 sps:$4 sm:$0xff]   ;;  %v7440_v35 = vadd.f32 %v22135_v18, %v1284_v50  ;;  %v7436_v8 = vadd.f32 %v22125_v54, %v1284_v50  ;;  %v20026_v50 = vld [vmem:[#allocation8] ss:$24 sps:$4 sm:$0xff]  }
 0x4c4   :  { %16132 = vmatprep.subr.bf16.mxu1 %v19989_v12  ;;  %v7569_v17 = vadd.f32 %v22171_v6, %v1292_v7  ;;  %v20011_v6 = vld [vmem:[#allocation8 + $0x390] ss:$24 sps:$4 sm:$0xff]  }
 0x4c5   :  { %v8379_v42 = vpop.f32.mrf.mxu0  ;;  %8636 = vmatmul.mubr.bf16.vlgmr.msra.gmra.mxu0 %v22013_v25 }
 0x4c6   :  { %v8380_v28 = vadd.f32 %v8379_v42, %v8337_v41  ;;  %v8422_v62 = vpop.f32.mrf.mxu1  ;;  %8679 = vmatmul.mubr.bf16.vlgmr.msra.gmra.mxu1 %v22021_v39  ;;  %16090 = vmatpush1.bf16.msra.mxu0 %v19984_v49  ;;  %v20001_v39 = vld [vmem:[#allocation8 + $0x3f4] ss:$24 sps:$4 sm:$0xff]   ;;  %v7565_v41 = vadd.f32 %v22166_v36, %v1292_v7  ;;  %v7612_v27 = vadd.f32 %v22201_v9, %v7569_v17  ;;  %v20008_v42 = vld [vmem:[#allocation8 + $0x90] ss:$24 sps:$4 sm:$0xff]   ;;  %v20019_v36 = vld [vmem:[#allocation8 + $0x364] ss:$24 sps:$4 sm:$0xff]  }
 0x4c7   :  { %16121 = vmatprep.mubr.bf16.mxu0 %v22466_v55  ;;  %16133 = vmatpush1.bf16.msra.mxu1 %v19987_v37  ;;  %v22472_v23 = vpop.f32.mrf.mxu0  ;;  %v20010_v49 = vld [vmem:[#allocation8 + $0x94] ss:$24 sps:$4 sm:$0xff]   ;;  %v7479_v9 = vadd.f32 %v22129_v3, %v7436_v8  ;;  %v20040_v8 = vld [vmem:[#allocation8 + $0x2a4] ss:$24 sps:$4 sm:$0xff]  }
 0x4c8   :  { %v22474_v25 = vadd.f32 %v8422_v62, %v8380_v28  ;;  %16164 = vmatprep.mubr.bf16.mxu1 %v22469_v44  ;;  %v22477_v33 = vpop.f32.mrf.mxu1  ;;  %16091 = vmatprep.subr.bf16.mxu0 %v19992_v47  ;;  %v20016_v28 = vld [vmem:[#allocation8 + $0x64] ss:$24 sps:$4 sm:$0xff]   ;;  %v7608_v62 = vadd.f32 %v22175_v16, %v7565_v41  ;;  %v20017_v16 = vld [vmem:[#allocation8 + $0x360] ss:$24 sps:$4 sm:$0xff]   ;;  %v20025_v3 = vld [vmem:[#allocation8 + $0x334] ss:$24 sps:$4 sm:$0xff]  }
 0x4c9   :  { %v8383_v26 = vpop.f32.mrf.mxu0  ;;  %16134 = vmatprep.subr.bf16.mxu1 %v19995_v19  ;;  %v7483_v19 = vadd.f32 %v22161_v60, %v7440_v35  ;;  %v20037_v35 = vld [vmem:[#allocation8 + $0x5d4] ss:$24 sps:$4 sm:$0xff]  }
 0x4ca   :  { %v8755_v14 = vmul.f32 0.044715, %v22474_v25  ;;  %v8384_v58 = vadd.f32 %v8383_v26, %v8341_v11  ;;  %16092 = vmatpush1.bf16.msra.mxu0 %v19990_v63  ;;  %v8426_v51 = vpop.f32.mrf.mxu1  ;;  %v22514_v11 = vadd.f32 %v22142_v40, %v7479_v9  ;;  %v23113_v26 = vld [vmem:[#allocation23_spill] sm:$0xff]  ;;  %v20023_v40 = vld [vmem:[#allocation8 + $0x330] ss:$24 sps:$4 sm:$0xff]  }
 0x4cb   :  { %16135 = vmatpush1.bf16.msra.mxu1 %v19993_v52  ;;  %16093 = vmatprep.subr.bf16.mxu0 %v19998_v48  ;;  %v22508_v63 = vadd.f32 %v22169_v2, %v7483_v19  ;;  %v22511_v52 = vadd.f32 %v22203_v30, %v7612_v27  ;;  %v20014_v48 = vld [vmem:[#allocation8 + $0x60] ss:$24 sps:$4 sm:$0xff]   ;;  %v20043_v27 = vld [vmem:[#allocation8 + $0x5a4] ss:$24 sps:$4 sm:$0xff]   ;;  %v20046_v9 = vld [vmem:[#allocation8 + $0x274] ss:$24 sps:$4 sm:$0xff]  }
 0x4cc   :  { %v8803_v59 = vmul.f32 %v8755_v14, %v22474_v25  ;;  %v22487_v10 = vadd.f32 %v8426_v51, %v8384_v58  ;;  %16136 = vmatprep.subr.bf16.mxu1 %v20001_v39  ;;  %v20022_v39 = vld [vmem:[#allocation8 + $0x34] ss:$24 sps:$4 sm:$0xff]   ;;  %v22517_v14 = vadd.f32 %v23113_v26, %v7608_v62  ;;  %v20020_v58 = vld [vmem:[#allocation8 + $0x30] ss:$24 sps:$4 sm:$0xff]   ;;  %v20028_v51 = vld [vmem:[#allocation8 + $0x4] ss:$24 sps:$4 sm:$0xff]  }
 0x4cd   :  { %v8766_v2 = vmul.f32 0.044715, %v22508_v63  ;;  %v8768_v30 = vmul.f32 0.044715, %v22511_v52  ;;  %v20038_v19 = vld [vmem:[#allocation8 + $0x2a0] ss:$24 sps:$4 sm:$0xff]  }
 0x4ce   :  { %v8851_v12 = vmul.f32 %v8803_v59, %v22474_v25  ;;  %v8779_v38 = vmul.f32 0.044715, %v22487_v10  ;;  %16094 = vmatpush1.bf16.msra.mxu0 %v19996_v56  ;;  %v8742_v56 = vmul.f32 0.044715, %v22514_v11  ;;  %v8731_v62 = vmul.f32 0.5, %v22487_v10 }
 0x4cf   :  { %16137 = vmatpush1.bf16.msra.mxu1 %v19999_v13  ;;  %16095 = vmatprep.subr.bf16.mxu0 %v20004_v61  ;;  %v8744_v13 = vmul.f32 0.044715, %v22517_v14  ;;  %v20031_v61 = vld [vmem:[#allocation8 + $0x304] ss:$24 sps:$4 sm:$0xff]   ;;  %v8814_v59 = vmul.f32 %v8766_v2, %v22508_v63  ;;  %v20044_v2 = vld [vmem:[#allocation8 + $0x270] ss:$24 sps:$4 sm:$0xff]  }
 0x4d0   :  { %v8899_v34 = vadd.f32 %v8851_v12, %v22474_v25  ;;  %v8827_v37 = vmul.f32 %v8779_v38, %v22487_v10  ;;  %16138 = vmatprep.subr.bf16.mxu1 %v20007_v57  ;;  %v8816_v57 = vmul.f32 %v8768_v30, %v22511_v52  ;;  %v8790_v7 = vmul.f32 %v8742_v56, %v22514_v11  ;;  %v20029_v12 = vld [vmem:[#allocation8 + $0x300] ss:$24 sps:$4 sm:$0xff]   ;;  %v20034_v38 = vld [vmem:[#allocation8 + $0x2d4] ss:$24 sps:$4 sm:$0xff]  }
 0x4d2   :  { %v8947_v47 = vmul.f32 0.7978846, %v8899_v34  ;;  %v8875_v18 = vmul.f32 %v8827_v37, %v22487_v10  ;;  %16096 = vmatpush1.bf16.msra.mxu0 %v20002_v15  ;;  %v8792_v15 = vmul.f32 %v8744_v13, %v22517_v14  ;;  %v8864_v17 = vmul.f32 %v8816_v57, %v22511_v52  ;;  %v20032_v34 = vld [vmem:[#allocation8 + $0x2d0] ss:$24 sps:$4 sm:$0xff]   ;;  %v20050_v13 = vld [vmem:[#allocation8 + $0x240] ss:$24 sps:$4 sm:$0xff]  }
 0x4d3   :  { %16139 = vmatpush1.bf16.msra.mxu1 %v20005_v45  ;;  %16097 = vmatprep.subr.bf16.mxu0 %v20010_v49  ;;  %v8862_v49 = vmul.f32 %v8814_v59, %v22508_v63  ;;  %v8838_v37 = vmul.f32 %v8790_v7, %v22514_v11  ;;  %v20058_v59 = vld [vmem:[#allocation8 + $0x214] ss:$24 sps:$4 sm:$0xff]   ;;  %v20059_v7 = vld [vmem:[#allocation8 + $0x510] ss:$24 sps:$4 sm:$0xff]  }
 0x4d4   :  { %21756 = vtanh.f32 %v8947_v47  ;;  %v8923_v54 = vadd.f32 %v8875_v18, %v22487_v10  ;;  %16140 = vmatprep.subr.bf16.mxu1 %v20013_v1  ;;  %v20035_v1 = vld [vmem:[#allocation8 + $0x5d0] ss:$24 sps:$4 sm:$0xff]   ;;  %v8840_v41 = vmul.f32 %v8792_v15, %v22517_v14  ;;  %v20061_v57 = vld [vmem:[#allocation8 + $0x514] ss:$24 sps:$4 sm:$0xff]   ;;  %v20062_v15 = vld [vmem:[#allocation8 + $0x1e0] ss:$24 sps:$4 sm:$0xff]  }
 0x4d5   :  { %v20047_v10 = vld [vmem:[#allocation8 + $0x570] ss:$24 sps:$4 sm:$0xff]  }
 0x4d6   :  { %v8971_v60 = vmul.f32 0.7978846, %v8923_v54  ;;  %16098 = vmatpush1.bf16.msra.mxu0 %v20008_v42  ;;  %v8910_v42 = vadd.f32 %v8862_v49, %v22508_v63  ;;  %v20073_v49 = vld [vmem:[#allocation8 + $0x4b4] ss:$24 sps:$4 sm:$0xff]  }
 0x4d7   :  { %16141 = vmatpush1.bf16.msra.mxu1 %v20011_v6  ;;  %16099 = vmatprep.subr.bf16.mxu0 %v20016_v28  ;;  %v8912_v6 = vadd.f32 %v8864_v17, %v22511_v52  ;;  %v8707_v28 = vmul.f32 0.5, %v22474_v25 }
 0x4d8   :  { %21758 = vtanh.f32 %v8971_v60  ;;  %16142 = vmatprep.subr.bf16.mxu1 %v20019_v36  ;;  %v20041_v36 = vld [vmem:[#allocation8 + $0x5a0] ss:$24 sps:$4 sm:$0xff]   ;;  %v8886_v60 = vadd.f32 %v8838_v37, %v22514_v11 }
 0x4d9   :  { %v8960_v30 = vmul.f32 0.7978846, %v8912_v6  ;;  %v20077_v6 = vld [vmem:[#allocation8 + $0x480] ss:$24 sps:$4 sm:$0xff]  }
 0x4da   :  { %16100 = vmatpush1.bf16.msra.mxu0 %v20014_v48  ;;  %v20049_v48 = vld [vmem:[#allocation8 + $0x574] ss:$24 sps:$4 sm:$0xff]   ;;  %v8934_v56 = vmul.f32 0.7978846, %v8886_v60 }
 0x4db   :  { %16143 = vmatpush1.bf16.msra.mxu1 %v20017_v16  ;;  %16101 = vmatprep.subr.bf16.mxu0 %v20022_v39  ;;  %v8888_v16 = vadd.f32 %v8840_v41, %v22517_v14 }
 0x4dc   :  { %16144 = vmatprep.subr.bf16.mxu1 %v20025_v3  ;;  %v8958_v3 = vmul.f32 0.7978846, %v8910_v42  ;;  %v20074_v42 = vld [vmem:[#allocation8 + $0x180] ss:$24 sps:$4 sm:$0xff]  }
 0x4de   :  { %16102 = vmatpush1.bf16.msra.mxu0 %v20020_v58  ;;  %v20052_v58 = vld [vmem:[#allocation8 + $0x244] ss:$24 sps:$4 sm:$0xff]   ;;  %21760 = vtanh.f32 %v8958_v3  ;;  %v20080_v3 = vld [vmem:[#allocation8 + $0x750] ss:$24 sps:$4 sm:$0xff]  }
 0x4df   :  { %16145 = vmatpush1.bf16.msra.mxu1 %v20023_v40  ;;  %16103 = vmatprep.subr.bf16.mxu0 %v20028_v51  ;;  %v20055_v40 = vld [vmem:[#allocation8 + $0x544] ss:$24 sps:$4 sm:$0xff]   ;;  %v8936_v51 = vmul.f32 0.7978846, %v8888_v16  ;;  %21762 = vtanh.f32 %v8960_v30 }
 0x4e0   :  { %16146 = vmatprep.subr.bf16.mxu1 %v20031_v61  ;;  %v20053_v61 = vld [vmem:[#allocation8 + $0x540] ss:$24 sps:$4 sm:$0xff]   ;;  %21764 = vtanh.f32 %v8934_v56  ;;  %v20088_v56 = vld [vmem:[#allocation8 + $0x724] ss:$24 sps:$4 sm:$0xff]  }
 0x4e1   :  { %v21757_v45 = vpop.eup %21756  ;;  %21766 = vtanh.f32 %v8936_v51  ;;  %v23114_v51 = vld [vmem:[#allocation17_spill] sm:$0xff] }
 0x4e2   :  { %16104 = vmatpush1.bf16.msra.mxu0 %v20026_v50  ;;  %v9043_v47 = vadd.f32 1.0, %v21757_v45  ;;  %v20056_v50 = vld [vmem:[#allocation8 + $0x210] ss:$24 sps:$4 sm:$0xff]   ;;  %v20070_v45 = vld [vmem:[#allocation8 + $0x1b4] ss:$24 sps:$4 sm:$0xff]  }
 0x4e3   :  { %16147 = vmatpush1.bf16.msra.mxu1 %v20029_v12  ;;  %16105 = vmatprep.subr.bf16.mxu0 %v20034_v38  ;;  %v20064_v12 = vld [vmem:[#allocation8 + $0x1e4] ss:$24 sps:$4 sm:$0xff]  }
 0x4e4   :  { %16148 = vmatprep.subr.bf16.mxu1 %v20037_v35  ;;  %v9091_v39 = vmul.f32 %v9043_v47, %v8707_v28  ;;  %v20067_v38 = vld [vmem:[#allocation8 + $0x4e4] ss:$24 sps:$4 sm:$0xff]   ;;  %v20065_v35 = vld [vmem:[#allocation8 + $0x4e0] ss:$24 sps:$4 sm:$0xff]   ;;  %v20082_v28 = vld [vmem:[#allocation8 + $0x754] ss:$24 sps:$4 sm:$0xff]  }
 0x4e5   :  { %v21759_v18 = vpop.eup %21758 }
 0x4e6   :  { %16106 = vmatpush2.bf16.msra.mxu0 %v20032_v34  ;;  %v9067_v54 = vadd.f32 1.0, %v21759_v18  ;;  %v20068_v34 = vld [vmem:[#allocation8 + $0x1b0] ss:$24 sps:$4 sm:$0xff]  }
 0x4e7   :  { %16149 = vmatpush2.bf16.msra.mxu1 %v20035_v1  ;;  %16107 = vmatprep.subr.bf16.mxu0 %v20040_v8  ;;  %v20071_v1 = vld [vmem:[#allocation8 + $0x4b0] ss:$24 sps:$4 sm:$0xff]   ;;  %v20076_v8 = vld [vmem:[#allocation8 + $0x184] ss:$24 sps:$4 sm:$0xff]  }
 0x4e8   :  { %16150 = vmatprep.subr.bf16.mxu1 %v20043_v27  ;;  %v9115_v26 = vmul.f32 %v9067_v54, %v8731_v62  ;;  %v20079_v27 = vld [vmem:[#allocation8 + $0x484] ss:$24 sps:$4 sm:$0xff]   ;;  %v8718_v62 = vmul.f32 0.5, %v22508_v63  ;;  %v22547_v63 = vpop.f32.mrf.mxu0 }
 0x4ea   :  { %16108 = vmatpush2.bf16.msra.mxu0 %v20038_v19  ;;  %v22537_v25 = vpack.c.bf16 %v9115_v26, %v9091_v39  ;;  %v22542_v39 = vld [vmem:[#allocation7 + $0x10] sm:$0xff] }
 0x4eb   :  { %16151 = vmatpush2.bf16.msra.mxu1 %v20041_v36  ;;  %16109 = vmatprep.subr.bf16.mxu0 %v20046_v9  ;;  %v21761_v17 = vpop.eup %21760  ;;  %v20085_v36 = vld [vmem:[#allocation8 + $0xa54] ss:$24 sps:$4 sm:$0xff]   ;;  %v8720_v9 = vmul.f32 0.5, %v22511_v52  ;;  %v1344_v26 = vrot.slane %v22542_v39, %v22115_v20 }
 0x4ec   :  { %16152 = vmatprep.subr.bf16.mxu1 %v20049_v48  ;;  %v21763_v37 = vpop.eup %21762  ;;  %v9054_v18 = vadd.f32 1.0, %v21761_v17  ;;  %v8694_v48 = vmul.f32 0.5, %v22514_v11  ;;  %v20814_v20 = vld [vmem:[#allocation8 + $0xe7c] ss:$24 sps:$4 sm:$0xff]  }
 0x4ed   :  { %v21765_v41 = vpop.eup %21764  ;;  %v9056_v19 = vadd.f32 1.0, %v21763_v37  ;;  %v20092_v37 = vld [vmem:[#allocation8 + $0x6f0] ss:$24 sps:$4 sm:$0xff]  }
 0x4ee   :  { %16110 = vmatpush2.bf16.msra.mxu0 %v20044_v2  ;;  %v21767_v47 = vpop.eup %21766  ;;  %v9030_v54 = vadd.f32 1.0, %v21765_v41  ;;  %v9102_v16 = vmul.f32 %v9054_v18, %v8718_v62  ;;  %v8696_v2 = vmul.f32 0.5, %v22517_v14  ;;  %v20100_v41 = vld [vmem:[#allocation8 + $0x6c4] ss:$24 sps:$4 sm:$0xff]   ;;  %v22567_v18 = vld [vmem:[#allocation7 + $0x8] sm:$0xff] }
 0x4ef   :  { %16153 = vmatpush2.bf16.msra.mxu1 %v20047_v10  ;;  %16111 = vmatprep.subr.bf16.mxu0 %v20052_v58  ;;  %v9032_v60 = vadd.f32 1.0, %v21767_v47  ;;  %v9104_v30 = vmul.f32 %v9056_v19, %v8720_v9  ;;  %v20083_v10 = vld [vmem:[#allocation8 + $0xa50] ss:$24 sps:$4 sm:$0xff]   ;;  %v22549_v58 = vpop.f32.mrf.mxu1  ;;  %v20103_v47 = vld [vmem:[#allocation8 + $0x9c4] ss:$24 sps:$4 sm:$0xff]   ;;  %v1308_v19 = vrot.slane %v22567_v18, %v22392_v21 }
 0x4f0   :  { %16154 = vmatprep.subr.bf16.mxu1 %v20055_v40  ;;  %v9078_v52 = vmul.f32 %v9030_v54, %v8694_v48  ;;  %v20101_v54 = vld [vmem:[#allocation8 + $0x9c0] ss:$24 sps:$4 sm:$0xff]   ;;  %v23117_v9 = vld [vmem:[#allocation33_spill] sm:$0xff] }
 0x4f1   :  { %v9080_v11 = vmul.f32 %v9032_v60, %v8696_v2  ;;  %v7827_v60 = vadd.f32 %v23117_v9, %v1308_v19  ;;  %v20109_v48 = vld [vmem:[#allocation8 + $0x994] ss:$24 sps:$4 sm:$0xff]  }
 0x4f2   :  { %16112 = vmatpush2.bf16.msra.mxu0 %v20050_v13  ;;  %v22552_v13 = vpack.c.bf16 %v9102_v16, %v9078_v52  ;;  %v23118_v16 = vld [vmem:[#allocation25_spill] sm:$0xff] }
 0x4f3   :  { %16155 = vmatpush2.bf16.msra.mxu1 %v20053_v61  ;;  %16113 = vmatprep.subr.bf16.mxu0 %v20058_v59  ;;  %v20091_v61 = vld [vmem:[#allocation8 + $0xa24] ss:$24 sps:$4 sm:$0xff]   ;;  %v20104_v52 = vld [vmem:[#allocation8 + $0x690] ss:$24 sps:$4 sm:$0xff]  }
 0x4f4   :  { %16156 = vmatprep.subr.bf16.mxu1 %v20061_v57  ;;  %v23115_v57 = vld [vmem:[#allocation19_spill] sm:$0xff] }
 0x4f6   :  { %16114 = vmatpush2.bf16.msra.mxu0 %v20056_v50  ;;  %v22555_v50 = vpack.c.bf16 %v9104_v30, %v9080_v11  ;;  %v23120_v30 = vld [vmem:[#allocation37_spill] sm:$0xff]  ;;  %v23121_v11 = vld [vmem:[#allocation30_spill] sm:$0xff] }
 0x4f7   :  { %16157 = vmatpush2.bf16.msra.mxu1 %v20059_v7  ;;  %16115 = vmatprep.subr.bf16.mxu0 %v20064_v12  ;;  %v20086_v7 = vld [vmem:[#allocation8 + $0x720] ss:$24 sps:$4 sm:$0xff]  }
 0x4f8   :  { %16158 = vmatprep.subr.bf16.mxu1 %v20067_v38  ;;  %v20089_v38 = vld [vmem:[#allocation8 + $0xa20] ss:$24 sps:$4 sm:$0xff]  }
 0x4fa   :  { %16116 = vmatpush2.bf16.msra.mxu0 %v20062_v15  ;;  %v20094_v15 = vld [vmem:[#allocation8 + $0x6f4] ss:$24 sps:$4 sm:$0xff]  }
 0x4fb   :  { %16159 = vmatpush2.bf16.msra.mxu1 %v20065_v35  ;;  %16117 = vmatprep.subr.bf16.mxu0 %v20070_v45 }
 0x4fc   :  { %16160 = vmatprep.subr.bf16.mxu1 %v20073_v49  ;;  %v20097_v49 = vld [vmem:[#allocation8 + $0x9f4] ss:$24 sps:$4 sm:$0xff]  }
 0x4fe   :  { %16118 = vmatpush2.bf16.msra.mxu0 %v20068_v34 }
 0x4ff   :  { %16161 = vmatpush2.bf16.msra.mxu1 %v20071_v1  ;;  %16119 = vmatprep.subr.bf16.mxu0 %v20076_v8  ;;  %v20095_v8 = vld [vmem:[#allocation8 + $0x9f0] ss:$24 sps:$4 sm:$0xff]  }
 0x500   :  { %16162 = vmatprep.subr.bf16.mxu1 %v20079_v27 }
 0x502   :  { %16120 = vmatpush2.bf16.msra.mxu0 %v20074_v42  ;;  %v1300_v42 = vrot.slane %v22567_v18, %v22385_v5 }
 0x503   :  { %16163 = vmatpush2.bf16.msra.mxu1 %v20077_v6  ;;  %16175 = vmatprep.subr.bf16.mxu0 %v20082_v28  ;;  %v20098_v6 = vld [vmem:[#allocation8 + $0x6c0] ss:$24 sps:$4 sm:$0xff]  }
 0x504   :  { %16218 = vmatprep.subr.bf16.mxu1 %v20085_v36  ;;  %v23116_v28 = vld [vmem:[#allocation27_spill] sm:$0xff]  ;;  %v20106_v36 = vld [vmem:[#allocation8 + $0x694] ss:$24 sps:$4 sm:$0xff]  }
 0x505   :  { %v8465_v40 = vpop.f32.mrf.mxu0  ;;  %16122 = vmatmul.mubr.bf16.vlgmr.msra.gmra.mxu0 %v23114_v51  ;;  %v7698_v62 = vadd.f32 %v23116_v28, %v1300_v42  ;;  %v20121_v28 = vld [vmem:[#allocation8 + $0x934] ss:$24 sps:$4 sm:$0xff]  }
 0x506   :  { %v8466_v59 = vadd.f32 %v8465_v40, %v1344_v26  ;;  %v8508_v14 = vpop.f32.mrf.mxu1  ;;  %16165 = vmatmul.mubr.bf16.vlgmr.msra.gmra.mxu1 %v23115_v57  ;;  %16176 = vmatpush1.bf16.msra.mxu0 %v20080_v3  ;;  %v23119_v3 = vld [vmem:[#allocation31_spill] sm:$0xff]  ;;  %v20107_v40 = vld [vmem:[#allocation8 + $0x990] ss:$24 sps:$4 sm:$0xff]  }
 0x507   :  { %16207 = vmatprep.mubr.bf16.mxu0 %v22552_v13  ;;  %16219 = vmatpush1.bf16.msra.mxu1 %v20083_v10  ;;  %v22558_v12 = vpop.f32.mrf.mxu0  ;;  %v7823_v2 = vadd.f32 %v23119_v3, %v1308_v19  ;;  %v7870_v10 = vadd.f32 %v23120_v30, %v7827_v60  ;;  %v23127_v19 = vld [vmem:[#allocation35_spill] sm:$0xff]  ;;  %v20119_v60 = vld [vmem:[#allocation8 + $0x930] ss:$24 sps:$4 sm:$0xff]  }
 0x508   :  { %v22560_v35 = vadd.f32 %v8508_v14, %v8466_v59  ;;  %16250 = vmatprep.mubr.bf16.mxu1 %v22555_v50  ;;  %v22563_v45 = vpop.f32.mrf.mxu1  ;;  %16177 = vmatprep.subr.bf16.mxu0 %v20088_v56  ;;  %v7741_v56 = vadd.f32 %v23121_v11, %v7698_v62  ;;  %v23122_v59 = vld [vmem:[#allocation34_spill] sm:$0xff] }
 0x509   :  { %v8469_v17 = vpop.f32.mrf.mxu0  ;;  %16220 = vmatprep.subr.bf16.mxu1 %v20091_v61  ;;  %v20112_v61 = vld [vmem:[#allocation8 + $0x664] ss:$24 sps:$4 sm:$0xff]   ;;  %v7866_v14 = vadd.f32 %v23122_v59, %v7823_v2  ;;  %v20122_v30 = vld [vmem:[#allocation8 + $0x600] ss:$24 sps:$4 sm:$0xff]   ;;  %v20130_v11 = vld [vmem:[#allocation8 + $0x8d4] ss:$24 sps:$4 sm:$0xff]  }
 0x50a   :  { %v8470_v34 = vadd.f32 %v8469_v17, %v1344_v26  ;;  %16178 = vmatpush1.bf16.msra.mxu0 %v20086_v7  ;;  %v8512_v1 = vpop.f32.mrf.mxu1  ;;  %v7694_v26 = vadd.f32 %v23118_v16, %v1300_v42  ;;  %v20115_v7 = vld [vmem:[#allocation8 + $0x964] ss:$24 sps:$4 sm:$0xff]   ;;  %v20118_v42 = vld [vmem:[#allocation8 + $0x634] ss:$24 sps:$4 sm:$0xff]  }
 0x50b   :  { %16221 = vmatpush1.bf16.msra.mxu1 %v20089_v38  ;;  %16179 = vmatprep.subr.bf16.mxu0 %v20094_v15  ;;  %v23123_v38 = vld [vmem:[#allocation26_spill] sm:$0xff] }
 0x50c   :  { %v22565_v27 = vadd.f32 %v8512_v1, %v8470_v34  ;;  %16222 = vmatprep.subr.bf16.mxu1 %v20097_v49  ;;  %v7737_v15 = vadd.f32 %v23123_v38, %v7694_v26  ;;  %v23124_v49 = vld [vmem:[#allocation32_spill] sm:$0xff]  ;;  %v23125_v34 = vld [vmem:[#allocation38_spill] sm:$0xff] }
 0x50d   :  { %v22582_v17 = vadd.f32 %v23124_v49, %v7741_v56  ;;  %v20110_v1 = vld [vmem:[#allocation8 + $0x660] ss:$24 sps:$4 sm:$0xff]   ;;  %v20127_v26 = vld [vmem:[#allocation8 + $0x904] ss:$24 sps:$4 sm:$0xff]   ;;  %v20131_v38 = vld [vmem:[#allocation8 + $0xbd0] ss:$24 sps:$4 sm:$0xff]  }
 0x50e   :  { %16180 = vmatpush1.bf16.msra.mxu0 %v20092_v37  ;;  %v22585_v37 = vadd.f32 %v23125_v34, %v7870_v10  ;;  %v20139_v34 = vld [vmem:[#allocation8 + $0xba4] ss:$24 sps:$4 sm:$0xff]  }
 0x50f   :  { %16223 = vmatpush1.bf16.msra.mxu1 %v20095_v8  ;;  %16181 = vmatprep.subr.bf16.mxu0 %v20100_v41  ;;  %v23126_v8 = vld [vmem:[#allocation28_spill] sm:$0xff]  ;;  %v8770_v62 = vmul.f32 0.044715, %v22582_v17 }
 0x510   :  { %16224 = vmatprep.subr.bf16.mxu1 %v20103_v47  ;;  %v22588_v41 = vadd.f32 %v23126_v8, %v7737_v15  ;;  %v20113_v47 = vld [vmem:[#allocation8 + $0x960] ss:$24 sps:$4 sm:$0xff]   ;;  %v20136_v15 = vld [vmem:[#allocation8 + $0x8a4] ss:$24 sps:$4 sm:$0xff]  }
 0x511   :  { %v8818_v3 = vmul.f32 %v8770_v62, %v22582_v17  ;;  %v20134_v8 = vld [vmem:[#allocation8 + $0x8a0] ss:$24 sps:$4 sm:$0xff]   ;;  %v20145_v62 = vld [vmem:[#allocation8 + $0xb74] ss:$24 sps:$4 sm:$0xff]  }
 0x512   :  { %16182 = vmatpush1.bf16.msra.mxu0 %v20098_v6  ;;  %v22591_v6 = vadd.f32 %v23127_v19, %v7866_v14  ;;  %v8746_v9 = vmul.f32 0.044715, %v22588_v41  ;;  %v20128_v14 = vld [vmem:[#allocation8 + $0x8d0] ss:$24 sps:$4 sm:$0xff]   ;;  %v20142_v19 = vld [vmem:[#allocation8 + $0x874] ss:$24 sps:$4 sm:$0xff]  }
 0x513   :  { %16225 = vmatpush1.bf16.msra.mxu1 %v20101_v54  ;;  %16183 = vmatprep.subr.bf16.mxu0 %v20106_v36  ;;  %v8772_v54 = vmul.f32 0.044715, %v22585_v37  ;;  %v20116_v36 = vld [vmem:[#allocation8 + $0x630] ss:$24 sps:$4 sm:$0xff]  }
 0x514   :  { %16226 = vmatprep.subr.bf16.mxu1 %v20109_v48  ;;  %v20124_v48 = vld [vmem:[#allocation8 + $0x604] ss:$24 sps:$4 sm:$0xff]   ;;  %v8748_v16 = vmul.f32 0.044715, %v22591_v6  ;;  %v8794_v10 = vmul.f32 %v8746_v9, %v22588_v41  ;;  %v20140_v9 = vld [vmem:[#allocation8 + $0x870] ss:$24 sps:$4 sm:$0xff]  }
 0x515   :  { %v8820_v2 = vmul.f32 %v8772_v54, %v22585_v37 }
 0x516   :  { %16184 = vmatpush1.bf16.msra.mxu0 %v20104_v52  ;;  %v20125_v52 = vld [vmem:[#allocation8 + $0x900] ss:$24 sps:$4 sm:$0xff]   ;;  %v8796_v56 = vmul.f32 %v8748_v16, %v22591_v6  ;;  %v20148_v16 = vld [vmem:[#allocation8 + $0x844] ss:$24 sps:$4 sm:$0xff]  }
 0x517   :  { %16227 = vmatpush1.bf16.msra.mxu1 %v20107_v40  ;;  %16185 = vmatprep.subr.bf16.mxu0 %v20112_v61  ;;  %v20133_v40 = vld [vmem:[#allocation8 + $0xbd4] ss:$24 sps:$4 sm:$0xff]   ;;  %v8866_v61 = vmul.f32 %v8818_v3, %v22582_v17  ;;  %v8868_v59 = vmul.f32 %v8820_v2, %v22585_v37  ;;  %v20151_v3 = vld [vmem:[#allocation8 + $0xb44] ss:$24 sps:$4 sm:$0xff]  }
 0x518   :  { %16228 = vmatprep.subr.bf16.mxu1 %v20115_v7  ;;  %v8842_v7 = vmul.f32 %v8794_v10, %v22588_v41  ;;  %v8844_v49 = vmul.f32 %v8796_v56, %v22591_v6  ;;  %v20149_v10 = vld [vmem:[#allocation8 + $0xb40] ss:$24 sps:$4 sm:$0xff]   ;;  %v20152_v56 = vld [vmem:[#allocation8 + $0x810] ss:$24 sps:$4 sm:$0xff]  }
 0x51a   :  { %16186 = vmatpush1.bf16.msra.mxu0 %v20110_v1  ;;  %v8914_v1 = vadd.f32 %v8866_v61, %v22582_v17  ;;  %v8892_v54 = vadd.f32 %v8844_v49, %v22591_v6  ;;  %v20160_v61 = vld [vmem:[#allocation8 + $0x7e4] ss:$24 sps:$4 sm:$0xff]  }
 0x51b   :  { %16229 = vmatpush1.bf16.msra.mxu1 %v20113_v47  ;;  %16187 = vmatprep.subr.bf16.mxu0 %v20118_v42  ;;  %v8916_v47 = vadd.f32 %v8868_v59, %v22585_v37  ;;  %v20137_v42 = vld [vmem:[#allocation8 + $0xba0] ss:$24 sps:$4 sm:$0xff]   ;;  %v20163_v59 = vld [vmem:[#allocation8 + $0xae4] ss:$24 sps:$4 sm:$0xff]  }
 0x51c   :  { %16230 = vmatprep.subr.bf16.mxu1 %v20121_v28  ;;  %v8890_v28 = vadd.f32 %v8842_v7, %v22588_v41  ;;  %v8940_v2 = vmul.f32 0.7978846, %v8892_v54  ;;  %v20161_v7 = vld [vmem:[#allocation8 + $0xae0] ss:$24 sps:$4 sm:$0xff]  }
 0x51d   :  { %v20170_v54 = vld [vmem:[#allocation8 + $0x780] ss:$24 sps:$4 sm:$0xff]  }
 0x51e   :  { %16188 = vmatpush1.bf16.msra.mxu0 %v20116_v36  ;;  %v8962_v36 = vmul.f32 0.7978846, %v8914_v1 }
 0x51f   :  { %16231 = vmatpush1.bf16.msra.mxu1 %v20119_v60  ;;  %16189 = vmatprep.subr.bf16.mxu0 %v20124_v48  ;;  %v8964_v60 = vmul.f32 0.7978846, %v8916_v47  ;;  %v20143_v48 = vld [vmem:[#allocation8 + $0xb70] ss:$24 sps:$4 sm:$0xff]   ;;  %v20172_v47 = vld [vmem:[#allocation8 + $0x784] ss:$24 sps:$4 sm:$0xff]  }
 0x520   :  { %16232 = vmatprep.subr.bf16.mxu1 %v20127_v26  ;;  %v8938_v26 = vmul.f32 0.7978846, %v8890_v28  ;;  %21768 = vtanh.f32 %v8962_v36 }
 0x521   :  { %21770 = vtanh.f32 %v8964_v60  ;;  %v20178_v60 = vld [vmem:[#allocation8 + $0xd54] ss:$24 sps:$4 sm:$0xff]  }
 0x522   :  { %16190 = vmatpush1.bf16.msra.mxu0 %v20122_v30  ;;  %v20146_v30 = vld [vmem:[#allocation8 + $0x840] ss:$24 sps:$4 sm:$0xff]   ;;  %21772 = vtanh.f32 %v8938_v26  ;;  %v20181_v26 = vld [vmem:[#allocation8 + $0x1054] ss:$24 sps:$4 sm:$0xff]  }
 0x523   :  { %16233 = vmatpush1.bf16.msra.mxu1 %v20125_v52  ;;  %16191 = vmatprep.subr.bf16.mxu0 %v20130_v11  ;;  %v20154_v52 = vld [vmem:[#allocation8 + $0x814] ss:$24 sps:$4 sm:$0xff]   ;;  %21774 = vtanh.f32 %v8940_v2 }
 0x524   :  { %16234 = vmatprep.subr.bf16.mxu1 %v20133_v40  ;;  %v20157_v11 = vld [vmem:[#allocation8 + $0xb14] ss:$24 sps:$4 sm:$0xff]   ;;  %v20155_v40 = vld [vmem:[#allocation8 + $0xb10] ss:$24 sps:$4 sm:$0xff]  }
 0x526   :  { %16192 = vmatpush2.bf16.msra.mxu0 %v20128_v14  ;;  %v20158_v14 = vld [vmem:[#allocation8 + $0x7e0] ss:$24 sps:$4 sm:$0xff]  }
 0x527   :  { %16235 = vmatpush2.bf16.msra.mxu1 %v20131_v38  ;;  %16193 = vmatprep.subr.bf16.mxu0 %v20136_v15  ;;  %v20166_v38 = vld [vmem:[#allocation8 + $0x7b4] ss:$24 sps:$4 sm:$0xff]  }
 0x528   :  { %16236 = vmatprep.subr.bf16.mxu1 %v20139_v34  ;;  %v20169_v15 = vld [vmem:[#allocation8 + $0xab4] ss:$24 sps:$4 sm:$0xff]   ;;  %v20164_v34 = vld [vmem:[#allocation8 + $0x7b0] ss:$24 sps:$4 sm:$0xff]  }
 0x52a   :  { %16194 = vmatpush2.bf16.msra.mxu0 %v20134_v8  ;;  %v20167_v8 = vld [vmem:[#allocation8 + $0xab0] ss:$24 sps:$4 sm:$0xff]  }
 0x52b   :  { %16237 = vmatpush2.bf16.msra.mxu1 %v20137_v42  ;;  %16195 = vmatprep.subr.bf16.mxu0 %v20142_v19  ;;  %v20175_v19 = vld [vmem:[#allocation8 + $0xa84] ss:$24 sps:$4 sm:$0xff]  }
 0x52c   :  { %16238 = vmatprep.subr.bf16.mxu1 %v20145_v62 }
 0x52d   :  { %v21769_v49 = vpop.eup %21768 }
 0x52e   :  { %16196 = vmatpush2.bf16.msra.mxu0 %v20140_v9  ;;  %v21771_v1 = vpop.eup %21770  ;;  %v9058_v62 = vadd.f32 1.0, %v21769_v49  ;;  %v20173_v9 = vld [vmem:[#allocation8 + $0xa80] ss:$24 sps:$4 sm:$0xff]  }
 0x52f   :  { %16239 = vmatpush2.bf16.msra.mxu1 %v20143_v48  ;;  %16197 = vmatprep.subr.bf16.mxu0 %v20148_v16  ;;  %v21773_v42 = vpop.eup %21772  ;;  %v9060_v36 = vadd.f32 1.0, %v21771_v1  ;;  %v8722_v48 = vmul.f32 0.5, %v22582_v17 }
 0x530   :  { %16240 = vmatprep.subr.bf16.mxu1 %v20151_v3  ;;  %v21775_v28 = vpop.eup %21774  ;;  %v9034_v16 = vadd.f32 1.0, %v21773_v42  ;;  %v8724_v3 = vmul.f32 0.5, %v22585_v37  ;;  %v23128_v37 = vld [vmem:[#allocation21_spill] sm:$0xff] }
 0x531   :  { %v9036_v2 = vadd.f32 1.0, %v21775_v28 }
 0x532   :  { %16198 = vmatpush2.bf16.msra.mxu0 %v20146_v30  ;;  %v8698_v30 = vmul.f32 0.5, %v22588_v41  ;;  %v20187_v41 = vld [vmem:[#allocation8 + $0x1024] ss:$24 sps:$4 sm:$0xff]  }
 0x533   :  { %16241 = vmatpush2.bf16.msra.mxu1 %v20149_v10  ;;  %16199 = vmatprep.subr.bf16.mxu0 %v20154_v52  ;;  %v9106_v10 = vmul.f32 %v9058_v62, %v8722_v48  ;;  %v20176_v52 = vld [vmem:[#allocation8 + $0xd50] ss:$24 sps:$4 sm:$0xff]  }
 0x534   :  { %16242 = vmatprep.subr.bf16.mxu1 %v20157_v11  ;;  %v8700_v11 = vmul.f32 0.5, %v22591_v6  ;;  %v9082_v17 = vmul.f32 %v9034_v16, %v8698_v30  ;;  %v23130_v6 = vld [vmem:[#allocation24_spill] sm:$0xff]  ;;  %v20194_v30 = vld [vmem:[#allocation8 + $0xcc0] ss:$24 sps:$4 sm:$0xff]  }
 0x535   :  { %v20199_v16 = vld [vmem:[#allocation8 + $0xfc4] ss:$24 sps:$4 sm:$0xff]  }
 0x536   :  { %16200 = vmatpush2.bf16.msra.mxu0 %v20152_v56  ;;  %v9108_v56 = vmul.f32 %v9060_v36, %v8724_v3  ;;  %v20191_v36 = vld [vmem:[#allocation8 + $0xff0] ss:$24 sps:$4 sm:$0xff]   ;;  %v1324_v3 = vrot.slane %v22567_v18, %v22483_v22 }
 0x537   :  { %16243 = vmatpush2.bf16.msra.mxu1 %v20155_v40  ;;  %16201 = vmatprep.subr.bf16.mxu0 %v20160_v61  ;;  %v22613_v40 = vpop.f32.mrf.mxu0  ;;  %v20179_v61 = vld [vmem:[#allocation8 + $0x1050] ss:$24 sps:$4 sm:$0xff]  }
 0x538   :  { %16244 = vmatprep.subr.bf16.mxu1 %v20163_v59  ;;  %v9084_v59 = vmul.f32 %v9036_v2, %v8700_v11  ;;  %v20197_v11 = vld [vmem:[#allocation8 + $0xfc0] ss:$24 sps:$4 sm:$0xff]  }
 0x53a   :  { %16202 = vmatpush2.bf16.msra.mxu0 %v20158_v14  ;;  %v20184_v14 = vld [vmem:[#allocation8 + $0xd24] ss:$24 sps:$4 sm:$0xff]   ;;  %v22622_v49 = vpack.c.bf16 %v9108_v56, %v9084_v59  ;;  %v20202_v56 = vld [vmem:[#allocation8 + $0xc94] ss:$24 sps:$4 sm:$0xff]  }
 0x53b   :  { %16245 = vmatpush2.bf16.msra.mxu1 %v20161_v7  ;;  %16203 = vmatprep.subr.bf16.mxu0 %v20166_v38  ;;  %v22616_v38 = vpack.c.bf16 %v9106_v10, %v9082_v17  ;;  %v23132_v10 = vld [vmem:[#allocation41_spill] sm:$0xff] }
 0x53c   :  { %16246 = vmatprep.subr.bf16.mxu1 %v20169_v15  ;;  %23131 = vst [vmem:[#allocation17_spill] sm:$0xff] %v22622_v49 }
 0x53d   :  { %23129 = vst [vmem:[#allocation23_spill] sm:$0xff] %v22616_v38 }
 0x53e   :  { %16204 = vmatpush2.bf16.msra.mxu0 %v20164_v34  ;;  %v20182_v34 = vld [vmem:[#allocation8 + $0xd20] ss:$24 sps:$4 sm:$0xff]  }
 0x53f   :  { %16247 = vmatpush2.bf16.msra.mxu1 %v20167_v8  ;;  %16205 = vmatprep.subr.bf16.mxu0 %v20172_v47  ;;  %v20185_v8 = vld [vmem:[#allocation8 + $0x1020] ss:$24 sps:$4 sm:$0xff]   ;;  %v20190_v47 = vld [vmem:[#allocation8 + $0xcf4] ss:$24 sps:$4 sm:$0xff]  }
 0x540   :  { %16248 = vmatprep.subr.bf16.mxu1 %v20175_v19 }
 0x542   :  { %16206 = vmatpush2.bf16.msra.mxu0 %v20170_v54  ;;  %v20188_v54 = vld [vmem:[#allocation8 + $0xcf0] ss:$24 sps:$4 sm:$0xff]  }
 0x543   :  { %16249 = vmatpush2.bf16.msra.mxu1 %v20173_v9  ;;  %16261 = vmatprep.subr.bf16.mxu0 %v20178_v60  ;;  %v20196_v9 = vld [vmem:[#allocation8 + $0xcc4] ss:$24 sps:$4 sm:$0xff]  }
 0x544   :  { %16304 = vmatprep.subr.bf16.mxu1 %v20181_v26  ;;  %v1316_v26 = vrot.slane %v22567_v18, %v22480_v32  ;;  %v23133_v18 = vld [vmem:[#allocation39_spill] sm:$0xff] }
 0x545   :  { %v8551_v7 = vpop.f32.mrf.mxu0  ;;  %16208 = vmatmul.mubr.bf16.vlgmr.msra.gmra.mxu0 %v23128_v37 }
 0x546   :  { %v22619_v15 = vadd.f32 %v8551_v7, %v22560_v35  ;;  %16251 = vmatmul.mubr.bf16.vlgmr.msra.gmra.mxu1 %v23130_v6  ;;  %16262 = vmatpush1.bf16.msra.mxu0 %v20176_v52  ;;  %v20193_v35 = vld [vmem:[#allocation8 + $0xff4] ss:$24 sps:$4 sm:$0xff]   ;;  %v7956_v52 = vadd.f32 %v23132_v10, %v1316_v26  ;;  %v7952_v7 = vadd.f32 %v23133_v18, %v1316_v26  ;;  %v20212_v18 = vld [vmem:[#allocation8 + $0xc30] ss:$24 sps:$4 sm:$0xff]  }
 0x547   :  { %16293 = vmatprep.mubr.bf16.mxu0 %v22616_v38  ;;  %16305 = vmatpush1.bf16.msra.mxu1 %v20179_v61  ;;  %v22625_v1 = vpop.f32.mrf.mxu0  ;;  %v8085_v61 = vadd.f32 %v22331_v53, %v1324_v3  ;;  %v20203_v53 = vld [vmem:[#allocation8 + $0xf90] ss:$24 sps:$4 sm:$0xff]  }
 0x548   :  { %v8757_v42 = vmul.f32 0.044715, %v22619_v15  ;;  %16336 = vmatprep.mubr.bf16.mxu1 %v22622_v49  ;;  %16263 = vmatprep.subr.bf16.mxu0 %v20184_v14  ;;  %v20205_v14 = vld [vmem:[#allocation8 + $0xf94] ss:$24 sps:$4 sm:$0xff]  }
 0x549   :  { %v8555_v19 = vpop.f32.mrf.mxu0  ;;  %16306 = vmatprep.subr.bf16.mxu1 %v20187_v41  ;;  %v8081_v41 = vadd.f32 %v22325_v4, %v1324_v3  ;;  %v23139_v3 = vld [vmem:[#allocation50_spill] sm:$0xff] }
 0x54a   :  { %v8805_v28 = vmul.f32 %v8757_v42, %v22619_v15  ;;  %v22631_v62 = vadd.f32 %v8555_v19, %v22565_v27  ;;  %16264 = vmatpush1.bf16.msra.mxu0 %v20182_v34  ;;  %v23134_v34 = vld [vmem:[#allocation49_spill] sm:$0xff] }
 0x54b   :  { %16307 = vmatpush1.bf16.msra.mxu1 %v20185_v8  ;;  %16265 = vmatprep.subr.bf16.mxu0 %v20190_v47  ;;  %v8128_v8 = vadd.f32 %v23134_v34, %v8085_v61  ;;  %v20200_v42 = vld [vmem:[#allocation8 + $0xc90] ss:$24 sps:$4 sm:$0xff]   ;;  %v20220_v34 = vld [vmem:[#allocation8 + $0xc04] ss:$24 sps:$4 sm:$0xff]  }
 0x54c   :  { %v8853_v60 = vmul.f32 %v8805_v28, %v22619_v15  ;;  %v8781_v48 = vmul.f32 0.044715, %v22631_v62  ;;  %16308 = vmatprep.subr.bf16.mxu1 %v20193_v35  ;;  %v23135_v35 = vld [vmem:[#allocation44_spill] sm:$0xff] }
 0x54d   :  { %v7999_v19 = vadd.f32 %v23135_v35, %v7956_v52  ;;  %v20208_v28 = vld [vmem:[#allocation8 + $0xc64] ss:$24 sps:$4 sm:$0xff]   ;;  %v20209_v52 = vld [vmem:[#allocation8 + $0xf60] ss:$24 sps:$4 sm:$0xff]  }
 0x54e   :  { %v8901_v27 = vadd.f32 %v8853_v60, %v22619_v15  ;;  %v8829_v2 = vmul.f32 %v8781_v48, %v22631_v62  ;;  %16266 = vmatpush1.bf16.msra.mxu0 %v20188_v54  ;;  %v23136_v54 = vld [vmem:[#allocation46_spill] sm:$0xff]  ;;  %v23137_v48 = vld [vmem:[#allocation40_spill] sm:$0xff] }
 0x54f   :  { %16309 = vmatpush1.bf16.msra.mxu1 %v20191_v36  ;;  %16267 = vmatprep.subr.bf16.mxu0 %v20196_v9  ;;  %v8124_v36 = vadd.f32 %v23136_v54, %v8081_v41  ;;  %v20211_v60 = vld [vmem:[#allocation8 + $0xf64] ss:$24 sps:$4 sm:$0xff]   ;;  %v7995_v4 = vadd.f32 %v23137_v48, %v7952_v7  ;;  %v20215_v41 = vld [vmem:[#allocation8 + $0xf30] ss:$24 sps:$4 sm:$0xff]   ;;  %v20221_v54 = vld [vmem:[#allocation8 + $0xf00] ss:$24 sps:$4 sm:$0xff]  }
 0x550   :  { %v8949_v17 = vmul.f32 0.7978846, %v8901_v27  ;;  %v8877_v59 = vmul.f32 %v8829_v2, %v22631_v62  ;;  %16310 = vmatprep.subr.bf16.mxu1 %v20199_v16  ;;  %v23138_v16 = vld [vmem:[#allocation45_spill] sm:$0xff]  ;;  %v22655_v27 = vadd.f32 %v23139_v3, %v8128_v8  ;;  %v20206_v2 = vld [vmem:[#allocation8 + $0xc60] ss:$24 sps:$4 sm:$0xff]  }
 0x551   :  { %v22652_v26 = vadd.f32 %v23138_v16, %v7999_v19  ;;  %v20218_v19 = vld [vmem:[#allocation8 + $0xc00] ss:$24 sps:$4 sm:$0xff]   ;;  %v20224_v16 = vld [vmem:[#allocation8 + $0xed0] ss:$24 sps:$4 sm:$0xff]  }
 0x552   :  { %21776 = vtanh.f32 %v8949_v17  ;;  %v8925_v47 = vadd.f32 %v8877_v59, %v22631_v62  ;;  %16268 = vmatpush1.bf16.msra.mxu0 %v20194_v30  ;;  %v23140_v30 = vld [vmem:[#allocation42_spill] sm:$0xff] }
 0x553   :  { %16311 = vmatpush1.bf16.msra.mxu1 %v20197_v11  ;;  %16269 = vmatprep.subr.bf16.mxu0 %v20202_v56  ;;  %v22658_v10 = vadd.f32 %v23140_v30, %v7995_v4  ;;  %v20214_v11 = vld [vmem:[#allocation8 + $0xc34] ss:$24 sps:$4 sm:$0xff]   ;;  %v23141_v56 = vld [vmem:[#allocation47_spill] sm:$0xff]  ;;  %v8774_v59 = vmul.f32 0.044715, %v22652_v26 }
 0x554   :  { %v8973_v9 = vmul.f32 0.7978846, %v8925_v47  ;;  %16312 = vmatprep.subr.bf16.mxu1 %v20205_v14  ;;  %v22661_v61 = vadd.f32 %v23141_v56, %v8124_v36  ;;  %v20217_v17 = vld [vmem:[#allocation8 + $0xf34] ss:$24 sps:$4 sm:$0xff]   ;;  %v8776_v14 = vmul.f32 0.044715, %v22655_v27 }
 0x555   :  { %v8750_v7 = vmul.f32 0.044715, %v22658_v10  ;;  %v20223_v47 = vld [vmem:[#allocation8 + $0xf04] ss:$24 sps:$4 sm:$0xff]   ;;  %v20226_v36 = vld [vmem:[#allocation8 + $0xed4] ss:$24 sps:$4 sm:$0xff]  }
 0x556   :  { %21778 = vtanh.f32 %v8973_v9  ;;  %16270 = vmatpush1.bf16.msra.mxu0 %v20200_v42  ;;  %v8752_v8 = vmul.f32 0.044715, %v22661_v61  ;;  %v8822_v42 = vmul.f32 %v8774_v59, %v22652_v26  ;;  %v8824_v35 = vmul.f32 %v8776_v14, %v22655_v27 }
 0x557   :  { %16313 = vmatpush1.bf16.msra.mxu1 %v20203_v53  ;;  %16271 = vmatprep.subr.bf16.mxu0 %v20208_v28  ;;  %v8798_v28 = vmul.f32 %v8750_v7, %v22658_v10  ;;  %v8709_v59 = vmul.f32 0.5, %v22619_v15  ;;  %v8733_v14 = vmul.f32 0.5, %v22631_v62 }
 0x558   :  { %16314 = vmatprep.subr.bf16.mxu1 %v20211_v60  ;;  %v8800_v9 = vmul.f32 %v8752_v8, %v22661_v61  ;;  %v20229_v60 = vld [vmem:[#allocation8 + $0x11d4] ss:$24 sps:$4 sm:$0xff]   ;;  %v8870_v48 = vmul.f32 %v8822_v42, %v22652_v26  ;;  %v8872_v4 = vmul.f32 %v8824_v35, %v22655_v27  ;;  %v20233_v42 = vld [vmem:[#allocation8 + $0x11a0] ss:$24 sps:$4 sm:$0xff]  }
 0x559   :  { %v8846_v30 = vmul.f32 %v8798_v28, %v22658_v10  ;;  %v20238_v35 = vld [vmem:[#allocation8 + $0xe74] ss:$24 sps:$4 sm:$0xff]  }
 0x55a   :  { %16272 = vmatpush1.bf16.msra.mxu0 %v20206_v2  ;;  %v8848_v56 = vmul.f32 %v8800_v9, %v22661_v61  ;;  %v8918_v7 = vadd.f32 %v8870_v48, %v22652_v26  ;;  %v20239_v9 = vld [vmem:[#allocation8 + $0x1170] ss:$24 sps:$4 sm:$0xff]  }
 0x55b   :  { %16315 = vmatpush1.bf16.msra.mxu1 %v20209_v52  ;;  %16273 = vmatprep.subr.bf16.mxu0 %v20214_v11  ;;  %v20227_v52 = vld [vmem:[#allocation8 + $0x11d0] ss:$24 sps:$4 sm:$0xff]   ;;  %v20232_v11 = vld [vmem:[#allocation8 + $0xea4] ss:$24 sps:$4 sm:$0xff]  }
 0x55c   :  { %16316 = vmatprep.subr.bf16.mxu1 %v20217_v17  ;;  %v20235_v17 = vld [vmem:[#allocation8 + $0x11a4] ss:$24 sps:$4 sm:$0xff]   ;;  %v8896_v15 = vadd.f32 %v8848_v56, %v22661_v61  ;;  %v8966_v28 = vmul.f32 0.7978846, %v8918_v7  ;;  %v20251_v56 = vld [vmem:[#allocation8 + $0x1110] ss:$24 sps:$4 sm:$0xff]  }
 0x55d   :  { %v20257_v7 = vld [vmem:[#allocation8 + $0x10e0] ss:$24 sps:$4 sm:$0xff]  }
 0x55e   :  { %16274 = vmatpush1.bf16.msra.mxu0 %v20212_v18  ;;  %21780 = vtanh.f32 %v8966_v28 }
 0x55f   :  { %v21777_v53 = vpop.eup %21776  ;;  %16317 = vmatpush1.bf16.msra.mxu1 %v20215_v41  ;;  %16275 = vmatprep.subr.bf16.mxu0 %v20220_v34  ;;  %v20230_v41 = vld [vmem:[#allocation8 + $0xea0] ss:$24 sps:$4 sm:$0xff]   ;;  %v8920_v34 = vadd.f32 %v8872_v4, %v22655_v27  ;;  %v20247_v4 = vld [vmem:[#allocation8 + $0x1144] ss:$24 sps:$4 sm:$0xff]  }
 0x560   :  { %16318 = vmatprep.subr.bf16.mxu1 %v20223_v47  ;;  %v9045_v3 = vadd.f32 1.0, %v21777_v53  ;;  %v20241_v53 = vld [vmem:[#allocation8 + $0x1174] ss:$24 sps:$4 sm:$0xff]  }
 0x562   :  { %16276 = vmatpush1.bf16.msra.mxu0 %v20218_v19  ;;  %v9093_v8 = vmul.f32 %v9045_v3, %v8709_v59  ;;  %v8894_v19 = vadd.f32 %v8846_v30, %v22658_v10  ;;  %v20242_v3 = vld [vmem:[#allocation8 + $0xe40] ss:$24 sps:$4 sm:$0xff]   ;;  %v20250_v30 = vld [vmem:[#allocation8 + $0xe14] ss:$24 sps:$4 sm:$0xff]   ;;  %v20259_v59 = vld [vmem:[#allocation8 + $0x10e4] ss:$24 sps:$4 sm:$0xff]  }
 0x563   :  { %v21779_v2 = vpop.eup %21778  ;;  %16319 = vmatpush1.bf16.msra.mxu1 %v20221_v54  ;;  %16277 = vmatprep.subr.bf16.mxu0 %v20226_v36  ;;  %v20236_v54 = vld [vmem:[#allocation8 + $0xe70] ss:$24 sps:$4 sm:$0xff]   ;;  %v8968_v36 = vmul.f32 0.7978846, %v8920_v34 }
 0x564   :  { %16320 = vmatprep.subr.bf16.mxu1 %v20229_v60  ;;  %v9069_v18 = vadd.f32 1.0, %v21779_v2  ;;  %v20244_v60 = vld [vmem:[#allocation8 + $0xe44] ss:$24 sps:$4 sm:$0xff]   ;;  %v8942_v48 = vmul.f32 0.7978846, %v8894_v19 }
 0x565   :  { %21782 = vtanh.f32 %v8968_v36  ;;  %v20245_v2 = vld [vmem:[#allocation8 + $0x1140] ss:$24 sps:$4 sm:$0xff]   ;;  %v20263_v19 = vld [vmem:[#allocation8 + $0x10b0] ss:$24 sps:$4 sm:$0xff]  }
 0x566   :  { %16278 = vmatpush2.bf16.msra.mxu0 %v20224_v16  ;;  %v9117_v47 = vmul.f32 %v9069_v18, %v8733_v14  ;;  %v8944_v16 = vmul.f32 0.7978846, %v8896_v15  ;;  %21784 = vtanh.f32 %v8942_v48  ;;  %v22683_v14 = vpop.f32.mrf.mxu1  ;;  %v20254_v18 = vld [vmem:[#allocation8 + $0xde0] ss:$24 sps:$4 sm:$0xff]  }
 0x567   :  { %16321 = vmatpush2.bf16.msra.mxu1 %v20227_v52  ;;  %16279 = vmatprep.subr.bf16.mxu0 %v20232_v11  ;;  %v20253_v52 = vld [vmem:[#allocation8 + $0x1114] ss:$24 sps:$4 sm:$0xff]   ;;  %v20248_v11 = vld [vmem:[#allocation8 + $0xe10] ss:$24 sps:$4 sm:$0xff]  }
 0x568   :  { %16322 = vmatprep.subr.bf16.mxu1 %v20235_v17  ;;  %v22681_v62 = vpack.c.bf16 %v9117_v47, %v9093_v8  ;;  %21786 = vtanh.f32 %v8944_v16  ;;  %v20256_v17 = vld [vmem:[#allocation8 + $0xde4] ss:$24 sps:$4 sm:$0xff]   ;;  %v8594_v34 = vpop.f32.mrf.mxu1  ;;  %v20265_v8 = vld [vmem:[#allocation8 + $0x10b4] ss:$24 sps:$4 sm:$0xff]  }
 0x569   :  { %v20274_v16 = vld [vmem:[#allocation8 + $0x1354] ss:$24 sps:$4 sm:$0xff]  }
 0x56a   :  { %16280 = vmatpush2.bf16.msra.mxu0 %v20230_v41  ;;  %v20262_v41 = vld [vmem:[#allocation8 + $0xdb4] ss:$24 sps:$4 sm:$0xff]   ;;  %v22685_v28 = vpop.f32.mrf.mxu1 }
 0x56b   :  { %16323 = vmatpush2.bf16.msra.mxu1 %v20233_v42  ;;  %16281 = vmatprep.subr.bf16.mxu0 %v20238_v35  ;;  %v21781_v47 = vpop.eup %21780  ;;  %v20260_v42 = vld [vmem:[#allocation8 + $0xdb0] ss:$24 sps:$4 sm:$0xff]  }
 0x56c   :  { %16324 = vmatprep.subr.bf16.mxu1 %v20241_v53  ;;  %v20268_v53 = vld [vmem:[#allocation8 + $0xd84] ss:$24 sps:$4 sm:$0xff]  }
 0x56e   :  { %16282 = vmatpush2.bf16.msra.mxu0 %v20236_v54  ;;  %v20271_v54 = vld [vmem:[#allocation8 + $0x1084] ss:$24 sps:$4 sm:$0xff]  }
 0x56f   :  { %16325 = vmatpush2.bf16.msra.mxu1 %v20239_v9  ;;  %16283 = vmatprep.subr.bf16.mxu0 %v20244_v60  ;;  %v9062_v9 = vadd.f32 1.0, %v21781_v47  ;;  %v20266_v60 = vld [vmem:[#allocation8 + $0xd80] ss:$24 sps:$4 sm:$0xff]  }
 0x570   :  { %16326 = vmatprep.subr.bf16.mxu1 %v20247_v4  ;;  %v20269_v4 = vld [vmem:[#allocation8 + $0x1080] ss:$24 sps:$4 sm:$0xff]  }
 0x572   :  { %16284 = vmatpush2.bf16.msra.mxu0 %v20242_v3  ;;  %v21783_v35 = vpop.eup %21782  ;;  %v8726_v3 = vmul.f32 0.5, %v22652_v26  ;;  %v20275_v26 = vld [vmem:[#allocation8 + $0x1650] ss:$24 sps:$4 sm:$0xff]  }
 0x573   :  { %16327 = vmatpush2.bf16.msra.mxu1 %v20245_v2  ;;  %16285 = vmatprep.subr.bf16.mxu0 %v20250_v30  ;;  %v21785_v15 = vpop.eup %21784  ;;  %v9064_v48 = vadd.f32 1.0, %v21783_v35  ;;  %v23142_v30 = vld [vmem:[#allocation22_spill] sm:$0xff] }
 0x574   :  { %16328 = vmatprep.subr.bf16.mxu1 %v20253_v52  ;;  %v9038_v2 = vadd.f32 1.0, %v21785_v15  ;;  %v1352_v52 = vrot.slane %v22542_v39, %v23142_v30  ;;  %v20280_v15 = vld [vmem:[#allocation8 + $0x1324] ss:$24 sps:$4 sm:$0xff]  }
 0x575   :  { %v21787_v36 = vpop.eup %21786 }
 0x576   :  { %16286 = vmatpush2.bf16.msra.mxu0 %v20248_v11  ;;  %v8598_v11 = vpop.f32.mrf.mxu1 }
 0x577   :  { %16329 = vmatpush2.bf16.msra.mxu1 %v20251_v56  ;;  %16287 = vmatprep.subr.bf16.mxu0 %v20256_v17  ;;  %v20277_v56 = vld [vmem:[#allocation8 + $0x1654] ss:$24 sps:$4 sm:$0xff]   ;;  %v8728_v17 = vmul.f32 0.5, %v22655_v27  ;;  %v8599_v30 = vadd.f32 %v8598_v11, %v1352_v52 }
 0x578   :  { %16330 = vmatprep.subr.bf16.mxu1 %v20259_v59  ;;  %v9040_v59 = vadd.f32 1.0, %v21787_v36 }
 0x579   :  { %v9112_v47 = vmul.f32 %v9064_v48, %v8728_v17  ;;  %v23144_v48 = vld [vmem:[#allocation36_spill] sm:$0xff] }
 0x57a   :  { %16288 = vmatpush2.bf16.msra.mxu0 %v20254_v18  ;;  %v8702_v18 = vmul.f32 0.5, %v22658_v10  ;;  %v23143_v10 = vld [vmem:[#allocation29_spill] sm:$0xff] }
 0x57b   :  { %16331 = vmatpush2.bf16.msra.mxu1 %v20257_v7  ;;  %16289 = vmatprep.subr.bf16.mxu0 %v20262_v41  ;;  %v9110_v7 = vmul.f32 %v9062_v9, %v8726_v3  ;;  %v20272_v41 = vld [vmem:[#allocation8 + $0x1350] ss:$24 sps:$4 sm:$0xff]   ;;  %v20283_v9 = vld [vmem:[#allocation8 + $0x1624] ss:$24 sps:$4 sm:$0xff]   ;;  %v20281_v3 = vld [vmem:[#allocation8 + $0x1620] ss:$24 sps:$4 sm:$0xff]  }
 0x57c   :  { %16332 = vmatprep.subr.bf16.mxu1 %v20265_v8  ;;  %v8704_v8 = vmul.f32 0.5, %v22661_v61  ;;  %v9086_v35 = vmul.f32 %v9038_v2, %v8702_v18  ;;  %v20286_v2 = vld [vmem:[#allocation8 + $0x12f4] ss:$24 sps:$4 sm:$0xff]  }
 0x57e   :  { %16290 = vmatpush2.bf16.msra.mxu0 %v20260_v42  ;;  %v22693_v42 = vpop.f32.mrf.mxu0  ;;  %v9088_v27 = vmul.f32 %v9040_v59, %v8704_v8  ;;  %v22698_v36 = vpack.c.bf16 %v9110_v7, %v9086_v35  ;;  %v20289_v59 = vld [vmem:[#allocation8 + $0x15f4] ss:$24 sps:$4 sm:$0xff]   ;;  %v20284_v8 = vld [vmem:[#allocation8 + $0x12f0] ss:$24 sps:$4 sm:$0xff]  }
 0x57f   :  { %16333 = vmatpush2.bf16.msra.mxu1 %v20263_v19  ;;  %16291 = vmatprep.subr.bf16.mxu0 %v20268_v53  ;;  %v8595_v19 = vadd.f32 %v8594_v34, %v1352_v52  ;;  %v22695_v53 = vpop.f32.mrf.mxu1  ;;  %v20292_v52 = vld [vmem:[#allocation8 + $0x12c4] ss:$24 sps:$4 sm:$0xff]  }
 0x580   :  { %16334 = vmatprep.subr.bf16.mxu1 %v20271_v54 }
 0x582   :  { %16292 = vmatpush2.bf16.msra.mxu0 %v20266_v60 }
 0x583   :  { %16335 = vmatpush2.bf16.msra.mxu1 %v20269_v4  ;;  %16347 = vmatprep.subr.bf16.mxu0 %v20274_v16  ;;  %v22701_v4 = vpack.c.bf16 %v9112_v47, %v9088_v27  ;;  %v20278_v16 = vld [vmem:[#allocation8 + $0x1320] ss:$24 sps:$4 sm:$0xff]   ;;  %v1332_v27 = vrot.slane %v22542_v39, %v22385_v5 }
 0x584   :  { %16390 = vmatprep.subr.bf16.mxu1 %v20277_v56 }
 0x585   :  { %v8637_v54 = vpop.f32.mrf.mxu0  ;;  %16294 = vmatmul.mubr.bf16.vlgmr.msra.gmra.mxu0 %v23143_v10 }
 0x586   :  { %v8638_v61 = vadd.f32 %v8637_v54, %v8595_v19  ;;  %v8680_v60 = vpop.f32.mrf.mxu1  ;;  %16337 = vmatmul.mubr.bf16.vlgmr.msra.gmra.mxu1 %v23144_v48  ;;  %16348 = vmatpush1.bf16.msra.mxu0 %v20272_v41  ;;  %v20295_v19 = vld [vmem:[#allocation8 + $0x15c4] ss:$24 sps:$4 sm:$0xff]  }
 0x587   :  { %16379 = vmatprep.mubr.bf16.mxu0 %v22698_v36  ;;  %16391 = vmatpush1.bf16.msra.mxu1 %v20275_v26  ;;  %v22704_v34 = vpop.f32.mrf.mxu0  ;;  %v20287_v26 = vld [vmem:[#allocation8 + $0x15f0] ss:$24 sps:$4 sm:$0xff]  }
 0x588   :  { %v22706_v56 = vadd.f32 %v8680_v60, %v8638_v61  ;;  %16422 = vmatprep.mubr.bf16.mxu1 %v22701_v4  ;;  %v22709_v17 = vpop.f32.mrf.mxu1  ;;  %16349 = vmatprep.subr.bf16.mxu0 %v20280_v15  ;;  %v1340_v15 = vrot.slane %v22542_v39, %v22392_v21  ;;  %v20290_v61 = vld [vmem:[#allocation8 + $0x12c0] ss:$24 sps:$4 sm:$0xff]   ;;  %v23145_v60 = vld [vmem:[#allocation53_spill] sm:$0xff] }
 0x589   :  { %v8641_v18 = vpop.f32.mrf.mxu0  ;;  %16392 = vmatprep.subr.bf16.mxu1 %v20283_v9  ;;  %v20301_v39 = vld [vmem:[#allocation8 + $0x1594] ss:$24 sps:$4 sm:$0xff]  }
 0x58a   :  { %v8759_v7 = vmul.f32 0.044715, %v22706_v56  ;;  %v8642_v41 = vadd.f32 %v8641_v18, %v8599_v30  ;;  %16350 = vmatpush1.bf16.msra.mxu0 %v20278_v16  ;;  %v8684_v47 = vpop.f32.mrf.mxu1  ;;  %v8214_v16 = vadd.f32 %v23145_v60, %v1332_v27  ;;  %v8343_v30 = vadd.f32 %v22463_v0, %v1340_v15  ;;  %v20299_v0 = vld [vmem:[#allocation8 + $0x1590] ss:$24 sps:$4 sm:$0xff]  }
 0x58b   :  { %16393 = vmatpush1.bf16.msra.mxu1 %v20281_v3  ;;  %16351 = vmatprep.subr.bf16.mxu0 %v20286_v2  ;;  %v20293_v3 = vld [vmem:[#allocation8 + $0x15c0] ss:$24 sps:$4 sm:$0xff]   ;;  %v20298_v2 = vld [vmem:[#allocation8 + $0x1294] ss:$24 sps:$4 sm:$0xff]  }
 0x58c   :  { %v8807_v11 = vmul.f32 %v8759_v7, %v22706_v56  ;;  %v22713_v35 = vadd.f32 %v8684_v47, %v8642_v41  ;;  %16394 = vmatprep.subr.bf16.mxu1 %v20289_v59  ;;  %v23146_v7 = vld [vmem:[#allocation51_spill] sm:$0xff]  ;;  %v8339_v47 = vadd.f32 %v22453_v24, %v1340_v15  ;;  %v8257_v60 = vadd.f32 %v22451_v29, %v8214_v16  ;;  %v23147_v15 = vld [vmem:[#allocation52_spill] sm:$0xff] }
 0x58d   :  { %v8210_v41 = vadd.f32 %v23146_v7, %v1332_v27  ;;  %v20307_v24 = vld [vmem:[#allocation8 + $0x1564] ss:$24 sps:$4 sm:$0xff]   ;;  %v20302_v16 = vld [vmem:[#allocation8 + $0x1260] ss:$24 sps:$4 sm:$0xff]  }
 0x58e   :  { %v8855_v54 = vmul.f32 %v8807_v11, %v22706_v56  ;;  %v8783_v9 = vmul.f32 0.044715, %v22713_v35  ;;  %16352 = vmatpush1.bf16.msra.mxu0 %v20284_v8  ;;  %v8386_v8 = vadd.f32 %v22547_v63, %v8343_v30  ;;  %v20310_v30 = vld [vmem:[#allocation8 + $0x1234] ss:$24 sps:$4 sm:$0xff]  }
 0x58f   :  { %16395 = vmatpush1.bf16.msra.mxu1 %v20287_v26  ;;  %16353 = vmatprep.subr.bf16.mxu0 %v20292_v52  ;;  %v20296_v52 = vld [vmem:[#allocation8 + $0x1290] ss:$24 sps:$4 sm:$0xff]   ;;  %v8253_v63 = vadd.f32 %v23147_v15, %v8210_v41 }
 0x590   :  { %v8903_v59 = vadd.f32 %v8855_v54, %v22706_v56  ;;  %v8831_v18 = vmul.f32 %v8783_v9, %v22713_v35  ;;  %16396 = vmatprep.subr.bf16.mxu1 %v20295_v19  ;;  %v20304_v54 = vld [vmem:[#allocation8 + $0x1264] ss:$24 sps:$4 sm:$0xff]   ;;  %v8382_v19 = vadd.f32 %v22472_v23, %v8339_v47  ;;  %v22734_v9 = vadd.f32 %v22461_v46, %v8257_v60  ;;  %v20305_v23 = vld [vmem:[#allocation8 + $0x1560] ss:$24 sps:$4 sm:$0xff]   ;;  %v20313_v46 = vld [vmem:[#allocation8 + $0x1534] ss:$24 sps:$4 sm:$0xff]  }
 0x591   :  { %v20311_v41 = vld [vmem:[#allocation8 + $0x1530] ss:$24 sps:$4 sm:$0xff]   ;;  %v20316_v47 = vld [vmem:[#allocation8 + $0x1204] ss:$24 sps:$4 sm:$0xff]  }
 0x592   :  { %v8951_v11 = vmul.f32 0.7978846, %v8903_v59  ;;  %v8879_v26 = vmul.f32 %v8831_v18, %v22713_v35  ;;  %16354 = vmatpush1.bf16.msra.mxu0 %v20290_v61  ;;  %v22737_v61 = vadd.f32 %v22549_v58, %v8386_v8  ;;  %v22743_v59 = vadd.f32 %v22477_v33, %v8382_v19  ;;  %v20319_v33 = vld [vmem:[#allocation8 + $0x1504] ss:$24 sps:$4 sm:$0xff]  }
 0x593   :  { %16397 = vmatpush1.bf16.msra.mxu1 %v20293_v3  ;;  %16355 = vmatprep.subr.bf16.mxu0 %v20298_v2  ;;  %v23148_v3 = vld [vmem:[#allocation54_spill] sm:$0xff]  ;;  %v8778_v18 = vmul.f32 0.044715, %v22734_v9 }
 0x594   :  { %21788 = vtanh.f32 %v8951_v11  ;;  %v8927_v27 = vadd.f32 %v8879_v26, %v22713_v35  ;;  %16398 = vmatprep.subr.bf16.mxu1 %v20301_v39  ;;  %v22740_v2 = vadd.f32 %v23148_v3, %v8253_v63  ;;  %v8780_v58 = vmul.f32 0.044715, %v22737_v61  ;;  %v20308_v39 = vld [vmem:[#allocation8 + $0x1230] ss:$24 sps:$4 sm:$0xff]  }
 0x595   :  { %v8756_v8 = vmul.f32 0.044715, %v22743_v59  ;;  %v8826_v11 = vmul.f32 %v8778_v18, %v22734_v9  ;;  %v20323_v3 = vld [vmem:[#allocation8 + $0x17d0] ss:$24 sps:$4 sm:$0xff]  }
 0x596   :  { %v8975_v29 = vmul.f32 0.7978846, %v8927_v27  ;;  %16356 = vmatpush1.bf16.msra.mxu0 %v20296_v52  ;;  %v8754_v7 = vmul.f32 0.044715, %v22740_v2  ;;  %v8828_v26 = vmul.f32 %v8780_v58, %v22737_v61  ;;  %v20314_v52 = vld [vmem:[#allocation8 + $0x1200] ss:$24 sps:$4 sm:$0xff]  }
 0x597   :  { %16399 = vmatpush1.bf16.msra.mxu1 %v20299_v0  ;;  %16357 = vmatprep.subr.bf16.mxu0 %v20304_v54  ;;  %v20317_v0 = vld [vmem:[#allocation8 + $0x1500] ss:$24 sps:$4 sm:$0xff]   ;;  %v20322_v54 = vld [vmem:[#allocation8 + $0x14d4] ss:$24 sps:$4 sm:$0xff]   ;;  %v8804_v19 = vmul.f32 %v8756_v8, %v22743_v59  ;;  %v8874_v15 = vmul.f32 %v8826_v11, %v22734_v9  ;;  %v8735_v8 = vmul.f32 0.5, %v22713_v35 }
 0x598   :  { %21790 = vtanh.f32 %v8975_v29  ;;  %16400 = vmatprep.subr.bf16.mxu1 %v20307_v24  ;;  %v8802_v60 = vmul.f32 %v8754_v7, %v22740_v2  ;;  %v20325_v27 = vld [vmem:[#allocation8 + $0x17d4] ss:$24 sps:$4 sm:$0xff]   ;;  %v8876_v63 = vmul.f32 %v8828_v26, %v22737_v61  ;;  %v20320_v29 = vld [vmem:[#allocation8 + $0x14d0] ss:$24 sps:$4 sm:$0xff]   ;;  %v20326_v7 = vld [vmem:[#allocation8 + $0x14a0] ss:$24 sps:$4 sm:$0xff]  }
 0x599   :  { %v20329_v11 = vld [vmem:[#allocation8 + $0x17a0] ss:$24 sps:$4 sm:$0xff]   ;;  %v20334_v26 = vld [vmem:[#allocation8 + $0x1474] ss:$24 sps:$4 sm:$0xff]   ;;  %v20335_v35 = vld [vmem:[#allocation8 + $0x1770] ss:$24 sps:$4 sm:$0xff]  }
 0x59a   :  { %16358 = vmatpush1.bf16.msra.mxu0 %v20302_v16  ;;  %v8850_v16 = vmul.f32 %v8802_v60, %v22740_v2  ;;  %v20337_v60 = vld [vmem:[#allocation8 + $0x1774] ss:$24 sps:$4 sm:$0xff]  }
 0x59b   :  { %16401 = vmatpush1.bf16.msra.mxu1 %v20305_v23  ;;  %16359 = vmatprep.subr.bf16.mxu0 %v20310_v30  ;;  %v20328_v23 = vld [vmem:[#allocation8 + $0x14a4] ss:$24 sps:$4 sm:$0xff]   ;;  %v8852_v30 = vmul.f32 %v8804_v19, %v22743_v59 }
 0x59c   :  { %16402 = vmatprep.subr.bf16.mxu1 %v20313_v46  ;;  %v20331_v46 = vld [vmem:[#allocation8 + $0x17a4] ss:$24 sps:$4 sm:$0xff]  }
 0x59e   :  { %16360 = vmatpush1.bf16.msra.mxu0 %v20308_v39  ;;  %v8922_v39 = vadd.f32 %v8874_v15, %v22734_v9 }
 0x59f   :  { %16403 = vmatpush1.bf16.msra.mxu1 %v20311_v41  ;;  %16361 = vmatprep.subr.bf16.mxu0 %v20316_v47  ;;  %v8924_v41 = vadd.f32 %v8876_v63, %v22737_v61  ;;  %v8711_v47 = vmul.f32 0.5, %v22706_v56  ;;  %v20340_v63 = vld [vmem:[#allocation8 + $0x1444] ss:$24 sps:$4 sm:$0xff]  }
 0x5a0   :  { %16404 = vmatprep.subr.bf16.mxu1 %v20319_v33 }
 0x5a1   :  { %v21789_v24 = vpop.eup %21788  ;;  %v8972_v15 = vmul.f32 0.7978846, %v8924_v41  ;;  %v20355_v41 = vld [vmem:[#allocation8 + $0x16e4] ss:$24 sps:$4 sm:$0xff]  }
 0x5a2   :  { %16362 = vmatpush1.bf16.msra.mxu0 %v20314_v52  ;;  %v9047_v18 = vadd.f32 1.0, %v21789_v24  ;;  %v8898_v52 = vadd.f32 %v8850_v16, %v22740_v2  ;;  %v20332_v24 = vld [vmem:[#allocation8 + $0x1470] ss:$24 sps:$4 sm:$0xff]  }
 0x5a3   :  { %16405 = vmatpush1.bf16.msra.mxu1 %v20317_v0  ;;  %16363 = vmatprep.subr.bf16.mxu0 %v20322_v54  ;;  %v8900_v0 = vadd.f32 %v8852_v30, %v22743_v59  ;;  %v20341_v30 = vld [vmem:[#allocation8 + $0x1740] ss:$24 sps:$4 sm:$0xff]  }
 0x5a4   :  { %16406 = vmatprep.subr.bf16.mxu1 %v20325_v27  ;;  %v9095_v54 = vmul.f32 %v9047_v18, %v8711_v47  ;;  %v8970_v27 = vmul.f32 0.7978846, %v8922_v39  ;;  %v20349_v18 = vld [vmem:[#allocation8 + $0x1714] ss:$24 sps:$4 sm:$0xff]   ;;  %v20347_v39 = vld [vmem:[#allocation8 + $0x1710] ss:$24 sps:$4 sm:$0xff]  }
 0x5a5   :  { %v21791_v58 = vpop.eup %21790  ;;  %v8948_v16 = vmul.f32 0.7978846, %v8900_v0  ;;  %v20350_v47 = vld [vmem:[#allocation8 + $0x13e0] ss:$24 sps:$4 sm:$0xff]   ;;  %v20359_v0 = vld [vmem:[#allocation8 + $0x16b0] ss:$24 sps:$4 sm:$0xff]  }
 0x5a6   :  { %16364 = vmatpush2.bf16.msra.mxu0 %v20320_v29  ;;  %v9071_v33 = vadd.f32 1.0, %v21791_v58  ;;  %v8946_v29 = vmul.f32 0.7978846, %v8898_v52  ;;  %21792 = vtanh.f32 %v8970_v27  ;;  %v20344_v58 = vld [vmem:[#allocation8 + $0x1410] ss:$24 sps:$4 sm:$0xff]  }
 0x5a7   :  { %16407 = vmatpush2.bf16.msra.mxu1 %v20323_v3  ;;  %16365 = vmatprep.subr.bf16.mxu0 %v20328_v23  ;;  %v20343_v3 = vld [vmem:[#allocation8 + $0x1744] ss:$24 sps:$4 sm:$0xff]   ;;  %v20338_v23 = vld [vmem:[#allocation8 + $0x1440] ss:$24 sps:$4 sm:$0xff]   ;;  %21794 = vtanh.f32 %v8972_v15  ;;  %v20356_v52 = vld [vmem:[#allocation8 + $0x13b0] ss:$24 sps:$4 sm:$0xff]  }
 0x5a8   :  { %16408 = vmatprep.subr.bf16.mxu1 %v20331_v46  ;;  %v9119_v19 = vmul.f32 %v9071_v33, %v8735_v8  ;;  %v20346_v46 = vld [vmem:[#allocation8 + $0x1414] ss:$24 sps:$4 sm:$0xff]   ;;  %21796 = vtanh.f32 %v8946_v29  ;;  %v20353_v8 = vld [vmem:[#allocation8 + $0x16e0] ss:$24 sps:$4 sm:$0xff]   ;;  %v20367_v27 = vld [vmem:[#allocation8 + $0x1684] ss:$24 sps:$4 sm:$0xff]  }
 0x5a9   :  { %21798 = vtanh.f32 %v8948_v16  ;;  %v20358_v33 = vld [vmem:[#allocation8 + $0x13b4] ss:$24 sps:$4 sm:$0xff]   ;;  %v20365_v29 = vld [vmem:[#allocation8 + $0x1680] ss:$24 sps:$4 sm:$0xff]   ;;  %v8730_v16 = vmul.f32 0.5, %v22734_v9 }
 0x5aa   :  { %16366 = vmatpush2.bf16.msra.mxu0 %v20326_v7  ;;  %v22763_v56 = vpack.c.bf16 %v9119_v19, %v9095_v54  ;;  %v20352_v7 = vld [vmem:[#allocation8 + $0x13e4] ss:$24 sps:$4 sm:$0xff]  }
 0x5ab   :  { %16409 = vmatpush2.bf16.msra.mxu1 %v20329_v11  ;;  %16367 = vmatprep.subr.bf16.mxu0 %v20334_v26  ;;  %v20361_v11 = vld [vmem:[#allocation8 + $0x16b4] ss:$24 sps:$4 sm:$0xff]   ;;  %v20364_v54 = vld [vmem:[#allocation8 + $0x1384] ss:$24 sps:$4 sm:$0xff]  }
 0x5ac   :  { %16410 = vmatprep.subr.bf16.mxu1 %v20337_v60 }
 0x5ae   :  { %16368 = vmatpush2.bf16.msra.mxu0 %v20332_v24 }
 0x5af   :  { %16411 = vmatpush2.bf16.msra.mxu1 %v20335_v35  ;;  %16369 = vmatprep.subr.bf16.mxu0 %v20340_v63  ;;  %v20362_v35 = vld [vmem:[#allocation8 + $0x1380] ss:$24 sps:$4 sm:$0xff]  }
 0x5b0   :  { %16412 = vmatprep.subr.bf16.mxu1 %v20343_v3  ;;  %v20370_v3 = vld [vmem:[#allocation8 + $0x1954] ss:$24 sps:$4 sm:$0xff]  }
 0x5b2   :  { %16370 = vmatpush2.bf16.msra.mxu0 %v20338_v23 }
 0x5b3   :  { %16413 = vmatpush2.bf16.msra.mxu1 %v20341_v30  ;;  %16371 = vmatprep.subr.bf16.mxu0 %v20346_v46  ;;  %v21793_v26 = vpop.eup %21792  ;;  %v20373_v30 = vld [vmem:[#allocation8 + $0x1c54] ss:$24 sps:$4 sm:$0xff]   ;;  %v8732_v46 = vmul.f32 0.5, %v22737_v61  ;;  %v20379_v61 = vld [vmem:[#allocation8 + $0x1c24] ss:$24 sps:$4 sm:$0xff]  }
 0x5b4   :  { %16414 = vmatprep.subr.bf16.mxu1 %v20349_v18  ;;  %v21795_v60 = vpop.eup %21794  ;;  %v9066_v15 = vadd.f32 1.0, %v21793_v26  ;;  %v23149_v26 = vld [vmem:[#allocation43_spill] sm:$0xff] }
 0x5b5   :  { %v21797_v19 = vpop.eup %21796  ;;  %v9068_v63 = vadd.f32 1.0, %v21795_v60  ;;  %v23150_v60 = vld [vmem:[#allocation48_spill] sm:$0xff] }
 0x5b6   :  { %16372 = vmatpush2.bf16.msra.mxu0 %v20344_v58  ;;  %v21799_v24 = vpop.eup %21798  ;;  %v9042_v23 = vadd.f32 1.0, %v21797_v19  ;;  %v8706_v58 = vmul.f32 0.5, %v22740_v2  ;;  %v20385_v19 = vld [vmem:[#allocation8 + $0x1bf4] ss:$24 sps:$4 sm:$0xff]  }
 0x5b7   :  { %16415 = vmatpush2.bf16.msra.mxu1 %v20347_v39  ;;  %16373 = vmatprep.subr.bf16.mxu0 %v20352_v7  ;;  %v9044_v18 = vadd.f32 1.0, %v21799_v24  ;;  %v9114_v39 = vmul.f32 %v9066_v15, %v8730_v16  ;;  %v20368_v7 = vld [vmem:[#allocation8 + $0x1950] ss:$24 sps:$4 sm:$0xff]   ;;  %v20388_v15 = vld [vmem:[#allocation8 + $0x18c4] ss:$24 sps:$4 sm:$0xff]  }
 0x5b8   :  { %16416 = vmatprep.subr.bf16.mxu1 %v20355_v41  ;;  %v8708_v41 = vmul.f32 0.5, %v22743_v59  ;;  %v20377_v59 = vld [vmem:[#allocation8 + $0x1c20] ss:$24 sps:$4 sm:$0xff]   ;;  %v20383_v24 = vld [vmem:[#allocation8 + $0x1bf0] ss:$24 sps:$4 sm:$0xff]  }
 0x5b9   :  { %v20386_v16 = vld [vmem:[#allocation8 + $0x18c0] ss:$24 sps:$4 sm:$0xff]  }
 0x5ba   :  { %16374 = vmatpush2.bf16.msra.mxu0 %v20350_v47  ;;  %v9116_v47 = vmul.f32 %v9068_v63, %v8732_v46  ;;  %v9092_v9 = vmul.f32 %v9044_v18, %v8708_v41  ;;  %v21814_v63 = vld [vmem:[#allocation7 + $0x10] sm:$0xff]  ;;  %v20394_v18 = vld [vmem:[#allocation8 + $0x1894] ss:$24 sps:$4 sm:$0xff]  }
 0x5bb   :  { %16417 = vmatpush2.bf16.msra.mxu1 %v20353_v8  ;;  %16375 = vmatprep.subr.bf16.mxu0 %v20358_v33  ;;  %v20371_v8 = vld [vmem:[#allocation8 + $0x1c50] ss:$24 sps:$4 sm:$0xff]   ;;  %v9090_v33 = vmul.f32 %v9042_v23, %v8706_v58  ;;  %v20389_v46 = vld [vmem:[#allocation8 + $0x1bc0] ss:$24 sps:$4 sm:$0xff]  }
 0x5bc   :  { %16418 = vmatprep.subr.bf16.mxu1 %v20361_v11  ;;  %v20376_v11 = vld [vmem:[#allocation8 + $0x1924] ss:$24 sps:$4 sm:$0xff]   ;;  %v22773_v2 = vpack.c.bf16 %v9116_v47, %v9092_v9 }
 0x5be   :  { %16376 = vmatpush2.bf16.msra.mxu0 %v20356_v52  ;;  %v22770_v52 = vpack.c.bf16 %v9114_v39, %v9090_v33  ;;  %v20397_v39 = vld [vmem:[#allocation8 + $0x1b94] ss:$24 sps:$4 sm:$0xff]   ;;  %v20400_v33 = vld [vmem:[#allocation8 + $0x1864] ss:$24 sps:$4 sm:$0xff]  }
 0x5bf   :  { %16419 = vmatpush2.bf16.msra.mxu1 %v20359_v0  ;;  %16377 = vmatprep.subr.bf16.mxu0 %v20364_v54  ;;  %v20374_v0 = vld [vmem:[#allocation8 + $0x1920] ss:$24 sps:$4 sm:$0xff]   ;;  %v20382_v54 = vld [vmem:[#allocation8 + $0x18f4] ss:$24 sps:$4 sm:$0xff]  }
 0x5c0   :  { %16420 = vmatprep.subr.bf16.mxu1 %v20367_v27  ;;  %v20380_v27 = vld [vmem:[#allocation8 + $0x18f0] ss:$24 sps:$4 sm:$0xff]  }
 0x5c2   :  { %16378 = vmatpush2.bf16.msra.mxu0 %v20362_v35  ;;  %v20391_v35 = vld [vmem:[#allocation8 + $0x1bc4] ss:$24 sps:$4 sm:$0xff]  }
 0x5c3   :  { %16421 = vmatpush2.bf16.msra.mxu1 %v20365_v29  ;;  %16433 = vmatprep.subr.bf16.mxu0 %v20370_v3  ;;  %v1348_v29 = vrot.slane %v21814_v63, %v22480_v32  ;;  %v1356_v3 = vrot.slane %v21814_v63, %v22483_v22  ;;  %v20392_v22 = vld [vmem:[#allocation8 + $0x1890] ss:$24 sps:$4 sm:$0xff]   ;;  %v20415_v63 = vld [vmem:[#allocation8 + $0x1b04] ss:$24 sps:$4 sm:$0xff]  }
 0x5c4   :  { %16476 = vmatprep.subr.bf16.mxu1 %v20373_v30  ;;  %v8643_v30 = vpop.f32.mrf.mxu0 }
 0x5c5   :  { %16380 = vmatmul.mubr.bf16.vlgmr.msra.gmra.mxu0 %v23149_v26  ;;  %v8472_v23 = vadd.f32 %v22613_v40, %v1348_v29  ;;  %v8601_v58 = vadd.f32 %v22695_v53, %v1356_v3  ;;  %v8597_v41 = vadd.f32 %v22685_v28, %v1356_v3  ;;  %v20395_v40 = vld [vmem:[#allocation8 + $0x1b90] ss:$24 sps:$4 sm:$0xff]   ;;  %v20410_v3 = vld [vmem:[#allocation8 + $0x1800] ss:$24 sps:$4 sm:$0xff]  }
 0x5c6   :  { %16423 = vmatmul.mubr.bf16.vlgmr.msra.gmra.mxu1 %v23150_v60  ;;  %16434 = vmatpush1.bf16.msra.mxu0 %v20368_v7  ;;  %v8468_v7 = vadd.f32 %v22558_v12, %v1348_v29  ;;  %v8686_v12 = vpop.f32.mrf.mxu1 }
 0x5c7   :  { %16465 = vmatprep.mubr.bf16.mxu0 %v22770_v52  ;;  %16477 = vmatpush1.bf16.msra.mxu1 %v20371_v8  ;;  %v8644_v47 = vadd.f32 %v8643_v30, %v8601_v58  ;;  %v8515_v8 = vadd.f32 %v22683_v14, %v8472_v23  ;;  %v8640_v9 = vadd.f32 %v22704_v34, %v8597_v41  ;;  %v20413_v23 = vld [vmem:[#allocation8 + $0x1b00] ss:$24 sps:$4 sm:$0xff]   ;;  %v20418_v30 = vld [vmem:[#allocation8 + $0x1ad4] ss:$24 sps:$4 sm:$0xff]  }
 0x5c8   :  { %16508 = vmatprep.mubr.bf16.mxu1 %v22773_v2  ;;  %16435 = vmatprep.subr.bf16.mxu0 %v20376_v11  ;;  %v20403_v11 = vld [vmem:[#allocation8 + $0x1b64] ss:$24 sps:$4 sm:$0xff]   ;;  %v8511_v53 = vadd.f32 %v22563_v45, %v8468_v7  ;;  %v20409_v45 = vld [vmem:[#allocation8 + $0x1b34] ss:$24 sps:$4 sm:$0xff]   ;;  %v20416_v7 = vld [vmem:[#allocation8 + $0x1ad0] ss:$24 sps:$4 sm:$0xff]  }
 0x5c9   :  { %16478 = vmatprep.subr.bf16.mxu1 %v20379_v61  ;;  %v22787_v61 = vadd.f32 %v22693_v42, %v8515_v8  ;;  %v22789_v28 = vadd.f32 %v8686_v12, %v8644_v47  ;;  %v22795_v34 = vadd.f32 %v22709_v17, %v8640_v9  ;;  %v20419_v47 = vld [vmem:[#allocation8 + $0x1dd0] ss:$24 sps:$4 sm:$0xff]   ;;  %v20422_v9 = vld [vmem:[#allocation8 + $0x1aa0] ss:$24 sps:$4 sm:$0xff]   ;;  %v20430_v12 = vld [vmem:[#allocation8 + $0x1a74] ss:$24 sps:$4 sm:$0xff]  }
 0x5ca   :  { %16436 = vmatpush1.bf16.msra.mxu0 %v20374_v0  ;;  %v20398_v0 = vld [vmem:[#allocation8 + $0x1860] ss:$24 sps:$4 sm:$0xff]   ;;  %v22792_v14 = vadd.f32 %v22625_v1, %v8511_v53  ;;  %v20407_v1 = vld [vmem:[#allocation8 + $0x1b30] ss:$24 sps:$4 sm:$0xff]  }
 0x5cb   :  { %16479 = vmatpush1.bf16.msra.mxu1 %v20377_v59  ;;  %16437 = vmatprep.subr.bf16.mxu0 %v20382_v54  ;;  %v20401_v59 = vld [vmem:[#allocation8 + $0x1b60] ss:$24 sps:$4 sm:$0xff]   ;;  %v20406_v54 = vld [vmem:[#allocation8 + $0x1834] ss:$24 sps:$4 sm:$0xff]   ;;  %v8782_v42 = vmul.f32 0.044715, %v22787_v61 }
 0x5cc   :  { %16480 = vmatprep.subr.bf16.mxu1 %v20385_v19  ;;  %v8784_v19 = vmul.f32 0.044715, %v22789_v28  ;;  %v20425_v53 = vld [vmem:[#allocation8 + $0x1da0] ss:$24 sps:$4 sm:$0xff]  }
 0x5cd   :  { %v8830_v17 = vmul.f32 %v8782_v42, %v22787_v61  ;;  %v20428_v42 = vld [vmem:[#allocation8 + $0x1a70] ss:$24 sps:$4 sm:$0xff]  }
 0x5ce   :  { %16438 = vmatpush1.bf16.msra.mxu0 %v20380_v27  ;;  %v20404_v27 = vld [vmem:[#allocation8 + $0x1830] ss:$24 sps:$4 sm:$0xff]   ;;  %v8832_v29 = vmul.f32 %v8784_v19, %v22789_v28 }
 0x5cf   :  { %16481 = vmatpush1.bf16.msra.mxu1 %v20383_v24  ;;  %16439 = vmatprep.subr.bf16.mxu0 %v20388_v15  ;;  %v8758_v24 = vmul.f32 0.044715, %v22792_v14  ;;  %v20412_v15 = vld [vmem:[#allocation8 + $0x1804] ss:$24 sps:$4 sm:$0xff]   ;;  %v8878_v58 = vmul.f32 %v8830_v17, %v22787_v61  ;;  %v20437_v17 = vld [vmem:[#allocation8 + $0x1d40] ss:$24 sps:$4 sm:$0xff]  }
 0x5d0   :  { %16482 = vmatprep.subr.bf16.mxu1 %v20391_v35  ;;  %v8760_v35 = vmul.f32 0.044715, %v22795_v34 }
 0x5d2   :  { %16440 = vmatpush1.bf16.msra.mxu0 %v20386_v16  ;;  %v8806_v16 = vmul.f32 %v8758_v24, %v22792_v14  ;;  %v20436_v24 = vld [vmem:[#allocation8 + $0x1a44] ss:$24 sps:$4 sm:$0xff]  }
 0x5d3   :  { %16483 = vmatpush1.bf16.msra.mxu1 %v20389_v46  ;;  %16441 = vmatprep.subr.bf16.mxu0 %v20394_v18  ;;  %v8808_v46 = vmul.f32 %v8760_v35, %v22795_v34  ;;  %v20421_v18 = vld [vmem:[#allocation8 + $0x1dd4] ss:$24 sps:$4 sm:$0xff]  }
 0x5d4   :  { %16484 = vmatprep.subr.bf16.mxu1 %v20397_v39  ;;  %v8880_v39 = vmul.f32 %v8832_v29, %v22789_v28  ;;  %v8854_v41 = vmul.f32 %v8806_v16, %v22792_v14  ;;  %v20442_v29 = vld [vmem:[#allocation8 + $0x1a14] ss:$24 sps:$4 sm:$0xff]   ;;  %v20440_v16 = vld [vmem:[#allocation8 + $0x1a10] ss:$24 sps:$4 sm:$0xff]  }
 0x5d5   :  { %v8856_v8 = vmul.f32 %v8808_v46, %v22795_v34  ;;  %v20451_v46 = vld [vmem:[#allocation8 + $0x1ce4] ss:$24 sps:$4 sm:$0xff]  }
 0x5d6   :  { %16442 = vmatpush1.bf16.msra.mxu0 %v20392_v22  ;;  %v20424_v22 = vld [vmem:[#allocation8 + $0x1aa4] ss:$24 sps:$4 sm:$0xff]  }
 0x5d7   :  { %16485 = vmatpush1.bf16.msra.mxu1 %v20395_v40  ;;  %16443 = vmatprep.subr.bf16.mxu0 %v20400_v33  ;;  %v20427_v40 = vld [vmem:[#allocation8 + $0x1da4] ss:$24 sps:$4 sm:$0xff]   ;;  %v8926_v33 = vadd.f32 %v8878_v58, %v22787_v61  ;;  %v20449_v58 = vld [vmem:[#allocation8 + $0x1ce0] ss:$24 sps:$4 sm:$0xff]  }
 0x5d8   :  { %16486 = vmatprep.subr.bf16.mxu1 %v20403_v11  ;;  %v8928_v11 = vadd.f32 %v8880_v39, %v22789_v28  ;;  %v20454_v39 = vld [vmem:[#allocation8 + $0x19b4] ss:$24 sps:$4 sm:$0xff]  }
 0x5da   :  { %16444 = vmatpush1.bf16.msra.mxu0 %v20398_v0  ;;  %v8902_v0 = vadd.f32 %v8854_v41, %v22792_v14  ;;  %v8976_v19 = vmul.f32 0.7978846, %v8928_v11 }
 0x5db   :  { %16487 = vmatpush1.bf16.msra.mxu1 %v20401_v59  ;;  %16445 = vmatprep.subr.bf16.mxu0 %v20406_v54  ;;  %v20433_v59 = vld [vmem:[#allocation8 + $0x1d74] ss:$24 sps:$4 sm:$0xff]   ;;  %v8904_v54 = vadd.f32 %v8856_v8, %v22795_v34  ;;  %v20455_v8 = vld [vmem:[#allocation8 + $0x1cb0] ss:$24 sps:$4 sm:$0xff]  }
 0x5dc   :  { %16488 = vmatprep.subr.bf16.mxu1 %v20409_v45  ;;  %v8974_v45 = vmul.f32 0.7978846, %v8926_v33 }
 0x5dd   :  { %v8952_v35 = vmul.f32 0.7978846, %v8904_v54  ;;  %v20466_v54 = vld [vmem:[#allocation8 + $0x1f54] ss:$24 sps:$4 sm:$0xff]  }
 0x5de   :  { %16446 = vmatpush1.bf16.msra.mxu0 %v20404_v27  ;;  %v20431_v27 = vld [vmem:[#allocation8 + $0x1d70] ss:$24 sps:$4 sm:$0xff]   ;;  %21800 = vtanh.f32 %v8974_v45  ;;  %v8734_v45 = vmul.f32 0.5, %v22787_v61 }
 0x5df   :  { %16489 = vmatpush1.bf16.msra.mxu1 %v20407_v1  ;;  %16447 = vmatprep.subr.bf16.mxu0 %v20412_v15  ;;  %v8950_v1 = vmul.f32 0.7978846, %v8902_v0  ;;  %v20439_v15 = vld [vmem:[#allocation8 + $0x1d44] ss:$24 sps:$4 sm:$0xff]   ;;  %21802 = vtanh.f32 %v8976_v19  ;;  %v20469_v19 = vld [vmem:[#allocation8 + $0x2254] ss:$24 sps:$4 sm:$0xff]  }
 0x5e0   :  { %16490 = vmatprep.subr.bf16.mxu1 %v20415_v63  ;;  %v20434_v63 = vld [vmem:[#allocation8 + $0x1a40] ss:$24 sps:$4 sm:$0xff]  }
 0x5e1   :  { %21804 = vtanh.f32 %v8950_v1  ;;  %v8710_v1 = vmul.f32 0.5, %v22792_v14 }
 0x5e2   :  { %16448 = vmatpush1.bf16.msra.mxu0 %v20410_v3  ;;  %v20445_v3 = vld [vmem:[#allocation8 + $0x1d14] ss:$24 sps:$4 sm:$0xff]   ;;  %21806 = vtanh.f32 %v8952_v35  ;;  %v20464_v35 = vld [vmem:[#allocation8 + $0x1f50] ss:$24 sps:$4 sm:$0xff]  }
 0x5e3   :  { %16491 = vmatpush1.bf16.msra.mxu1 %v20413_v23  ;;  %16449 = vmatprep.subr.bf16.mxu0 %v20418_v30  ;;  %v20443_v23 = vld [vmem:[#allocation8 + $0x1d10] ss:$24 sps:$4 sm:$0xff]   ;;  %v20448_v30 = vld [vmem:[#allocation8 + $0x19e4] ss:$24 sps:$4 sm:$0xff]  }
 0x5e4   :  { %16492 = vmatprep.subr.bf16.mxu1 %v20421_v18  ;;  %v20446_v18 = vld [vmem:[#allocation8 + $0x19e0] ss:$24 sps:$4 sm:$0xff]  }
 0x5e6   :  { %16450 = vmatpush2.bf16.msra.mxu0 %v20416_v7  ;;  %v20457_v7 = vld [vmem:[#allocation8 + $0x1cb4] ss:$24 sps:$4 sm:$0xff]  }
 0x5e7   :  { %16493 = vmatpush2.bf16.msra.mxu1 %v20419_v47  ;;  %16451 = vmatprep.subr.bf16.mxu0 %v20424_v22  ;;  %v20452_v47 = vld [vmem:[#allocation8 + $0x19b0] ss:$24 sps:$4 sm:$0xff]  }
 0x5e8   :  { %16494 = vmatprep.subr.bf16.mxu1 %v20427_v40  ;;  %v20460_v40 = vld [vmem:[#allocation8 + $0x1984] ss:$24 sps:$4 sm:$0xff]  }
 0x5ea   :  { %16452 = vmatpush2.bf16.msra.mxu0 %v20422_v9  ;;  %v20463_v9 = vld [vmem:[#allocation8 + $0x1c84] ss:$24 sps:$4 sm:$0xff]  }
 0x5eb   :  { %16495 = vmatpush2.bf16.msra.mxu1 %v20425_v53  ;;  %16453 = vmatprep.subr.bf16.mxu0 %v20430_v12  ;;  %v21801_v41 = vpop.eup %21800  ;;  %v20458_v12 = vld [vmem:[#allocation8 + $0x1980] ss:$24 sps:$4 sm:$0xff]  }
 0x5ec   :  { %16496 = vmatprep.subr.bf16.mxu1 %v20433_v59  ;;  %v21803_v22 = vpop.eup %21802  ;;  %v9070_v53 = vadd.f32 1.0, %v21801_v41  ;;  %v20461_v59 = vld [vmem:[#allocation8 + $0x1c80] ss:$24 sps:$4 sm:$0xff]   ;;  %v20487_v41 = vld [vmem:[#allocation8 + $0x21c4] ss:$24 sps:$4 sm:$0xff]  }
 0x5ed   :  { %v9072_v0 = vadd.f32 1.0, %v21803_v22  ;;  %v20485_v22 = vld [vmem:[#allocation8 + $0x21c0] ss:$24 sps:$4 sm:$0xff]  }
 0x5ee   :  { %16454 = vmatpush2.bf16.msra.mxu0 %v20428_v42  ;;  %v21805_v33 = vpop.eup %21804 }
 0x5ef   :  { %16497 = vmatpush2.bf16.msra.mxu1 %v20431_v27  ;;  %16455 = vmatprep.subr.bf16.mxu0 %v20436_v24  ;;  %v21807_v11 = vpop.eup %21806  ;;  %v9046_v42 = vadd.f32 1.0, %v21805_v33  ;;  %v8736_v27 = vmul.f32 0.5, %v22789_v28  ;;  %v20475_v28 = vld [vmem:[#allocation8 + $0x2224] ss:$24 sps:$4 sm:$0xff]   ;;  %v20488_v33 = vld [vmem:[#allocation8 + $0x1e90] ss:$24 sps:$4 sm:$0xff]  }
 0x5f0   :  { %16498 = vmatprep.subr.bf16.mxu1 %v20439_v15  ;;  %v9048_v24 = vadd.f32 1.0, %v21807_v11  ;;  %v9118_v15 = vmul.f32 %v9070_v53, %v8734_v45  ;;  %v20496_v11 = vld [vmem:[#allocation8 + $0x1e64] ss:$24 sps:$4 sm:$0xff]   ;;  %v20500_v45 = vld [vmem:[#allocation8 + $0x1e30] ss:$24 sps:$4 sm:$0xff]  }
 0x5f1   :  { %v20499_v53 = vld [vmem:[#allocation8 + $0x2164] ss:$24 sps:$4 sm:$0xff]  }
 0x5f2   :  { %16456 = vmatpush2.bf16.msra.mxu0 %v20434_v63  ;;  %v8712_v63 = vmul.f32 0.5, %v22795_v34  ;;  %v20473_v34 = vld [vmem:[#allocation8 + $0x2220] ss:$24 sps:$4 sm:$0xff]  }
 0x5f3   :  { %16499 = vmatpush2.bf16.msra.mxu1 %v20437_v17  ;;  %16457 = vmatprep.subr.bf16.mxu0 %v20442_v29  ;;  %v9120_v17 = vmul.f32 %v9072_v0, %v8736_v27  ;;  %v20467_v29 = vld [vmem:[#allocation8 + $0x2250] ss:$24 sps:$4 sm:$0xff]   ;;  %v20497_v0 = vld [vmem:[#allocation8 + $0x2160] ss:$24 sps:$4 sm:$0xff]   ;;  %v20511_v27 = vld [vmem:[#allocation8 + $0x2104] ss:$24 sps:$4 sm:$0xff]  }
 0x5f4   :  { %16500 = vmatprep.subr.bf16.mxu1 %v20445_v3  ;;  %v9094_v3 = vmul.f32 %v9046_v42, %v8710_v1  ;;  %v9096_v61 = vmul.f32 %v9048_v24, %v8712_v63  ;;  %v20503_v42 = vld [vmem:[#allocation8 + $0x2130] ss:$24 sps:$4 sm:$0xff]   ;;  %v20506_v24 = vld [vmem:[#allocation8 + $0x1e00] ss:$24 sps:$4 sm:$0xff]  }
 0x5f5   :  { %v20509_v1 = vld [vmem:[#allocation8 + $0x2100] ss:$24 sps:$4 sm:$0xff]   ;;  %v20512_v63 = vld [vmem:[#allocation8 + $0x20d0] ss:$24 sps:$4 sm:$0xff]  }
 0x5f6   :  { %16458 = vmatpush2.bf16.msra.mxu0 %v20440_v16  ;;  %v20472_v16 = vld [vmem:[#allocation8 + $0x1f24] ss:$24 sps:$4 sm:$0xff]   ;;  %v22821_v14 = vpack.c.bf16 %v9120_v17, %v9096_v61  ;;  %v20515_v17 = vld [vmem:[#allocation8 + $0x23d0] ss:$24 sps:$4 sm:$0xff]   ;;  %v20518_v61 = vld [vmem:[#allocation8 + $0x20a0] ss:$24 sps:$4 sm:$0xff]  }
 0x5f7   :  { %16501 = vmatpush2.bf16.msra.mxu1 %v20443_v23  ;;  %16459 = vmatprep.subr.bf16.mxu0 %v20448_v30  ;;  %v22818_v23 = vpack.c.bf16 %v9118_v15, %v9094_v3  ;;  %v20470_v30 = vld [vmem:[#allocation8 + $0x1f20] ss:$24 sps:$4 sm:$0xff]   ;;  %v20514_v15 = vld [vmem:[#allocation8 + $0x20d4] ss:$24 sps:$4 sm:$0xff]   ;;  %v20523_v3 = vld [vmem:[#allocation8 + $0x23a4] ss:$24 sps:$4 sm:$0xff]  }
 0x5f8   :  { %16502 = vmatprep.subr.bf16.mxu1 %v20451_v46  ;;  %v20478_v46 = vld [vmem:[#allocation8 + $0x1ef4] ss:$24 sps:$4 sm:$0xff]  }
 0x5fa   :  { %16460 = vmatpush2.bf16.msra.mxu0 %v20446_v18  ;;  %v20481_v18 = vld [vmem:[#allocation8 + $0x21f4] ss:$24 sps:$4 sm:$0xff]  }
 0x5fb   :  { %16503 = vmatpush2.bf16.msra.mxu1 %v20449_v58  ;;  %16461 = vmatprep.subr.bf16.mxu0 %v20454_v39  ;;  %v20476_v58 = vld [vmem:[#allocation8 + $0x1ef0] ss:$24 sps:$4 sm:$0xff]  }
 0x5fc   :  { %16504 = vmatprep.subr.bf16.mxu1 %v20457_v7  ;;  %v20479_v39 = vld [vmem:[#allocation8 + $0x21f0] ss:$24 sps:$4 sm:$0xff]   ;;  %v20484_v7 = vld [vmem:[#allocation8 + $0x1ec4] ss:$24 sps:$4 sm:$0xff]  }
 0x5fe   :  { %16462 = vmatpush2.bf16.msra.mxu0 %v20452_v47  ;;  %v20482_v47 = vld [vmem:[#allocation8 + $0x1ec0] ss:$24 sps:$4 sm:$0xff]  }
 0x5ff   :  { %16505 = vmatpush2.bf16.msra.mxu1 %v20455_v8  ;;  %16463 = vmatprep.subr.bf16.mxu0 %v20460_v40  ;;  %v20490_v8 = vld [vmem:[#allocation8 + $0x1e94] ss:$24 sps:$4 sm:$0xff]  }
 0x600   :  { %16506 = vmatprep.subr.bf16.mxu1 %v20463_v9  ;;  %v20493_v40 = vld [vmem:[#allocation8 + $0x2194] ss:$24 sps:$4 sm:$0xff]   ;;  %v20491_v9 = vld [vmem:[#allocation8 + $0x2190] ss:$24 sps:$4 sm:$0xff]  }
 0x602   :  { %16464 = vmatpush2.bf16.msra.mxu0 %v20458_v12  ;;  %v20494_v12 = vld [vmem:[#allocation8 + $0x1e60] ss:$24 sps:$4 sm:$0xff]  }
 0x603   :  { %16507 = vmatpush2.bf16.msra.mxu1 %v20461_v59  ;;  %16519 = vmatprep.subr.bf16.mxu0 %v20466_v54  ;;  %v20502_v59 = vld [vmem:[#allocation8 + $0x1e34] ss:$24 sps:$4 sm:$0xff]  }
 0x604   :  { %16562 = vmatprep.subr.bf16.mxu1 %v20469_v19  ;;  %v20505_v54 = vld [vmem:[#allocation8 + $0x2134] ss:$24 sps:$4 sm:$0xff]   ;;  %v20508_v19 = vld [vmem:[#allocation8 + $0x1e04] ss:$24 sps:$4 sm:$0xff]  }
 0x605   :  { %16466 = vmatmul.mubr.bf16.vlgmr.msra.gmra.mxu0 %v22449_v43 }
 0x606   :  { %16509 = vmatmul.mubr.bf16.vlgmr.msra.gmra.mxu1 %v22537_v25  ;;  %16520 = vmatpush1.bf16.msra.mxu0 %v20464_v35  ;;  %v20517_v35 = vld [vmem:[#allocation8 + $0x23d4] ss:$24 sps:$4 sm:$0xff]  }
 0x607   :  { %16551 = vmatprep.mubr.bf16.mxu0 %v22818_v23  ;;  %16563 = vmatpush1.bf16.msra.mxu1 %v20467_v29  ;;  %v20520_v29 = vld [vmem:[#allocation8 + $0x20a4] ss:$24 sps:$4 sm:$0xff]  }
 0x608   :  { %16594 = vmatprep.mubr.bf16.mxu1 %v22821_v14  ;;  %16521 = vmatprep.subr.bf16.mxu0 %v20472_v16  ;;  %v20521_v16 = vld [vmem:[#allocation8 + $0x23a0] ss:$24 sps:$4 sm:$0xff]  }
 0x609   :  { %16564 = vmatprep.subr.bf16.mxu1 %v20475_v28  ;;  %v20526_v28 = vld [vmem:[#allocation8 + $0x2074] ss:$24 sps:$4 sm:$0xff]  }
 0x60a   :  { %16522 = vmatpush1.bf16.msra.mxu0 %v20470_v30  ;;  %v20529_v30 = vld [vmem:[#allocation8 + $0x2374] ss:$24 sps:$4 sm:$0xff]  }
 0x60b   :  { %16565 = vmatpush1.bf16.msra.mxu1 %v20473_v34  ;;  %16523 = vmatprep.subr.bf16.mxu0 %v20478_v46  ;;  %v20524_v34 = vld [vmem:[#allocation8 + $0x2070] ss:$24 sps:$4 sm:$0xff]  }
 0x60c   :  { %16566 = vmatprep.subr.bf16.mxu1 %v20481_v18  ;;  %v20527_v46 = vld [vmem:[#allocation8 + $0x2370] ss:$24 sps:$4 sm:$0xff]   ;;  %v20532_v18 = vld [vmem:[#allocation8 + $0x2044] ss:$24 sps:$4 sm:$0xff]  }
 0x60e   :  { %16524 = vmatpush1.bf16.msra.mxu0 %v20476_v58  ;;  %v20535_v58 = vld [vmem:[#allocation8 + $0x2344] ss:$24 sps:$4 sm:$0xff]  }
 0x60f   :  { %16567 = vmatpush1.bf16.msra.mxu1 %v20479_v39  ;;  %16525 = vmatprep.subr.bf16.mxu0 %v20484_v7  ;;  %v20530_v39 = vld [vmem:[#allocation8 + $0x2040] ss:$24 sps:$4 sm:$0xff]  }
 0x610   :  { %16568 = vmatprep.subr.bf16.mxu1 %v20487_v41  ;;  %v20533_v7 = vld [vmem:[#allocation8 + $0x2340] ss:$24 sps:$4 sm:$0xff]   ;;  %v20538_v41 = vld [vmem:[#allocation8 + $0x2014] ss:$24 sps:$4 sm:$0xff]  }
 0x612   :  { %16526 = vmatpush1.bf16.msra.mxu0 %v20482_v47  ;;  %v20541_v47 = vld [vmem:[#allocation8 + $0x2314] ss:$24 sps:$4 sm:$0xff]  }
 0x613   :  { %16569 = vmatpush1.bf16.msra.mxu1 %v20485_v22  ;;  %16527 = vmatprep.subr.bf16.mxu0 %v20490_v8  ;;  %v20536_v22 = vld [vmem:[#allocation8 + $0x2010] ss:$24 sps:$4 sm:$0xff]  }
 0x614   :  { %16570 = vmatprep.subr.bf16.mxu1 %v20493_v40  ;;  %v20539_v8 = vld [vmem:[#allocation8 + $0x2310] ss:$24 sps:$4 sm:$0xff]   ;;  %v20544_v40 = vld [vmem:[#allocation8 + $0x1fe4] ss:$24 sps:$4 sm:$0xff]  }
 0x616   :  { %16528 = vmatpush1.bf16.msra.mxu0 %v20488_v33  ;;  %v20547_v33 = vld [vmem:[#allocation8 + $0x22e4] ss:$24 sps:$4 sm:$0xff]  }
 0x617   :  { %16571 = vmatpush1.bf16.msra.mxu1 %v20491_v9  ;;  %16529 = vmatprep.subr.bf16.mxu0 %v20496_v11  ;;  %v20542_v9 = vld [vmem:[#allocation8 + $0x1fe0] ss:$24 sps:$4 sm:$0xff]  }
 0x618   :  { %16572 = vmatprep.subr.bf16.mxu1 %v20499_v53  ;;  %v20545_v11 = vld [vmem:[#allocation8 + $0x22e0] ss:$24 sps:$4 sm:$0xff]   ;;  %v20550_v53 = vld [vmem:[#allocation8 + $0x1fb4] ss:$24 sps:$4 sm:$0xff]  }
 0x61a   :  { %16530 = vmatpush1.bf16.msra.mxu0 %v20494_v12  ;;  %v20553_v12 = vld [vmem:[#allocation8 + $0x22b4] ss:$24 sps:$4 sm:$0xff]  }
 0x61b   :  { %16573 = vmatpush1.bf16.msra.mxu1 %v20497_v0  ;;  %16531 = vmatprep.subr.bf16.mxu0 %v20502_v59  ;;  %v20548_v0 = vld [vmem:[#allocation8 + $0x1fb0] ss:$24 sps:$4 sm:$0xff]  }
 0x61c   :  { %16574 = vmatprep.subr.bf16.mxu1 %v20505_v54  ;;  %v20551_v59 = vld [vmem:[#allocation8 + $0x22b0] ss:$24 sps:$4 sm:$0xff]   ;;  %v20556_v54 = vld [vmem:[#allocation8 + $0x1f84] ss:$24 sps:$4 sm:$0xff]  }
 0x61e   :  { %16532 = vmatpush1.bf16.msra.mxu0 %v20500_v45  ;;  %v20559_v45 = vld [vmem:[#allocation8 + $0x2284] ss:$24 sps:$4 sm:$0xff]  }
 0x61f   :  { %16575 = vmatpush1.bf16.msra.mxu1 %v20503_v42  ;;  %16533 = vmatprep.subr.bf16.mxu0 %v20508_v19  ;;  %v20554_v42 = vld [vmem:[#allocation8 + $0x1f80] ss:$24 sps:$4 sm:$0xff]  }
 0x620   :  { %16576 = vmatprep.subr.bf16.mxu1 %v20511_v27  ;;  %v20557_v19 = vld [vmem:[#allocation8 + $0x2280] ss:$24 sps:$4 sm:$0xff]   ;;  %v20562_v27 = vld [vmem:[#allocation8 + $0x15c] ss:$24 sps:$4 sm:$0xff]  }
 0x622   :  { %16534 = vmatpush1.bf16.msra.mxu0 %v20506_v24  ;;  %v20565_v24 = vld [vmem:[#allocation8 + $0x45c] ss:$24 sps:$4 sm:$0xff]  }
 0x623   :  { %16577 = vmatpush1.bf16.msra.mxu1 %v20509_v1  ;;  %16535 = vmatprep.subr.bf16.mxu0 %v20514_v15  ;;  %v20560_v1 = vld [vmem:[#allocation8 + $0x158] ss:$24 sps:$4 sm:$0xff]  }
 0x624   :  { %16578 = vmatprep.subr.bf16.mxu1 %v20517_v35  ;;  %v20563_v15 = vld [vmem:[#allocation8 + $0x458] ss:$24 sps:$4 sm:$0xff]   ;;  %v20568_v35 = vld [vmem:[#allocation8 + $0x12c] ss:$24 sps:$4 sm:$0xff]  }
 0x626   :  { %16536 = vmatpush2.bf16.msra.mxu0 %v20512_v63  ;;  %v20571_v63 = vld [vmem:[#allocation8 + $0x42c] ss:$24 sps:$4 sm:$0xff]  }
 0x627   :  { %16579 = vmatpush2.bf16.msra.mxu1 %v20515_v17  ;;  %16537 = vmatprep.subr.bf16.mxu0 %v20520_v29  ;;  %v20566_v17 = vld [vmem:[#allocation8 + $0x128] ss:$24 sps:$4 sm:$0xff]  }
 0x628   :  { %16580 = vmatprep.subr.bf16.mxu1 %v20523_v3  ;;  %v20569_v29 = vld [vmem:[#allocation8 + $0x428] ss:$24 sps:$4 sm:$0xff]   ;;  %v20574_v3 = vld [vmem:[#allocation8 + $0xfc] ss:$24 sps:$4 sm:$0xff]  }
 0x62a   :  { %16538 = vmatpush2.bf16.msra.mxu0 %v20518_v61  ;;  %v20577_v61 = vld [vmem:[#allocation8 + $0x3fc] ss:$24 sps:$4 sm:$0xff]  }
 0x62b   :  { %16581 = vmatpush2.bf16.msra.mxu1 %v20521_v16  ;;  %16539 = vmatprep.subr.bf16.mxu0 %v20526_v28  ;;  %v20572_v16 = vld [vmem:[#allocation8 + $0xf8] ss:$24 sps:$4 sm:$0xff]  }
 0x62c   :  { %16582 = vmatprep.subr.bf16.mxu1 %v20529_v30  ;;  %v20575_v28 = vld [vmem:[#allocation8 + $0x3f8] ss:$24 sps:$4 sm:$0xff]   ;;  %v20580_v30 = vld [vmem:[#allocation8 + $0xcc] ss:$24 sps:$4 sm:$0xff]  }
 0x62e   :  { %16540 = vmatpush2.bf16.msra.mxu0 %v20524_v34  ;;  %v20583_v34 = vld [vmem:[#allocation8 + $0x3cc] ss:$24 sps:$4 sm:$0xff]  }
 0x62f   :  { %16583 = vmatpush2.bf16.msra.mxu1 %v20527_v46  ;;  %16541 = vmatprep.subr.bf16.mxu0 %v20532_v18  ;;  %v20578_v46 = vld [vmem:[#allocation8 + $0xc8] ss:$24 sps:$4 sm:$0xff]  }
 0x630   :  { %16584 = vmatprep.subr.bf16.mxu1 %v20535_v58  ;;  %v20581_v18 = vld [vmem:[#allocation8 + $0x3c8] ss:$24 sps:$4 sm:$0xff]   ;;  %v20586_v58 = vld [vmem:[#allocation8 + $0x9c] ss:$24 sps:$4 sm:$0xff]  }
 0x632   :  { %16542 = vmatpush2.bf16.msra.mxu0 %v20530_v39  ;;  %v20589_v39 = vld [vmem:[#allocation8 + $0x39c] ss:$24 sps:$4 sm:$0xff]  }
 0x633   :  { %16585 = vmatpush2.bf16.msra.mxu1 %v20533_v7  ;;  %16543 = vmatprep.subr.bf16.mxu0 %v20538_v41  ;;  %v20584_v7 = vld [vmem:[#allocation8 + $0x98] ss:$24 sps:$4 sm:$0xff]  }
 0x634   :  { %16586 = vmatprep.subr.bf16.mxu1 %v20541_v47  ;;  %v20587_v41 = vld [vmem:[#allocation8 + $0x398] ss:$24 sps:$4 sm:$0xff]   ;;  %v20592_v47 = vld [vmem:[#allocation8 + $0x6c] ss:$24 sps:$4 sm:$0xff]  }
 0x636   :  { %16544 = vmatpush2.bf16.msra.mxu0 %v20536_v22  ;;  %v20595_v22 = vld [vmem:[#allocation8 + $0x36c] ss:$24 sps:$4 sm:$0xff]  }
 0x637   :  { %16587 = vmatpush2.bf16.msra.mxu1 %v20539_v8  ;;  %16545 = vmatprep.subr.bf16.mxu0 %v20544_v40  ;;  %v20590_v8 = vld [vmem:[#allocation8 + $0x68] ss:$24 sps:$4 sm:$0xff]  }
 0x638   :  { %16588 = vmatprep.subr.bf16.mxu1 %v20547_v33  ;;  %v20593_v40 = vld [vmem:[#allocation8 + $0x368] ss:$24 sps:$4 sm:$0xff]   ;;  %v20598_v33 = vld [vmem:[#allocation8 + $0x3c] ss:$24 sps:$4 sm:$0xff]  }
 0x63a   :  { %16546 = vmatpush2.bf16.msra.mxu0 %v20542_v9  ;;  %v20601_v9 = vld [vmem:[#allocation8 + $0x33c] ss:$24 sps:$4 sm:$0xff]  }
 0x63b   :  { %16589 = vmatpush2.bf16.msra.mxu1 %v20545_v11  ;;  %16547 = vmatprep.subr.bf16.mxu0 %v20550_v53  ;;  %v20596_v11 = vld [vmem:[#allocation8 + $0x38] ss:$24 sps:$4 sm:$0xff]  }
 0x63c   :  { %16590 = vmatprep.subr.bf16.mxu1 %v20553_v12  ;;  %v20599_v53 = vld [vmem:[#allocation8 + $0x338] ss:$24 sps:$4 sm:$0xff]   ;;  %v20604_v12 = vld [vmem:[#allocation8 + $0xc] ss:$24 sps:$4 sm:$0xff]  }
 0x63e   :  { %16548 = vmatpush2.bf16.msra.mxu0 %v20548_v0  ;;  %v20607_v0 = vld [vmem:[#allocation8 + $0x30c] ss:$24 sps:$4 sm:$0xff]  }
 0x63f   :  { %16591 = vmatpush2.bf16.msra.mxu1 %v20551_v59  ;;  %16549 = vmatprep.subr.bf16.mxu0 %v20556_v54  ;;  %v20602_v59 = vld [vmem:[#allocation8 + $0x8] ss:$24 sps:$4 sm:$0xff]  }
 0x640   :  { %16592 = vmatprep.subr.bf16.mxu1 %v20559_v45  ;;  %v20605_v54 = vld [vmem:[#allocation8 + $0x308] ss:$24 sps:$4 sm:$0xff]   ;;  %v20610_v45 = vld [vmem:[#allocation8 + $0x2dc] ss:$24 sps:$4 sm:$0xff]  }
 0x642   :  { %16550 = vmatpush2.bf16.msra.mxu0 %v20554_v42  ;;  %v20613_v42 = vld [vmem:[#allocation8 + $0x5dc] ss:$24 sps:$4 sm:$0xff]  }
 0x643   :  { %16593 = vmatpush2.bf16.msra.mxu1 %v20557_v19  ;;  %16605 = vmatprep.subr.bf16.mxu0 %v20562_v27  ;;  %v20608_v19 = vld [vmem:[#allocation8 + $0x2d8] ss:$24 sps:$4 sm:$0xff]  }
 0x644   :  { %16648 = vmatprep.subr.bf16.mxu1 %v20565_v24  ;;  %v20611_v27 = vld [vmem:[#allocation8 + $0x5d8] ss:$24 sps:$4 sm:$0xff]   ;;  %v20616_v24 = vld [vmem:[#allocation8 + $0x2ac] ss:$24 sps:$4 sm:$0xff]  }
 0x645   :  { %16552 = vmatmul.mubr.bf16.vlgmr.msra.gmra.mxu0 %v22681_v62 }
 0x646   :  { %16595 = vmatmul.mubr.bf16.vlgmr.msra.gmra.mxu1 %v22763_v56  ;;  %16606 = vmatpush1.bf16.msra.mxu0 %v20560_v1  ;;  %v20619_v1 = vld [vmem:[#allocation8 + $0x5ac] ss:$24 sps:$4 sm:$0xff]  }
 0x647   :  { %16637 = vmatprep.mubr.bf16.mxu0 %v22466_v55  ;;  %16649 = vmatpush1.bf16.msra.mxu1 %v20563_v15  ;;  %v20614_v15 = vld [vmem:[#allocation8 + $0x2a8] ss:$24 sps:$4 sm:$0xff]  }
 0x648   :  { %16680 = vmatprep.mubr.bf16.mxu1 %v22469_v44  ;;  %16607 = vmatprep.subr.bf16.mxu0 %v20568_v35  ;;  %v20617_v35 = vld [vmem:[#allocation8 + $0x5a8] ss:$24 sps:$4 sm:$0xff]  }
 0x649   :  { %16650 = vmatprep.subr.bf16.mxu1 %v20571_v63  ;;  %v20622_v63 = vld [vmem:[#allocation8 + $0x27c] ss:$24 sps:$4 sm:$0xff]  }
 0x64a   :  { %16608 = vmatpush1.bf16.msra.mxu0 %v20566_v17  ;;  %v20625_v17 = vld [vmem:[#allocation8 + $0x57c] ss:$24 sps:$4 sm:$0xff]  }
 0x64b   :  { %16651 = vmatpush1.bf16.msra.mxu1 %v20569_v29  ;;  %16609 = vmatprep.subr.bf16.mxu0 %v20574_v3  ;;  %v20620_v29 = vld [vmem:[#allocation8 + $0x278] ss:$24 sps:$4 sm:$0xff]  }
 0x64c   :  { %16652 = vmatprep.subr.bf16.mxu1 %v20577_v61  ;;  %v20623_v3 = vld [vmem:[#allocation8 + $0x578] ss:$24 sps:$4 sm:$0xff]   ;;  %v20628_v61 = vld [vmem:[#allocation8 + $0x24c] ss:$24 sps:$4 sm:$0xff]  }
 0x64e   :  { %16610 = vmatpush1.bf16.msra.mxu0 %v20572_v16  ;;  %v20631_v16 = vld [vmem:[#allocation8 + $0x54c] ss:$24 sps:$4 sm:$0xff]  }
 0x64f   :  { %16653 = vmatpush1.bf16.msra.mxu1 %v20575_v28  ;;  %16611 = vmatprep.subr.bf16.mxu0 %v20580_v30  ;;  %v20626_v28 = vld [vmem:[#allocation8 + $0x248] ss:$24 sps:$4 sm:$0xff]  }
 0x650   :  { %16654 = vmatprep.subr.bf16.mxu1 %v20583_v34  ;;  %v20629_v30 = vld [vmem:[#allocation8 + $0x548] ss:$24 sps:$4 sm:$0xff]   ;;  %v20634_v34 = vld [vmem:[#allocation8 + $0x21c] ss:$24 sps:$4 sm:$0xff]  }
 0x652   :  { %16612 = vmatpush1.bf16.msra.mxu0 %v20578_v46  ;;  %v20637_v46 = vld [vmem:[#allocation8 + $0x51c] ss:$24 sps:$4 sm:$0xff]  }
 0x653   :  { %16655 = vmatpush1.bf16.msra.mxu1 %v20581_v18  ;;  %16613 = vmatprep.subr.bf16.mxu0 %v20586_v58  ;;  %v20632_v18 = vld [vmem:[#allocation8 + $0x218] ss:$24 sps:$4 sm:$0xff]  }
 0x654   :  { %16656 = vmatprep.subr.bf16.mxu1 %v20589_v39  ;;  %v20635_v58 = vld [vmem:[#allocation8 + $0x518] ss:$24 sps:$4 sm:$0xff]   ;;  %v20640_v39 = vld [vmem:[#allocation8 + $0x1ec] ss:$24 sps:$4 sm:$0xff]  }
 0x656   :  { %16614 = vmatpush1.bf16.msra.mxu0 %v20584_v7  ;;  %v20643_v7 = vld [vmem:[#allocation8 + $0x4ec] ss:$24 sps:$4 sm:$0xff]  }
 0x657   :  { %16657 = vmatpush1.bf16.msra.mxu1 %v20587_v41  ;;  %16615 = vmatprep.subr.bf16.mxu0 %v20592_v47  ;;  %v20638_v41 = vld [vmem:[#allocation8 + $0x1e8] ss:$24 sps:$4 sm:$0xff]  }
 0x658   :  { %16658 = vmatprep.subr.bf16.mxu1 %v20595_v22  ;;  %v20641_v47 = vld [vmem:[#allocation8 + $0x4e8] ss:$24 sps:$4 sm:$0xff]   ;;  %v20646_v22 = vld [vmem:[#allocation8 + $0x1bc] ss:$24 sps:$4 sm:$0xff]  }
 0x65a   :  { %16616 = vmatpush1.bf16.msra.mxu0 %v20590_v8  ;;  %v20649_v8 = vld [vmem:[#allocation8 + $0x4bc] ss:$24 sps:$4 sm:$0xff]  }
 0x65b   :  { %16659 = vmatpush1.bf16.msra.mxu1 %v20593_v40  ;;  %16617 = vmatprep.subr.bf16.mxu0 %v20598_v33  ;;  %v20644_v40 = vld [vmem:[#allocation8 + $0x1b8] ss:$24 sps:$4 sm:$0xff]  }
 0x65c   :  { %16660 = vmatprep.subr.bf16.mxu1 %v20601_v9  ;;  %v20647_v33 = vld [vmem:[#allocation8 + $0x4b8] ss:$24 sps:$4 sm:$0xff]   ;;  %v20652_v9 = vld [vmem:[#allocation8 + $0x18c] ss:$24 sps:$4 sm:$0xff]  }
 0x65e   :  { %16618 = vmatpush1.bf16.msra.mxu0 %v20596_v11  ;;  %v20655_v11 = vld [vmem:[#allocation8 + $0x48c] ss:$24 sps:$4 sm:$0xff]  }
 0x65f   :  { %16661 = vmatpush1.bf16.msra.mxu1 %v20599_v53  ;;  %16619 = vmatprep.subr.bf16.mxu0 %v20604_v12  ;;  %v20650_v53 = vld [vmem:[#allocation8 + $0x188] ss:$24 sps:$4 sm:$0xff]  }
 0x660   :  { %16662 = vmatprep.subr.bf16.mxu1 %v20607_v0  ;;  %v20653_v12 = vld [vmem:[#allocation8 + $0x488] ss:$24 sps:$4 sm:$0xff]   ;;  %v20658_v0 = vld [vmem:[#allocation8 + $0x75c] ss:$24 sps:$4 sm:$0xff]  }
 0x662   :  { %16620 = vmatpush1.bf16.msra.mxu0 %v20602_v59  ;;  %v20661_v59 = vld [vmem:[#allocation8 + $0xa5c] ss:$24 sps:$4 sm:$0xff]  }
 0x663   :  { %16663 = vmatpush1.bf16.msra.mxu1 %v20605_v54  ;;  %16621 = vmatprep.subr.bf16.mxu0 %v20610_v45  ;;  %v20656_v54 = vld [vmem:[#allocation8 + $0x758] ss:$24 sps:$4 sm:$0xff]  }
 0x664   :  { %16664 = vmatprep.subr.bf16.mxu1 %v20613_v42  ;;  %v20659_v45 = vld [vmem:[#allocation8 + $0xa58] ss:$24 sps:$4 sm:$0xff]   ;;  %v20664_v42 = vld [vmem:[#allocation8 + $0x72c] ss:$24 sps:$4 sm:$0xff]  }
 0x666   :  { %16622 = vmatpush2.bf16.msra.mxu0 %v20608_v19  ;;  %v20667_v19 = vld [vmem:[#allocation8 + $0xa2c] ss:$24 sps:$4 sm:$0xff]  }
 0x667   :  { %16665 = vmatpush2.bf16.msra.mxu1 %v20611_v27  ;;  %16623 = vmatprep.subr.bf16.mxu0 %v20616_v24  ;;  %v20662_v27 = vld [vmem:[#allocation8 + $0x728] ss:$24 sps:$4 sm:$0xff]  }
 0x668   :  { %16666 = vmatprep.subr.bf16.mxu1 %v20619_v1  ;;  %v20665_v24 = vld [vmem:[#allocation8 + $0xa28] ss:$24 sps:$4 sm:$0xff]   ;;  %v20670_v1 = vld [vmem:[#allocation8 + $0x6fc] ss:$24 sps:$4 sm:$0xff]  }
 0x66a   :  { %16624 = vmatpush2.bf16.msra.mxu0 %v20614_v15  ;;  %v20673_v15 = vld [vmem:[#allocation8 + $0x9fc] ss:$24 sps:$4 sm:$0xff]  }
 0x66b   :  { %16667 = vmatpush2.bf16.msra.mxu1 %v20617_v35  ;;  %16625 = vmatprep.subr.bf16.mxu0 %v20622_v63  ;;  %v20668_v35 = vld [vmem:[#allocation8 + $0x6f8] ss:$24 sps:$4 sm:$0xff]  }
 0x66c   :  { %16668 = vmatprep.subr.bf16.mxu1 %v20625_v17  ;;  %v20671_v63 = vld [vmem:[#allocation8 + $0x9f8] ss:$24 sps:$4 sm:$0xff]   ;;  %v20676_v17 = vld [vmem:[#allocation8 + $0x6cc] ss:$24 sps:$4 sm:$0xff]  }
 0x66e   :  { %16626 = vmatpush2.bf16.msra.mxu0 %v20620_v29  ;;  %v20679_v29 = vld [vmem:[#allocation8 + $0x9cc] ss:$24 sps:$4 sm:$0xff]  }
 0x66f   :  { %16669 = vmatpush2.bf16.msra.mxu1 %v20623_v3  ;;  %16627 = vmatprep.subr.bf16.mxu0 %v20628_v61  ;;  %v20674_v3 = vld [vmem:[#allocation8 + $0x6c8] ss:$24 sps:$4 sm:$0xff]  }
 0x670   :  { %16670 = vmatprep.subr.bf16.mxu1 %v20631_v16  ;;  %v20677_v61 = vld [vmem:[#allocation8 + $0x9c8] ss:$24 sps:$4 sm:$0xff]   ;;  %v20682_v16 = vld [vmem:[#allocation8 + $0x69c] ss:$24 sps:$4 sm:$0xff]  }
 0x672   :  { %16628 = vmatpush2.bf16.msra.mxu0 %v20626_v28  ;;  %v20685_v28 = vld [vmem:[#allocation8 + $0x99c] ss:$24 sps:$4 sm:$0xff]  }
 0x673   :  { %16671 = vmatpush2.bf16.msra.mxu1 %v20629_v30  ;;  %16629 = vmatprep.subr.bf16.mxu0 %v20634_v34  ;;  %v20680_v30 = vld [vmem:[#allocation8 + $0x698] ss:$24 sps:$4 sm:$0xff]  }
 0x674   :  { %16672 = vmatprep.subr.bf16.mxu1 %v20637_v46  ;;  %v20683_v34 = vld [vmem:[#allocation8 + $0x998] ss:$24 sps:$4 sm:$0xff]   ;;  %v20688_v46 = vld [vmem:[#allocation8 + $0x66c] ss:$24 sps:$4 sm:$0xff]  }
 0x676   :  { %16630 = vmatpush2.bf16.msra.mxu0 %v20632_v18  ;;  %v20691_v18 = vld [vmem:[#allocation8 + $0x96c] ss:$24 sps:$4 sm:$0xff]  }
 0x677   :  { %16673 = vmatpush2.bf16.msra.mxu1 %v20635_v58  ;;  %16631 = vmatprep.subr.bf16.mxu0 %v20640_v39  ;;  %v20686_v58 = vld [vmem:[#allocation8 + $0x668] ss:$24 sps:$4 sm:$0xff]  }
 0x678   :  { %16674 = vmatprep.subr.bf16.mxu1 %v20643_v7  ;;  %v20689_v39 = vld [vmem:[#allocation8 + $0x968] ss:$24 sps:$4 sm:$0xff]   ;;  %v20694_v7 = vld [vmem:[#allocation8 + $0x63c] ss:$24 sps:$4 sm:$0xff]  }
 0x67a   :  { %16632 = vmatpush2.bf16.msra.mxu0 %v20638_v41  ;;  %v20697_v41 = vld [vmem:[#allocation8 + $0x93c] ss:$24 sps:$4 sm:$0xff]  }
 0x67b   :  { %16675 = vmatpush2.bf16.msra.mxu1 %v20641_v47  ;;  %16633 = vmatprep.subr.bf16.mxu0 %v20646_v22  ;;  %v20692_v47 = vld [vmem:[#allocation8 + $0x638] ss:$24 sps:$4 sm:$0xff]  }
 0x67c   :  { %16676 = vmatprep.subr.bf16.mxu1 %v20649_v8  ;;  %v20695_v22 = vld [vmem:[#allocation8 + $0x938] ss:$24 sps:$4 sm:$0xff]   ;;  %v20700_v8 = vld [vmem:[#allocation8 + $0x60c] ss:$24 sps:$4 sm:$0xff]  }
 0x67e   :  { %16634 = vmatpush2.bf16.msra.mxu0 %v20644_v40  ;;  %v20703_v40 = vld [vmem:[#allocation8 + $0x90c] ss:$24 sps:$4 sm:$0xff]  }
 0x67f   :  { %16677 = vmatpush2.bf16.msra.mxu1 %v20647_v33  ;;  %16635 = vmatprep.subr.bf16.mxu0 %v20652_v9  ;;  %v20698_v33 = vld [vmem:[#allocation8 + $0x608] ss:$24 sps:$4 sm:$0xff]  }
 0x680   :  { %16678 = vmatprep.subr.bf16.mxu1 %v20655_v11  ;;  %v20701_v9 = vld [vmem:[#allocation8 + $0x908] ss:$24 sps:$4 sm:$0xff]   ;;  %v20706_v11 = vld [vmem:[#allocation8 + $0x8dc] ss:$24 sps:$4 sm:$0xff]  }
 0x682   :  { %16636 = vmatpush2.bf16.msra.mxu0 %v20650_v53  ;;  %v20709_v53 = vld [vmem:[#allocation8 + $0xbdc] ss:$24 sps:$4 sm:$0xff]  }
 0x683   :  { %16679 = vmatpush2.bf16.msra.mxu1 %v20653_v12  ;;  %16691 = vmatprep.subr.bf16.mxu0 %v20658_v0  ;;  %v20704_v12 = vld [vmem:[#allocation8 + $0x8d8] ss:$24 sps:$4 sm:$0xff]  }
 0x684   :  { %16734 = vmatprep.subr.bf16.mxu1 %v20661_v59  ;;  %v20707_v0 = vld [vmem:[#allocation8 + $0xbd8] ss:$24 sps:$4 sm:$0xff]   ;;  %v20712_v59 = vld [vmem:[#allocation8 + $0x8ac] ss:$24 sps:$4 sm:$0xff]  }
 0x685   :  { %16638 = vmatmul.mubr.bf16.vlgmr.msra.gmra.mxu0 %v23114_v51 }
 0x686   :  { %16681 = vmatmul.mubr.bf16.vlgmr.msra.gmra.mxu1 %v23115_v57  ;;  %16692 = vmatpush1.bf16.msra.mxu0 %v20656_v54  ;;  %v20715_v54 = vld [vmem:[#allocation8 + $0xbac] ss:$24 sps:$4 sm:$0xff]  }
 0x687   :  { %16723 = vmatprep.mubr.bf16.mxu0 %v22552_v13  ;;  %16735 = vmatpush1.bf16.msra.mxu1 %v20659_v45  ;;  %v20710_v45 = vld [vmem:[#allocation8 + $0x8a8] ss:$24 sps:$4 sm:$0xff]  }
 0x688   :  { %16766 = vmatprep.mubr.bf16.mxu1 %v22555_v50  ;;  %16693 = vmatprep.subr.bf16.mxu0 %v20664_v42  ;;  %v20713_v42 = vld [vmem:[#allocation8 + $0xba8] ss:$24 sps:$4 sm:$0xff]  }
 0x689   :  { %16736 = vmatprep.subr.bf16.mxu1 %v20667_v19  ;;  %v20718_v19 = vld [vmem:[#allocation8 + $0x87c] ss:$24 sps:$4 sm:$0xff]  }
 0x68a   :  { %16694 = vmatpush1.bf16.msra.mxu0 %v20662_v27  ;;  %v20721_v27 = vld [vmem:[#allocation8 + $0xb7c] ss:$24 sps:$4 sm:$0xff]  }
 0x68b   :  { %16737 = vmatpush1.bf16.msra.mxu1 %v20665_v24  ;;  %16695 = vmatprep.subr.bf16.mxu0 %v20670_v1  ;;  %v20716_v24 = vld [vmem:[#allocation8 + $0x878] ss:$24 sps:$4 sm:$0xff]  }
 0x68c   :  { %16738 = vmatprep.subr.bf16.mxu1 %v20673_v15  ;;  %v20719_v1 = vld [vmem:[#allocation8 + $0xb78] ss:$24 sps:$4 sm:$0xff]   ;;  %v20724_v15 = vld [vmem:[#allocation8 + $0x84c] ss:$24 sps:$4 sm:$0xff]  }
 0x68e   :  { %16696 = vmatpush1.bf16.msra.mxu0 %v20668_v35  ;;  %v20727_v35 = vld [vmem:[#allocation8 + $0xb4c] ss:$24 sps:$4 sm:$0xff]  }
 0x68f   :  { %16739 = vmatpush1.bf16.msra.mxu1 %v20671_v63  ;;  %16697 = vmatprep.subr.bf16.mxu0 %v20676_v17  ;;  %v20722_v63 = vld [vmem:[#allocation8 + $0x848] ss:$24 sps:$4 sm:$0xff]  }
 0x690   :  { %16740 = vmatprep.subr.bf16.mxu1 %v20679_v29  ;;  %v20725_v17 = vld [vmem:[#allocation8 + $0xb48] ss:$24 sps:$4 sm:$0xff]   ;;  %v20730_v29 = vld [vmem:[#allocation8 + $0x81c] ss:$24 sps:$4 sm:$0xff]  }
 0x692   :  { %16698 = vmatpush1.bf16.msra.mxu0 %v20674_v3  ;;  %v20733_v3 = vld [vmem:[#allocation8 + $0xb1c] ss:$24 sps:$4 sm:$0xff]  }
 0x693   :  { %16741 = vmatpush1.bf16.msra.mxu1 %v20677_v61  ;;  %16699 = vmatprep.subr.bf16.mxu0 %v20682_v16  ;;  %v20728_v61 = vld [vmem:[#allocation8 + $0x818] ss:$24 sps:$4 sm:$0xff]  }
 0x694   :  { %16742 = vmatprep.subr.bf16.mxu1 %v20685_v28  ;;  %v20731_v16 = vld [vmem:[#allocation8 + $0xb18] ss:$24 sps:$4 sm:$0xff]   ;;  %v20736_v28 = vld [vmem:[#allocation8 + $0x7ec] ss:$24 sps:$4 sm:$0xff]  }
 0x696   :  { %16700 = vmatpush1.bf16.msra.mxu0 %v20680_v30  ;;  %v20739_v30 = vld [vmem:[#allocation8 + $0xaec] ss:$24 sps:$4 sm:$0xff]  }
 0x697   :  { %16743 = vmatpush1.bf16.msra.mxu1 %v20683_v34  ;;  %16701 = vmatprep.subr.bf16.mxu0 %v20688_v46  ;;  %v20734_v34 = vld [vmem:[#allocation8 + $0x7e8] ss:$24 sps:$4 sm:$0xff]  }
 0x698   :  { %16744 = vmatprep.subr.bf16.mxu1 %v20691_v18  ;;  %v20737_v46 = vld [vmem:[#allocation8 + $0xae8] ss:$24 sps:$4 sm:$0xff]   ;;  %v20742_v18 = vld [vmem:[#allocation8 + $0x7bc] ss:$24 sps:$4 sm:$0xff]  }
 0x69a   :  { %16702 = vmatpush1.bf16.msra.mxu0 %v20686_v58  ;;  %v20745_v58 = vld [vmem:[#allocation8 + $0xabc] ss:$24 sps:$4 sm:$0xff]  }
 0x69b   :  { %16745 = vmatpush1.bf16.msra.mxu1 %v20689_v39  ;;  %16703 = vmatprep.subr.bf16.mxu0 %v20694_v7  ;;  %v20740_v39 = vld [vmem:[#allocation8 + $0x7b8] ss:$24 sps:$4 sm:$0xff]  }
 0x69c   :  { %16746 = vmatprep.subr.bf16.mxu1 %v20697_v41  ;;  %v20743_v7 = vld [vmem:[#allocation8 + $0xab8] ss:$24 sps:$4 sm:$0xff]   ;;  %v20748_v41 = vld [vmem:[#allocation8 + $0x78c] ss:$24 sps:$4 sm:$0xff]  }
 0x69e   :  { %16704 = vmatpush1.bf16.msra.mxu0 %v20692_v47  ;;  %v20751_v47 = vld [vmem:[#allocation8 + $0xa8c] ss:$24 sps:$4 sm:$0xff]  }
 0x69f   :  { %16747 = vmatpush1.bf16.msra.mxu1 %v20695_v22  ;;  %16705 = vmatprep.subr.bf16.mxu0 %v20700_v8  ;;  %v20746_v22 = vld [vmem:[#allocation8 + $0x788] ss:$24 sps:$4 sm:$0xff]   ;;  %v22833_v8 = vpop.f32.mrf.mxu0 }
 0x6a0   :  { %16748 = vmatprep.subr.bf16.mxu1 %v20703_v40  ;;  %v20749_v40 = vld [vmem:[#allocation8 + $0xa88] ss:$24 sps:$4 sm:$0xff]  }
 0x6a2   :  { %16706 = vmatpush1.bf16.msra.mxu0 %v20698_v33  ;;  %v20754_v33 = vld [vmem:[#allocation8 + $0xd5c] ss:$24 sps:$4 sm:$0xff]  }
 0x6a3   :  { %16749 = vmatpush1.bf16.msra.mxu1 %v20701_v9  ;;  %16707 = vmatprep.subr.bf16.mxu0 %v20706_v11  ;;  %v22835_v9 = vpop.f32.mrf.mxu1  ;;  %v20757_v11 = vld [vmem:[#allocation8 + $0x105c] ss:$24 sps:$4 sm:$0xff]  }
 0x6a4   :  { %16750 = vmatprep.subr.bf16.mxu1 %v20709_v53  ;;  %v20752_v53 = vld [vmem:[#allocation8 + $0xd58] ss:$24 sps:$4 sm:$0xff]  }
 0x6a6   :  { %16708 = vmatpush2.bf16.msra.mxu0 %v20704_v12  ;;  %v22837_v12 = vpop.f32.mrf.mxu0 }
 0x6a7   :  { %16751 = vmatpush2.bf16.msra.mxu1 %v20707_v0  ;;  %16709 = vmatprep.subr.bf16.mxu0 %v20712_v59  ;;  %v20755_v0 = vld [vmem:[#allocation8 + $0x1058] ss:$24 sps:$4 sm:$0xff]   ;;  %v22839_v59 = vpop.f32.mrf.mxu1 }
 0x6a8   :  { %16752 = vmatprep.subr.bf16.mxu1 %v20715_v54  ;;  %v20760_v54 = vld [vmem:[#allocation8 + $0xd2c] ss:$24 sps:$4 sm:$0xff]  }
 0x6aa   :  { %16710 = vmatpush2.bf16.msra.mxu0 %v20710_v45  ;;  %v20763_v45 = vld [vmem:[#allocation8 + $0x102c] ss:$24 sps:$4 sm:$0xff]  }
 0x6ab   :  { %16753 = vmatpush2.bf16.msra.mxu1 %v20713_v42  ;;  %16711 = vmatprep.subr.bf16.mxu0 %v20718_v19  ;;  %v20758_v42 = vld [vmem:[#allocation8 + $0xd28] ss:$24 sps:$4 sm:$0xff]   ;;  %v22843_v19 = vpop.f32.mrf.mxu0 }
 0x6ac   :  { %16754 = vmatprep.subr.bf16.mxu1 %v20721_v27  ;;  %v20761_v27 = vld [vmem:[#allocation8 + $0x1028] ss:$24 sps:$4 sm:$0xff]  }
 0x6ae   :  { %16712 = vmatpush2.bf16.msra.mxu0 %v20716_v24  ;;  %v20766_v24 = vld [vmem:[#allocation8 + $0xcfc] ss:$24 sps:$4 sm:$0xff]  }
 0x6af   :  { %16755 = vmatpush2.bf16.msra.mxu1 %v20719_v1  ;;  %16713 = vmatprep.subr.bf16.mxu0 %v20724_v15  ;;  %v22846_v1 = vpop.f32.mrf.mxu1  ;;  %v20769_v15 = vld [vmem:[#allocation8 + $0xffc] ss:$24 sps:$4 sm:$0xff]  }
 0x6b0   :  { %16756 = vmatprep.subr.bf16.mxu1 %v20727_v35  ;;  %v20764_v35 = vld [vmem:[#allocation8 + $0xcf8] ss:$24 sps:$4 sm:$0xff]  }
 0x6b2   :  { %16714 = vmatpush2.bf16.msra.mxu0 %v20722_v63  ;;  %v22849_v63 = vpop.f32.mrf.mxu0 }
 0x6b3   :  { %16757 = vmatpush2.bf16.msra.mxu1 %v20725_v17  ;;  %16715 = vmatprep.subr.bf16.mxu0 %v20730_v29  ;;  %v20767_v17 = vld [vmem:[#allocation8 + $0xff8] ss:$24 sps:$4 sm:$0xff]   ;;  %v20772_v29 = vld [vmem:[#allocation8 + $0xccc] ss:$24 sps:$4 sm:$0xff]  }
 0x6b4   :  { %16758 = vmatprep.subr.bf16.mxu1 %v20733_v3  ;;  %v22851_v3 = vpop.f32.mrf.mxu1 }
 0x6b6   :  { %16716 = vmatpush2.bf16.msra.mxu0 %v20728_v61  ;;  %v20775_v61 = vld [vmem:[#allocation8 + $0xfcc] ss:$24 sps:$4 sm:$0xff]  }
 0x6b7   :  { %16759 = vmatpush2.bf16.msra.mxu1 %v20731_v16  ;;  %16717 = vmatprep.subr.bf16.mxu0 %v20736_v28  ;;  %v22853_v16 = vpop.f32.mrf.mxu0  ;;  %v22855_v28 = vpop.f32.mrf.mxu1 }
 0x6b8   :  { %16760 = vmatprep.subr.bf16.mxu1 %v20739_v30  ;;  %v20770_v30 = vld [vmem:[#allocation8 + $0xcc8] ss:$24 sps:$4 sm:$0xff]  }
 0x6ba   :  { %16718 = vmatpush2.bf16.msra.mxu0 %v20734_v34  ;;  %v20773_v34 = vld [vmem:[#allocation8 + $0xfc8] ss:$24 sps:$4 sm:$0xff]  }
 0x6bb   :  { %16761 = vmatpush2.bf16.msra.mxu1 %v20737_v46  ;;  %16719 = vmatprep.subr.bf16.mxu0 %v20742_v18  ;;  %v20778_v46 = vld [vmem:[#allocation8 + $0xc9c] ss:$24 sps:$4 sm:$0xff]  }
 0x6bc   :  { %16762 = vmatprep.subr.bf16.mxu1 %v20745_v58  ;;  %v20781_v18 = vld [vmem:[#allocation8 + $0xf9c] ss:$24 sps:$4 sm:$0xff]   ;;  %v22857_v58 = vpop.f32.mrf.mxu0 }
 0x6be   :  { %16720 = vmatpush2.bf16.msra.mxu0 %v20740_v39  ;;  %v22859_v39 = vpop.f32.mrf.mxu1 }
 0x6bf   :  { %16763 = vmatpush2.bf16.msra.mxu1 %v20743_v7  ;;  %16721 = vmatprep.subr.bf16.mxu0 %v20748_v41  ;;  %v20776_v7 = vld [vmem:[#allocation8 + $0xc98] ss:$24 sps:$4 sm:$0xff]  }
 0x6c0   :  { %16764 = vmatprep.subr.bf16.mxu1 %v20751_v47  ;;  %v20779_v41 = vld [vmem:[#allocation8 + $0xf98] ss:$24 sps:$4 sm:$0xff]   ;;  %v20784_v47 = vld [vmem:[#allocation8 + $0xc6c] ss:$24 sps:$4 sm:$0xff]  }
 0x6c2   :  { %16722 = vmatpush2.bf16.msra.mxu0 %v20746_v22  ;;  %v20787_v22 = vld [vmem:[#allocation8 + $0xf6c] ss:$24 sps:$4 sm:$0xff]  }
 0x6c3   :  { %16765 = vmatpush2.bf16.msra.mxu1 %v20749_v40  ;;  %16777 = vmatprep.subr.bf16.mxu0 %v20754_v33  ;;  %v22861_v40 = vpop.f32.mrf.mxu0  ;;  %v22863_v33 = vpop.f32.mrf.mxu1 }
 0x6c4   :  { %16820 = vmatprep.subr.bf16.mxu1 %v20757_v11  ;;  %v20782_v11 = vld [vmem:[#allocation8 + $0xc68] ss:$24 sps:$4 sm:$0xff]  }
 0x6c5   :  { %16724 = vmatmul.mubr.bf16.vlgmr.msra.gmra.mxu0 %v23128_v37 }
 0x6c6   :  { %16767 = vmatmul.mubr.bf16.vlgmr.msra.gmra.mxu1 %v23130_v6  ;;  %16778 = vmatpush1.bf16.msra.mxu0 %v20752_v53  ;;  %v20785_v53 = vld [vmem:[#allocation8 + $0xf68] ss:$24 sps:$4 sm:$0xff]  }
 0x6c7   :  { %16809 = vmatprep.mubr.bf16.mxu0 %v22616_v38  ;;  %16821 = vmatpush1.bf16.msra.mxu1 %v20755_v0  ;;  %v20790_v0 = vld [vmem:[#allocation8 + $0xc3c] ss:$24 sps:$4 sm:$0xff]  }
 0x6c8   :  { %16852 = vmatprep.mubr.bf16.mxu1 %v22622_v49  ;;  %16779 = vmatprep.subr.bf16.mxu0 %v20760_v54  ;;  %v20793_v54 = vld [vmem:[#allocation8 + $0xf3c] ss:$24 sps:$4 sm:$0xff]  }
 0x6c9   :  { %16822 = vmatprep.subr.bf16.mxu1 %v20763_v45  ;;  %v22865_v45 = vpop.f32.mrf.mxu0 }
 0x6ca   :  { %16780 = vmatpush1.bf16.msra.mxu0 %v20758_v42  ;;  %v22867_v42 = vpop.f32.mrf.mxu1 }
 0x6cb   :  { %16823 = vmatpush1.bf16.msra.mxu1 %v20761_v27  ;;  %16781 = vmatprep.subr.bf16.mxu0 %v20766_v24  ;;  %v20788_v27 = vld [vmem:[#allocation8 + $0xc38] ss:$24 sps:$4 sm:$0xff]   ;;  %v22869_v24 = vpop.f32.mrf.mxu0 }
 0x6cc   :  { %16824 = vmatprep.subr.bf16.mxu1 %v20769_v15  ;;  %v20791_v15 = vld [vmem:[#allocation8 + $0xf38] ss:$24 sps:$4 sm:$0xff]  }
 0x6ce   :  { %16782 = vmatpush1.bf16.msra.mxu0 %v20764_v35  ;;  %v20796_v35 = vld [vmem:[#allocation8 + $0xc0c] ss:$24 sps:$4 sm:$0xff]  }
 0x6cf   :  { %16825 = vmatpush1.bf16.msra.mxu1 %v20767_v17  ;;  %16783 = vmatprep.subr.bf16.mxu0 %v20772_v29  ;;  %v22871_v17 = vpop.f32.mrf.mxu1  ;;  %v20799_v29 = vld [vmem:[#allocation8 + $0xf0c] ss:$24 sps:$4 sm:$0xff]  }
 0x6d0   :  { %16826 = vmatprep.subr.bf16.mxu1 %v20775_v61  ;;  %v20794_v61 = vld [vmem:[#allocation8 + $0xc08] ss:$24 sps:$4 sm:$0xff]  }
 0x6d2   :  { %16784 = vmatpush1.bf16.msra.mxu0 %v20770_v30  ;;  %v22873_v30 = vpop.f32.mrf.mxu0 }
 0x6d3   :  { %16827 = vmatpush1.bf16.msra.mxu1 %v20773_v34  ;;  %16785 = vmatprep.subr.bf16.mxu0 %v20778_v46  ;;  %v20797_v34 = vld [vmem:[#allocation8 + $0xf08] ss:$24 sps:$4 sm:$0xff]   ;;  %v20802_v46 = vld [vmem:[#allocation8 + $0xedc] ss:$24 sps:$4 sm:$0xff]  }
 0x6d4   :  { %16828 = vmatprep.subr.bf16.mxu1 %v20781_v18  ;;  %v22875_v18 = vpop.f32.mrf.mxu1 }
 0x6d6   :  { %16786 = vmatpush1.bf16.msra.mxu0 %v20776_v7  ;;  %v20805_v7 = vld [vmem:[#allocation8 + $0x11dc] ss:$24 sps:$4 sm:$0xff]  }
 0x6d7   :  { %16829 = vmatpush1.bf16.msra.mxu1 %v20779_v41  ;;  %16787 = vmatprep.subr.bf16.mxu0 %v20784_v47  ;;  %v10297_v41 = vld [vmem:[#allocation10] sm:$0x3f]  ;;  %v20800_v47 = vld [vmem:[#allocation8 + $0xed8] ss:$24 sps:$4 sm:$0xff]  }
 0x6d8   :  { %16830 = vmatprep.subr.bf16.mxu1 %v20787_v22  ;;  %v22877_v22 = vpop.f32.mrf.mxu0 }
 0x6da   :  { %16788 = vmatpush1.bf16.msra.mxu0 %v20782_v11  ;;  %v20803_v11 = vld [vmem:[#allocation8 + $0x11d8] ss:$24 sps:$4 sm:$0xff]   ;;  %v22883_v32 = vpop.f32.mrf.mxu0 }
 0x6db   :  { %16831 = vmatpush1.bf16.msra.mxu1 %v20785_v53  ;;  %16789 = vmatprep.subr.bf16.mxu0 %v20790_v0  ;;  %v20808_v53 = vld [vmem:[#allocation8 + $0xeac] ss:$24 sps:$4 sm:$0xff]  }
 0x6dc   :  { %16832 = vmatprep.subr.bf16.mxu1 %v20793_v54  ;;  %v23151_v0 = vld [vmem:[#allocation16_spill] sm:$0xff]  ;;  %v22888_v21 = vpop.f32.mrf.mxu0 }
 0x6dd   :  { %v10302_v54 = vrot.slane %v10297_v41, %v23151_v0  ;;  %v20817_v0 = vld [vmem:[#allocation8 + $0x117c] ss:$24 sps:$4 sm:$0xff]  }
 0x6de   :  { %16790 = vmatpush1.bf16.msra.mxu0 %v20788_v27  ;;  %v22880_v27 = vpop.f32.mrf.mxu1 }
 0x6df   :  { %16833 = vmatpush1.bf16.msra.mxu1 %v20791_v15  ;;  %16791 = vmatprep.subr.bf16.mxu0 %v20796_v35  ;;  %v20811_v15 = vld [vmem:[#allocation8 + $0x11ac] ss:$24 sps:$4 sm:$0xff]   ;;  %v10306_v35 = vrot.slane %v10297_v41, %v22385_v5  ;;  %v20812_v5 = vld [vmem:[#allocation8 + $0xe78] ss:$24 sps:$4 sm:$0xff]  }
 0x6e0   :  { %16834 = vmatprep.subr.bf16.mxu1 %v20799_v29  ;;  %v20806_v29 = vld [vmem:[#allocation8 + $0xea8] ss:$24 sps:$4 sm:$0xff]   ;;  %v20815_v41 = vld [vmem:[#allocation8 + $0x1178] ss:$24 sps:$4 sm:$0xff]  }
 0x6e1   :  { %v16130_v38 = vadd.f32 %v22849_v63, %v10306_v35 }
 0x6e2   :  { %16792 = vmatpush1.bf16.msra.mxu0 %v20794_v61  ;;  %v20809_v61 = vld [vmem:[#allocation8 + $0x11a8] ss:$24 sps:$4 sm:$0xff]  }
 0x6e3   :  { %16835 = vmatpush1.bf16.msra.mxu1 %v20797_v34  ;;  %16793 = vmatprep.subr.bf16.mxu0 %v20802_v46  ;;  %v16124_v34 = vadd.f32 %v22833_v8, %v10302_v54  ;;  %v22886_v46 = vpop.f32.mrf.mxu1  ;;  %v16128_v8 = vadd.f32 %v22843_v19, %v10302_v54  ;;  %v20829_v54 = vld [vmem:[#allocation8 + $0x111c] ss:$24 sps:$4 sm:$0xff]  }
 0x6e4   :  { %16836 = vmatprep.subr.bf16.mxu1 %v20805_v7  ;;  %v16126_v7 = vadd.f32 %v22837_v12, %v10306_v35 }
 0x6e5   :  { %v22891_v31 = vpop.f32.mrf.mxu1 }
 0x6e6   :  { %16794 = vmatpush2.bf16.msra.mxu0 %v20800_v47  ;;  %v20820_v47 = vld [vmem:[#allocation8 + $0xe4c] ss:$24 sps:$4 sm:$0xff]   ;;  %v16169_v49 = vadd.f32 %v22839_v59, %v16126_v7  ;;  %v16173_v59 = vadd.f32 %v22851_v3, %v16130_v38  ;;  %v20827_v7 = vld [vmem:[#allocation8 + $0x1118] ss:$24 sps:$4 sm:$0xff]  }
 0x6e7   :  { %16837 = vmatpush2.bf16.msra.mxu1 %v20803_v11  ;;  %16795 = vmatprep.subr.bf16.mxu0 %v20808_v53  ;;  %v16167_v11 = vadd.f32 %v22835_v9, %v16124_v34  ;;  %v20823_v53 = vld [vmem:[#allocation8 + $0x114c] ss:$24 sps:$4 sm:$0xff]   ;;  %v22898_v6 = vpop.f32.mrf.mxu1  ;;  %v16171_v9 = vadd.f32 %v22846_v1, %v16128_v8  ;;  %v20833_v8 = vld [vmem:[#allocation8 + $0x10e8] ss:$24 sps:$4 sm:$0xff]  }
 0x6e8   :  { %16838 = vmatprep.subr.bf16.mxu1 %v20811_v15  ;;  %v16383_v15 = vpop.f32.mrf.mxu0  ;;  %v16212_v19 = vadd.f32 %v22857_v58, %v16169_v49  ;;  %v16216_v49 = vadd.f32 %v22865_v45, %v16173_v59  ;;  %v20847_v59 = vld [vmem:[#allocation8 + $0x108c] ss:$24 sps:$4 sm:$0xff]  }
 0x6e9   :  { %v16210_v12 = vadd.f32 %v22853_v16, %v16167_v11  ;;  %v16214_v16 = vadd.f32 %v22861_v40, %v16171_v9  ;;  %v16428_v35 = vpop.f32.mrf.mxu1 }
 0x6ea   :  { %16796 = vmatpush2.bf16.msra.mxu0 %v20806_v29  ;;  %v20818_v29 = vld [vmem:[#allocation8 + $0xe48] ss:$24 sps:$4 sm:$0xff]   ;;  %v16385_v34 = vpop.f32.mrf.mxu0  ;;  %v16255_v1 = vadd.f32 %v22859_v39, %v16212_v19  ;;  %v16259_v39 = vadd.f32 %v22867_v42, %v16216_v49  ;;  %v20839_v19 = vld [vmem:[#allocation8 + $0x10b8] ss:$24 sps:$4 sm:$0xff]   ;;  %v20844_v42 = vld [vmem:[#allocation8 + $0xd8c] ss:$24 sps:$4 sm:$0xff]  }
 0x6eb   :  { %16839 = vmatpush2.bf16.msra.mxu1 %v20809_v61  ;;  %16797 = vmatprep.subr.bf16.mxu0 %v20814_v20  ;;  %v20821_v20 = vld [vmem:[#allocation8 + $0x1148] ss:$24 sps:$4 sm:$0xff]   ;;  %v20826_v61 = vld [vmem:[#allocation8 + $0xe1c] ss:$24 sps:$4 sm:$0xff]   ;;  %v16253_v63 = vadd.f32 %v22855_v28, %v16210_v12  ;;  %v16257_v3 = vadd.f32 %v22863_v33, %v16214_v16  ;;  %v16430_v40 = vpop.f32.mrf.mxu1 }
 0x6ec   :  { %16840 = vmatprep.subr.bf16.mxu1 %v20817_v0  ;;  %v20824_v0 = vld [vmem:[#allocation8 + $0xe18] ss:$24 sps:$4 sm:$0xff]   ;;  %v16387_v38 = vpop.f32.mrf.mxu0  ;;  %v16298_v28 = vadd.f32 %v22873_v30, %v16255_v1  ;;  %v16302_v30 = vadd.f32 %v22883_v32, %v16259_v39  ;;  %v20853_v49 = vld [vmem:[#allocation8 + $0x165c] ss:$24 sps:$4 sm:$0xff]  }
 0x6ed   :  { %v16296_v58 = vadd.f32 %v22869_v24, %v16253_v63  ;;  %v16300_v24 = vadd.f32 %v22877_v22, %v16257_v3  ;;  %v16510_v12 = vpop.f32.mrf.mxu1 }
 0x6ee   :  { %16798 = vmatpush2.bf16.msra.mxu0 %v20812_v5  ;;  %v20832_v5 = vld [vmem:[#allocation8 + $0xdec] ss:$24 sps:$4 sm:$0xff]   ;;  %v16467_v11 = vpop.f32.mrf.mxu0  ;;  %v16341_v33 = vadd.f32 %v22875_v18, %v16298_v28  ;;  %v16345_v63 = vadd.f32 %v22886_v46, %v16302_v30  ;;  %v20848_v46 = vld [vmem:[#allocation8 + $0x1358] ss:$24 sps:$4 sm:$0xff]  }
 0x6ef   :  { %16841 = vmatpush2.bf16.msra.mxu1 %v20815_v41  ;;  %16799 = vmatprep.subr.bf16.mxu0 %v20820_v47  ;;  %v20835_v41 = vld [vmem:[#allocation8 + $0x10ec] ss:$24 sps:$4 sm:$0xff]   ;;  %v20830_v47 = vld [vmem:[#allocation8 + $0xde8] ss:$24 sps:$4 sm:$0xff]   ;;  %v16339_v45 = vadd.f32 %v22871_v17, %v16296_v58  ;;  %v16343_v17 = vadd.f32 %v22880_v27, %v16300_v24  ;;  %v16512_v22 = vpop.f32.mrf.mxu1 }
 0x6f0   :  { %16842 = vmatprep.subr.bf16.mxu1 %v20823_v53  ;;  %v20838_v53 = vld [vmem:[#allocation8 + $0xdbc] ss:$24 sps:$4 sm:$0xff]   ;;  %v16469_v9 = vpop.f32.mrf.mxu0  ;;  %v16388_v1 = vadd.f32 %v16387_v38, %v16345_v63  ;;  %v20859_v38 = vld [vmem:[#allocation8 + $0x162c] ss:$24 sps:$4 sm:$0xff]   ;;  %v20854_v24 = vld [vmem:[#allocation8 + $0x1328] ss:$24 sps:$4 sm:$0xff]  }
 0x6f1   :  { %v16386_v32 = vadd.f32 %v16385_v34, %v16343_v17  ;;  %v20851_v34 = vld [vmem:[#allocation8 + $0x1658] ss:$24 sps:$4 sm:$0xff]  }
 0x6f2   :  { %16800 = vmatpush2.bf16.msra.mxu0 %v20818_v29  ;;  %v20841_v29 = vld [vmem:[#allocation8 + $0x10bc] ss:$24 sps:$4 sm:$0xff]   ;;  %v16471_v16 = vpop.f32.mrf.mxu0  ;;  %v16431_v3 = vadd.f32 %v16430_v40, %v16388_v1  ;;  %v20866_v1 = vld [vmem:[#allocation8 + $0x12c8] ss:$24 sps:$4 sm:$0xff]  }
 0x6f3   :  { %16843 = vmatpush2.bf16.msra.mxu1 %v20821_v20  ;;  %16801 = vmatprep.subr.bf16.mxu0 %v20826_v61  ;;  %v16382_v20 = vadd.f32 %v22888_v21, %v16339_v45  ;;  %v20836_v61 = vld [vmem:[#allocation8 + $0xdb8] ss:$24 sps:$4 sm:$0xff]   ;;  %v20842_v21 = vld [vmem:[#allocation8 + $0xd88] ss:$24 sps:$4 sm:$0xff]   ;;  %v16429_v58 = vadd.f32 %v16428_v35, %v16386_v32  ;;  %v20868_v32 = vld [vmem:[#allocation8 + $0x12cc] ss:$24 sps:$4 sm:$0xff]  }
 0x6f4   :  { %16844 = vmatprep.subr.bf16.mxu1 %v20829_v54  ;;  %v16384_v54 = vadd.f32 %v16383_v15, %v16341_v33  ;;  %v16514_v15 = vpop.f32.mrf.mxu1 }
 0x6f5   :  { %v16425_v18 = vadd.f32 %v22891_v31, %v16382_v20  ;;  %v16473_v31 = vpop.f32.mrf.mxu0 }
 0x6f6   :  { %16802 = vmatpush2.bf16.msra.mxu0 %v20824_v0  ;;  %v20845_v0 = vld [vmem:[#allocation8 + $0x1088] ss:$24 sps:$4 sm:$0xff]   ;;  %v16474_v39 = vadd.f32 %v16473_v31, %v16431_v3  ;;  %v20883_v31 = vld [vmem:[#allocation8 + $0x156c] ss:$24 sps:$4 sm:$0xff]  }
 0x6f7   :  { %16845 = vmatpush2.bf16.msra.mxu1 %v20827_v7  ;;  %16803 = vmatprep.subr.bf16.mxu0 %v20832_v5  ;;  %v20850_v7 = vld [vmem:[#allocation8 + $0x135c] ss:$24 sps:$4 sm:$0xff]   ;;  %v16427_v5 = vadd.f32 %v22898_v6, %v16384_v54  ;;  %v16468_v27 = vadd.f32 %v16467_v11, %v16425_v18  ;;  %v20863_v18 = vld [vmem:[#allocation8 + $0x15f8] ss:$24 sps:$4 sm:$0xff]   ;;  %v20881_v3 = vld [vmem:[#allocation8 + $0x1568] ss:$24 sps:$4 sm:$0xff]  }
 0x6f8   :  { %16846 = vmatprep.subr.bf16.mxu1 %v20835_v41 }
 0x6f9   :  { %v16470_v41 = vadd.f32 %v16469_v9, %v16427_v5  ;;  %v16511_v28 = vadd.f32 %v16510_v12, %v16468_v27  ;;  %v20857_v12 = vld [vmem:[#allocation8 + $0x1628] ss:$24 sps:$4 sm:$0xff]   ;;  %v20865_v9 = vld [vmem:[#allocation8 + $0x15fc] ss:$24 sps:$4 sm:$0xff]  }
 0x6fa   :  { %16804 = vmatpush2.bf16.msra.mxu0 %v20830_v47  ;;  %v16472_v47 = vadd.f32 %v16471_v16, %v16429_v58  ;;  %v20869_v27 = vld [vmem:[#allocation8 + $0x15c8] ss:$24 sps:$4 sm:$0xff]   ;;  %v20872_v58 = vld [vmem:[#allocation8 + $0x1298] ss:$24 sps:$4 sm:$0xff]  }
 0x6fb   :  { %16847 = vmatpush2.bf16.msra.mxu1 %v20833_v8  ;;  %16805 = vmatprep.subr.bf16.mxu0 %v20838_v53  ;;  %v16516_v8 = vpop.f32.mrf.mxu1  ;;  %v20856_v53 = vld [vmem:[#allocation8 + $0x132c] ss:$24 sps:$4 sm:$0xff]   ;;  %v16513_v11 = vadd.f32 %v16512_v22, %v16470_v41  ;;  %v20875_v41 = vld [vmem:[#allocation8 + $0x1598] ss:$24 sps:$4 sm:$0xff]  }
 0x6fc   :  { %16848 = vmatprep.subr.bf16.mxu1 %v20841_v29  ;;  %v20862_v29 = vld [vmem:[#allocation8 + $0x12fc] ss:$24 sps:$4 sm:$0xff]   ;;  %v16515_v33 = vadd.f32 %v16514_v15, %v16472_v47 }
 0x6fd   :  { %v20874_v15 = vld [vmem:[#allocation8 + $0x129c] ss:$24 sps:$4 sm:$0xff]  }
 0x6fe   :  { %16806 = vmatpush2.bf16.msra.mxu0 %v20836_v61  ;;  %v20889_v47 = vld [vmem:[#allocation8 + $0x153c] ss:$24 sps:$4 sm:$0xff]  }
 0x6ff   :  { %16849 = vmatpush2.bf16.msra.mxu1 %v20839_v19  ;;  %16807 = vmatprep.subr.bf16.mxu0 %v20844_v42  ;;  %v16517_v42 = vadd.f32 %v16516_v8, %v16474_v39  ;;  %v20884_v8 = vld [vmem:[#allocation8 + $0x1238] ss:$24 sps:$4 sm:$0xff]   ;;  %v20893_v39 = vld [vmem:[#allocation8 + $0x1508] ss:$24 sps:$4 sm:$0xff]  }
 0x700   :  { %16850 = vmatprep.subr.bf16.mxu1 %v20847_v59  ;;  %v20860_v59 = vld [vmem:[#allocation8 + $0x12f8] ss:$24 sps:$4 sm:$0xff]  }
 0x702   :  { %16808 = vmatpush2.bf16.msra.mxu0 %v20842_v21 }
 0x703   :  { %16851 = vmatpush2.bf16.msra.mxu1 %v20845_v0  ;;  %16863 = vmatprep.subr.bf16.mxu0 %v20850_v7  ;;  %v20871_v0 = vld [vmem:[#allocation8 + $0x15cc] ss:$24 sps:$4 sm:$0xff]  }
 0x704   :  { %16906 = vmatprep.subr.bf16.mxu1 %v20853_v49  ;;  %v20877_v49 = vld [vmem:[#allocation8 + $0x159c] ss:$24 sps:$4 sm:$0xff]  }
 0x705   :  { %v16553_v6 = vpop.f32.mrf.mxu0  ;;  %16810 = vmatmul.mubr.bf16.vlgmr.msra.gmra.mxu0 %v23143_v10 }
 0x706   :  { %v16554_v35 = vadd.f32 %v16553_v6, %v16511_v28  ;;  %v16596_v45 = vpop.f32.mrf.mxu1  ;;  %16853 = vmatmul.mubr.bf16.vlgmr.msra.gmra.mxu1 %v23144_v48  ;;  %16864 = vmatpush1.bf16.msra.mxu0 %v20848_v46  ;;  %v20880_v46 = vld [vmem:[#allocation8 + $0x126c] ss:$24 sps:$4 sm:$0xff]   ;;  %v20886_v28 = vld [vmem:[#allocation8 + $0x123c] ss:$24 sps:$4 sm:$0xff]  }
 0x707   :  { %16895 = vmatprep.mubr.bf16.mxu0 %v22698_v36  ;;  %16907 = vmatpush1.bf16.msra.mxu1 %v20851_v34  ;;  %v16555_v40 = vpop.f32.mrf.mxu0  ;;  %v20878_v34 = vld [vmem:[#allocation8 + $0x1268] ss:$24 sps:$4 sm:$0xff]   ;;  %v20892_v6 = vld [vmem:[#allocation8 + $0x120c] ss:$24 sps:$4 sm:$0xff]  }
 0x708   :  { %v16597_v30 = vadd.f32 %v16596_v45, %v16554_v35  ;;  %16938 = vmatprep.mubr.bf16.mxu1 %v22701_v4  ;;  %v16556_v20 = vadd.f32 %v16555_v40, %v16513_v11  ;;  %v16598_v61 = vpop.f32.mrf.mxu1  ;;  %16865 = vmatprep.subr.bf16.mxu0 %v20856_v53  ;;  %v20887_v53 = vld [vmem:[#allocation8 + $0x1538] ss:$24 sps:$4 sm:$0xff]   ;;  %v20890_v11 = vld [vmem:[#allocation8 + $0x1208] ss:$24 sps:$4 sm:$0xff]   ;;  %v20898_v35 = vld [vmem:[#allocation8 + $0x14dc] ss:$24 sps:$4 sm:$0xff]  }
 0x709   :  { %v16557_v19 = vpop.f32.mrf.mxu0  ;;  %16908 = vmatprep.subr.bf16.mxu1 %v20859_v38  ;;  %v20895_v38 = vld [vmem:[#allocation8 + $0x150c] ss:$24 sps:$4 sm:$0xff]   ;;  %v20901_v45 = vld [vmem:[#allocation8 + $0x17dc] ss:$24 sps:$4 sm:$0xff]   ;;  %v20899_v40 = vld [vmem:[#allocation8 + $0x17d8] ss:$24 sps:$4 sm:$0xff]  }
 0x70a   :  { %17637 = vst [vmem:[#allocation11] sm:$0xff] %v16597_v30  ;;  %v16599_v17 = vadd.f32 %v16598_v61, %v16556_v20  ;;  %v16558_v54 = vadd.f32 %v16557_v19, %v16515_v33  ;;  %v16600_v22 = vpop.f32.mrf.mxu1  ;;  %16866 = vmatpush1.bf16.msra.mxu0 %v20854_v24  ;;  %v20896_v24 = vld [vmem:[#allocation8 + $0x14d8] ss:$24 sps:$4 sm:$0xff]   ;;  %v20902_v33 = vld [vmem:[#allocation8 + $0x14a8] ss:$24 sps:$4 sm:$0xff]  }
 0x70b   :  { %16909 = vmatpush1.bf16.msra.mxu1 %v20857_v12  ;;  %v16559_v63 = vpop.f32.mrf.mxu0  ;;  %16867 = vmatprep.subr.bf16.mxu0 %v20862_v29  ;;  %v20904_v12 = vld [vmem:[#allocation8 + $0x14ac] ss:$24 sps:$4 sm:$0xff]   ;;  %v20905_v30 = vld [vmem:[#allocation8 + $0x17a8] ss:$24 sps:$4 sm:$0xff]   ;;  %v20910_v20 = vld [vmem:[#allocation8 + $0x147c] ss:$24 sps:$4 sm:$0xff]  }
 0x70c   :  { %17638 = vst [vmem:[#allocation11 + $0x8] sm:$0xff] %v16599_v17  ;;  %v16601_v21 = vadd.f32 %v16600_v22, %v16558_v54  ;;  %v16560_v16 = vadd.f32 %v16559_v63, %v16517_v42  ;;  %16910 = vmatprep.subr.bf16.mxu1 %v20865_v9  ;;  %v16602_v7 = vpop.f32.mrf.mxu1  ;;  %v20907_v29 = vld [vmem:[#allocation8 + $0x17ac] ss:$24 sps:$4 sm:$0xff]   ;;  %v20913_v61 = vld [vmem:[#allocation8 + $0x177c] ss:$24 sps:$4 sm:$0xff]  }
 0x70d   :  { %v20908_v9 = vld [vmem:[#allocation8 + $0x1478] ss:$24 sps:$4 sm:$0xff]   ;;  %v20916_v42 = vld [vmem:[#allocation8 + $0x144c] ss:$24 sps:$4 sm:$0xff]   ;;  %v20914_v54 = vld [vmem:[#allocation8 + $0x1448] ss:$24 sps:$4 sm:$0xff]  }
 0x70e   :  { %17643 = vst [vmem:[#allocation11 + $0x30] sm:$0xff] %v16601_v21  ;;  %v16603_v5 = vadd.f32 %v16602_v7, %v16560_v16  ;;  %16868 = vmatpush1.bf16.msra.mxu0 %v20860_v59  ;;  %v20911_v19 = vld [vmem:[#allocation8 + $0x1778] ss:$24 sps:$4 sm:$0xff]   ;;  %v20919_v17 = vld [vmem:[#allocation8 + $0x174c] ss:$24 sps:$4 sm:$0xff]  }
 0x70f   :  { %16911 = vmatpush1.bf16.msra.mxu1 %v20863_v18  ;;  %16869 = vmatprep.subr.bf16.mxu0 %v20868_v32  ;;  %v20917_v22 = vld [vmem:[#allocation8 + $0x1748] ss:$24 sps:$4 sm:$0xff]   ;;  %v20922_v59 = vld [vmem:[#allocation8 + $0x141c] ss:$24 sps:$4 sm:$0xff]   ;;  %v20920_v18 = vld [vmem:[#allocation8 + $0x1418] ss:$24 sps:$4 sm:$0xff]  }
 0x710   :  { %17644 = vst [vmem:[#allocation11 + $0x38] sm:$0xff] %v16603_v5  ;;  %16912 = vmatprep.subr.bf16.mxu1 %v20871_v0  ;;  %v20925_v63 = vld [vmem:[#allocation8 + $0x171c] ss:$24 sps:$4 sm:$0xff]   ;;  %v20923_v32 = vld [vmem:[#allocation8 + $0x1718] ss:$24 sps:$4 sm:$0xff]  }
 0x711   :  { %v20928_v21 = vld [vmem:[#allocation8 + $0x13ec] ss:$24 sps:$4 sm:$0xff]   ;;  %v20926_v0 = vld [vmem:[#allocation8 + $0x13e8] ss:$24 sps:$4 sm:$0xff]   ;;  %v20934_v5 = vld [vmem:[#allocation8 + $0x13bc] ss:$24 sps:$4 sm:$0xff]  }
 0x712   :  { %16870 = vmatpush1.bf16.msra.mxu0 %v20866_v1  ;;  %v20931_v16 = vld [vmem:[#allocation8 + $0x16ec] ss:$24 sps:$4 sm:$0xff]   ;;  %v20929_v7 = vld [vmem:[#allocation8 + $0x16e8] ss:$24 sps:$4 sm:$0xff]   ;;  %v20937_v1 = vld [vmem:[#allocation8 + $0x16bc] ss:$24 sps:$4 sm:$0xff]  }
 0x713   :  { %16913 = vmatpush1.bf16.msra.mxu1 %v20869_v27  ;;  %16871 = vmatprep.subr.bf16.mxu0 %v20874_v15  ;;  %v20932_v27 = vld [vmem:[#allocation8 + $0x13b8] ss:$24 sps:$4 sm:$0xff]  }
 0x714   :  { %16914 = vmatprep.subr.bf16.mxu1 %v20877_v49  ;;  %v20935_v15 = vld [vmem:[#allocation8 + $0x16b8] ss:$24 sps:$4 sm:$0xff]   ;;  %v20940_v49 = vld [vmem:[#allocation8 + $0x138c] ss:$24 sps:$4 sm:$0xff]  }
 0x716   :  { %16872 = vmatpush1.bf16.msra.mxu0 %v20872_v58  ;;  %v20943_v58 = vld [vmem:[#allocation8 + $0x168c] ss:$24 sps:$4 sm:$0xff]  }
 0x717   :  { %16915 = vmatpush1.bf16.msra.mxu1 %v20875_v41  ;;  %16873 = vmatprep.subr.bf16.mxu0 %v20880_v46  ;;  %v20938_v41 = vld [vmem:[#allocation8 + $0x1388] ss:$24 sps:$4 sm:$0xff]  }
 0x718   :  { %16916 = vmatprep.subr.bf16.mxu1 %v20883_v31  ;;  %v20941_v46 = vld [vmem:[#allocation8 + $0x1688] ss:$24 sps:$4 sm:$0xff]   ;;  %v20946_v31 = vld [vmem:[#allocation8 + $0x195c] ss:$24 sps:$4 sm:$0xff]  }
 0x71a   :  { %16874 = vmatpush1.bf16.msra.mxu0 %v20878_v34  ;;  %v20949_v34 = vld [vmem:[#allocation8 + $0x1c5c] ss:$24 sps:$4 sm:$0xff]  }
 0x71b   :  { %16917 = vmatpush1.bf16.msra.mxu1 %v20881_v3  ;;  %16875 = vmatprep.subr.bf16.mxu0 %v20886_v28  ;;  %v20944_v3 = vld [vmem:[#allocation8 + $0x1958] ss:$24 sps:$4 sm:$0xff]  }
 0x71c   :  { %16918 = vmatprep.subr.bf16.mxu1 %v20889_v47  ;;  %v20947_v28 = vld [vmem:[#allocation8 + $0x1c58] ss:$24 sps:$4 sm:$0xff]   ;;  %v20952_v47 = vld [vmem:[#allocation8 + $0x192c] ss:$24 sps:$4 sm:$0xff]  }
 0x71e   :  { %16876 = vmatpush1.bf16.msra.mxu0 %v20884_v8  ;;  %v20955_v8 = vld [vmem:[#allocation8 + $0x1c2c] ss:$24 sps:$4 sm:$0xff]  }
 0x71f   :  { %16919 = vmatpush1.bf16.msra.mxu1 %v20887_v53  ;;  %16877 = vmatprep.subr.bf16.mxu0 %v20892_v6  ;;  %v20950_v53 = vld [vmem:[#allocation8 + $0x1928] ss:$24 sps:$4 sm:$0xff]  }
 0x720   :  { %16920 = vmatprep.subr.bf16.mxu1 %v20895_v38  ;;  %v20953_v6 = vld [vmem:[#allocation8 + $0x1c28] ss:$24 sps:$4 sm:$0xff]   ;;  %v20958_v38 = vld [vmem:[#allocation8 + $0x18fc] ss:$24 sps:$4 sm:$0xff]  }
 0x722   :  { %16878 = vmatpush1.bf16.msra.mxu0 %v20890_v11  ;;  %v20961_v11 = vld [vmem:[#allocation8 + $0x1bfc] ss:$24 sps:$4 sm:$0xff]  }
 0x723   :  { %16921 = vmatpush1.bf16.msra.mxu1 %v20893_v39  ;;  %16879 = vmatprep.subr.bf16.mxu0 %v20898_v35  ;;  %v20956_v39 = vld [vmem:[#allocation8 + $0x18f8] ss:$24 sps:$4 sm:$0xff]  }
 0x724   :  { %16922 = vmatprep.subr.bf16.mxu1 %v20901_v45  ;;  %v20959_v35 = vld [vmem:[#allocation8 + $0x1bf8] ss:$24 sps:$4 sm:$0xff]   ;;  %v20964_v45 = vld [vmem:[#allocation8 + $0x18cc] ss:$24 sps:$4 sm:$0xff]  }
 0x726   :  { %16880 = vmatpush2.bf16.msra.mxu0 %v20896_v24  ;;  %v20967_v24 = vld [vmem:[#allocation8 + $0x1bcc] ss:$24 sps:$4 sm:$0xff]  }
 0x727   :  { %16923 = vmatpush2.bf16.msra.mxu1 %v20899_v40  ;;  %16881 = vmatprep.subr.bf16.mxu0 %v20904_v12  ;;  %v20962_v40 = vld [vmem:[#allocation8 + $0x18c8] ss:$24 sps:$4 sm:$0xff]  }
 0x728   :  { %16924 = vmatprep.subr.bf16.mxu1 %v20907_v29  ;;  %v20965_v12 = vld [vmem:[#allocation8 + $0x1bc8] ss:$24 sps:$4 sm:$0xff]   ;;  %v20970_v29 = vld [vmem:[#allocation8 + $0x189c] ss:$24 sps:$4 sm:$0xff]  }
 0x72a   :  { %16882 = vmatpush2.bf16.msra.mxu0 %v20902_v33  ;;  %v20973_v33 = vld [vmem:[#allocation8 + $0x1b9c] ss:$24 sps:$4 sm:$0xff]  }
 0x72b   :  { %16925 = vmatpush2.bf16.msra.mxu1 %v20905_v30  ;;  %16883 = vmatprep.subr.bf16.mxu0 %v20910_v20  ;;  %v20968_v30 = vld [vmem:[#allocation8 + $0x1898] ss:$24 sps:$4 sm:$0xff]  }
 0x72c   :  { %16926 = vmatprep.subr.bf16.mxu1 %v20913_v61  ;;  %v20971_v20 = vld [vmem:[#allocation8 + $0x1b98] ss:$24 sps:$4 sm:$0xff]   ;;  %v20976_v61 = vld [vmem:[#allocation8 + $0x186c] ss:$24 sps:$4 sm:$0xff]  }
 0x72e   :  { %16884 = vmatpush2.bf16.msra.mxu0 %v20908_v9  ;;  %v20979_v9 = vld [vmem:[#allocation8 + $0x1b6c] ss:$24 sps:$4 sm:$0xff]  }
 0x72f   :  { %16927 = vmatpush2.bf16.msra.mxu1 %v20911_v19  ;;  %16885 = vmatprep.subr.bf16.mxu0 %v20916_v42  ;;  %v20974_v19 = vld [vmem:[#allocation8 + $0x1868] ss:$24 sps:$4 sm:$0xff]  }
 0x730   :  { %16928 = vmatprep.subr.bf16.mxu1 %v20919_v17  ;;  %v20977_v42 = vld [vmem:[#allocation8 + $0x1b68] ss:$24 sps:$4 sm:$0xff]   ;;  %v20982_v17 = vld [vmem:[#allocation8 + $0x183c] ss:$24 sps:$4 sm:$0xff]  }
 0x732   :  { %16886 = vmatpush2.bf16.msra.mxu0 %v20914_v54  ;;  %v20985_v54 = vld [vmem:[#allocation8 + $0x1b3c] ss:$24 sps:$4 sm:$0xff]  }
 0x733   :  { %16929 = vmatpush2.bf16.msra.mxu1 %v20917_v22  ;;  %16887 = vmatprep.subr.bf16.mxu0 %v20922_v59  ;;  %v20980_v22 = vld [vmem:[#allocation8 + $0x1838] ss:$24 sps:$4 sm:$0xff]  }
 0x734   :  { %16930 = vmatprep.subr.bf16.mxu1 %v20925_v63  ;;  %v20983_v59 = vld [vmem:[#allocation8 + $0x1b38] ss:$24 sps:$4 sm:$0xff]   ;;  %v20988_v63 = vld [vmem:[#allocation8 + $0x180c] ss:$24 sps:$4 sm:$0xff]  }
 0x736   :  { %16888 = vmatpush2.bf16.msra.mxu0 %v20920_v18  ;;  %v20991_v18 = vld [vmem:[#allocation8 + $0x1b0c] ss:$24 sps:$4 sm:$0xff]  }
 0x737   :  { %16931 = vmatpush2.bf16.msra.mxu1 %v20923_v32  ;;  %16889 = vmatprep.subr.bf16.mxu0 %v20928_v21  ;;  %v20986_v32 = vld [vmem:[#allocation8 + $0x1808] ss:$24 sps:$4 sm:$0xff]  }
 0x738   :  { %16932 = vmatprep.subr.bf16.mxu1 %v20931_v16  ;;  %v20989_v21 = vld [vmem:[#allocation8 + $0x1b08] ss:$24 sps:$4 sm:$0xff]   ;;  %v20994_v16 = vld [vmem:[#allocation8 + $0x1adc] ss:$24 sps:$4 sm:$0xff]  }
 0x73a   :  { %16890 = vmatpush2.bf16.msra.mxu0 %v20926_v0  ;;  %v20997_v0 = vld [vmem:[#allocation8 + $0x1ddc] ss:$24 sps:$4 sm:$0xff]  }
 0x73b   :  { %16933 = vmatpush2.bf16.msra.mxu1 %v20929_v7  ;;  %16891 = vmatprep.subr.bf16.mxu0 %v20934_v5  ;;  %v20992_v7 = vld [vmem:[#allocation8 + $0x1ad8] ss:$24 sps:$4 sm:$0xff]  }
 0x73c   :  { %16934 = vmatprep.subr.bf16.mxu1 %v20937_v1  ;;  %v20995_v5 = vld [vmem:[#allocation8 + $0x1dd8] ss:$24 sps:$4 sm:$0xff]   ;;  %v21000_v1 = vld [vmem:[#allocation8 + $0x1aac] ss:$24 sps:$4 sm:$0xff]  }
 0x73e   :  { %16892 = vmatpush2.bf16.msra.mxu0 %v20932_v27  ;;  %v21003_v27 = vld [vmem:[#allocation8 + $0x1dac] ss:$24 sps:$4 sm:$0xff]  }
 0x73f   :  { %16935 = vmatpush2.bf16.msra.mxu1 %v20935_v15  ;;  %16893 = vmatprep.subr.bf16.mxu0 %v20940_v49  ;;  %v20998_v15 = vld [vmem:[#allocation8 + $0x1aa8] ss:$24 sps:$4 sm:$0xff]  }
 0x740   :  { %16936 = vmatprep.subr.bf16.mxu1 %v20943_v58  ;;  %v21001_v49 = vld [vmem:[#allocation8 + $0x1da8] ss:$24 sps:$4 sm:$0xff]   ;;  %v21006_v58 = vld [vmem:[#allocation8 + $0x1a7c] ss:$24 sps:$4 sm:$0xff]  }
 0x742   :  { %16894 = vmatpush2.bf16.msra.mxu0 %v20938_v41  ;;  %v21009_v41 = vld [vmem:[#allocation8 + $0x1d7c] ss:$24 sps:$4 sm:$0xff]  }
 0x743   :  { %16937 = vmatpush2.bf16.msra.mxu1 %v20941_v46  ;;  %16949 = vmatprep.subr.bf16.mxu0 %v20946_v31  ;;  %v21004_v46 = vld [vmem:[#allocation8 + $0x1a78] ss:$24 sps:$4 sm:$0xff]  }
 0x744   :  { %16992 = vmatprep.subr.bf16.mxu1 %v20949_v34  ;;  %v21007_v31 = vld [vmem:[#allocation8 + $0x1d78] ss:$24 sps:$4 sm:$0xff]   ;;  %v21012_v34 = vld [vmem:[#allocation8 + $0x1a4c] ss:$24 sps:$4 sm:$0xff]  }
 0x745   :  { %16896 = vmatmul.mubr.bf16.vlgmr.msra.gmra.mxu0 %v23149_v26 }
 0x746   :  { %16939 = vmatmul.mubr.bf16.vlgmr.msra.gmra.mxu1 %v23150_v60  ;;  %16950 = vmatpush1.bf16.msra.mxu0 %v20944_v3  ;;  %v21015_v3 = vld [vmem:[#allocation8 + $0x1d4c] ss:$24 sps:$4 sm:$0xff]  }
 0x747   :  { %16981 = vmatprep.mubr.bf16.mxu0 %v22770_v52  ;;  %16993 = vmatpush1.bf16.msra.mxu1 %v20947_v28  ;;  %v21010_v28 = vld [vmem:[#allocation8 + $0x1a48] ss:$24 sps:$4 sm:$0xff]  }
 0x748   :  { %17024 = vmatprep.mubr.bf16.mxu1 %v22773_v2  ;;  %16951 = vmatprep.subr.bf16.mxu0 %v20952_v47  ;;  %v21013_v47 = vld [vmem:[#allocation8 + $0x1d48] ss:$24 sps:$4 sm:$0xff]  }
 0x749   :  { %16994 = vmatprep.subr.bf16.mxu1 %v20955_v8  ;;  %v21018_v8 = vld [vmem:[#allocation8 + $0x1a1c] ss:$24 sps:$4 sm:$0xff]  }
 0x74a   :  { %16952 = vmatpush1.bf16.msra.mxu0 %v20950_v53  ;;  %v21021_v53 = vld [vmem:[#allocation8 + $0x1d1c] ss:$24 sps:$4 sm:$0xff]  }
 0x74b   :  { %16995 = vmatpush1.bf16.msra.mxu1 %v20953_v6  ;;  %16953 = vmatprep.subr.bf16.mxu0 %v20958_v38  ;;  %v21016_v6 = vld [vmem:[#allocation8 + $0x1a18] ss:$24 sps:$4 sm:$0xff]  }
 0x74c   :  { %16996 = vmatprep.subr.bf16.mxu1 %v20961_v11  ;;  %v21019_v38 = vld [vmem:[#allocation8 + $0x1d18] ss:$24 sps:$4 sm:$0xff]   ;;  %v21024_v11 = vld [vmem:[#allocation8 + $0x19ec] ss:$24 sps:$4 sm:$0xff]  }
 0x74e   :  { %16954 = vmatpush1.bf16.msra.mxu0 %v20956_v39  ;;  %v21027_v39 = vld [vmem:[#allocation8 + $0x1cec] ss:$24 sps:$4 sm:$0xff]  }
 0x74f   :  { %16997 = vmatpush1.bf16.msra.mxu1 %v20959_v35  ;;  %16955 = vmatprep.subr.bf16.mxu0 %v20964_v45  ;;  %v21022_v35 = vld [vmem:[#allocation8 + $0x19e8] ss:$24 sps:$4 sm:$0xff]  }
 0x750   :  { %16998 = vmatprep.subr.bf16.mxu1 %v20967_v24  ;;  %v21025_v45 = vld [vmem:[#allocation8 + $0x1ce8] ss:$24 sps:$4 sm:$0xff]   ;;  %v21030_v24 = vld [vmem:[#allocation8 + $0x19bc] ss:$24 sps:$4 sm:$0xff]  }
 0x752   :  { %16956 = vmatpush1.bf16.msra.mxu0 %v20962_v40  ;;  %v21033_v40 = vld [vmem:[#allocation8 + $0x1cbc] ss:$24 sps:$4 sm:$0xff]  }
 0x753   :  { %16999 = vmatpush1.bf16.msra.mxu1 %v20965_v12  ;;  %16957 = vmatprep.subr.bf16.mxu0 %v20970_v29  ;;  %v21028_v12 = vld [vmem:[#allocation8 + $0x19b8] ss:$24 sps:$4 sm:$0xff]  }
 0x754   :  { %17000 = vmatprep.subr.bf16.mxu1 %v20973_v33  ;;  %v21031_v29 = vld [vmem:[#allocation8 + $0x1cb8] ss:$24 sps:$4 sm:$0xff]   ;;  %v21036_v33 = vld [vmem:[#allocation8 + $0x198c] ss:$24 sps:$4 sm:$0xff]  }
 0x756   :  { %16958 = vmatpush1.bf16.msra.mxu0 %v20968_v30  ;;  %v21039_v30 = vld [vmem:[#allocation8 + $0x1c8c] ss:$24 sps:$4 sm:$0xff]  }
 0x757   :  { %17001 = vmatpush1.bf16.msra.mxu1 %v20971_v20  ;;  %16959 = vmatprep.subr.bf16.mxu0 %v20976_v61  ;;  %v21034_v20 = vld [vmem:[#allocation8 + $0x1988] ss:$24 sps:$4 sm:$0xff]  }
 0x758   :  { %17002 = vmatprep.subr.bf16.mxu1 %v20979_v9  ;;  %v21037_v61 = vld [vmem:[#allocation8 + $0x1c88] ss:$24 sps:$4 sm:$0xff]   ;;  %v21042_v9 = vld [vmem:[#allocation8 + $0x1f5c] ss:$24 sps:$4 sm:$0xff]  }
 0x75a   :  { %16960 = vmatpush1.bf16.msra.mxu0 %v20974_v19  ;;  %v21045_v19 = vld [vmem:[#allocation8 + $0x225c] ss:$24 sps:$4 sm:$0xff]  }
 0x75b   :  { %17003 = vmatpush1.bf16.msra.mxu1 %v20977_v42  ;;  %16961 = vmatprep.subr.bf16.mxu0 %v20982_v17  ;;  %v21040_v42 = vld [vmem:[#allocation8 + $0x1f58] ss:$24 sps:$4 sm:$0xff]  }
 0x75c   :  { %17004 = vmatprep.subr.bf16.mxu1 %v20985_v54  ;;  %v21043_v17 = vld [vmem:[#allocation8 + $0x2258] ss:$24 sps:$4 sm:$0xff]   ;;  %v21048_v54 = vld [vmem:[#allocation8 + $0x1f2c] ss:$24 sps:$4 sm:$0xff]  }
 0x75e   :  { %16962 = vmatpush1.bf16.msra.mxu0 %v20980_v22  ;;  %v21051_v22 = vld [vmem:[#allocation8 + $0x222c] ss:$24 sps:$4 sm:$0xff]  }
 0x75f   :  { %17005 = vmatpush1.bf16.msra.mxu1 %v20983_v59  ;;  %16963 = vmatprep.subr.bf16.mxu0 %v20988_v63  ;;  %v21046_v59 = vld [vmem:[#allocation8 + $0x1f28] ss:$24 sps:$4 sm:$0xff]  }
 0x760   :  { %17006 = vmatprep.subr.bf16.mxu1 %v20991_v18  ;;  %v21049_v63 = vld [vmem:[#allocation8 + $0x2228] ss:$24 sps:$4 sm:$0xff]   ;;  %v21054_v18 = vld [vmem:[#allocation8 + $0x1efc] ss:$24 sps:$4 sm:$0xff]  }
 0x762   :  { %16964 = vmatpush1.bf16.msra.mxu0 %v20986_v32  ;;  %v21057_v32 = vld [vmem:[#allocation8 + $0x21fc] ss:$24 sps:$4 sm:$0xff]  }
 0x763   :  { %17007 = vmatpush1.bf16.msra.mxu1 %v20989_v21  ;;  %16965 = vmatprep.subr.bf16.mxu0 %v20994_v16  ;;  %v21052_v21 = vld [vmem:[#allocation8 + $0x1ef8] ss:$24 sps:$4 sm:$0xff]  }
 0x764   :  { %17008 = vmatprep.subr.bf16.mxu1 %v20997_v0  ;;  %v21055_v16 = vld [vmem:[#allocation8 + $0x21f8] ss:$24 sps:$4 sm:$0xff]   ;;  %v21060_v0 = vld [vmem:[#allocation8 + $0x1ecc] ss:$24 sps:$4 sm:$0xff]  }
 0x766   :  { %16966 = vmatpush2.bf16.msra.mxu0 %v20992_v7  ;;  %v21063_v7 = vld [vmem:[#allocation8 + $0x21cc] ss:$24 sps:$4 sm:$0xff]  }
 0x767   :  { %17009 = vmatpush2.bf16.msra.mxu1 %v20995_v5  ;;  %16967 = vmatprep.subr.bf16.mxu0 %v21000_v1  ;;  %v21058_v5 = vld [vmem:[#allocation8 + $0x1ec8] ss:$24 sps:$4 sm:$0xff]  }
 0x768   :  { %17010 = vmatprep.subr.bf16.mxu1 %v21003_v27  ;;  %v21061_v1 = vld [vmem:[#allocation8 + $0x21c8] ss:$24 sps:$4 sm:$0xff]   ;;  %v21066_v27 = vld [vmem:[#allocation8 + $0x1e9c] ss:$24 sps:$4 sm:$0xff]  }
 0x76a   :  { %16968 = vmatpush2.bf16.msra.mxu0 %v20998_v15  ;;  %v21069_v15 = vld [vmem:[#allocation8 + $0x219c] ss:$24 sps:$4 sm:$0xff]  }
 0x76b   :  { %17011 = vmatpush2.bf16.msra.mxu1 %v21001_v49  ;;  %16969 = vmatprep.subr.bf16.mxu0 %v21006_v58  ;;  %v21064_v49 = vld [vmem:[#allocation8 + $0x1e98] ss:$24 sps:$4 sm:$0xff]  }
 0x76c   :  { %17012 = vmatprep.subr.bf16.mxu1 %v21009_v41  ;;  %v21067_v58 = vld [vmem:[#allocation8 + $0x2198] ss:$24 sps:$4 sm:$0xff]   ;;  %v21072_v41 = vld [vmem:[#allocation8 + $0x1e6c] ss:$24 sps:$4 sm:$0xff]  }
 0x76e   :  { %16970 = vmatpush2.bf16.msra.mxu0 %v21004_v46  ;;  %v21075_v46 = vld [vmem:[#allocation8 + $0x216c] ss:$24 sps:$4 sm:$0xff]  }
 0x76f   :  { %17013 = vmatpush2.bf16.msra.mxu1 %v21007_v31  ;;  %16971 = vmatprep.subr.bf16.mxu0 %v21012_v34  ;;  %v21070_v31 = vld [vmem:[#allocation8 + $0x1e68] ss:$24 sps:$4 sm:$0xff]  }
 0x770   :  { %17014 = vmatprep.subr.bf16.mxu1 %v21015_v3  ;;  %v21073_v34 = vld [vmem:[#allocation8 + $0x2168] ss:$24 sps:$4 sm:$0xff]   ;;  %v21078_v3 = vld [vmem:[#allocation8 + $0x1e3c] ss:$24 sps:$4 sm:$0xff]  }
 0x772   :  { %16972 = vmatpush2.bf16.msra.mxu0 %v21010_v28  ;;  %v21081_v28 = vld [vmem:[#allocation8 + $0x213c] ss:$24 sps:$4 sm:$0xff]  }
 0x773   :  { %17015 = vmatpush2.bf16.msra.mxu1 %v21013_v47  ;;  %16973 = vmatprep.subr.bf16.mxu0 %v21018_v8  ;;  %v21076_v47 = vld [vmem:[#allocation8 + $0x1e38] ss:$24 sps:$4 sm:$0xff]  }
 0x774   :  { %17016 = vmatprep.subr.bf16.mxu1 %v21021_v53  ;;  %v21079_v8 = vld [vmem:[#allocation8 + $0x2138] ss:$24 sps:$4 sm:$0xff]   ;;  %v21084_v53 = vld [vmem:[#allocation8 + $0x1e0c] ss:$24 sps:$4 sm:$0xff]  }
 0x776   :  { %16974 = vmatpush2.bf16.msra.mxu0 %v21016_v6  ;;  %v21087_v6 = vld [vmem:[#allocation8 + $0x210c] ss:$24 sps:$4 sm:$0xff]  }
 0x777   :  { %17017 = vmatpush2.bf16.msra.mxu1 %v21019_v38  ;;  %16975 = vmatprep.subr.bf16.mxu0 %v21024_v11  ;;  %v21082_v38 = vld [vmem:[#allocation8 + $0x1e08] ss:$24 sps:$4 sm:$0xff]  }
 0x778   :  { %17018 = vmatprep.subr.bf16.mxu1 %v21027_v39  ;;  %v21085_v11 = vld [vmem:[#allocation8 + $0x2108] ss:$24 sps:$4 sm:$0xff]   ;;  %v21090_v39 = vld [vmem:[#allocation8 + $0x20dc] ss:$24 sps:$4 sm:$0xff]  }
 0x77a   :  { %16976 = vmatpush2.bf16.msra.mxu0 %v21022_v35  ;;  %v21093_v35 = vld [vmem:[#allocation8 + $0x23dc] ss:$24 sps:$4 sm:$0xff]  }
 0x77b   :  { %17019 = vmatpush2.bf16.msra.mxu1 %v21025_v45  ;;  %16977 = vmatprep.subr.bf16.mxu0 %v21030_v24  ;;  %v21088_v45 = vld [vmem:[#allocation8 + $0x20d8] ss:$24 sps:$4 sm:$0xff]  }
 0x77c   :  { %17020 = vmatprep.subr.bf16.mxu1 %v21033_v40  ;;  %v21091_v24 = vld [vmem:[#allocation8 + $0x23d8] ss:$24 sps:$4 sm:$0xff]   ;;  %v21096_v40 = vld [vmem:[#allocation8 + $0x20ac] ss:$24 sps:$4 sm:$0xff]  }
 0x77e   :  { %16978 = vmatpush2.bf16.msra.mxu0 %v21028_v12  ;;  %v21099_v12 = vld [vmem:[#allocation8 + $0x23ac] ss:$24 sps:$4 sm:$0xff]  }
 0x77f   :  { %17021 = vmatpush2.bf16.msra.mxu1 %v21031_v29  ;;  %16979 = vmatprep.subr.bf16.mxu0 %v21036_v33  ;;  %v21094_v29 = vld [vmem:[#allocation8 + $0x20a8] ss:$24 sps:$4 sm:$0xff]  }
 0x780   :  { %17022 = vmatprep.subr.bf16.mxu1 %v21039_v30  ;;  %v21097_v33 = vld [vmem:[#allocation8 + $0x23a8] ss:$24 sps:$4 sm:$0xff]   ;;  %v21102_v30 = vld [vmem:[#allocation8 + $0x207c] ss:$24 sps:$4 sm:$0xff]  }
 0x782   :  { %16980 = vmatpush2.bf16.msra.mxu0 %v21034_v20  ;;  %v21105_v20 = vld [vmem:[#allocation8 + $0x237c] ss:$24 sps:$4 sm:$0xff]  }
 0x783   :  { %17023 = vmatpush2.bf16.msra.mxu1 %v21037_v61  ;;  %17035 = vmatprep.subr.bf16.mxu0 %v21042_v9  ;;  %v21100_v61 = vld [vmem:[#allocation8 + $0x2078] ss:$24 sps:$4 sm:$0xff]  }
 0x784   :  { %17078 = vmatprep.subr.bf16.mxu1 %v21045_v19  ;;  %v21103_v9 = vld [vmem:[#allocation8 + $0x2378] ss:$24 sps:$4 sm:$0xff]   ;;  %v21108_v19 = vld [vmem:[#allocation8 + $0x204c] ss:$24 sps:$4 sm:$0xff]  }
 0x785   :  { %16982 = vmatmul.mubr.bf16.vlgmr.msra.gmra.mxu0 %v22449_v43 }
 0x786   :  { %17025 = vmatmul.mubr.bf16.vlgmr.msra.gmra.mxu1 %v22537_v25  ;;  %17036 = vmatpush1.bf16.msra.mxu0 %v21040_v42  ;;  %v21111_v42 = vld [vmem:[#allocation8 + $0x234c] ss:$24 sps:$4 sm:$0xff]  }
 0x787   :  { %17067 = vmatprep.mubr.bf16.mxu0 %v22818_v23  ;;  %17079 = vmatpush1.bf16.msra.mxu1 %v21043_v17  ;;  %v21106_v17 = vld [vmem:[#allocation8 + $0x2048] ss:$24 sps:$4 sm:$0xff]  }
 0x788   :  { %17110 = vmatprep.mubr.bf16.mxu1 %v22821_v14  ;;  %17037 = vmatprep.subr.bf16.mxu0 %v21048_v54  ;;  %v21109_v54 = vld [vmem:[#allocation8 + $0x2348] ss:$24 sps:$4 sm:$0xff]  }
 0x789   :  { %17080 = vmatprep.subr.bf16.mxu1 %v21051_v22  ;;  %v21114_v22 = vld [vmem:[#allocation8 + $0x201c] ss:$24 sps:$4 sm:$0xff]  }
 0x78a   :  { %17038 = vmatpush1.bf16.msra.mxu0 %v21046_v59  ;;  %v21117_v59 = vld [vmem:[#allocation8 + $0x231c] ss:$24 sps:$4 sm:$0xff]  }
 0x78b   :  { %17081 = vmatpush1.bf16.msra.mxu1 %v21049_v63  ;;  %17039 = vmatprep.subr.bf16.mxu0 %v21054_v18  ;;  %v21112_v63 = vld [vmem:[#allocation8 + $0x2018] ss:$24 sps:$4 sm:$0xff]  }
 0x78c   :  { %17082 = vmatprep.subr.bf16.mxu1 %v21057_v32  ;;  %v21115_v18 = vld [vmem:[#allocation8 + $0x2318] ss:$24 sps:$4 sm:$0xff]   ;;  %v21120_v32 = vld [vmem:[#allocation8 + $0x1fec] ss:$24 sps:$4 sm:$0xff]  }
 0x78e   :  { %17040 = vmatpush1.bf16.msra.mxu0 %v21052_v21  ;;  %v21123_v21 = vld [vmem:[#allocation8 + $0x22ec] ss:$24 sps:$4 sm:$0xff]  }
 0x78f   :  { %17083 = vmatpush1.bf16.msra.mxu1 %v21055_v16  ;;  %17041 = vmatprep.subr.bf16.mxu0 %v21060_v0  ;;  %v21118_v16 = vld [vmem:[#allocation8 + $0x1fe8] ss:$24 sps:$4 sm:$0xff]  }
 0x790   :  { %17084 = vmatprep.subr.bf16.mxu1 %v21063_v7  ;;  %v21121_v0 = vld [vmem:[#allocation8 + $0x22e8] ss:$24 sps:$4 sm:$0xff]   ;;  %v21126_v7 = vld [vmem:[#allocation8 + $0x1fbc] ss:$24 sps:$4 sm:$0xff]  }
 0x792   :  { %17042 = vmatpush1.bf16.msra.mxu0 %v21058_v5  ;;  %v21129_v5 = vld [vmem:[#allocation8 + $0x22bc] ss:$24 sps:$4 sm:$0xff]  }
 0x793   :  { %17085 = vmatpush1.bf16.msra.mxu1 %v21061_v1  ;;  %17043 = vmatprep.subr.bf16.mxu0 %v21066_v27  ;;  %v21124_v1 = vld [vmem:[#allocation8 + $0x1fb8] ss:$24 sps:$4 sm:$0xff]  }
 0x794   :  { %17086 = vmatprep.subr.bf16.mxu1 %v21069_v15  ;;  %v21127_v27 = vld [vmem:[#allocation8 + $0x22b8] ss:$24 sps:$4 sm:$0xff]   ;;  %v21132_v15 = vld [vmem:[#allocation8 + $0x1f8c] ss:$24 sps:$4 sm:$0xff]  }
 0x796   :  { %17044 = vmatpush1.bf16.msra.mxu0 %v21064_v49  ;;  %v21135_v49 = vld [vmem:[#allocation8 + $0x228c] ss:$24 sps:$4 sm:$0xff]  }
 0x797   :  { %17087 = vmatpush1.bf16.msra.mxu1 %v21067_v58  ;;  %17045 = vmatprep.subr.bf16.mxu0 %v21072_v41  ;;  %v21130_v58 = vld [vmem:[#allocation8 + $0x1f88] ss:$24 sps:$4 sm:$0xff]  }
 0x798   :  { %17088 = vmatprep.subr.bf16.mxu1 %v21075_v46  ;;  %v21133_v41 = vld [vmem:[#allocation8 + $0x2288] ss:$24 sps:$4 sm:$0xff]   ;;  %v21138_v46 = vld [vmem:[#allocation8 + $0x164] ss:$24 sps:$4 sm:$0xff]  }
 0x79a   :  { %17046 = vmatpush1.bf16.msra.mxu0 %v21070_v31  ;;  %v21141_v31 = vld [vmem:[#allocation8 + $0x464] ss:$24 sps:$4 sm:$0xff]  }
 0x79b   :  { %17089 = vmatpush1.bf16.msra.mxu1 %v21073_v34  ;;  %17047 = vmatprep.subr.bf16.mxu0 %v21078_v3  ;;  %v21136_v34 = vld [vmem:[#allocation8 + $0x160] ss:$24 sps:$4 sm:$0xff]  }
 0x79c   :  { %17090 = vmatprep.subr.bf16.mxu1 %v21081_v28  ;;  %v21139_v3 = vld [vmem:[#allocation8 + $0x460] ss:$24 sps:$4 sm:$0xff]   ;;  %v21144_v28 = vld [vmem:[#allocation8 + $0x134] ss:$24 sps:$4 sm:$0xff]  }
 0x79e   :  { %17048 = vmatpush1.bf16.msra.mxu0 %v21076_v47  ;;  %v21147_v47 = vld [vmem:[#allocation8 + $0x434] ss:$24 sps:$4 sm:$0xff]  }
 0x79f   :  { %17091 = vmatpush1.bf16.msra.mxu1 %v21079_v8  ;;  %17049 = vmatprep.subr.bf16.mxu0 %v21084_v53  ;;  %v21142_v8 = vld [vmem:[#allocation8 + $0x130] ss:$24 sps:$4 sm:$0xff]  }
 0x7a0   :  { %17092 = vmatprep.subr.bf16.mxu1 %v21087_v6  ;;  %v21145_v53 = vld [vmem:[#allocation8 + $0x430] ss:$24 sps:$4 sm:$0xff]   ;;  %v21150_v6 = vld [vmem:[#allocation8 + $0x104] ss:$24 sps:$4 sm:$0xff]  }
 0x7a2   :  { %17050 = vmatpush1.bf16.msra.mxu0 %v21082_v38  ;;  %v21153_v38 = vld [vmem:[#allocation8 + $0x404] ss:$24 sps:$4 sm:$0xff]  }
 0x7a3   :  { %17093 = vmatpush1.bf16.msra.mxu1 %v21085_v11  ;;  %17051 = vmatprep.subr.bf16.mxu0 %v21090_v39  ;;  %v21148_v11 = vld [vmem:[#allocation8 + $0x100] ss:$24 sps:$4 sm:$0xff]  }
 0x7a4   :  { %17094 = vmatprep.subr.bf16.mxu1 %v21093_v35  ;;  %v21151_v39 = vld [vmem:[#allocation8 + $0x400] ss:$24 sps:$4 sm:$0xff]   ;;  %v21156_v35 = vld [vmem:[#allocation8 + $0xd4] ss:$24 sps:$4 sm:$0xff]  }
 0x7a6   :  { %17052 = vmatpush2.bf16.msra.mxu0 %v21088_v45  ;;  %v21159_v45 = vld [vmem:[#allocation8 + $0x3d4] ss:$24 sps:$4 sm:$0xff]  }
 0x7a7   :  { %17095 = vmatpush2.bf16.msra.mxu1 %v21091_v24  ;;  %17053 = vmatprep.subr.bf16.mxu0 %v21096_v40  ;;  %v21154_v24 = vld [vmem:[#allocation8 + $0xd0] ss:$24 sps:$4 sm:$0xff]   ;;  %v21162_v40 = vld [vmem:[#allocation8 + $0xa4] ss:$24 sps:$4 sm:$0xff]  }
 0x7a8   :  { %17096 = vmatprep.subr.bf16.mxu1 %v21099_v12  ;;  %v21165_v12 = vld [vmem:[#allocation8 + $0x3a4] ss:$24 sps:$4 sm:$0xff]  }
 0x7aa   :  { %17054 = vmatpush2.bf16.msra.mxu0 %v21094_v29  ;;  %v21163_v29 = vld [vmem:[#allocation8 + $0x3a0] ss:$24 sps:$4 sm:$0xff]  }
 0x7ab   :  { %17097 = vmatpush2.bf16.msra.mxu1 %v21097_v33  ;;  %17055 = vmatprep.subr.bf16.mxu0 %v21102_v30  ;;  %v21168_v33 = vld [vmem:[#allocation8 + $0x74] ss:$24 sps:$4 sm:$0xff]  }
 0x7ac   :  { %17098 = vmatprep.subr.bf16.mxu1 %v21105_v20  ;;  %v21171_v30 = vld [vmem:[#allocation8 + $0x374] ss:$24 sps:$4 sm:$0xff]   ;;  %v21166_v20 = vld [vmem:[#allocation8 + $0x70] ss:$24 sps:$4 sm:$0xff]  }
 0x7ae   :  { %17056 = vmatpush2.bf16.msra.mxu0 %v21100_v61  ;;  %v21169_v61 = vld [vmem:[#allocation8 + $0x370] ss:$24 sps:$4 sm:$0xff]  }
 0x7af   :  { %17099 = vmatpush2.bf16.msra.mxu1 %v21103_v9  ;;  %17057 = vmatprep.subr.bf16.mxu0 %v21108_v19  ;;  %v21174_v9 = vld [vmem:[#allocation8 + $0x44] ss:$24 sps:$4 sm:$0xff]  }
 0x7b0   :  { %17100 = vmatprep.subr.bf16.mxu1 %v21111_v42  ;;  %v21177_v19 = vld [vmem:[#allocation8 + $0x344] ss:$24 sps:$4 sm:$0xff]   ;;  %v21172_v42 = vld [vmem:[#allocation8 + $0x40] ss:$24 sps:$4 sm:$0xff]  }
 0x7b2   :  { %17058 = vmatpush2.bf16.msra.mxu0 %v21106_v17  ;;  %v21175_v17 = vld [vmem:[#allocation8 + $0x340] ss:$24 sps:$4 sm:$0xff]  }
 0x7b3   :  { %17101 = vmatpush2.bf16.msra.mxu1 %v21109_v54  ;;  %17059 = vmatprep.subr.bf16.mxu0 %v21114_v22  ;;  %v21180_v54 = vld [vmem:[#allocation8 + $0x14] ss:$24 sps:$4 sm:$0xff]  }
 0x7b4   :  { %17102 = vmatprep.subr.bf16.mxu1 %v21117_v59  ;;  %v21183_v22 = vld [vmem:[#allocation8 + $0x314] ss:$24 sps:$4 sm:$0xff]   ;;  %v21178_v59 = vld [vmem:[#allocation8 + $0x10] ss:$24 sps:$4 sm:$0xff]  }
 0x7b6   :  { %17060 = vmatpush2.bf16.msra.mxu0 %v21112_v63  ;;  %v21181_v63 = vld [vmem:[#allocation8 + $0x310] ss:$24 sps:$4 sm:$0xff]  }
 0x7b7   :  { %17103 = vmatpush2.bf16.msra.mxu1 %v21115_v18  ;;  %17061 = vmatprep.subr.bf16.mxu0 %v21120_v32  ;;  %v21186_v18 = vld [vmem:[#allocation8 + $0x2e4] ss:$24 sps:$4 sm:$0xff]  }
 0x7b8   :  { %17104 = vmatprep.subr.bf16.mxu1 %v21123_v21  ;;  %v21189_v32 = vld [vmem:[#allocation8 + $0x5e4] ss:$24 sps:$4 sm:$0xff]   ;;  %v21184_v21 = vld [vmem:[#allocation8 + $0x2e0] ss:$24 sps:$4 sm:$0xff]  }
 0x7ba   :  { %17062 = vmatpush2.bf16.msra.mxu0 %v21118_v16  ;;  %v21187_v16 = vld [vmem:[#allocation8 + $0x5e0] ss:$24 sps:$4 sm:$0xff]  }
 0x7bb   :  { %17105 = vmatpush2.bf16.msra.mxu1 %v21121_v0  ;;  %17063 = vmatprep.subr.bf16.mxu0 %v21126_v7  ;;  %v21192_v0 = vld [vmem:[#allocation8 + $0x2b4] ss:$24 sps:$4 sm:$0xff]  }
 0x7bc   :  { %17106 = vmatprep.subr.bf16.mxu1 %v21129_v5  ;;  %v21195_v7 = vld [vmem:[#allocation8 + $0x5b4] ss:$24 sps:$4 sm:$0xff]   ;;  %v21190_v5 = vld [vmem:[#allocation8 + $0x2b0] ss:$24 sps:$4 sm:$0xff]  }
 0x7be   :  { %17064 = vmatpush2.bf16.msra.mxu0 %v21124_v1  ;;  %v21193_v1 = vld [vmem:[#allocation8 + $0x5b0] ss:$24 sps:$4 sm:$0xff]  }
 0x7bf   :  { %17107 = vmatpush2.bf16.msra.mxu1 %v21127_v27  ;;  %17065 = vmatprep.subr.bf16.mxu0 %v21132_v15  ;;  %v21198_v27 = vld [vmem:[#allocation8 + $0x284] ss:$24 sps:$4 sm:$0xff]  }
 0x7c0   :  { %17108 = vmatprep.subr.bf16.mxu1 %v21135_v49  ;;  %v21201_v15 = vld [vmem:[#allocation8 + $0x584] ss:$24 sps:$4 sm:$0xff]   ;;  %v21196_v49 = vld [vmem:[#allocation8 + $0x280] ss:$24 sps:$4 sm:$0xff]  }
 0x7c2   :  { %17066 = vmatpush2.bf16.msra.mxu0 %v21130_v58  ;;  %v21199_v58 = vld [vmem:[#allocation8 + $0x580] ss:$24 sps:$4 sm:$0xff]  }
 0x7c3   :  { %17109 = vmatpush2.bf16.msra.mxu1 %v21133_v41  ;;  %17121 = vmatprep.subr.bf16.mxu0 %v21138_v46  ;;  %v21204_v41 = vld [vmem:[#allocation8 + $0x254] ss:$24 sps:$4 sm:$0xff]  }
 0x7c4   :  { %17164 = vmatprep.subr.bf16.mxu1 %v21141_v31  ;;  %v21207_v46 = vld [vmem:[#allocation8 + $0x554] ss:$24 sps:$4 sm:$0xff]   ;;  %v21202_v31 = vld [vmem:[#allocation8 + $0x250] ss:$24 sps:$4 sm:$0xff]  }
 0x7c5   :  { %17068 = vmatmul.mubr.bf16.vlgmr.msra.gmra.mxu0 %v22681_v62 }
 0x7c6   :  { %17111 = vmatmul.mubr.bf16.vlgmr.msra.gmra.mxu1 %v22763_v56  ;;  %17122 = vmatpush1.bf16.msra.mxu0 %v21136_v34  ;;  %v21205_v34 = vld [vmem:[#allocation8 + $0x550] ss:$24 sps:$4 sm:$0xff]  }
 0x7c7   :  { %17153 = vmatprep.mubr.bf16.mxu0 %v22466_v55  ;;  %17165 = vmatpush1.bf16.msra.mxu1 %v21139_v3  ;;  %v21157_v55 = vld [vmem:[#allocation8 + $0x3d0] ss:$24 sps:$4 sm:$0xff]   ;;  %v21210_v3 = vld [vmem:[#allocation8 + $0x224] ss:$24 sps:$4 sm:$0xff]  }
 0x7c8   :  { %17196 = vmatprep.mubr.bf16.mxu1 %v22469_v44  ;;  %17123 = vmatprep.subr.bf16.mxu0 %v21144_v28  ;;  %v21160_v44 = vld [vmem:[#allocation8 + $0xa0] ss:$24 sps:$4 sm:$0xff]   ;;  %v21213_v28 = vld [vmem:[#allocation8 + $0x524] ss:$24 sps:$4 sm:$0xff]  }
 0x7c9   :  { %17166 = vmatprep.subr.bf16.mxu1 %v21147_v47  ;;  %v21208_v47 = vld [vmem:[#allocation8 + $0x220] ss:$24 sps:$4 sm:$0xff]  }
 0x7ca   :  { %17124 = vmatpush1.bf16.msra.mxu0 %v21142_v8  ;;  %v21211_v8 = vld [vmem:[#allocation8 + $0x520] ss:$24 sps:$4 sm:$0xff]  }
 0x7cb   :  { %17167 = vmatpush1.bf16.msra.mxu1 %v21145_v53  ;;  %17125 = vmatprep.subr.bf16.mxu0 %v21150_v6  ;;  %v21216_v53 = vld [vmem:[#allocation8 + $0x1f4] ss:$24 sps:$4 sm:$0xff]  }
 0x7cc   :  { %17168 = vmatprep.subr.bf16.mxu1 %v21153_v38  ;;  %v21219_v6 = vld [vmem:[#allocation8 + $0x4f4] ss:$24 sps:$4 sm:$0xff]   ;;  %v21214_v38 = vld [vmem:[#allocation8 + $0x1f0] ss:$24 sps:$4 sm:$0xff]  }
 0x7ce   :  { %17126 = vmatpush1.bf16.msra.mxu0 %v21148_v11  ;;  %v21217_v11 = vld [vmem:[#allocation8 + $0x4f0] ss:$24 sps:$4 sm:$0xff]  }
 0x7cf   :  { %17169 = vmatpush1.bf16.msra.mxu1 %v21151_v39  ;;  %17127 = vmatprep.subr.bf16.mxu0 %v21156_v35  ;;  %v21222_v39 = vld [vmem:[#allocation8 + $0x1c4] ss:$24 sps:$4 sm:$0xff]  }
 0x7d0   :  { %17170 = vmatprep.subr.bf16.mxu1 %v21159_v45  ;;  %v21225_v35 = vld [vmem:[#allocation8 + $0x4c4] ss:$24 sps:$4 sm:$0xff]   ;;  %v21220_v45 = vld [vmem:[#allocation8 + $0x1c0] ss:$24 sps:$4 sm:$0xff]  }
 0x7d2   :  { %17128 = vmatpush1.bf16.msra.mxu0 %v21154_v24  ;;  %v21223_v24 = vld [vmem:[#allocation8 + $0x4c0] ss:$24 sps:$4 sm:$0xff]  }
 0x7d3   :  { %17171 = vmatpush1.bf16.msra.mxu1 %v21157_v55  ;;  %17129 = vmatprep.subr.bf16.mxu0 %v21162_v40  ;;  %v21228_v55 = vld [vmem:[#allocation8 + $0x194] ss:$24 sps:$4 sm:$0xff]  }
 0x7d4   :  { %17172 = vmatprep.subr.bf16.mxu1 %v21165_v12  ;;  %v21231_v40 = vld [vmem:[#allocation8 + $0x494] ss:$24 sps:$4 sm:$0xff]   ;;  %v21226_v12 = vld [vmem:[#allocation8 + $0x190] ss:$24 sps:$4 sm:$0xff]  }
 0x7d6   :  { %17130 = vmatpush1.bf16.msra.mxu0 %v21160_v44  ;;  %v21229_v44 = vld [vmem:[#allocation8 + $0x490] ss:$24 sps:$4 sm:$0xff]  }
 0x7d7   :  { %17173 = vmatpush1.bf16.msra.mxu1 %v21163_v29  ;;  %17131 = vmatprep.subr.bf16.mxu0 %v21168_v33  ;;  %v21234_v29 = vld [vmem:[#allocation8 + $0x764] ss:$24 sps:$4 sm:$0xff]  }
 0x7d8   :  { %17174 = vmatprep.subr.bf16.mxu1 %v21171_v30  ;;  %v21237_v33 = vld [vmem:[#allocation8 + $0xa64] ss:$24 sps:$4 sm:$0xff]   ;;  %v21232_v30 = vld [vmem:[#allocation8 + $0x760] ss:$24 sps:$4 sm:$0xff]  }
 0x7da   :  { %17132 = vmatpush1.bf16.msra.mxu0 %v21166_v20  ;;  %v21235_v20 = vld [vmem:[#allocation8 + $0xa60] ss:$24 sps:$4 sm:$0xff]  }
 0x7db   :  { %17175 = vmatpush1.bf16.msra.mxu1 %v21169_v61  ;;  %17133 = vmatprep.subr.bf16.mxu0 %v21174_v9  ;;  %v21240_v61 = vld [vmem:[#allocation8 + $0x734] ss:$24 sps:$4 sm:$0xff]  }
 0x7dc   :  { %17176 = vmatprep.subr.bf16.mxu1 %v21177_v19  ;;  %v21243_v9 = vld [vmem:[#allocation8 + $0xa34] ss:$24 sps:$4 sm:$0xff]   ;;  %v21238_v19 = vld [vmem:[#allocation8 + $0x730] ss:$24 sps:$4 sm:$0xff]  }
 0x7de   :  { %17134 = vmatpush1.bf16.msra.mxu0 %v21172_v42  ;;  %v21241_v42 = vld [vmem:[#allocation8 + $0xa30] ss:$24 sps:$4 sm:$0xff]  }
 0x7df   :  { %17177 = vmatpush1.bf16.msra.mxu1 %v21175_v17  ;;  %17135 = vmatprep.subr.bf16.mxu0 %v21180_v54  ;;  %v21246_v17 = vld [vmem:[#allocation8 + $0x704] ss:$24 sps:$4 sm:$0xff]  }
 0x7e0   :  { %17178 = vmatprep.subr.bf16.mxu1 %v21183_v22  ;;  %v21249_v54 = vld [vmem:[#allocation8 + $0xa04] ss:$24 sps:$4 sm:$0xff]   ;;  %v21244_v22 = vld [vmem:[#allocation8 + $0x700] ss:$24 sps:$4 sm:$0xff]  }
 0x7e2   :  { %17136 = vmatpush1.bf16.msra.mxu0 %v21178_v59  ;;  %v21252_v59 = vld [vmem:[#allocation8 + $0x6d4] ss:$24 sps:$4 sm:$0xff]  }
 0x7e3   :  { %17179 = vmatpush1.bf16.msra.mxu1 %v21181_v63  ;;  %17137 = vmatprep.subr.bf16.mxu0 %v21186_v18  ;;  %v21250_v63 = vld [vmem:[#allocation8 + $0x6d0] ss:$24 sps:$4 sm:$0xff]   ;;  %v21258_v18 = vld [vmem:[#allocation8 + $0x6a4] ss:$24 sps:$4 sm:$0xff]  }
 0x7e4   :  { %17180 = vmatprep.subr.bf16.mxu1 %v21189_v32  ;;  %v21261_v32 = vld [vmem:[#allocation8 + $0x9a4] ss:$24 sps:$4 sm:$0xff]  }
 0x7e6   :  { %17138 = vmatpush2.bf16.msra.mxu0 %v21184_v21  ;;  %v21259_v21 = vld [vmem:[#allocation8 + $0x9a0] ss:$24 sps:$4 sm:$0xff]  }
 0x7e7   :  { %17181 = vmatpush2.bf16.msra.mxu1 %v21187_v16  ;;  %17139 = vmatprep.subr.bf16.mxu0 %v21192_v0  ;;  %v21264_v16 = vld [vmem:[#allocation8 + $0x674] ss:$24 sps:$4 sm:$0xff]  }
 0x7e8   :  { %17182 = vmatprep.subr.bf16.mxu1 %v21195_v7  ;;  %v21267_v0 = vld [vmem:[#allocation8 + $0x974] ss:$24 sps:$4 sm:$0xff]   ;;  %v21262_v7 = vld [vmem:[#allocation8 + $0x670] ss:$24 sps:$4 sm:$0xff]  }
 0x7ea   :  { %17140 = vmatpush2.bf16.msra.mxu0 %v21190_v5  ;;  %v21265_v5 = vld [vmem:[#allocation8 + $0x970] ss:$24 sps:$4 sm:$0xff]  }
 0x7eb   :  { %17183 = vmatpush2.bf16.msra.mxu1 %v21193_v1  ;;  %17141 = vmatprep.subr.bf16.mxu0 %v21198_v27  ;;  %v21270_v1 = vld [vmem:[#allocation8 + $0x644] ss:$24 sps:$4 sm:$0xff]  }
 0x7ec   :  { %17184 = vmatprep.subr.bf16.mxu1 %v21201_v15  ;;  %v21273_v27 = vld [vmem:[#allocation8 + $0x944] ss:$24 sps:$4 sm:$0xff]   ;;  %v21268_v15 = vld [vmem:[#allocation8 + $0x640] ss:$24 sps:$4 sm:$0xff]  }
 0x7ee   :  { %17142 = vmatpush2.bf16.msra.mxu0 %v21196_v49  ;;  %v21271_v49 = vld [vmem:[#allocation8 + $0x940] ss:$24 sps:$4 sm:$0xff]  }
 0x7ef   :  { %17185 = vmatpush2.bf16.msra.mxu1 %v21199_v58  ;;  %17143 = vmatprep.subr.bf16.mxu0 %v21204_v41  ;;  %v21276_v58 = vld [vmem:[#allocation8 + $0x614] ss:$24 sps:$4 sm:$0xff]  }
 0x7f0   :  { %17186 = vmatprep.subr.bf16.mxu1 %v21207_v46  ;;  %v21279_v41 = vld [vmem:[#allocation8 + $0x914] ss:$24 sps:$4 sm:$0xff]   ;;  %v21274_v46 = vld [vmem:[#allocation8 + $0x610] ss:$24 sps:$4 sm:$0xff]  }
 0x7f2   :  { %17144 = vmatpush2.bf16.msra.mxu0 %v21202_v31  ;;  %v21277_v31 = vld [vmem:[#allocation8 + $0x910] ss:$24 sps:$4 sm:$0xff]  }
 0x7f3   :  { %17187 = vmatpush2.bf16.msra.mxu1 %v21205_v34  ;;  %17145 = vmatprep.subr.bf16.mxu0 %v21210_v3  ;;  %v21282_v34 = vld [vmem:[#allocation8 + $0x8e4] ss:$24 sps:$4 sm:$0xff]  }
 0x7f4   :  { %17188 = vmatprep.subr.bf16.mxu1 %v21213_v28  ;;  %v21285_v3 = vld [vmem:[#allocation8 + $0xbe4] ss:$24 sps:$4 sm:$0xff]   ;;  %v21280_v28 = vld [vmem:[#allocation8 + $0x8e0] ss:$24 sps:$4 sm:$0xff]  }
 0x7f6   :  { %17146 = vmatpush2.bf16.msra.mxu0 %v21208_v47  ;;  %v21283_v47 = vld [vmem:[#allocation8 + $0xbe0] ss:$24 sps:$4 sm:$0xff]  }
 0x7f7   :  { %17189 = vmatpush2.bf16.msra.mxu1 %v21211_v8  ;;  %17147 = vmatprep.subr.bf16.mxu0 %v21216_v53  ;;  %v21288_v8 = vld [vmem:[#allocation8 + $0x8b4] ss:$24 sps:$4 sm:$0xff]  }
 0x7f8   :  { %17190 = vmatprep.subr.bf16.mxu1 %v21219_v6  ;;  %v21291_v53 = vld [vmem:[#allocation8 + $0xbb4] ss:$24 sps:$4 sm:$0xff]   ;;  %v21286_v6 = vld [vmem:[#allocation8 + $0x8b0] ss:$24 sps:$4 sm:$0xff]  }
 0x7fa   :  { %17148 = vmatpush2.bf16.msra.mxu0 %v21214_v38  ;;  %v21289_v38 = vld [vmem:[#allocation8 + $0xbb0] ss:$24 sps:$4 sm:$0xff]  }
 0x7fb   :  { %17191 = vmatpush2.bf16.msra.mxu1 %v21217_v11  ;;  %17149 = vmatprep.subr.bf16.mxu0 %v21222_v39  ;;  %v21294_v11 = vld [vmem:[#allocation8 + $0x884] ss:$24 sps:$4 sm:$0xff]  }
 0x7fc   :  { %17192 = vmatprep.subr.bf16.mxu1 %v21225_v35  ;;  %v21297_v39 = vld [vmem:[#allocation8 + $0xb84] ss:$24 sps:$4 sm:$0xff]   ;;  %v21292_v35 = vld [vmem:[#allocation8 + $0x880] ss:$24 sps:$4 sm:$0xff]  }
 0x7fe   :  { %17150 = vmatpush2.bf16.msra.mxu0 %v21220_v45  ;;  %v21295_v45 = vld [vmem:[#allocation8 + $0xb80] ss:$24 sps:$4 sm:$0xff]  }
 0x7ff   :  { %17193 = vmatpush2.bf16.msra.mxu1 %v21223_v24  ;;  %17151 = vmatprep.subr.bf16.mxu0 %v21228_v55  ;;  %v21300_v24 = vld [vmem:[#allocation8 + $0x854] ss:$24 sps:$4 sm:$0xff]  }
 0x800   :  { %17194 = vmatprep.subr.bf16.mxu1 %v21231_v40  ;;  %v21303_v55 = vld [vmem:[#allocation8 + $0xb54] ss:$24 sps:$4 sm:$0xff]   ;;  %v21298_v40 = vld [vmem:[#allocation8 + $0x850] ss:$24 sps:$4 sm:$0xff]  }
 0x802   :  { %17152 = vmatpush2.bf16.msra.mxu0 %v21226_v12  ;;  %v21301_v12 = vld [vmem:[#allocation8 + $0xb50] ss:$24 sps:$4 sm:$0xff]  }
 0x803   :  { %17195 = vmatpush2.bf16.msra.mxu1 %v21229_v44  ;;  %17207 = vmatprep.subr.bf16.mxu0 %v21234_v29  ;;  %v21306_v44 = vld [vmem:[#allocation8 + $0x824] ss:$24 sps:$4 sm:$0xff]  }
 0x804   :  { %17250 = vmatprep.subr.bf16.mxu1 %v21237_v33  ;;  %v21309_v29 = vld [vmem:[#allocation8 + $0xb24] ss:$24 sps:$4 sm:$0xff]   ;;  %v21304_v33 = vld [vmem:[#allocation8 + $0x820] ss:$24 sps:$4 sm:$0xff]  }
 0x805   :  { %17154 = vmatmul.mubr.bf16.vlgmr.msra.gmra.mxu0 %v23114_v51  ;;  %v21247_v51 = vld [vmem:[#allocation8 + $0xa00] ss:$24 sps:$4 sm:$0xff]  }
 0x806   :  { %17197 = vmatmul.mubr.bf16.vlgmr.msra.gmra.mxu1 %v23115_v57  ;;  %17208 = vmatpush1.bf16.msra.mxu0 %v21232_v30  ;;  %v21255_v57 = vld [vmem:[#allocation8 + $0x9d4] ss:$24 sps:$4 sm:$0xff]   ;;  %v21307_v30 = vld [vmem:[#allocation8 + $0xb20] ss:$24 sps:$4 sm:$0xff]  }
 0x807   :  { %17239 = vmatprep.mubr.bf16.mxu0 %v22552_v13  ;;  %17251 = vmatpush1.bf16.msra.mxu1 %v21235_v20  ;;  %v21253_v13 = vld [vmem:[#allocation8 + $0x9d0] ss:$24 sps:$4 sm:$0xff]   ;;  %v21312_v20 = vld [vmem:[#allocation8 + $0x7f4] ss:$24 sps:$4 sm:$0xff]  }
 0x808   :  { %17282 = vmatprep.mubr.bf16.mxu1 %v22555_v50  ;;  %17209 = vmatprep.subr.bf16.mxu0 %v21240_v61  ;;  %v21256_v50 = vld [vmem:[#allocation8 + $0x6a0] ss:$24 sps:$4 sm:$0xff]   ;;  %v21315_v61 = vld [vmem:[#allocation8 + $0xaf4] ss:$24 sps:$4 sm:$0xff]  }
 0x809   :  { %17252 = vmatprep.subr.bf16.mxu1 %v21243_v9  ;;  %v21310_v9 = vld [vmem:[#allocation8 + $0x7f0] ss:$24 sps:$4 sm:$0xff]  }
 0x80a   :  { %17210 = vmatpush1.bf16.msra.mxu0 %v21238_v19  ;;  %v21313_v19 = vld [vmem:[#allocation8 + $0xaf0] ss:$24 sps:$4 sm:$0xff]  }
 0x80b   :  { %17253 = vmatpush1.bf16.msra.mxu1 %v21241_v42  ;;  %17211 = vmatprep.subr.bf16.mxu0 %v21246_v17  ;;  %v21318_v42 = vld [vmem:[#allocation8 + $0x7c4] ss:$24 sps:$4 sm:$0xff]  }
 0x80c   :  { %17254 = vmatprep.subr.bf16.mxu1 %v21249_v54  ;;  %v21321_v17 = vld [vmem:[#allocation8 + $0xac4] ss:$24 sps:$4 sm:$0xff]   ;;  %v21316_v54 = vld [vmem:[#allocation8 + $0x7c0] ss:$24 sps:$4 sm:$0xff]  }
 0x80e   :  { %17212 = vmatpush1.bf16.msra.mxu0 %v21244_v22  ;;  %v21319_v22 = vld [vmem:[#allocation8 + $0xac0] ss:$24 sps:$4 sm:$0xff]  }
 0x80f   :  { %17255 = vmatpush1.bf16.msra.mxu1 %v21247_v51  ;;  %17213 = vmatprep.subr.bf16.mxu0 %v21252_v59  ;;  %v21324_v51 = vld [vmem:[#allocation8 + $0x794] ss:$24 sps:$4 sm:$0xff]  }
 0x810   :  { %17256 = vmatprep.subr.bf16.mxu1 %v21255_v57  ;;  %v21327_v59 = vld [vmem:[#allocation8 + $0xa94] ss:$24 sps:$4 sm:$0xff]   ;;  %v21322_v57 = vld [vmem:[#allocation8 + $0x790] ss:$24 sps:$4 sm:$0xff]  }
 0x812   :  { %17214 = vmatpush1.bf16.msra.mxu0 %v21250_v63  ;;  %v22940_v63 = vpop.f32.mrf.mxu0 }
 0x813   :  { %17257 = vmatpush1.bf16.msra.mxu1 %v21253_v13  ;;  %17215 = vmatprep.subr.bf16.mxu0 %v21258_v18  ;;  %v21325_v13 = vld [vmem:[#allocation8 + $0xa90] ss:$24 sps:$4 sm:$0xff]   ;;  %v21330_v18 = vld [vmem:[#allocation8 + $0xd64] ss:$24 sps:$4 sm:$0xff]  }
 0x814   :  { %17258 = vmatprep.subr.bf16.mxu1 %v21261_v32  ;;  %v22942_v32 = vpop.f32.mrf.mxu1 }
 0x816   :  { %17216 = vmatpush1.bf16.msra.mxu0 %v21256_v50  ;;  %v21333_v50 = vld [vmem:[#allocation8 + $0x1064] ss:$24 sps:$4 sm:$0xff]  }
 0x817   :  { %17259 = vmatpush1.bf16.msra.mxu1 %v21259_v21  ;;  %17217 = vmatprep.subr.bf16.mxu0 %v21264_v16  ;;  %v21328_v21 = vld [vmem:[#allocation8 + $0xd60] ss:$24 sps:$4 sm:$0xff]   ;;  %v22944_v16 = vpop.f32.mrf.mxu0 }
 0x818   :  { %17260 = vmatprep.subr.bf16.mxu1 %v21267_v0  ;;  %v21331_v0 = vld [vmem:[#allocation8 + $0x1060] ss:$24 sps:$4 sm:$0xff]  }
 0x81a   :  { %17218 = vmatpush1.bf16.msra.mxu0 %v21262_v7  ;;  %v22946_v7 = vpop.f32.mrf.mxu1 }
 0x81b   :  { %17261 = vmatpush1.bf16.msra.mxu1 %v21265_v5  ;;  %17219 = vmatprep.subr.bf16.mxu0 %v21270_v1  ;;  %v21336_v5 = vld [vmem:[#allocation8 + $0xd34] ss:$24 sps:$4 sm:$0xff]  }
 0x81c   :  { %17262 = vmatprep.subr.bf16.mxu1 %v21273_v27  ;;  %v21339_v1 = vld [vmem:[#allocation8 + $0x1034] ss:$24 sps:$4 sm:$0xff]  }
 0x81d   :  { %v23152_v27 = vld [vmem:[#allocation24_spill] sm:$0xff] }
 0x81e   :  { %17220 = vmatpush1.bf16.msra.mxu0 %v21268_v15  ;;  %v21334_v15 = vld [vmem:[#allocation8 + $0xd30] ss:$24 sps:$4 sm:$0xff]  }
 0x81f   :  { %17263 = vmatpush1.bf16.msra.mxu1 %v21271_v49  ;;  %17221 = vmatprep.subr.bf16.mxu0 %v21276_v58  ;;  %v22950_v49 = vpop.f32.mrf.mxu0  ;;  %v23153_v58 = vld [vmem:[#allocation23_spill] sm:$0xff] }
 0x820   :  { %17264 = vmatprep.subr.bf16.mxu1 %v21279_v41  ;;  %v21337_v41 = vld [vmem:[#allocation8 + $0x1030] ss:$24 sps:$4 sm:$0xff]  }
 0x822   :  { %17222 = vmatpush1.bf16.msra.mxu0 %v21274_v46  ;;  %v21342_v46 = vld [vmem:[#allocation8 + $0xd04] ss:$24 sps:$4 sm:$0xff]  }
 0x823   :  { %17265 = vmatpush1.bf16.msra.mxu1 %v21277_v31  ;;  %17223 = vmatprep.subr.bf16.mxu0 %v21282_v34  ;;  %v22953_v31 = vpop.f32.mrf.mxu1  ;;  %v23154_v34 = vld [vmem:[#allocation17_spill] sm:$0xff] }
 0x824   :  { %17266 = vmatprep.subr.bf16.mxu1 %v21285_v3  ;;  %v21345_v3 = vld [vmem:[#allocation8 + $0x1004] ss:$24 sps:$4 sm:$0xff]  }
 0x826   :  { %17224 = vmatpush2.bf16.msra.mxu0 %v21280_v28  ;;  %v22956_v28 = vpop.f32.mrf.mxu0 }
 0x827   :  { %17267 = vmatpush2.bf16.msra.mxu1 %v21283_v47  ;;  %17225 = vmatprep.subr.bf16.mxu0 %v21288_v8  ;;  %v21343_v47 = vld [vmem:[#allocation8 + $0x1000] ss:$24 sps:$4 sm:$0xff]   ;;  %v21348_v8 = vld [vmem:[#allocation8 + $0xcd4] ss:$24 sps:$4 sm:$0xff]  }
 0x828   :  { %17268 = vmatprep.subr.bf16.mxu1 %v21291_v53  ;;  %v22958_v53 = vpop.f32.mrf.mxu1 }
 0x82a   :  { %17226 = vmatpush2.bf16.msra.mxu0 %v21286_v6  ;;  %v21351_v6 = vld [vmem:[#allocation8 + $0xfd4] ss:$24 sps:$4 sm:$0xff]  }
 0x82b   :  { %17269 = vmatpush2.bf16.msra.mxu1 %v21289_v38  ;;  %17227 = vmatprep.subr.bf16.mxu0 %v21294_v11  ;;  %v22960_v38 = vpop.f32.mrf.mxu0  ;;  %v22962_v11 = vpop.f32.mrf.mxu1 }
 0x82c   :  { %17270 = vmatprep.subr.bf16.mxu1 %v21297_v39  ;;  %v21346_v39 = vld [vmem:[#allocation8 + $0xcd0] ss:$24 sps:$4 sm:$0xff]  }
 0x82e   :  { %17228 = vmatpush2.bf16.msra.mxu0 %v21292_v35  ;;  %v21349_v35 = vld [vmem:[#allocation8 + $0xfd0] ss:$24 sps:$4 sm:$0xff]  }
 0x82f   :  { %17271 = vmatpush2.bf16.msra.mxu1 %v21295_v45  ;;  %17229 = vmatprep.subr.bf16.mxu0 %v21300_v24  ;;  %v21354_v45 = vld [vmem:[#allocation8 + $0xca4] ss:$24 sps:$4 sm:$0xff]  }
 0x830   :  { %17272 = vmatprep.subr.bf16.mxu1 %v21303_v55  ;;  %v21357_v24 = vld [vmem:[#allocation8 + $0xfa4] ss:$24 sps:$4 sm:$0xff]   ;;  %v22964_v55 = vpop.f32.mrf.mxu0 }
 0x832   :  { %17230 = vmatpush2.bf16.msra.mxu0 %v21298_v40  ;;  %v22966_v40 = vpop.f32.mrf.mxu1 }
 0x833   :  { %17273 = vmatpush2.bf16.msra.mxu1 %v21301_v12  ;;  %17231 = vmatprep.subr.bf16.mxu0 %v21306_v44  ;;  %v21352_v12 = vld [vmem:[#allocation8 + $0xca0] ss:$24 sps:$4 sm:$0xff]  }
 0x834   :  { %17274 = vmatprep.subr.bf16.mxu1 %v21309_v29  ;;  %v21355_v44 = vld [vmem:[#allocation8 + $0xfa0] ss:$24 sps:$4 sm:$0xff]   ;;  %v21360_v29 = vld [vmem:[#allocation8 + $0xc74] ss:$24 sps:$4 sm:$0xff]  }
 0x836   :  { %17232 = vmatpush2.bf16.msra.mxu0 %v21304_v33  ;;  %v21363_v33 = vld [vmem:[#allocation8 + $0xf74] ss:$24 sps:$4 sm:$0xff]  }
 0x837   :  { %17275 = vmatpush2.bf16.msra.mxu1 %v21307_v30  ;;  %17233 = vmatprep.subr.bf16.mxu0 %v21312_v20  ;;  %v22968_v30 = vpop.f32.mrf.mxu0  ;;  %v22970_v20 = vpop.f32.mrf.mxu1 }
 0x838   :  { %17276 = vmatprep.subr.bf16.mxu1 %v21315_v61  ;;  %v21358_v61 = vld [vmem:[#allocation8 + $0xc70] ss:$24 sps:$4 sm:$0xff]  }
 0x83a   :  { %17234 = vmatpush2.bf16.msra.mxu0 %v21310_v9  ;;  %v21361_v9 = vld [vmem:[#allocation8 + $0xf70] ss:$24 sps:$4 sm:$0xff]  }
 0x83b   :  { %17277 = vmatpush2.bf16.msra.mxu1 %v21313_v19  ;;  %17235 = vmatprep.subr.bf16.mxu0 %v21318_v42  ;;  %v21366_v19 = vld [vmem:[#allocation8 + $0xc44] ss:$24 sps:$4 sm:$0xff]  }
 0x83c   :  { %17278 = vmatprep.subr.bf16.mxu1 %v21321_v17  ;;  %v21369_v42 = vld [vmem:[#allocation8 + $0xf44] ss:$24 sps:$4 sm:$0xff]   ;;  %v22972_v17 = vpop.f32.mrf.mxu0 }
 0x83e   :  { %17236 = vmatpush2.bf16.msra.mxu0 %v21316_v54  ;;  %v22974_v54 = vpop.f32.mrf.mxu1 }
 0x83f   :  { %17279 = vmatpush2.bf16.msra.mxu1 %v21319_v22  ;;  %17237 = vmatprep.subr.bf16.mxu0 %v21324_v51  ;;  %v21364_v22 = vld [vmem:[#allocation8 + $0xc40] ss:$24 sps:$4 sm:$0xff]   ;;  %v22976_v51 = vpop.f32.mrf.mxu0 }
 0x840   :  { %17280 = vmatprep.subr.bf16.mxu1 %v21327_v59  ;;  %v21367_v59 = vld [vmem:[#allocation8 + $0xf40] ss:$24 sps:$4 sm:$0xff]  }
 0x842   :  { %17238 = vmatpush2.bf16.msra.mxu0 %v21322_v57  ;;  %v21372_v57 = vld [vmem:[#allocation8 + $0xc14] ss:$24 sps:$4 sm:$0xff]  }
 0x843   :  { %17281 = vmatpush2.bf16.msra.mxu1 %v21325_v13  ;;  %17293 = vmatprep.subr.bf16.mxu0 %v21330_v18  ;;  %v22978_v13 = vpop.f32.mrf.mxu1  ;;  %v21375_v18 = vld [vmem:[#allocation8 + $0xf14] ss:$24 sps:$4 sm:$0xff]  }
 0x844   :  { %17336 = vmatprep.subr.bf16.mxu1 %v21333_v50  ;;  %v21370_v50 = vld [vmem:[#allocation8 + $0xc10] ss:$24 sps:$4 sm:$0xff]  }
 0x845   :  { %17240 = vmatmul.mubr.bf16.vlgmr.msra.gmra.mxu0 %v23128_v37  ;;  %v21340_v37 = vld [vmem:[#allocation8 + $0xd00] ss:$24 sps:$4 sm:$0xff]  }
 0x846   :  { %17283 = vmatmul.mubr.bf16.vlgmr.msra.gmra.mxu1 %v23152_v27  ;;  %17294 = vmatpush1.bf16.msra.mxu0 %v21328_v21  ;;  %v22980_v21 = vpop.f32.mrf.mxu0  ;;  %v21381_v27 = vld [vmem:[#allocation8 + $0x11e4] ss:$24 sps:$4 sm:$0xff]  }
 0x847   :  { %17325 = vmatprep.mubr.bf16.mxu0 %v23153_v58  ;;  %17337 = vmatpush1.bf16.msra.mxu1 %v21331_v0  ;;  %v21373_v0 = vld [vmem:[#allocation8 + $0xf10] ss:$24 sps:$4 sm:$0xff]  }
 0x848   :  { %17368 = vmatprep.mubr.bf16.mxu1 %v23154_v34  ;;  %17295 = vmatprep.subr.bf16.mxu0 %v21336_v5  ;;  %v21378_v5 = vld [vmem:[#allocation8 + $0xee4] ss:$24 sps:$4 sm:$0xff]   ;;  %v22984_v58 = vpop.f32.mrf.mxu0 }
 0x849   :  { %17338 = vmatprep.subr.bf16.mxu1 %v21339_v1  ;;  %v22982_v1 = vpop.f32.mrf.mxu1  ;;  %v21815_v34 = vld [vmem:[#allocation10] sm:$0x3f] }
 0x84a   :  { %17296 = vmatpush1.bf16.msra.mxu0 %v21334_v15  ;;  %v21376_v15 = vld [vmem:[#allocation8 + $0xee0] ss:$24 sps:$4 sm:$0xff]  }
 0x84b   :  { %17339 = vmatpush1.bf16.msra.mxu1 %v21337_v41  ;;  %17297 = vmatprep.subr.bf16.mxu0 %v21342_v46  ;;  %v21379_v41 = vld [vmem:[#allocation8 + $0x11e0] ss:$24 sps:$4 sm:$0xff]   ;;  %v21384_v46 = vld [vmem:[#allocation8 + $0xeb4] ss:$24 sps:$4 sm:$0xff]  }
 0x84c   :  { %17340 = vmatprep.subr.bf16.mxu1 %v21345_v3  ;;  %v23155_v3 = vld [vmem:[#allocation18_spill] sm:$0xff] }
 0x84e   :  { %17298 = vmatpush1.bf16.msra.mxu0 %v21340_v37  ;;  %v10310_v37 = vrot.slane %v21815_v34, %v23155_v3 }
 0x84f   :  { %17341 = vmatpush1.bf16.msra.mxu1 %v21343_v47  ;;  %17299 = vmatprep.subr.bf16.mxu0 %v21348_v8  ;;  %v22987_v47 = vpop.f32.mrf.mxu1  ;;  %v21387_v8 = vld [vmem:[#allocation8 + $0x11b4] ss:$24 sps:$4 sm:$0xff]  }
 0x850   :  { %17342 = vmatprep.subr.bf16.mxu1 %v21351_v6  ;;  %v23156_v6 = vld [vmem:[#allocation55_spill] sm:$0xff] }
 0x852   :  { %17300 = vmatpush1.bf16.msra.mxu0 %v21346_v39  ;;  %v10314_v39 = vrot.slane %v21815_v34, %v23156_v6  ;;  %v21405_v34 = vld [vmem:[#allocation8 + $0x1124] ss:$24 sps:$4 sm:$0xff]   ;;  %v21403_v6 = vld [vmem:[#allocation8 + $0x1120] ss:$24 sps:$4 sm:$0xff]  }
 0x853   :  { %17343 = vmatpush1.bf16.msra.mxu1 %v21349_v35  ;;  %17301 = vmatprep.subr.bf16.mxu0 %v21354_v45  ;;  %v21382_v35 = vld [vmem:[#allocation8 + $0xeb0] ss:$24 sps:$4 sm:$0xff]   ;;  %v22990_v45 = vpop.f32.mrf.mxu0 }
 0x854   :  { %17344 = vmatprep.subr.bf16.mxu1 %v21357_v24  ;;  %v21385_v24 = vld [vmem:[#allocation8 + $0x11b0] ss:$24 sps:$4 sm:$0xff]  }
 0x856   :  { %17302 = vmatpush1.bf16.msra.mxu0 %v21352_v12  ;;  %v21390_v12 = vld [vmem:[#allocation8 + $0xe84] ss:$24 sps:$4 sm:$0xff]  }
 0x857   :  { %17345 = vmatpush1.bf16.msra.mxu1 %v21355_v44  ;;  %17303 = vmatprep.subr.bf16.mxu0 %v21360_v29  ;;  %v16640_v44 = vadd.f32 %v22940_v63, %v10310_v37  ;;  %v22993_v29 = vpop.f32.mrf.mxu1  ;;  %v16644_v63 = vadd.f32 %v22950_v49, %v10310_v37 }
 0x858   :  { %17346 = vmatprep.subr.bf16.mxu1 %v21363_v33  ;;  %v21393_v33 = vld [vmem:[#allocation8 + $0x1184] ss:$24 sps:$4 sm:$0xff]  }
 0x85a   :  { %17304 = vmatpush1.bf16.msra.mxu0 %v21358_v61  ;;  %v22995_v61 = vpop.f32.mrf.mxu0 }
 0x85b   :  { %17347 = vmatpush1.bf16.msra.mxu1 %v21361_v9  ;;  %17305 = vmatprep.subr.bf16.mxu0 %v21366_v19  ;;  %v16642_v9 = vadd.f32 %v22944_v16, %v10314_v39  ;;  %v22998_v19 = vpop.f32.mrf.mxu1 }
 0x85c   :  { %17348 = vmatprep.subr.bf16.mxu1 %v21369_v42  ;;  %v21388_v42 = vld [vmem:[#allocation8 + $0xe80] ss:$24 sps:$4 sm:$0xff]  }
 0x85e   :  { %17306 = vmatpush1.bf16.msra.mxu0 %v21364_v22  ;;  %v21391_v22 = vld [vmem:[#allocation8 + $0x1180] ss:$24 sps:$4 sm:$0xff]  }
 0x85f   :  { %17349 = vmatpush1.bf16.msra.mxu1 %v21367_v59  ;;  %17307 = vmatprep.subr.bf16.mxu0 %v21372_v57  ;;  %v21396_v59 = vld [vmem:[#allocation8 + $0xe54] ss:$24 sps:$4 sm:$0xff]   ;;  %v16683_v57 = vadd.f32 %v22942_v32, %v16640_v44  ;;  %v16687_v32 = vadd.f32 %v22953_v31, %v16644_v63  ;;  %v21406_v44 = vld [vmem:[#allocation8 + $0xdf0] ss:$24 sps:$4 sm:$0xff]   ;;  %v21412_v63 = vld [vmem:[#allocation8 + $0xdc0] ss:$24 sps:$4 sm:$0xff]  }
 0x860   :  { %17350 = vmatprep.subr.bf16.mxu1 %v21375_v18  ;;  %v21399_v18 = vld [vmem:[#allocation8 + $0x1154] ss:$24 sps:$4 sm:$0xff]  }
 0x861   :  { %v16726_v16 = vadd.f32 %v22960_v38, %v16683_v57  ;;  %v16730_v38 = vadd.f32 %v22968_v30, %v16687_v32  ;;  %v21426_v32 = vld [vmem:[#allocation8 + $0x1364] ss:$24 sps:$4 sm:$0xff]  }
 0x862   :  { %17308 = vmatpush1.bf16.msra.mxu0 %v21370_v50  ;;  %v16899_v50 = vpop.f32.mrf.mxu0 }
 0x863   :  { %17351 = vmatpush1.bf16.msra.mxu1 %v21373_v0  ;;  %17309 = vmatprep.subr.bf16.mxu0 %v21378_v5  ;;  %v16685_v0 = vadd.f32 %v22946_v7, %v16642_v9  ;;  %v16646_v5 = vadd.f32 %v22956_v28, %v10314_v39  ;;  %v16769_v28 = vadd.f32 %v22962_v11, %v16726_v16  ;;  %v21408_v39 = vld [vmem:[#allocation8 + $0xdf4] ss:$24 sps:$4 sm:$0xff]   ;;  %v21409_v9 = vld [vmem:[#allocation8 + $0x10f0] ss:$24 sps:$4 sm:$0xff]  }
 0x864   :  { %17352 = vmatprep.subr.bf16.mxu1 %v21381_v27  ;;  %v23005_v27 = vpop.f32.mrf.mxu1  ;;  %v16901_v3 = vpop.f32.mrf.mxu0  ;;  %v16773_v11 = vadd.f32 %v22970_v20, %v16730_v38  ;;  %v21423_v16 = vld [vmem:[#allocation8 + $0x1094] ss:$24 sps:$4 sm:$0xff]  }
 0x865   :  { %v16728_v49 = vadd.f32 %v22964_v55, %v16685_v0  ;;  %v16689_v7 = vadd.f32 %v22958_v53, %v16646_v5  ;;  %v21415_v0 = vld [vmem:[#allocation8 + $0x10c0] ss:$24 sps:$4 sm:$0xff]  }
 0x866   :  { %17310 = vmatpush2.bf16.msra.mxu0 %v21376_v15  ;;  %v21394_v15 = vld [vmem:[#allocation8 + $0xe50] ss:$24 sps:$4 sm:$0xff]   ;;  %v16944_v37 = vpop.f32.mrf.mxu1  ;;  %v16903_v53 = vpop.f32.mrf.mxu0 }
 0x867   :  { %17353 = vmatpush2.bf16.msra.mxu1 %v21379_v41  ;;  %17311 = vmatprep.subr.bf16.mxu0 %v21384_v46  ;;  %v21397_v41 = vld [vmem:[#allocation8 + $0x1150] ss:$24 sps:$4 sm:$0xff]   ;;  %v21402_v46 = vld [vmem:[#allocation8 + $0xe24] ss:$24 sps:$4 sm:$0xff]   ;;  %v16771_v31 = vadd.f32 %v22966_v40, %v16728_v49  ;;  %v16732_v55 = vadd.f32 %v22972_v17, %v16689_v7 }
 0x868   :  { %17354 = vmatprep.subr.bf16.mxu1 %v21387_v8  ;;  %v21400_v8 = vld [vmem:[#allocation8 + $0xe20] ss:$24 sps:$4 sm:$0xff]   ;;  %v21429_v7 = vld [vmem:[#allocation8 + $0x1664] ss:$24 sps:$4 sm:$0xff]  }
 0x869   :  { %v16814_v30 = vadd.f32 %v22980_v21, %v16771_v31  ;;  %v16775_v40 = vadd.f32 %v22974_v54, %v16732_v55  ;;  %v21420_v54 = vld [vmem:[#allocation8 + $0xd94] ss:$24 sps:$4 sm:$0xff]  }
 0x86a   :  { %17312 = vmatpush2.bf16.msra.mxu0 %v21382_v35  ;;  %v16812_v35 = vadd.f32 %v22976_v51, %v16769_v28  ;;  %v16816_v51 = vadd.f32 %v22984_v58, %v16773_v11  ;;  %v21432_v55 = vld [vmem:[#allocation8 + $0x1334] ss:$24 sps:$4 sm:$0xff]  }
 0x86b   :  { %17355 = vmatpush2.bf16.msra.mxu1 %v21385_v24  ;;  %17313 = vmatprep.subr.bf16.mxu0 %v21390_v12  ;;  %v21411_v24 = vld [vmem:[#allocation8 + $0x10f4] ss:$24 sps:$4 sm:$0xff]   ;;  %v16946_v12 = vpop.f32.mrf.mxu1  ;;  %v16857_v20 = vadd.f32 %v22982_v1, %v16814_v30  ;;  %v16818_v21 = vadd.f32 %v22990_v45, %v16775_v40  ;;  %v21430_v30 = vld [vmem:[#allocation8 + $0x1330] ss:$24 sps:$4 sm:$0xff]  }
 0x86c   :  { %17356 = vmatprep.subr.bf16.mxu1 %v21393_v33  ;;  %v16983_v33 = vpop.f32.mrf.mxu0  ;;  %v16855_v17 = vadd.f32 %v22978_v13, %v16812_v35  ;;  %v16859_v13 = vadd.f32 %v22987_v47, %v16816_v51  ;;  %v21435_v35 = vld [vmem:[#allocation8 + $0x1634] ss:$24 sps:$4 sm:$0xff]  }
 0x86d   :  { %v16900_v5 = vadd.f32 %v16899_v50, %v16857_v20 }
 0x86e   :  { %17314 = vmatpush2.bf16.msra.mxu0 %v21388_v42  ;;  %v21414_v42 = vld [vmem:[#allocation8 + $0xdc4] ss:$24 sps:$4 sm:$0xff]   ;;  %v16898_v57 = vadd.f32 %v22995_v61, %v16855_v17  ;;  %v16902_v45 = vadd.f32 %v16901_v3, %v16859_v13  ;;  %v21418_v61 = vld [vmem:[#allocation8 + $0xd90] ss:$24 sps:$4 sm:$0xff]   ;;  %v21427_v3 = vld [vmem:[#allocation8 + $0x1660] ss:$24 sps:$4 sm:$0xff]  }
 0x86f   :  { %17357 = vmatpush2.bf16.msra.mxu1 %v21391_v22  ;;  %17315 = vmatprep.subr.bf16.mxu0 %v21396_v59  ;;  %v17026_v22 = vpop.f32.mrf.mxu1  ;;  %v21417_v59 = vld [vmem:[#allocation8 + $0x10c4] ss:$24 sps:$4 sm:$0xff]   ;;  %v16943_v49 = vadd.f32 %v23005_v27, %v16900_v5  ;;  %v21442_v5 = vld [vmem:[#allocation8 + $0x12d0] ss:$24 sps:$4 sm:$0xff]  }
 0x870   :  { %17358 = vmatprep.subr.bf16.mxu1 %v21399_v18  ;;  %v16985_v18 = vpop.f32.mrf.mxu0  ;;  %v16941_v1 = vadd.f32 %v22998_v19, %v16898_v57  ;;  %v16945_v28 = vadd.f32 %v16944_v37, %v16902_v45  ;;  %v21441_v17 = vld [vmem:[#allocation8 + $0x1604] ss:$24 sps:$4 sm:$0xff]   ;;  %v21439_v57 = vld [vmem:[#allocation8 + $0x1600] ss:$24 sps:$4 sm:$0xff]  }
 0x871   :  { %v17028_v58 = vpop.f32.mrf.mxu1  ;;  %v16986_v38 = vadd.f32 %v16985_v18, %v16943_v49  ;;  %v21451_v45 = vld [vmem:[#allocation8 + $0x15a0] ss:$24 sps:$4 sm:$0xff]   ;;  %v21462_v49 = vld [vmem:[#allocation8 + $0x1244] ss:$24 sps:$4 sm:$0xff]  }
 0x872   :  { %17316 = vmatpush2.bf16.msra.mxu0 %v21394_v15  ;;  %v16861_v15 = vadd.f32 %v22993_v29, %v16818_v21  ;;  %v16984_v47 = vadd.f32 %v16983_v33, %v16941_v1  ;;  %v21424_v29 = vld [vmem:[#allocation8 + $0x1360] ss:$24 sps:$4 sm:$0xff]   ;;  %v21438_v33 = vld [vmem:[#allocation8 + $0x1304] ss:$24 sps:$4 sm:$0xff]  }
 0x873   :  { %17359 = vmatpush2.bf16.msra.mxu1 %v21397_v41  ;;  %17317 = vmatprep.subr.bf16.mxu0 %v21402_v46  ;;  %v16987_v41 = vpop.f32.mrf.mxu0  ;;  %v21421_v46 = vld [vmem:[#allocation8 + $0x1090] ss:$24 sps:$4 sm:$0xff]   ;;  %v17030_v50 = vpop.f32.mrf.mxu1  ;;  %v21448_v1 = vld [vmem:[#allocation8 + $0x12a0] ss:$24 sps:$4 sm:$0xff]  }
 0x874   :  { %17360 = vmatprep.subr.bf16.mxu1 %v21405_v34  ;;  %v16904_v34 = vadd.f32 %v16903_v53, %v16861_v15  ;;  %v21453_v15 = vld [vmem:[#allocation8 + $0x15a4] ss:$24 sps:$4 sm:$0xff]  }
 0x875   :  { %v16989_v19 = vpop.f32.mrf.mxu0  ;;  %v17032_v31 = vpop.f32.mrf.mxu1 }
 0x876   :  { %17318 = vmatpush2.bf16.msra.mxu0 %v21400_v8  ;;  %v16947_v8 = vadd.f32 %v16946_v12, %v16904_v34  ;;  %v21465_v34 = vld [vmem:[#allocation8 + $0x1544] ss:$24 sps:$4 sm:$0xff]  }
 0x877   :  { %17361 = vmatpush2.bf16.msra.mxu1 %v21403_v6  ;;  %17319 = vmatprep.subr.bf16.mxu0 %v21408_v39  ;;  %v17027_v6 = vadd.f32 %v17026_v22, %v16984_v47  ;;  %v16988_v39 = vadd.f32 %v16987_v41, %v16945_v28  ;;  %v21459_v41 = vld [vmem:[#allocation8 + $0x1574] ss:$24 sps:$4 sm:$0xff]   ;;  %v21460_v47 = vld [vmem:[#allocation8 + $0x1240] ss:$24 sps:$4 sm:$0xff]  }
 0x878   :  { %17362 = vmatprep.subr.bf16.mxu1 %v21411_v24  ;;  %v17029_v24 = vadd.f32 %v17028_v58, %v16986_v38  ;;  %v16990_v53 = vadd.f32 %v16989_v19, %v16947_v8  ;;  %v21445_v58 = vld [vmem:[#allocation8 + $0x15d0] ss:$24 sps:$4 sm:$0xff]   ;;  %v21471_v28 = vld [vmem:[#allocation8 + $0x1514] ss:$24 sps:$4 sm:$0xff]   ;;  %v21474_v19 = vld [vmem:[#allocation8 + $0x14e4] ss:$24 sps:$4 sm:$0xff]  }
 0x879   :  { %v21466_v38 = vld [vmem:[#allocation8 + $0x1210] ss:$24 sps:$4 sm:$0xff]   ;;  %v21472_v8 = vld [vmem:[#allocation8 + $0x14e0] ss:$24 sps:$4 sm:$0xff]  }
 0x87a   :  { %17320 = vmatpush2.bf16.msra.mxu0 %v21406_v44  ;;  %v21433_v44 = vld [vmem:[#allocation8 + $0x1630] ss:$24 sps:$4 sm:$0xff]   ;;  %v17033_v22 = vadd.f32 %v17032_v31, %v16990_v53  ;;  %v21483_v31 = vld [vmem:[#allocation8 + $0x17b4] ss:$24 sps:$4 sm:$0xff]   ;;  %v21484_v53 = vld [vmem:[#allocation8 + $0x1480] ss:$24 sps:$4 sm:$0xff]  }
 0x87b   :  { %17363 = vmatpush2.bf16.msra.mxu1 %v21409_v9  ;;  %17321 = vmatprep.subr.bf16.mxu0 %v21414_v42  ;;  %v17031_v9 = vadd.f32 %v17030_v50, %v16988_v39  ;;  %v21463_v50 = vld [vmem:[#allocation8 + $0x1540] ss:$24 sps:$4 sm:$0xff]   ;;  %v21480_v39 = vld [vmem:[#allocation8 + $0x14b4] ss:$24 sps:$4 sm:$0xff]  }
 0x87c   :  { %17364 = vmatprep.subr.bf16.mxu1 %v21417_v59 }
 0x87e   :  { %17322 = vmatpush2.bf16.msra.mxu0 %v21412_v63  ;;  %v21444_v63 = vld [vmem:[#allocation8 + $0x12d4] ss:$24 sps:$4 sm:$0xff]  }
 0x87f   :  { %17365 = vmatpush2.bf16.msra.mxu1 %v21415_v0  ;;  %17323 = vmatprep.subr.bf16.mxu0 %v21420_v54  ;;  %v21447_v0 = vld [vmem:[#allocation8 + $0x15d4] ss:$24 sps:$4 sm:$0xff]  }
 0x880   :  { %17366 = vmatprep.subr.bf16.mxu1 %v21423_v16  ;;  %v21450_v16 = vld [vmem:[#allocation8 + $0x12a4] ss:$24 sps:$4 sm:$0xff]  }
 0x882   :  { %17324 = vmatpush2.bf16.msra.mxu0 %v21418_v61  ;;  %v21456_v61 = vld [vmem:[#allocation8 + $0x1274] ss:$24 sps:$4 sm:$0xff]  }
 0x883   :  { %17367 = vmatpush2.bf16.msra.mxu1 %v21421_v46  ;;  %17379 = vmatprep.subr.bf16.mxu0 %v21426_v32  ;;  %v21454_v46 = vld [vmem:[#allocation8 + $0x1270] ss:$24 sps:$4 sm:$0xff]  }
 0x884   :  { %17422 = vmatprep.subr.bf16.mxu1 %v21429_v7  ;;  %v21457_v32 = vld [vmem:[#allocation8 + $0x1570] ss:$24 sps:$4 sm:$0xff]   ;;  %v21468_v7 = vld [vmem:[#allocation8 + $0x1214] ss:$24 sps:$4 sm:$0xff]  }
 0x885   :  { %v17069_v27 = vpop.f32.mrf.mxu0  ;;  %17326 = vmatmul.mubr.bf16.vlgmr.msra.gmra.mxu0 %v23143_v10 }
 0x886   :  { %v17070_v37 = vadd.f32 %v17069_v27, %v17027_v6  ;;  %v17112_v11 = vpop.f32.mrf.mxu1  ;;  %17369 = vmatmul.mubr.bf16.vlgmr.msra.gmra.mxu1 %v23144_v48  ;;  %17380 = vmatpush1.bf16.msra.mxu0 %v21424_v29  ;;  %v21469_v29 = vld [vmem:[#allocation8 + $0x1510] ss:$24 sps:$4 sm:$0xff]   ;;  %v21475_v6 = vld [vmem:[#allocation8 + $0x17e0] ss:$24 sps:$4 sm:$0xff]  }
 0x887   :  { %17411 = vmatprep.mubr.bf16.mxu0 %v22698_v36  ;;  %17423 = vmatpush1.bf16.msra.mxu1 %v21427_v3  ;;  %v17071_v12 = vpop.f32.mrf.mxu0  ;;  %v21436_v36 = vld [vmem:[#allocation8 + $0x1300] ss:$24 sps:$4 sm:$0xff]   ;;  %v21477_v3 = vld [vmem:[#allocation8 + $0x17e4] ss:$24 sps:$4 sm:$0xff]   ;;  %v21481_v27 = vld [vmem:[#allocation8 + $0x17b0] ss:$24 sps:$4 sm:$0xff]  }
 0x888   :  { %v17113_v42 = vadd.f32 %v17112_v11, %v17070_v37  ;;  %17454 = vmatprep.mubr.bf16.mxu1 %v22701_v4  ;;  %v17072_v10 = vadd.f32 %v17071_v12, %v17029_v24  ;;  %v17114_v40 = vpop.f32.mrf.mxu1  ;;  %17381 = vmatprep.subr.bf16.mxu0 %v21432_v55  ;;  %v21478_v55 = vld [vmem:[#allocation8 + $0x14b0] ss:$24 sps:$4 sm:$0xff]   ;;  %v21489_v24 = vld [vmem:[#allocation8 + $0x1784] ss:$24 sps:$4 sm:$0xff]   ;;  %v21487_v37 = vld [vmem:[#allocation8 + $0x1780] ss:$24 sps:$4 sm:$0xff]  }
 0x889   :  { %v17073_v51 = vpop.f32.mrf.mxu0  ;;  %17424 = vmatprep.subr.bf16.mxu1 %v21435_v35  ;;  %v21486_v35 = vld [vmem:[#allocation8 + $0x1484] ss:$24 sps:$4 sm:$0xff]   ;;  %v21492_v11 = vld [vmem:[#allocation8 + $0x1454] ss:$24 sps:$4 sm:$0xff]   ;;  %v21490_v12 = vld [vmem:[#allocation8 + $0x1450] ss:$24 sps:$4 sm:$0xff]  }
 0x88a   :  { %17639 = vst [vmem:[#allocation11 + $0x10] sm:$0xff] %v17113_v42  ;;  %v17115_v48 = vadd.f32 %v17114_v40, %v17072_v10  ;;  %v17074_v59 = vadd.f32 %v17073_v51, %v17031_v9  ;;  %v17116_v20 = vpop.f32.mrf.mxu1  ;;  %17382 = vmatpush1.bf16.msra.mxu0 %v21430_v30  ;;  %v21495_v30 = vld [vmem:[#allocation8 + $0x1754] ss:$24 sps:$4 sm:$0xff]   ;;  %v21501_v9 = vld [vmem:[#allocation8 + $0x1724] ss:$24 sps:$4 sm:$0xff]  }
 0x88b   :  { %17425 = vmatpush1.bf16.msra.mxu1 %v21433_v44  ;;  %v17075_v21 = vpop.f32.mrf.mxu0  ;;  %17383 = vmatprep.subr.bf16.mxu0 %v21438_v33  ;;  %v21493_v44 = vld [vmem:[#allocation8 + $0x1750] ss:$24 sps:$4 sm:$0xff]   ;;  %v21498_v33 = vld [vmem:[#allocation8 + $0x1424] ss:$24 sps:$4 sm:$0xff]   ;;  %v21496_v42 = vld [vmem:[#allocation8 + $0x1420] ss:$24 sps:$4 sm:$0xff]  }
 0x88c   :  { %17640 = vst [vmem:[#allocation11 + $0x18] sm:$0xff] %v17115_v48  ;;  %v17117_v4 = vadd.f32 %v17116_v20, %v17074_v59  ;;  %v17076_v18 = vadd.f32 %v17075_v21, %v17033_v22  ;;  %17426 = vmatprep.subr.bf16.mxu1 %v21441_v17  ;;  %v17118_v54 = vpop.f32.mrf.mxu1  ;;  %v21499_v10 = vld [vmem:[#allocation8 + $0x1720] ss:$24 sps:$4 sm:$0xff]   ;;  %v21504_v40 = vld [vmem:[#allocation8 + $0x13f4] ss:$24 sps:$4 sm:$0xff]  }
 0x88d   :  { %v21507_v17 = vld [vmem:[#allocation8 + $0x16f4] ss:$24 sps:$4 sm:$0xff]   ;;  %v21502_v51 = vld [vmem:[#allocation8 + $0x13f0] ss:$24 sps:$4 sm:$0xff]   ;;  %v21510_v48 = vld [vmem:[#allocation8 + $0x13c4] ss:$24 sps:$4 sm:$0xff]  }
 0x88e   :  { %17645 = vst [vmem:[#allocation11 + $0x40] sm:$0xff] %v17117_v4  ;;  %v17119_v13 = vadd.f32 %v17118_v54, %v17076_v18  ;;  %17384 = vmatpush1.bf16.msra.mxu0 %v21436_v36  ;;  %v21505_v22 = vld [vmem:[#allocation8 + $0x16f0] ss:$24 sps:$4 sm:$0xff]   ;;  %v21513_v59 = vld [vmem:[#allocation8 + $0x16c4] ss:$24 sps:$4 sm:$0xff]  }
 0x88f   :  { %17427 = vmatpush1.bf16.msra.mxu1 %v21439_v57  ;;  %17385 = vmatprep.subr.bf16.mxu0 %v21444_v63  ;;  %v21508_v20 = vld [vmem:[#allocation8 + $0x13c0] ss:$24 sps:$4 sm:$0xff]   ;;  %v21516_v21 = vld [vmem:[#allocation8 + $0x1394] ss:$24 sps:$4 sm:$0xff]   ;;  %v21514_v63 = vld [vmem:[#allocation8 + $0x1390] ss:$24 sps:$4 sm:$0xff]  }
 0x890   :  { %17646 = vst [vmem:[#allocation11 + $0x48] sm:$0xff] %v17119_v13  ;;  %17428 = vmatprep.subr.bf16.mxu1 %v21447_v0  ;;  %v21511_v36 = vld [vmem:[#allocation8 + $0x16c0] ss:$24 sps:$4 sm:$0xff]   ;;  %v21519_v57 = vld [vmem:[#allocation8 + $0x1694] ss:$24 sps:$4 sm:$0xff]  }
 0x891   :  { %v21517_v4 = vld [vmem:[#allocation8 + $0x1690] ss:$24 sps:$4 sm:$0xff]   ;;  %v21522_v18 = vld [vmem:[#allocation8 + $0x1964] ss:$24 sps:$4 sm:$0xff]   ;;  %v21520_v54 = vld [vmem:[#allocation8 + $0x1960] ss:$24 sps:$4 sm:$0xff]  }
 0x892   :  { %17386 = vmatpush1.bf16.msra.mxu0 %v21442_v5  ;;  %v21525_v0 = vld [vmem:[#allocation8 + $0x1c64] ss:$24 sps:$4 sm:$0xff]   ;;  %v21523_v13 = vld [vmem:[#allocation8 + $0x1c60] ss:$24 sps:$4 sm:$0xff]   ;;  %v21528_v5 = vld [vmem:[#allocation8 + $0x1934] ss:$24 sps:$4 sm:$0xff]  }
 0x893   :  { %17429 = vmatpush1.bf16.msra.mxu1 %v21445_v58  ;;  %17387 = vmatprep.subr.bf16.mxu0 %v21450_v16  ;;  %v21531_v58 = vld [vmem:[#allocation8 + $0x1c34] ss:$24 sps:$4 sm:$0xff]   ;;  %v21526_v16 = vld [vmem:[#allocation8 + $0x1930] ss:$24 sps:$4 sm:$0xff]  }
 0x894   :  { %17430 = vmatprep.subr.bf16.mxu1 %v21453_v15  ;;  %v21529_v15 = vld [vmem:[#allocation8 + $0x1c30] ss:$24 sps:$4 sm:$0xff]  }
 0x896   :  { %17388 = vmatpush1.bf16.msra.mxu0 %v21448_v1  ;;  %v21534_v1 = vld [vmem:[#allocation8 + $0x1904] ss:$24 sps:$4 sm:$0xff]  }
 0x897   :  { %17431 = vmatpush1.bf16.msra.mxu1 %v21451_v45  ;;  %17389 = vmatprep.subr.bf16.mxu0 %v21456_v61  ;;  %v21537_v45 = vld [vmem:[#allocation8 + $0x1c04] ss:$24 sps:$4 sm:$0xff]   ;;  %v21532_v61 = vld [vmem:[#allocation8 + $0x1900] ss:$24 sps:$4 sm:$0xff]  }
 0x898   :  { %17432 = vmatprep.subr.bf16.mxu1 %v21459_v41  ;;  %v21540_v41 = vld [vmem:[#allocation8 + $0x18d4] ss:$24 sps:$4 sm:$0xff]  }
 0x89a   :  { %17390 = vmatpush1.bf16.msra.mxu0 %v21454_v46  ;;  %v21538_v46 = vld [vmem:[#allocation8 + $0x18d0] ss:$24 sps:$4 sm:$0xff]  }
 0x89b   :  { %17433 = vmatpush1.bf16.msra.mxu1 %v21457_v32  ;;  %17391 = vmatprep.subr.bf16.mxu0 %v21462_v49  ;;  %v21546_v32 = vld [vmem:[#allocation8 + $0x18a4] ss:$24 sps:$4 sm:$0xff]  }
 0x89c   :  { %17434 = vmatprep.subr.bf16.mxu1 %v21465_v34  ;;  %v21549_v49 = vld [vmem:[#allocation8 + $0x1ba4] ss:$24 sps:$4 sm:$0xff]   ;;  %v21547_v34 = vld [vmem:[#allocation8 + $0x1ba0] ss:$24 sps:$4 sm:$0xff]  }
 0x89e   :  { %17392 = vmatpush1.bf16.msra.mxu0 %v21460_v47  ;;  %v21552_v47 = vld [vmem:[#allocation8 + $0x1874] ss:$24 sps:$4 sm:$0xff]  }
 0x89f   :  { %17435 = vmatpush1.bf16.msra.mxu1 %v21463_v50  ;;  %17393 = vmatprep.subr.bf16.mxu0 %v21468_v7  ;;  %v21555_v50 = vld [vmem:[#allocation8 + $0x1b74] ss:$24 sps:$4 sm:$0xff]   ;;  %v21550_v7 = vld [vmem:[#allocation8 + $0x1870] ss:$24 sps:$4 sm:$0xff]  }
 0x8a0   :  { %17436 = vmatprep.subr.bf16.mxu1 %v21471_v28  ;;  %v21553_v28 = vld [vmem:[#allocation8 + $0x1b70] ss:$24 sps:$4 sm:$0xff]  }
 0x8a2   :  { %17394 = vmatpush1.bf16.msra.mxu0 %v21466_v38  ;;  %v21558_v38 = vld [vmem:[#allocation8 + $0x1844] ss:$24 sps:$4 sm:$0xff]  }
 0x8a3   :  { %17437 = vmatpush1.bf16.msra.mxu1 %v21469_v29  ;;  %17395 = vmatprep.subr.bf16.mxu0 %v21474_v19  ;;  %v21561_v29 = vld [vmem:[#allocation8 + $0x1b44] ss:$24 sps:$4 sm:$0xff]   ;;  %v21556_v19 = vld [vmem:[#allocation8 + $0x1840] ss:$24 sps:$4 sm:$0xff]  }
 0x8a4   :  { %17438 = vmatprep.subr.bf16.mxu1 %v21477_v3  ;;  %v21559_v3 = vld [vmem:[#allocation8 + $0x1b40] ss:$24 sps:$4 sm:$0xff]  }
 0x8a6   :  { %17396 = vmatpush2.bf16.msra.mxu0 %v21472_v8  ;;  %v21564_v8 = vld [vmem:[#allocation8 + $0x1814] ss:$24 sps:$4 sm:$0xff]  }
 0x8a7   :  { %17439 = vmatpush2.bf16.msra.mxu1 %v21475_v6  ;;  %17397 = vmatprep.subr.bf16.mxu0 %v21480_v39  ;;  %v21567_v6 = vld [vmem:[#allocation8 + $0x1b14] ss:$24 sps:$4 sm:$0xff]   ;;  %v21562_v39 = vld [vmem:[#allocation8 + $0x1810] ss:$24 sps:$4 sm:$0xff]  }
 0x8a8   :  { %17440 = vmatprep.subr.bf16.mxu1 %v21483_v31  ;;  %v21565_v31 = vld [vmem:[#allocation8 + $0x1b10] ss:$24 sps:$4 sm:$0xff]  }
 0x8aa   :  { %17398 = vmatpush2.bf16.msra.mxu0 %v21478_v55  ;;  %v21570_v55 = vld [vmem:[#allocation8 + $0x1ae4] ss:$24 sps:$4 sm:$0xff]  }
 0x8ab   :  { %17441 = vmatpush2.bf16.msra.mxu1 %v21481_v27  ;;  %17399 = vmatprep.subr.bf16.mxu0 %v21486_v35  ;;  %v21573_v27 = vld [vmem:[#allocation8 + $0x1de4] ss:$24 sps:$4 sm:$0xff]   ;;  %v21568_v35 = vld [vmem:[#allocation8 + $0x1ae0] ss:$24 sps:$4 sm:$0xff]  }
 0x8ac   :  { %17442 = vmatprep.subr.bf16.mxu1 %v21489_v24  ;;  %v21571_v24 = vld [vmem:[#allocation8 + $0x1de0] ss:$24 sps:$4 sm:$0xff]  }
 0x8ae   :  { %17400 = vmatpush2.bf16.msra.mxu0 %v21484_v53  ;;  %v21576_v53 = vld [vmem:[#allocation8 + $0x1ab4] ss:$24 sps:$4 sm:$0xff]  }
 0x8af   :  { %17443 = vmatpush2.bf16.msra.mxu1 %v21487_v37  ;;  %17401 = vmatprep.subr.bf16.mxu0 %v21492_v11  ;;  %v21579_v37 = vld [vmem:[#allocation8 + $0x1db4] ss:$24 sps:$4 sm:$0xff]   ;;  %v21574_v11 = vld [vmem:[#allocation8 + $0x1ab0] ss:$24 sps:$4 sm:$0xff]  }
 0x8b0   :  { %17444 = vmatprep.subr.bf16.mxu1 %v21495_v30  ;;  %v21577_v30 = vld [vmem:[#allocation8 + $0x1db0] ss:$24 sps:$4 sm:$0xff]  }
 0x8b2   :  { %17402 = vmatpush2.bf16.msra.mxu0 %v21490_v12  ;;  %v21582_v12 = vld [vmem:[#allocation8 + $0x1a84] ss:$24 sps:$4 sm:$0xff]  }
 0x8b3   :  { %17445 = vmatpush2.bf16.msra.mxu1 %v21493_v44  ;;  %17403 = vmatprep.subr.bf16.mxu0 %v21498_v33  ;;  %v21585_v44 = vld [vmem:[#allocation8 + $0x1d84] ss:$24 sps:$4 sm:$0xff]   ;;  %v21580_v33 = vld [vmem:[#allocation8 + $0x1a80] ss:$24 sps:$4 sm:$0xff]  }
 0x8b4   :  { %17446 = vmatprep.subr.bf16.mxu1 %v21501_v9  ;;  %v21583_v9 = vld [vmem:[#allocation8 + $0x1d80] ss:$24 sps:$4 sm:$0xff]  }
 0x8b6   :  { %17404 = vmatpush2.bf16.msra.mxu0 %v21496_v42  ;;  %v21588_v42 = vld [vmem:[#allocation8 + $0x1a54] ss:$24 sps:$4 sm:$0xff]  }
 0x8b7   :  { %17447 = vmatpush2.bf16.msra.mxu1 %v21499_v10  ;;  %17405 = vmatprep.subr.bf16.mxu0 %v21504_v40  ;;  %v21591_v10 = vld [vmem:[#allocation8 + $0x1d54] ss:$24 sps:$4 sm:$0xff]   ;;  %v21586_v40 = vld [vmem:[#allocation8 + $0x1a50] ss:$24 sps:$4 sm:$0xff]  }
 0x8b8   :  { %17448 = vmatprep.subr.bf16.mxu1 %v21507_v17  ;;  %v21589_v17 = vld [vmem:[#allocation8 + $0x1d50] ss:$24 sps:$4 sm:$0xff]  }
 0x8ba   :  { %17406 = vmatpush2.bf16.msra.mxu0 %v21502_v51  ;;  %v21594_v51 = vld [vmem:[#allocation8 + $0x1a24] ss:$24 sps:$4 sm:$0xff]  }
 0x8bb   :  { %17449 = vmatpush2.bf16.msra.mxu1 %v21505_v22  ;;  %17407 = vmatprep.subr.bf16.mxu0 %v21510_v48  ;;  %v21597_v22 = vld [vmem:[#allocation8 + $0x1d24] ss:$24 sps:$4 sm:$0xff]   ;;  %v21592_v48 = vld [vmem:[#allocation8 + $0x1a20] ss:$24 sps:$4 sm:$0xff]  }
 0x8bc   :  { %17450 = vmatprep.subr.bf16.mxu1 %v21513_v59  ;;  %v21595_v59 = vld [vmem:[#allocation8 + $0x1d20] ss:$24 sps:$4 sm:$0xff]  }
 0x8be   :  { %17408 = vmatpush2.bf16.msra.mxu0 %v21508_v20  ;;  %v21600_v20 = vld [vmem:[#allocation8 + $0x19f4] ss:$24 sps:$4 sm:$0xff]  }
 0x8bf   :  { %17451 = vmatpush2.bf16.msra.mxu1 %v21511_v36  ;;  %17409 = vmatprep.subr.bf16.mxu0 %v21516_v21  ;;  %v21603_v36 = vld [vmem:[#allocation8 + $0x1cf4] ss:$24 sps:$4 sm:$0xff]   ;;  %v21598_v21 = vld [vmem:[#allocation8 + $0x19f0] ss:$24 sps:$4 sm:$0xff]  }
 0x8c0   :  { %17452 = vmatprep.subr.bf16.mxu1 %v21519_v57  ;;  %v21601_v57 = vld [vmem:[#allocation8 + $0x1cf0] ss:$24 sps:$4 sm:$0xff]  }
 0x8c2   :  { %17410 = vmatpush2.bf16.msra.mxu0 %v21514_v63  ;;  %v21606_v63 = vld [vmem:[#allocation8 + $0x19c4] ss:$24 sps:$4 sm:$0xff]  }
 0x8c3   :  { %17453 = vmatpush2.bf16.msra.mxu1 %v21517_v4  ;;  %17465 = vmatprep.subr.bf16.mxu0 %v21522_v18  ;;  %v21609_v4 = vld [vmem:[#allocation8 + $0x1cc4] ss:$24 sps:$4 sm:$0xff]   ;;  %v21604_v18 = vld [vmem:[#allocation8 + $0x19c0] ss:$24 sps:$4 sm:$0xff]  }
 0x8c4   :  { %17508 = vmatprep.subr.bf16.mxu1 %v21525_v0  ;;  %v21607_v0 = vld [vmem:[#allocation8 + $0x1cc0] ss:$24 sps:$4 sm:$0xff]  }
 0x8c5   :  { %17412 = vmatmul.mubr.bf16.vlgmr.msra.gmra.mxu0 %v23149_v26  ;;  %v21535_v26 = vld [vmem:[#allocation8 + $0x1c00] ss:$24 sps:$4 sm:$0xff]  }
 0x8c6   :  { %17455 = vmatmul.mubr.bf16.vlgmr.msra.gmra.mxu1 %v23150_v60  ;;  %17466 = vmatpush1.bf16.msra.mxu0 %v21520_v54  ;;  %v21543_v60 = vld [vmem:[#allocation8 + $0x1bd4] ss:$24 sps:$4 sm:$0xff]  }
 0x8c7   :  { %17497 = vmatprep.mubr.bf16.mxu0 %v22770_v52  ;;  %17509 = vmatpush1.bf16.msra.mxu1 %v21523_v13  ;;  %v21541_v52 = vld [vmem:[#allocation8 + $0x1bd0] ss:$24 sps:$4 sm:$0xff]   ;;  %v21612_v54 = vld [vmem:[#allocation8 + $0x1994] ss:$24 sps:$4 sm:$0xff]  }
 0x8c8   :  { %17540 = vmatprep.mubr.bf16.mxu1 %v22773_v2  ;;  %17467 = vmatprep.subr.bf16.mxu0 %v21528_v5  ;;  %v21544_v2 = vld [vmem:[#allocation8 + $0x18a0] ss:$24 sps:$4 sm:$0xff]   ;;  %v21615_v13 = vld [vmem:[#allocation8 + $0x1c94] ss:$24 sps:$4 sm:$0xff]   ;;  %v21610_v5 = vld [vmem:[#allocation8 + $0x1990] ss:$24 sps:$4 sm:$0xff]  }
 0x8c9   :  { %17510 = vmatprep.subr.bf16.mxu1 %v21531_v58  ;;  %v21613_v58 = vld [vmem:[#allocation8 + $0x1c90] ss:$24 sps:$4 sm:$0xff]  }
 0x8ca   :  { %17468 = vmatpush1.bf16.msra.mxu0 %v21526_v16  ;;  %v21618_v16 = vld [vmem:[#allocation8 + $0x1f64] ss:$24 sps:$4 sm:$0xff]  }
 0x8cb   :  { %17511 = vmatpush1.bf16.msra.mxu1 %v21529_v15  ;;  %17469 = vmatprep.subr.bf16.mxu0 %v21534_v1  ;;  %v21621_v15 = vld [vmem:[#allocation8 + $0x2264] ss:$24 sps:$4 sm:$0xff]   ;;  %v21616_v1 = vld [vmem:[#allocation8 + $0x1f60] ss:$24 sps:$4 sm:$0xff]  }
 0x8cc   :  { %17512 = vmatprep.subr.bf16.mxu1 %v21537_v45  ;;  %v21619_v45 = vld [vmem:[#allocation8 + $0x2260] ss:$24 sps:$4 sm:$0xff]  }
 0x8ce   :  { %17470 = vmatpush1.bf16.msra.mxu0 %v21532_v61  ;;  %v21624_v61 = vld [vmem:[#allocation8 + $0x1f34] ss:$24 sps:$4 sm:$0xff]  }
 0x8cf   :  { %17513 = vmatpush1.bf16.msra.mxu1 %v21535_v26  ;;  %17471 = vmatprep.subr.bf16.mxu0 %v21540_v41  ;;  %v21627_v26 = vld [vmem:[#allocation8 + $0x2234] ss:$24 sps:$4 sm:$0xff]   ;;  %v21622_v41 = vld [vmem:[#allocation8 + $0x1f30] ss:$24 sps:$4 sm:$0xff]  }
 0x8d0   :  { %17514 = vmatprep.subr.bf16.mxu1 %v21543_v60  ;;  %v21625_v60 = vld [vmem:[#allocation8 + $0x2230] ss:$24 sps:$4 sm:$0xff]  }
 0x8d2   :  { %17472 = vmatpush1.bf16.msra.mxu0 %v21538_v46  ;;  %v21630_v46 = vld [vmem:[#allocation8 + $0x1f04] ss:$24 sps:$4 sm:$0xff]  }
 0x8d3   :  { %17515 = vmatpush1.bf16.msra.mxu1 %v21541_v52  ;;  %17473 = vmatprep.subr.bf16.mxu0 %v21546_v32  ;;  %v21633_v52 = vld [vmem:[#allocation8 + $0x2204] ss:$24 sps:$4 sm:$0xff]   ;;  %v21628_v32 = vld [vmem:[#allocation8 + $0x1f00] ss:$24 sps:$4 sm:$0xff]  }
 0x8d4   :  { %17516 = vmatprep.subr.bf16.mxu1 %v21549_v49  ;;  %v21636_v49 = vld [vmem:[#allocation8 + $0x1ed4] ss:$24 sps:$4 sm:$0xff]  }
 0x8d6   :  { %17474 = vmatpush1.bf16.msra.mxu0 %v21544_v2  ;;  %v21634_v2 = vld [vmem:[#allocation8 + $0x1ed0] ss:$24 sps:$4 sm:$0xff]  }
 0x8d7   :  { %17517 = vmatpush1.bf16.msra.mxu1 %v21547_v34  ;;  %17475 = vmatprep.subr.bf16.mxu0 %v21552_v47  ;;  %v21642_v34 = vld [vmem:[#allocation8 + $0x1ea4] ss:$24 sps:$4 sm:$0xff]  }
 0x8d8   :  { %17518 = vmatprep.subr.bf16.mxu1 %v21555_v50  ;;  %v21645_v47 = vld [vmem:[#allocation8 + $0x21a4] ss:$24 sps:$4 sm:$0xff]   ;;  %v21643_v50 = vld [vmem:[#allocation8 + $0x21a0] ss:$24 sps:$4 sm:$0xff]  }
 0x8da   :  { %17476 = vmatpush1.bf16.msra.mxu0 %v21550_v7  ;;  %v21648_v7 = vld [vmem:[#allocation8 + $0x1e74] ss:$24 sps:$4 sm:$0xff]  }
 0x8db   :  { %17519 = vmatpush1.bf16.msra.mxu1 %v21553_v28  ;;  %17477 = vmatprep.subr.bf16.mxu0 %v21558_v38  ;;  %v21651_v28 = vld [vmem:[#allocation8 + $0x2174] ss:$24 sps:$4 sm:$0xff]   ;;  %v21646_v38 = vld [vmem:[#allocation8 + $0x1e70] ss:$24 sps:$4 sm:$0xff]  }
 0x8dc   :  { %17520 = vmatprep.subr.bf16.mxu1 %v21561_v29  ;;  %v21649_v29 = vld [vmem:[#allocation8 + $0x2170] ss:$24 sps:$4 sm:$0xff]  }
 0x8de   :  { %17478 = vmatpush1.bf16.msra.mxu0 %v21556_v19  ;;  %v21654_v19 = vld [vmem:[#allocation8 + $0x1e44] ss:$24 sps:$4 sm:$0xff]  }
 0x8df   :  { %17521 = vmatpush1.bf16.msra.mxu1 %v21559_v3  ;;  %17479 = vmatprep.subr.bf16.mxu0 %v21564_v8  ;;  %v21657_v3 = vld [vmem:[#allocation8 + $0x2144] ss:$24 sps:$4 sm:$0xff]   ;;  %v21652_v8 = vld [vmem:[#allocation8 + $0x1e40] ss:$24 sps:$4 sm:$0xff]  }
 0x8e0   :  { %17522 = vmatprep.subr.bf16.mxu1 %v21567_v6  ;;  %v21655_v6 = vld [vmem:[#allocation8 + $0x2140] ss:$24 sps:$4 sm:$0xff]  }
 0x8e2   :  { %17480 = vmatpush1.bf16.msra.mxu0 %v21562_v39  ;;  %v21660_v39 = vld [vmem:[#allocation8 + $0x1e14] ss:$24 sps:$4 sm:$0xff]  }
 0x8e3   :  { %17523 = vmatpush1.bf16.msra.mxu1 %v21565_v31  ;;  %17481 = vmatprep.subr.bf16.mxu0 %v21570_v55  ;;  %v21663_v31 = vld [vmem:[#allocation8 + $0x2114] ss:$24 sps:$4 sm:$0xff]   ;;  %v21658_v55 = vld [vmem:[#allocation8 + $0x1e10] ss:$24 sps:$4 sm:$0xff]  }
 0x8e4   :  { %17524 = vmatprep.subr.bf16.mxu1 %v21573_v27  ;;  %v21661_v27 = vld [vmem:[#allocation8 + $0x2110] ss:$24 sps:$4 sm:$0xff]  }
 0x8e6   :  { %17482 = vmatpush2.bf16.msra.mxu0 %v21568_v35  ;;  %v21666_v35 = vld [vmem:[#allocation8 + $0x20e4] ss:$24 sps:$4 sm:$0xff]  }
 0x8e7   :  { %17525 = vmatpush2.bf16.msra.mxu1 %v21571_v24  ;;  %17483 = vmatprep.subr.bf16.mxu0 %v21576_v53  ;;  %v21669_v24 = vld [vmem:[#allocation8 + $0x23e4] ss:$24 sps:$4 sm:$0xff]   ;;  %v21664_v53 = vld [vmem:[#allocation8 + $0x20e0] ss:$24 sps:$4 sm:$0xff]  }
 0x8e8   :  { %17526 = vmatprep.subr.bf16.mxu1 %v21579_v37  ;;  %v21667_v37 = vld [vmem:[#allocation8 + $0x23e0] ss:$24 sps:$4 sm:$0xff]  }
 0x8ea   :  { %17484 = vmatpush2.bf16.msra.mxu0 %v21574_v11  ;;  %v21672_v11 = vld [vmem:[#allocation8 + $0x20b4] ss:$24 sps:$4 sm:$0xff]  }
 0x8eb   :  { %17527 = vmatpush2.bf16.msra.mxu1 %v21577_v30  ;;  %17485 = vmatprep.subr.bf16.mxu0 %v21582_v12  ;;  %v21675_v30 = vld [vmem:[#allocation8 + $0x23b4] ss:$24 sps:$4 sm:$0xff]   ;;  %v21670_v12 = vld [vmem:[#allocation8 + $0x20b0] ss:$24 sps:$4 sm:$0xff]  }
 0x8ec   :  { %17528 = vmatprep.subr.bf16.mxu1 %v21585_v44  ;;  %v21673_v44 = vld [vmem:[#allocation8 + $0x23b0] ss:$24 sps:$4 sm:$0xff]  }
 0x8ee   :  { %17486 = vmatpush2.bf16.msra.mxu0 %v21580_v33  ;;  %v21678_v33 = vld [vmem:[#allocation8 + $0x2084] ss:$24 sps:$4 sm:$0xff]  }
 0x8ef   :  { %17529 = vmatpush2.bf16.msra.mxu1 %v21583_v9  ;;  %17487 = vmatprep.subr.bf16.mxu0 %v21588_v42  ;;  %v21681_v9 = vld [vmem:[#allocation8 + $0x2384] ss:$24 sps:$4 sm:$0xff]   ;;  %v21676_v42 = vld [vmem:[#allocation8 + $0x2080] ss:$24 sps:$4 sm:$0xff]  }
 0x8f0   :  { %17530 = vmatprep.subr.bf16.mxu1 %v21591_v10  ;;  %v21679_v10 = vld [vmem:[#allocation8 + $0x2380] ss:$24 sps:$4 sm:$0xff]  }
 0x8f2   :  { %17488 = vmatpush2.bf16.msra.mxu0 %v21586_v40  ;;  %v21684_v40 = vld [vmem:[#allocation8 + $0x2054] ss:$24 sps:$4 sm:$0xff]  }
 0x8f3   :  { %17531 = vmatpush2.bf16.msra.mxu1 %v21589_v17  ;;  %17489 = vmatprep.subr.bf16.mxu0 %v21594_v51  ;;  %v21687_v17 = vld [vmem:[#allocation8 + $0x2354] ss:$24 sps:$4 sm:$0xff]   ;;  %v21682_v51 = vld [vmem:[#allocation8 + $0x2050] ss:$24 sps:$4 sm:$0xff]  }
 0x8f4   :  { %17532 = vmatprep.subr.bf16.mxu1 %v21597_v22  ;;  %v21685_v22 = vld [vmem:[#allocation8 + $0x2350] ss:$24 sps:$4 sm:$0xff]  }
 0x8f6   :  { %17490 = vmatpush2.bf16.msra.mxu0 %v21592_v48  ;;  %v21690_v48 = vld [vmem:[#allocation8 + $0x2024] ss:$24 sps:$4 sm:$0xff]  }
 0x8f7   :  { %17533 = vmatpush2.bf16.msra.mxu1 %v21595_v59  ;;  %17491 = vmatprep.subr.bf16.mxu0 %v21600_v20  ;;  %v21693_v59 = vld [vmem:[#allocation8 + $0x2324] ss:$24 sps:$4 sm:$0xff]   ;;  %v21688_v20 = vld [vmem:[#allocation8 + $0x2020] ss:$24 sps:$4 sm:$0xff]  }
 0x8f8   :  { %17534 = vmatprep.subr.bf16.mxu1 %v21603_v36  ;;  %v21691_v36 = vld [vmem:[#allocation8 + $0x2320] ss:$24 sps:$4 sm:$0xff]  }
 0x8fa   :  { %17492 = vmatpush2.bf16.msra.mxu0 %v21598_v21  ;;  %v21696_v21 = vld [vmem:[#allocation8 + $0x1ff4] ss:$24 sps:$4 sm:$0xff]  }
 0x8fb   :  { %17535 = vmatpush2.bf16.msra.mxu1 %v21601_v57  ;;  %17493 = vmatprep.subr.bf16.mxu0 %v21606_v63  ;;  %v21699_v57 = vld [vmem:[#allocation8 + $0x22f4] ss:$24 sps:$4 sm:$0xff]   ;;  %v21694_v63 = vld [vmem:[#allocation8 + $0x1ff0] ss:$24 sps:$4 sm:$0xff]  }
 0x8fc   :  { %17536 = vmatprep.subr.bf16.mxu1 %v21609_v4  ;;  %v21697_v4 = vld [vmem:[#allocation8 + $0x22f0] ss:$24 sps:$4 sm:$0xff]  }
 0x8fe   :  { %17494 = vmatpush2.bf16.msra.mxu0 %v21604_v18  ;;  %v21702_v18 = vld [vmem:[#allocation8 + $0x1fc4] ss:$24 sps:$4 sm:$0xff]  }
 0x8ff   :  { %17537 = vmatpush2.bf16.msra.mxu1 %v21607_v0  ;;  %17495 = vmatprep.subr.bf16.mxu0 %v21612_v54  ;;  %v21705_v0 = vld [vmem:[#allocation8 + $0x22c4] ss:$24 sps:$4 sm:$0xff]   ;;  %v21700_v54 = vld [vmem:[#allocation8 + $0x1fc0] ss:$24 sps:$4 sm:$0xff]  }
 0x900   :  { %17538 = vmatprep.subr.bf16.mxu1 %v21615_v13  ;;  %v21703_v13 = vld [vmem:[#allocation8 + $0x22c0] ss:$24 sps:$4 sm:$0xff]  }
 0x902   :  { %17496 = vmatpush2.bf16.msra.mxu0 %v21610_v5  ;;  %v21708_v5 = vld [vmem:[#allocation8 + $0x1f94] ss:$24 sps:$4 sm:$0xff]  }
 0x903   :  { %17539 = vmatpush2.bf16.msra.mxu1 %v21613_v58  ;;  %17551 = vmatprep.subr.bf16.mxu0 %v21618_v16  ;;  %v21711_v58 = vld [vmem:[#allocation8 + $0x2294] ss:$24 sps:$4 sm:$0xff]   ;;  %v21706_v16 = vld [vmem:[#allocation8 + $0x1f90] ss:$24 sps:$4 sm:$0xff]  }
 0x904   :  { %17594 = vmatprep.subr.bf16.mxu1 %v21621_v15  ;;  %v21709_v15 = vld [vmem:[#allocation8 + $0x2290] ss:$24 sps:$4 sm:$0xff]  }
 0x905   :  { %17498 = vmatmul.mubr.bf16.vlgmr.msra.gmra.mxu0 %v22449_v43  ;;  %v21631_v43 = vld [vmem:[#allocation8 + $0x2200] ss:$24 sps:$4 sm:$0xff]  }
 0x906   :  { %17541 = vmatmul.mubr.bf16.vlgmr.msra.gmra.mxu1 %v22537_v25  ;;  %17552 = vmatpush1.bf16.msra.mxu0 %v21616_v1  ;;  %v21639_v25 = vld [vmem:[#allocation8 + $0x21d4] ss:$24 sps:$4 sm:$0xff]   ;;  %v17155_v1 = vpop.f32.mrf.mxu0 }
 0x907   :  { %17583 = vmatprep.mubr.bf16.mxu0 %v22818_v23  ;;  %17595 = vmatpush1.bf16.msra.mxu1 %v21619_v45  ;;  %v21637_v23 = vld [vmem:[#allocation8 + $0x21d0] ss:$24 sps:$4 sm:$0xff]   ;;  %v17198_v45 = vpop.f32.mrf.mxu1 }
 0x908   :  { %17626 = vmatprep.mubr.bf16.mxu1 %v22821_v14  ;;  %17553 = vmatprep.subr.bf16.mxu0 %v21624_v61  ;;  %v21640_v14 = vld [vmem:[#allocation8 + $0x1ea0] ss:$24 sps:$4 sm:$0xff]   ;;  %v17157_v61 = vpop.f32.mrf.mxu0 }
 0x909   :  { %17596 = vmatprep.subr.bf16.mxu1 %v21627_v26  ;;  %v17200_v26 = vpop.f32.mrf.mxu1 }
 0x90a   :  { %17554 = vmatpush1.bf16.msra.mxu0 %v21622_v41  ;;  %v17159_v41 = vpop.f32.mrf.mxu0 }
 0x90b   :  { %17597 = vmatpush1.bf16.msra.mxu1 %v21625_v60  ;;  %17555 = vmatprep.subr.bf16.mxu0 %v21630_v46  ;;  %v17202_v60 = vpop.f32.mrf.mxu1 }
 0x90c   :  { %17598 = vmatprep.subr.bf16.mxu1 %v21633_v52  ;;  %v17161_v46 = vpop.f32.mrf.mxu0 }
 0x90d   :  { %v17204_v52 = vpop.f32.mrf.mxu1 }
 0x90e   :  { %17556 = vmatpush1.bf16.msra.mxu0 %v21628_v32  ;;  %v17241_v32 = vpop.f32.mrf.mxu0 }
 0x90f   :  { %17599 = vmatpush1.bf16.msra.mxu1 %v21631_v43  ;;  %17557 = vmatprep.subr.bf16.mxu0 %v21636_v49  ;;  %v17284_v43 = vpop.f32.mrf.mxu1 }
 0x910   :  { %17600 = vmatprep.subr.bf16.mxu1 %v21639_v25  ;;  %v17243_v49 = vpop.f32.mrf.mxu0 }
 0x911   :  { %v17286_v25 = vpop.f32.mrf.mxu1 }
 0x912   :  { %17558 = vmatpush1.bf16.msra.mxu0 %v21634_v2  ;;  %v17245_v2 = vpop.f32.mrf.mxu0 }
 0x913   :  { %17601 = vmatpush1.bf16.msra.mxu1 %v21637_v23  ;;  %17559 = vmatprep.subr.bf16.mxu0 %v21642_v34  ;;  %v17288_v23 = vpop.f32.mrf.mxu1 }
 0x914   :  { %17602 = vmatprep.subr.bf16.mxu1 %v21645_v47  ;;  %v17247_v34 = vpop.f32.mrf.mxu0 }
 0x915   :  { %v17290_v47 = vpop.f32.mrf.mxu1 }
 0x916   :  { %17560 = vmatpush1.bf16.msra.mxu0 %v21640_v14 }
 0x917   :  { %17603 = vmatpush1.bf16.msra.mxu1 %v21643_v50  ;;  %17561 = vmatprep.subr.bf16.mxu0 %v21648_v7 }
 0x918   :  { %17604 = vmatprep.subr.bf16.mxu1 %v21651_v28  ;;  %v21816_v28 = vld [vmem:[#allocation10] sm:$0x3f] }
 0x91a   :  { %17562 = vmatpush1.bf16.msra.mxu0 %v21646_v38  ;;  %v23157_v38 = vld [vmem:[#allocation20_spill] sm:$0xff] }
 0x91b   :  { %17605 = vmatpush1.bf16.msra.mxu1 %v21649_v29  ;;  %17563 = vmatprep.subr.bf16.mxu0 %v21654_v19  ;;  %v10318_v29 = vrot.slane %v21816_v28, %v23157_v38 }
 0x91c   :  { %17606 = vmatprep.subr.bf16.mxu1 %v21657_v3  ;;  %v23158_v3 = vld [vmem:[#allocation56_spill] sm:$0xff] }
 0x91e   :  { %17564 = vmatpush1.bf16.msra.mxu0 %v21652_v8  ;;  %v10322_v8 = vrot.slane %v21816_v28, %v23158_v3 }
 0x91f   :  { %17607 = vmatpush1.bf16.msra.mxu1 %v21655_v6  ;;  %17565 = vmatprep.subr.bf16.mxu0 %v21660_v39  ;;  %v17156_v39 = vadd.f32 %v17155_v1, %v10318_v29 }
 0x920   :  { %17608 = vmatprep.subr.bf16.mxu1 %v21663_v31 }
 0x922   :  { %17566 = vmatpush1.bf16.msra.mxu0 %v21658_v55 }
 0x923   :  { %17609 = vmatpush1.bf16.msra.mxu1 %v21661_v27  ;;  %17567 = vmatprep.subr.bf16.mxu0 %v21666_v35  ;;  %v17158_v27 = vadd.f32 %v17157_v61, %v10322_v8 }
 0x924   :  { %17610 = vmatprep.subr.bf16.mxu1 %v21669_v24  ;;  %v17199_v24 = vadd.f32 %v17198_v45, %v17156_v39 }
 0x926   :  { %17568 = vmatpush2.bf16.msra.mxu0 %v21664_v53  ;;  %v17160_v53 = vadd.f32 %v17159_v41, %v10318_v29 }
 0x927   :  { %17611 = vmatpush2.bf16.msra.mxu1 %v21667_v37  ;;  %17569 = vmatprep.subr.bf16.mxu0 %v21672_v11  ;;  %v17201_v11 = vadd.f32 %v17200_v26, %v17158_v27 }
 0x928   :  { %17612 = vmatprep.subr.bf16.mxu1 %v21675_v30  ;;  %v17162_v30 = vadd.f32 %v17161_v46, %v10322_v8 }
 0x92a   :  { %17570 = vmatpush2.bf16.msra.mxu0 %v21670_v12  ;;  %v17242_v12 = vadd.f32 %v17241_v32, %v17199_v24 }
 0x92b   :  { %17613 = vmatpush2.bf16.msra.mxu1 %v21673_v44  ;;  %17571 = vmatprep.subr.bf16.mxu0 %v21678_v33  ;;  %v17203_v33 = vadd.f32 %v17202_v60, %v17160_v53 }
 0x92c   :  { %17614 = vmatprep.subr.bf16.mxu1 %v21681_v9  ;;  %v17244_v9 = vadd.f32 %v17243_v49, %v17201_v11 }
 0x92e   :  { %17572 = vmatpush2.bf16.msra.mxu0 %v21676_v42 }
 0x92f   :  { %17615 = vmatpush2.bf16.msra.mxu1 %v21679_v10  ;;  %17573 = vmatprep.subr.bf16.mxu0 %v21684_v40  ;;  %v17205_v10 = vadd.f32 %v17204_v52, %v17162_v30  ;;  %v17285_v40 = vadd.f32 %v17284_v43, %v17242_v12 }
 0x930   :  { %17616 = vmatprep.subr.bf16.mxu1 %v21687_v17  ;;  %v17246_v17 = vadd.f32 %v17245_v2, %v17203_v33 }
 0x932   :  { %17574 = vmatpush2.bf16.msra.mxu0 %v21682_v51 }
 0x933   :  { %17617 = vmatpush2.bf16.msra.mxu1 %v21685_v22  ;;  %17575 = vmatprep.subr.bf16.mxu0 %v21690_v48  ;;  %v17287_v22 = vadd.f32 %v17286_v25, %v17244_v9  ;;  %v17248_v48 = vadd.f32 %v17247_v34, %v17205_v10 }
 0x934   :  { %17618 = vmatprep.subr.bf16.mxu1 %v21693_v59 }
 0x936   :  { %17576 = vmatpush2.bf16.msra.mxu0 %v21688_v20 }
 0x937   :  { %17619 = vmatpush2.bf16.msra.mxu1 %v21691_v36  ;;  %17577 = vmatprep.subr.bf16.mxu0 %v21696_v21  ;;  %v17289_v36 = vadd.f32 %v17288_v23, %v17246_v17 }
 0x938   :  { %17620 = vmatprep.subr.bf16.mxu1 %v21699_v57 }
 0x93a   :  { %17578 = vmatpush2.bf16.msra.mxu0 %v21694_v63 }
 0x93b   :  { %17621 = vmatpush2.bf16.msra.mxu1 %v21697_v4  ;;  %17579 = vmatprep.subr.bf16.mxu0 %v21702_v18  ;;  %v17291_v4 = vadd.f32 %v17290_v47, %v17248_v48 }
 0x93c   :  { %17622 = vmatprep.subr.bf16.mxu1 %v21705_v0 }
 0x93e   :  { %17580 = vmatpush2.bf16.msra.mxu0 %v21700_v54 }
 0x93f   :  { %17623 = vmatpush2.bf16.msra.mxu1 %v21703_v13  ;;  %17581 = vmatprep.subr.bf16.mxu0 %v21708_v5 }
 0x940   :  { %17624 = vmatprep.subr.bf16.mxu1 %v21711_v58 }
 0x942   :  { %17582 = vmatpush2.bf16.msra.mxu0 %v21706_v16 }
 0x943   :  { %17625 = vmatpush2.bf16.msra.mxu1 %v21709_v15 }
 0x945   :  { %17584 = vmatmul.mubr.bf16.vlgmr.msra.gmra.mxu0 %v22681_v62  ;;  %v17327_v14 = vpop.f32.mrf.mxu0 }
 0x946   :  { %17627 = vmatmul.mubr.bf16.vlgmr.msra.gmra.mxu1 %v22763_v56  ;;  %v17370_v62 = vpop.f32.mrf.mxu1  ;;  %v17328_v59 = vadd.f32 %v17327_v14, %v17285_v40 }
 0x947   :  { %v17329_v50 = vpop.f32.mrf.mxu0 }
 0x948   :  { %v17372_v56 = vpop.f32.mrf.mxu1  ;;  %v17330_v21 = vadd.f32 %v17329_v50, %v17287_v22  ;;  %v17371_v18 = vadd.f32 %v17370_v62, %v17328_v59 }
 0x949   :  { %v17331_v7 = vpop.f32.mrf.mxu0 }
 0x94a   :  { %v17374_v19 = vpop.f32.mrf.mxu1  ;;  %v17332_v0 = vadd.f32 %v17331_v7, %v17289_v36  ;;  %v17373_v13 = vadd.f32 %v17372_v56, %v17330_v21 }
 0x94b   :  { %v17333_v6 = vpop.f32.mrf.mxu0 }
 0x94c   :  { %v17376_v31 = vpop.f32.mrf.mxu1  ;;  %v17334_v5 = vadd.f32 %v17333_v6, %v17291_v4  ;;  %v17375_v15 = vadd.f32 %v17374_v19, %v17332_v0 }
 0x94e   :  { %v17377_v61 = vadd.f32 %v17376_v31, %v17334_v5 }
 0x985   :  { %v17413_v55 = vpop.f32.mrf.mxu0 }
 0x986   :  { %v17456_v35 = vpop.f32.mrf.mxu1  ;;  %v17414_v58 = vadd.f32 %v17413_v55, %v17371_v18 }
 0x987   :  { %v17415_v37 = vpop.f32.mrf.mxu0 }
 0x988   :  { %v17458_v44 = vpop.f32.mrf.mxu1  ;;  %v17416_v1 = vadd.f32 %v17415_v37, %v17373_v13  ;;  %v17457_v26 = vadd.f32 %v17456_v35, %v17414_v58 }
 0x989   :  { %v17417_v42 = vpop.f32.mrf.mxu0 }
 0x98a   :  { %v17460_v51 = vpop.f32.mrf.mxu1  ;;  %v17418_v41 = vadd.f32 %v17417_v42, %v17375_v15  ;;  %v17459_v46 = vadd.f32 %v17458_v44, %v17416_v1 }
 0x98b   :  { %v17419_v20 = vpop.f32.mrf.mxu0 }
 0x98c   :  { %v17462_v57 = vpop.f32.mrf.mxu1  ;;  %v17420_v52 = vadd.f32 %v17419_v20, %v17377_v61  ;;  %v17461_v49 = vadd.f32 %v17460_v51, %v17418_v41 }
 0x98e   :  { %v17463_v23 = vadd.f32 %v17462_v57, %v17420_v52 }
 0x9c5   :  { %v17499_v63 = vpop.f32.mrf.mxu0 }
 0x9c6   :  { %v17542_v54 = vpop.f32.mrf.mxu1  ;;  %v17500_v32 = vadd.f32 %v17499_v63, %v17457_v26 }
 0x9c7   :  { %v17501_v16 = vpop.f32.mrf.mxu0 }
 0x9c8   :  { %v17544_v45 = vpop.f32.mrf.mxu1  ;;  %v17502_v25 = vadd.f32 %v17501_v16, %v17459_v46  ;;  %v17543_v34 = vadd.f32 %v17542_v54, %v17500_v32 }
 0x9c9   :  { %v17503_v60 = vpop.f32.mrf.mxu0 }
 0x9ca   :  { %v17546_v43 = vpop.f32.mrf.mxu1  ;;  %v17504_v47 = vadd.f32 %v17503_v60, %v17461_v49  ;;  %v17545_v50 = vadd.f32 %v17544_v45, %v17502_v25 }
 0x9cb   :  { %v17505_v2 = vpop.f32.mrf.mxu0 }
 0x9cc   :  { %v17548_v14 = vpop.f32.mrf.mxu1  ;;  %v17506_v56 = vadd.f32 %v17505_v2, %v17463_v23  ;;  %v17547_v29 = vadd.f32 %v17546_v43, %v17504_v47 }
 0x9ce   :  { %v17549_v39 = vadd.f32 %v17548_v14, %v17506_v56 }
 0xa05   :  { %v17585_v62 = vpop.f32.mrf.mxu0 }
 0xa06   :  { %v17586_v7 = vadd.f32 %v17585_v62, %v17543_v34  ;;  %v17628_v28 = vpop.f32.mrf.mxu1 }
 0xa07   :  { %v17587_v38 = vpop.f32.mrf.mxu0 }
 0xa08   :  { %v17629_v19 = vadd.f32 %v17628_v28, %v17586_v7  ;;  %v17588_v3 = vadd.f32 %v17587_v38, %v17545_v50  ;;  %v17630_v8 = vpop.f32.mrf.mxu1 }
 0xa09   :  { %v17589_v6 = vpop.f32.mrf.mxu0 }
 0xa0a   :  { %17641 = vst [vmem:[#allocation11 + $0x20] sm:$0xff] %v17629_v19  ;;  %v17631_v31 = vadd.f32 %v17630_v8, %v17588_v3  ;;  %v17590_v55 = vadd.f32 %v17589_v6, %v17547_v29  ;;  %v17632_v27 = vpop.f32.mrf.mxu1 }
 0xa0b   :  { %v17591_v35 = vpop.f32.mrf.mxu0 }
 0xa0c   :  { %17642 = vst [vmem:[#allocation11 + $0x28] sm:$0xff] %v17631_v31  ;;  %v17633_v24 = vadd.f32 %v17632_v27, %v17590_v55  ;;  %v17592_v53 = vadd.f32 %v17591_v35, %v17549_v39  ;;  %v17634_v37 = vpop.f32.mrf.mxu1 }
 0xa0e   :  { %17647 = vst [vmem:[#allocation11 + $0x50] sm:$0xff] %v17633_v24  ;;  %v17635_v11 = vadd.f32 %v17634_v37, %v17592_v53 }
 0xa10   :  { %17648 = vst [vmem:[#allocation11 + $0x58] sm:$0xff] %v17635_v11 }
 0xa11   :  { %21928 = shalt.err (!%p21925_p1)
}
 0xa12   :  { %17660 = dma.vmem_to_hbm [thread:$0]  %s17655_s4, 1536, %s23054_s5, [#allocation4], %s21952_s9, %s21952_s9, %s21953_s10  }
 0xa13   :  { %21943 = dma.done.wait [#allocation4], 1536  }
 0xa14   :  { %21944 = vsyncadd [#allocation4], 4294965760 }
 0xa15   :  { %17664 = vsyncpa [#allocation3], 1 }
 0xa16   :  { %17665 = vsyncpa [#allocation6], 1 }
 0xa17   :  { %17666 = vsyncpa [#allocation9], 1 }
 0xa18   :  { %17667 = vsyncpa [#allocation4], 1 }

</bundles_post_ra>
